<compile_context>
chip_gen: v7x
topology: tpu7x:2x2x1
jax: 0.10.0
libtpu: 0.0.40
codegen_flags: <defaults>
</compile_context>

<pallas_src>
import numpy as np
import jax
import jax.numpy as jnp
from jax.experimental import pallas as pl
from jax.experimental.pallas import tpu as pltpu

# ---------------- small config (mirrors Encoder_Localizer_config) -----------
B = 2                     # batch
IMG_C = 3                 # image channels
H = W = 16                # spatial size
HIDDEN = 8                # encoder hidden channels
BLOCK_SIZE = 4            # config.block_size
MIN_REQUIRED_BLOCK = 4    # config.min_required_block
BLOCKS_PER_ROW = W // BLOCK_SIZE
NUM_BLOCKS = BLOCKS_PER_ROW * (H // BLOCK_SIZE)


# ---------------- fused forward kernel ---------------------------------------
def _fused_kernel(rows_ref, cols_ref,                        # SMEM scalar prefetch
                  x_ref,                                     # (B, H, W, 3) secret
                  ew1, eb1, ew2, eb2, ew3, eb3,              # encoder params
                  rw1, rb1, rw2, rb2,                        # recovery params
                  x1_ref, rec_ref,                           # outputs (VMEM)
                  pad1, pad2, padb, padr):                   # VMEM scratch
    Bn = x_ref.shape[0]

    def conv3x3_same(act, pad_ref, w_ref, b_ref, relu):
        # act: (Bn, Hs, Ws, Cin); pad_ref: (Bn, Hs+2, Ws+2, Cin) zero-border scratch.
        _, Hs, Ws, Cin = act.shape
        Cout = w_ref.shape[-1]
        pad_ref[...] = jnp.zeros_like(pad_ref)               # zero borders (in VMEM)
        pad_ref[:, 1:Hs + 1, 1:Ws + 1, :] = act              # fill interior
        acc = jnp.zeros((Bn * Hs * Ws, Cout), jnp.float32)
        for ky in range(3):                                  # 9 static taps -> MXU,
            for kx in range(3):                              # batch folded into M.
                patch = pad_ref[:, ky:ky + Hs, kx:kx + Ws, :].reshape(
                    Bn * Hs * Ws, Cin)
                acc = acc + jnp.dot(patch, w_ref[ky, kx],
                                    preferred_element_type=jnp.float32)
        acc = acc + b_ref[...]                               # bias once per layer
        if relu:
            acc = jnp.maximum(acc, 0.0)
        return acc.reshape(Bn, Hs, Ws, Cout)

    # ---- encoder: secret -> stego (x_1) -------------------------------------
    h = conv3x3_same(x_ref[...], pad1, ew1, eb1, relu=True)       # (B,H,W,8)
    h = conv3x3_same(h, pad2, ew2, eb2, relu=True)                # (B,H,W,8)
    x1 = jnp.dot(h.reshape(Bn * H * W, HIDDEN), ew3[0, 0],        # 1x1 conv
                 preferred_element_type=jnp.float32) + eb3[...]
    x1 = x1.reshape(Bn, H, W, IMG_C)
    x1_ref[...] = x1

    # random_noise_layer(x_1): Identity branch.
    # TODO(synk): np.random.choice over {Identity, JpegCompression, Quantization}
    #             is host-side randomness and JPEG has no clean Pallas
    #             equivalent; only the Identity branch is implemented.

    # ---- gather selected blocks (element offset = block index * block_size) --
    bs = BLOCK_SIZE
    padb[...] = jnp.zeros_like(padb)                         # zero borders once
    for i in range(MIN_REQUIRED_BLOCK):
        r = rows_ref[i] * bs
        c = cols_ref[i] * bs
        padb[i * Bn:(i + 1) * Bn, 1:bs + 1, 1:bs + 1, :] = (
            x1_ref[:, pl.ds(r, bs), pl.ds(c, bs), :])

    # ---- recovery conv1: Cin = n_blocks*IMG_C, expanded via linearity -------
    # (equivalent to a 3x3 conv over the channel-stacked blocks; avoids an
    #  in-kernel lane-dim concatenate)
    M = Bn * bs * bs
    acc = jnp.zeros((M, HIDDEN), jnp.float32)
    for i in range(MIN_REQUIRED_BLOCK):
        for ky in range(3):
            for kx in range(3):
                patch = padb[i * Bn:(i + 1) * Bn,
                             ky:ky + bs, kx:kx + bs, :].reshape(M, IMG_C)
                wsl = rw1[ky, kx, i * IMG_C:(i + 1) * IMG_C, :]
                acc = acc + jnp.dot(patch, wsl,
                                    preferred_element_type=jnp.float32)
    r1 = jnp.maximum(acc + rb1[...], 0.0).reshape(Bn, bs, bs, HIDDEN)

    # ---- recovery conv2 ------------------------------------------------------
    rec_ref[...] = conv3x3_same(r1, padr, rw2, rb2, relu=False)   # (B,bs,bs,3)


# ---------------- pallas_call wrapper -----------------------------------------
def _full_spec(shape):
    rank = len(shape)
    return pl.BlockSpec(shape, lambda i, *_: (0,) * rank)


def _fused_forward(rows, cols, x_nhwc, params):
    weights = (params["enc_w1"], params["enc_b1"],
               params["enc_w2"], params["enc_b2"],
               params["enc_w3"], params["enc_b3"],
               params["rec_w1"], params["rec_b1"],
               params["rec_w2"], params["rec_b2"])
    ins = (x_nhwc,) + weights
    out_shapes = (
        jax.ShapeDtypeStruct((B, H, W, IMG_C), jnp.float32),
        jax.ShapeDtypeStruct((B, BLOCK_SIZE, BLOCK_SIZE, IMG_C), jnp.float32),
    )
    return pl.pallas_call(
        _fused_kernel,
        out_shape=out_shapes,
        grid_spec=pltpu.PrefetchScalarGridSpec(
            num_scalar_prefetch=2,                 # rows, cols -> SMEM
            grid=(1,),                             # whole problem fits in VMEM
            in_specs=[_full_spec(a.shape) for a in ins],
            out_specs=[_full_spec(s.shape) for s in out_shapes],
            scratch_shapes=[
                pltpu.VMEM((B, H + 2, W + 2, IMG_C), jnp.float32),   # pad1
                pltpu.VMEM((B, H + 2, W + 2, HIDDEN), jnp.float32),  # pad2
                pltpu.VMEM((MIN_REQUIRED_BLOCK * B, BLOCK_SIZE + 2,
                            BLOCK_SIZE + 2, IMG_C), jnp.float32),    # padb
                pltpu.VMEM((B, BLOCK_SIZE + 2, BLOCK_SIZE + 2,
                            HIDDEN), jnp.float32),                   # padr
            ]),
        compiler_params=pltpu.CompilerParams(
            dimension_semantics=("parallel",)),
    )(rows, cols, *ins)


# ---------------- parameters --------------------------------------------------
def init_params(key):
    ks = jax.random.split(key, 8)

    def wconv(k, kh, kw, cin, cout):
        return jax.random.normal(k, (kh, kw, cin, cout), jnp.float32) * (
            1.0 / np.sqrt(kh * kw * cin))

    return {
        # EncoderNetwork(is_embed_message=False): conv stack secret -> stego
        "enc_w1": wconv(ks[0], 3, 3, IMG_C, HIDDEN), "enc_b1": jnp.zeros((1, HIDDEN), jnp.float32),
        "enc_w2": wconv(ks[1], 3, 3, HIDDEN, HIDDEN), "enc_b2": jnp.zeros((1, HIDDEN), jnp.float32),
        "enc_w3": wconv(ks[2], 1, 1, HIDDEN, IMG_C),  "enc_b3": jnp.zeros((1, IMG_C), jnp.float32),
        # recovery: stacked selected blocks -> recovered image block
        "rec_w1": wconv(ks[3], 3, 3, IMG_C * MIN_REQUIRED_BLOCK, HIDDEN),
        "rec_b1": jnp.zeros((1, HIDDEN), jnp.float32),
        "rec_w2": wconv(ks[4], 3, 3, HIDDEN, IMG_C),
        "rec_b2": jnp.zeros((1, IMG_C), jnp.float32),
    }


# ---------------- forward (mirrors Encoder_Recovery.forward) ------------------
def encoder_recovery_forward(params, secret_nchw, cover_nchw, rows, cols):
    del cover_nchw                     # `cover` is accepted but unused by the reference forward
    x = jnp.transpose(secret_nchw, (0, 2, 3, 1))        # NCHW -> NHWC (boundary only)
    x1_nhwc, rec_nhwc = _fused_forward(rows, cols, x, params)
    return (jnp.transpose(x1_nhwc, (0, 3, 1, 2)),
            jnp.transpose(rec_nhwc, (0, 3, 1, 2)))


# ---------------- host-side random block selection (deterministic) ------------
def select_blocks(seed=0):
    rng = np.random.RandomState(seed)
    taken = []
    while len(taken) < MIN_REQUIRED_BLOCK:
        selected = int(rng.uniform(0, NUM_BLOCKS))
        if selected not in taken:
            taken.append(selected)
    # block indices; the kernel multiplies by BLOCK_SIZE to get element offsets
    rows = np.array([s // BLOCKS_PER_ROW for s in taken], dtype=np.int32)
    cols = np.array([s % BLOCKS_PER_ROW for s in taken], dtype=np.int32)
    return jnp.asarray(rows), jnp.asarray(cols)


if __name__ == "__main__":
    key = jax.random.PRNGKey(0)
    pkey, skey, ckey = jax.random.split(key, 3)
    params = init_params(pkey)
    secret = jax.random.normal(skey, (B, IMG_C, H, W), jnp.float32)
    cover = jax.random.normal(ckey, (B, IMG_C, H, W), jnp.float32)
    rows, cols = select_blocks(seed=0)

    fwd = jax.jit(encoder_recovery_forward)
    x1, recovered = fwd(params, secret, cover, rows, cols)
    jax.block_until_ready((x1, recovered))

    assert x1.shape == (B, IMG_C, H, W)
    assert recovered.shape == (B, IMG_C, BLOCK_SIZE, BLOCK_SIZE)
    print("KERNEL_OK")
</pallas_src>

<mosaic_0001>
module attributes {stable_mosaic.version = 11 : i64} {
  func.func @_fused_kernel(%arg0: i32, %arg1: memref<4xi32, #tpu.memory_space<smem>>, %arg2: memref<4xi32, #tpu.memory_space<smem>>, %arg3: memref<2x16x16x3xf32, #tpu.memory_space<vmem>>, %arg4: memref<3x3x3x8xf32, #tpu.memory_space<vmem>>, %arg5: memref<1x8xf32, #tpu.memory_space<vmem>>, %arg6: memref<3x3x8x8xf32, #tpu.memory_space<vmem>>, %arg7: memref<1x8xf32, #tpu.memory_space<vmem>>, %arg8: memref<1x1x8x3xf32, #tpu.memory_space<vmem>>, %arg9: memref<1x3xf32, #tpu.memory_space<vmem>>, %arg10: memref<3x3x12x8xf32, #tpu.memory_space<vmem>>, %arg11: memref<1x8xf32, #tpu.memory_space<vmem>>, %arg12: memref<3x3x8x3xf32, #tpu.memory_space<vmem>>, %arg13: memref<1x3xf32, #tpu.memory_space<vmem>>, %arg14: memref<2x16x16x3xf32, #tpu.memory_space<vmem>>, %arg15: memref<2x4x4x3xf32, #tpu.memory_space<vmem>>, %arg16: memref<2x18x18x3xf32, #tpu.memory_space<vmem>>, %arg17: memref<2x18x18x8xf32, #tpu.memory_space<vmem>>, %arg18: memref<8x6x6x3xf32, #tpu.memory_space<vmem>>, %arg19: memref<2x6x6x8xf32, #tpu.memory_space<vmem>>) attributes {dimension_semantics = [#tpu.dimension_semantics<parallel>], iteration_bounds = array<i64: 1>, scalar_prefetch = 2 : i64, scratch_operands = 4 : i64, tpu.core_type = #tpu.core_type<tc>, window_params = [{pipeline_mode = #tpu.pipeline_mode<synchronous>, transform_indices = @transform_0, window_bounds = array<i64: 2, 16, 16, 3>}, {pipeline_mode = #tpu.pipeline_mode<synchronous>, transform_indices = @transform_1, window_bounds = array<i64: 3, 3, 3, 8>}, {pipeline_mode = #tpu.pipeline_mode<synchronous>, transform_indices = @transform_2, window_bounds = array<i64: 1, 8>}, {pipeline_mode = #tpu.pipeline_mode<synchronous>, transform_indices = @transform_3, window_bounds = array<i64: 3, 3, 8, 8>}, {pipeline_mode = #tpu.pipeline_mode<synchronous>, transform_indices = @transform_4, window_bounds = array<i64: 1, 8>}, {pipeline_mode = #tpu.pipeline_mode<synchronous>, transform_indices = @transform_5, window_bounds = array<i64: 1, 1, 8, 3>}, {pipeline_mode = #tpu.pipeline_mode<synchronous>, transform_indices = @transform_6, window_bounds = array<i64: 1, 3>}, {pipeline_mode = #tpu.pipeline_mode<synchronous>, transform_indices = @transform_7, window_bounds = array<i64: 3, 3, 12, 8>}, {pipeline_mode = #tpu.pipeline_mode<synchronous>, transform_indices = @transform_8, window_bounds = array<i64: 1, 8>}, {pipeline_mode = #tpu.pipeline_mode<synchronous>, transform_indices = @transform_9, window_bounds = array<i64: 3, 3, 8, 3>}, {pipeline_mode = #tpu.pipeline_mode<synchronous>, transform_indices = @transform_10, window_bounds = array<i64: 1, 3>}, {pipeline_mode = #tpu.pipeline_mode<synchronous>, transform_indices = @transform_11, window_bounds = array<i64: 2, 16, 16, 3>}, {pipeline_mode = #tpu.pipeline_mode<synchronous>, transform_indices = @transform_12, window_bounds = array<i64: 2, 4, 4, 3>}]} {
    %c0 = arith.constant 0 : index
    %c0_0 = arith.constant 0 : index
    %c0_1 = arith.constant 0 : index
    %c0_2 = arith.constant 0 : index
    %0 = vector.load %arg3[%c0, %c0_0, %c0_1, %c0_2] : memref<2x16x16x3xf32, #tpu.memory_space<vmem>>, vector<2x16x16x3xf32>
    %cst = arith.constant 0.000000e+00 : f32
    %1 = vector.broadcast %cst : f32 to vector<2x18x18x3xf32>
    %c0_3 = arith.constant 0 : index
    %c0_4 = arith.constant 0 : index
    %c0_5 = arith.constant 0 : index
    %c0_6 = arith.constant 0 : index
    %2 = vector.load %arg16[%c0_3, %c0_4, %c0_5, %c0_6] : memref<2x18x18x3xf32, #tpu.memory_space<vmem>>, vector<2x18x18x3xf32>
    tpu.vector_store %arg16[%c0_3, %c0_4, %c0_5, %c0_6], %1 {strides = array<i32>} : memref<2x18x18x3xf32, #tpu.memory_space<vmem>>, vector<2x18x18x3xf32>,
    %c0_7 = arith.constant 0 : index
    %c1 = arith.constant 1 : index
    %c1_8 = arith.constant 1 : index
    %c0_9 = arith.constant 0 : index
    %3 = vector.load %arg16[%c0_7, %c1, %c1_8, %c0_9] : memref<2x18x18x3xf32, #tpu.memory_space<vmem>>, vector<2x16x16x3xf32>
    tpu.vector_store %arg16[%c0_7, %c1, %c1_8, %c0_9], %0 {strides = array<i32>} : memref<2x18x18x3xf32, #tpu.memory_space<vmem>>, vector<2x16x16x3xf32>,
    %cst_10 = arith.constant 0.000000e+00 : f32
    %4 = vector.broadcast %cst_10 : f32 to vector<512x8xf32>
    %c0_11 = arith.constant 0 : index
    %c0_12 = arith.constant 0 : index
    %c0_13 = arith.constant 0 : index
    %c0_14 = arith.constant 0 : index
    %5 = vector.load %arg16[%c0_11, %c0_12, %c0_13, %c0_14] : memref<2x18x18x3xf32, #tpu.memory_space<vmem>>, vector<2x16x16x3xf32>
    %6 = vector.shape_cast %5 : vector<2x16x16x3xf32> to vector<512x3xf32>
    %c0_15 = arith.constant 0 : index
    %c0_16 = arith.constant 0 : index
    %c0_17 = arith.constant 0 : index
    %c0_18 = arith.constant 0 : index
    %7 = vector.load %arg4[%c0_15, %c0_16, %c0_17, %c0_18] : memref<3x3x3x8xf32, #tpu.memory_space<vmem>>, vector<1x1x3x8xf32>
    %8 = vector.shape_cast %7 : vector<1x1x3x8xf32> to vector<3x8xf32>
    %cst_19 = arith.constant dense<0.000000e+00> : vector<512x8xf32>
    %9 = tpu.matmul %6, %8, %cst_19 {dimension_numbers = #tpu.dot_dimension_numbers<[1], [0], [0], [1], [0, 0, 1, 1], [], []>} : vector<512x3xf32>, vector<3x8xf32>, vector<512x8xf32> -> vector<512x8xf32>
    %10 = arith.addf %4, %9 : vector<512x8xf32>
    %c0_20 = arith.constant 0 : index
    %c0_21 = arith.constant 0 : index
    %c1_22 = arith.constant 1 : index
    %c0_23 = arith.constant 0 : index
    %11 = vector.load %arg16[%c0_20, %c0_21, %c1_22, %c0_23] : memref<2x18x18x3xf32, #tpu.memory_space<vmem>>, vector<2x16x16x3xf32>
    %12 = vector.shape_cast %11 : vector<2x16x16x3xf32> to vector<512x3xf32>
    %c0_24 = arith.constant 0 : index
    %c1_25 = arith.constant 1 : index
    %c0_26 = arith.constant 0 : index
    %c0_27 = arith.constant 0 : index
    %13 = vector.load %arg4[%c0_24, %c1_25, %c0_26, %c0_27] : memref<3x3x3x8xf32, #tpu.memory_space<vmem>>, vector<1x1x3x8xf32>
    %14 = vector.shape_cast %13 : vector<1x1x3x8xf32> to vector<3x8xf32>
    %cst_28 = arith.constant dense<0.000000e+00> : vector<512x8xf32>
    %15 = tpu.matmul %12, %14, %cst_28 {dimension_numbers = #tpu.dot_dimension_numbers<[1], [0], [0], [1], [0, 0, 1, 1], [], []>} : vector<512x3xf32>, vector<3x8xf32>, vector<512x8xf32> -> vector<512x8xf32>
    %16 = arith.addf %10, %15 : vector<512x8xf32>
    %c0_29 = arith.constant 0 : index
    %c0_30 = arith.constant 0 : index
    %c2 = arith.constant 2 : index
    %c0_31 = arith.constant 0 : index
    %17 = vector.load %arg16[%c0_29, %c0_30, %c2, %c0_31] : memref<2x18x18x3xf32, #tpu.memory_space<vmem>>, vector<2x16x16x3xf32>
    %18 = vector.shape_cast %17 : vector<2x16x16x3xf32> to vector<512x3xf32>
    %c0_32 = arith.constant 0 : index
    %c2_33 = arith.constant 2 : index
    %c0_34 = arith.constant 0 : index
    %c0_35 = arith.constant 0 : index
    %19 = vector.load %arg4[%c0_32, %c2_33, %c0_34, %c0_35] : memref<3x3x3x8xf32, #tpu.memory_space<vmem>>, vector<1x1x3x8xf32>
    %20 = vector.shape_cast %19 : vector<1x1x3x8xf32> to vector<3x8xf32>
    %cst_36 = arith.constant dense<0.000000e+00> : vector<512x8xf32>
    %21 = tpu.matmul %18, %20, %cst_36 {dimension_numbers = #tpu.dot_dimension_numbers<[1], [0], [0], [1], [0, 0, 1, 1], [], []>} : vector<512x3xf32>, vector<3x8xf32>, vector<512x8xf32> -> vector<512x8xf32>
    %22 = arith.addf %16, %21 : vector<512x8xf32>
    %c0_37 = arith.constant 0 : index
    %c1_38 = arith.constant 1 : index
    %c0_39 = arith.constant 0 : index
    %c0_40 = arith.constant 0 : index
    %23 = vector.load %arg16[%c0_37, %c1_38, %c0_39, %c0_40] : memref<2x18x18x3xf32, #tpu.memory_space<vmem>>, vector<2x16x16x3xf32>
    %24 = vector.shape_cast %23 : vector<2x16x16x3xf32> to vector<512x3xf32>
    %c1_41 = arith.constant 1 : index
    %c0_42 = arith.constant 0 : index
    %c0_43 = arith.constant 0 : index
    %c0_44 = arith.constant 0 : index
    %25 = vector.load %arg4[%c1_41, %c0_42, %c0_43, %c0_44] : memref<3x3x3x8xf32, #tpu.memory_space<vmem>>, vector<1x1x3x8xf32>
    %26 = vector.shape_cast %25 : vector<1x1x3x8xf32> to vector<3x8xf32>
    %cst_45 = arith.constant dense<0.000000e+00> : vector<512x8xf32>
    %27 = tpu.matmul %24, %26, %cst_45 {dimension_numbers = #tpu.dot_dimension_numbers<[1], [0], [0], [1], [0, 0, 1, 1], [], []>} : vector<512x3xf32>, vector<3x8xf32>, vector<512x8xf32> -> vector<512x8xf32>
    %28 = arith.addf %22, %27 : vector<512x8xf32>
    %c0_46 = arith.constant 0 : index
    %c1_47 = arith.constant 1 : index
    %c1_48 = arith.constant 1 : index
    %c0_49 = arith.constant 0 : index
    %29 = vector.load %arg16[%c0_46, %c1_47, %c1_48, %c0_49] : memref<2x18x18x3xf32, #tpu.memory_space<vmem>>, vector<2x16x16x3xf32>
    %30 = vector.shape_cast %29 : vector<2x16x16x3xf32> to vector<512x3xf32>
    %c1_50 = arith.constant 1 : index
    %c1_51 = arith.constant 1 : index
    %c0_52 = arith.constant 0 : index
    %c0_53 = arith.constant 0 : index
    %31 = vector.load %arg4[%c1_50, %c1_51, %c0_52, %c0_53] : memref<3x3x3x8xf32, #tpu.memory_space<vmem>>, vector<1x1x3x8xf32>
    %32 = vector.shape_cast %31 : vector<1x1x3x8xf32> to vector<3x8xf32>
    %cst_54 = arith.constant dense<0.000000e+00> : vector<512x8xf32>
    %33 = tpu.matmul %30, %32, %cst_54 {dimension_numbers = #tpu.dot_dimension_numbers<[1], [0], [0], [1], [0, 0, 1, 1], [], []>} : vector<512x3xf32>, vector<3x8xf32>, vector<512x8xf32> -> vector<512x8xf32>
    %34 = arith.addf %28, %33 : vector<512x8xf32>
    %c0_55 = arith.constant 0 : index
    %c1_56 = arith.constant 1 : index
    %c2_57 = arith.constant 2 : index
    %c0_58 = arith.constant 0 : index
    %35 = vector.load %arg16[%c0_55, %c1_56, %c2_57, %c0_58] : memref<2x18x18x3xf32, #tpu.memory_space<vmem>>, vector<2x16x16x3xf32>
    %36 = vector.shape_cast %35 : vector<2x16x16x3xf32> to vector<512x3xf32>
    %c1_59 = arith.constant 1 : index
    %c2_60 = arith.constant 2 : index
    %c0_61 = arith.constant 0 : index
    %c0_62 = arith.constant 0 : index
    %37 = vector.load %arg4[%c1_59, %c2_60, %c0_61, %c0_62] : memref<3x3x3x8xf32, #tpu.memory_space<vmem>>, vector<1x1x3x8xf32>
    %38 = vector.shape_cast %37 : vector<1x1x3x8xf32> to vector<3x8xf32>
    %cst_63 = arith.constant dense<0.000000e+00> : vector<512x8xf32>
    %39 = tpu.matmul %36, %38, %cst_63 {dimension_numbers = #tpu.dot_dimension_numbers<[1], [0], [0], [1], [0, 0, 1, 1], [], []>} : vector<512x3xf32>, vector<3x8xf32>, vector<512x8xf32> -> vector<512x8xf32>
    %40 = arith.addf %34, %39 : vector<512x8xf32>
    %c0_64 = arith.constant 0 : index
    %c2_65 = arith.constant 2 : index
    %c0_66 = arith.constant 0 : index
    %c0_67 = arith.constant 0 : index
    %41 = vector.load %arg16[%c0_64, %c2_65, %c0_66, %c0_67] : memref<2x18x18x3xf32, #tpu.memory_space<vmem>>, vector<2x16x16x3xf32>
    %42 = vector.shape_cast %41 : vector<2x16x16x3xf32> to vector<512x3xf32>
    %c2_68 = arith.constant 2 : index
    %c0_69 = arith.constant 0 : index
    %c0_70 = arith.constant 0 : index
    %c0_71 = arith.constant 0 : index
    %43 = vector.load %arg4[%c2_68, %c0_69, %c0_70, %c0_71] : memref<3x3x3x8xf32, #tpu.memory_space<vmem>>, vector<1x1x3x8xf32>
    %44 = vector.shape_cast %43 : vector<1x1x3x8xf32> to vector<3x8xf32>
    %cst_72 = arith.constant dense<0.000000e+00> : vector<512x8xf32>
    %45 = tpu.matmul %42, %44, %cst_72 {dimension_numbers = #tpu.dot_dimension_numbers<[1], [0], [0], [1], [0, 0, 1, 1], [], []>} : vector<512x3xf32>, vector<3x8xf32>, vector<512x8xf32> -> vector<512x8xf32>
    %46 = arith.addf %40, %45 : vector<512x8xf32>
    %c0_73 = arith.constant 0 : index
    %c2_74 = arith.constant 2 : index
    %c1_75 = arith.constant 1 : index
    %c0_76 = arith.constant 0 : index
    %47 = vector.load %arg16[%c0_73, %c2_74, %c1_75, %c0_76] : memref<2x18x18x3xf32, #tpu.memory_space<vmem>>, vector<2x16x16x3xf32>
    %48 = vector.shape_cast %47 : vector<2x16x16x3xf32> to vector<512x3xf32>
    %c2_77 = arith.constant 2 : index
    %c1_78 = arith.constant 1 : index
    %c0_79 = arith.constant 0 : index
    %c0_80 = arith.constant 0 : index
    %49 = vector.load %arg4[%c2_77, %c1_78, %c0_79, %c0_80] : memref<3x3x3x8xf32, #tpu.memory_space<vmem>>, vector<1x1x3x8xf32>
    %50 = vector.shape_cast %49 : vector<1x1x3x8xf32> to vector<3x8xf32>
    %cst_81 = arith.constant dense<0.000000e+00> : vector<512x8xf32>
    %51 = tpu.matmul %48, %50, %cst_81 {dimension_numbers = #tpu.dot_dimension_numbers<[1], [0], [0], [1], [0, 0, 1, 1], [], []>} : vector<512x3xf32>, vector<3x8xf32>, vector<512x8xf32> -> vector<512x8xf32>
    %52 = arith.addf %46, %51 : vector<512x8xf32>
    %c0_82 = arith.constant 0 : index
    %c2_83 = arith.constant 2 : index
    %c2_84 = arith.constant 2 : index
    %c0_85 = arith.constant 0 : index
    %53 = vector.load %arg16[%c0_82, %c2_83, %c2_84, %c0_85] : memref<2x18x18x3xf32, #tpu.memory_space<vmem>>, vector<2x16x16x3xf32>
    %54 = vector.shape_cast %53 : vector<2x16x16x3xf32> to vector<512x3xf32>
    %c2_86 = arith.constant 2 : index
    %c2_87 = arith.constant 2 : index
    %c0_88 = arith.constant 0 : index
    %c0_89 = arith.constant 0 : index
    %55 = vector.load %arg4[%c2_86, %c2_87, %c0_88, %c0_89] : memref<3x3x3x8xf32, #tpu.memory_space<vmem>>, vector<1x1x3x8xf32>
    %56 = vector.shape_cast %55 : vector<1x1x3x8xf32> to vector<3x8xf32>
    %cst_90 = arith.constant dense<0.000000e+00> : vector<512x8xf32>
    %57 = tpu.matmul %54, %56, %cst_90 {dimension_numbers = #tpu.dot_dimension_numbers<[1], [0], [0], [1], [0, 0, 1, 1], [], []>} : vector<512x3xf32>, vector<3x8xf32>, vector<512x8xf32> -> vector<512x8xf32>
    %58 = arith.addf %52, %57 : vector<512x8xf32>
    %c0_91 = arith.constant 0 : index
    %c0_92 = arith.constant 0 : index
    %59 = vector.load %arg5[%c0_91, %c0_92] : memref<1x8xf32, #tpu.memory_space<vmem>>, vector<1x8xf32>
    %60 = vector.broadcast %59 : vector<1x8xf32> to vector<512x8xf32>
    %61 = arith.addf %58, %60 : vector<512x8xf32>
    %cst_93 = arith.constant 0.000000e+00 : f32
    %62 = vector.broadcast %cst_93 : f32 to vector<512x8xf32>
    %63 = arith.maximumf %61, %62 : vector<512x8xf32>
    %64 = vector.shape_cast %63 : vector<512x8xf32> to vector<2x16x16x8xf32>
    %cst_94 = arith.constant 0.000000e+00 : f32
    %65 = vector.broadcast %cst_94 : f32 to vector<2x18x18x8xf32>
    %c0_95 = arith.constant 0 : index
    %c0_96 = arith.constant 0 : index
    %c0_97 = arith.constant 0 : index
    %c0_98 = arith.constant 0 : index
    %66 = vector.load %arg17[%c0_95, %c0_96, %c0_97, %c0_98] : memref<2x18x18x8xf32, #tpu.memory_space<vmem>>, vector<2x18x18x8xf32>
    tpu.vector_store %arg17[%c0_95, %c0_96, %c0_97, %c0_98], %65 {strides = array<i32>} : memref<2x18x18x8xf32, #tpu.memory_space<vmem>>, vector<2x18x18x8xf32>,
    %c0_99 = arith.constant 0 : index
    %c1_100 = arith.constant 1 : index
    %c1_101 = arith.constant 1 : index
    %c0_102 = arith.constant 0 : index
    %67 = vector.load %arg17[%c0_99, %c1_100, %c1_101, %c0_102] : memref<2x18x18x8xf32, #tpu.memory_space<vmem>>, vector<2x16x16x8xf32>
    tpu.vector_store %arg17[%c0_99, %c1_100, %c1_101, %c0_102], %64 {strides = array<i32>} : memref<2x18x18x8xf32, #tpu.memory_space<vmem>>, vector<2x16x16x8xf32>,
    %cst_103 = arith.constant 0.000000e+00 : f32
    %68 = vector.broadcast %cst_103 : f32 to vector<512x8xf32>
    %c0_104 = arith.constant 0 : index
    %c0_105 = arith.constant 0 : index
    %c0_106 = arith.constant 0 : index
    %c0_107 = arith.constant 0 : index
    %69 = vector.load %arg17[%c0_104, %c0_105, %c0_106, %c0_107] : memref<2x18x18x8xf32, #tpu.memory_space<vmem>>, vector<2x16x16x8xf32>
    %70 = vector.shape_cast %69 : vector<2x16x16x8xf32> to vector<512x8xf32>
    %c0_108 = arith.constant 0 : index
    %c0_109 = arith.constant 0 : index
    %c0_110 = arith.constant 0 : index
    %c0_111 = arith.constant 0 : index
    %71 = vector.load %arg6[%c0_108, %c0_109, %c0_110, %c0_111] : memref<3x3x8x8xf32, #tpu.memory_space<vmem>>, vector<1x1x8x8xf32>
    %72 = vector.shape_cast %71 : vector<1x1x8x8xf32> to vector<8x8xf32>
    %cst_112 = arith.constant dense<0.000000e+00> : vector<512x8xf32>
    %73 = tpu.matmul %70, %72, %cst_112 {dimension_numbers = #tpu.dot_dimension_numbers<[1], [0], [0], [1], [0, 0, 1, 1], [], []>} : vector<512x8xf32>, vector<8x8xf32>, vector<512x8xf32> -> vector<512x8xf32>
    %74 = arith.addf %68, %73 : vector<512x8xf32>
    %c0_113 = arith.constant 0 : index
    %c0_114 = arith.constant 0 : index
    %c1_115 = arith.constant 1 : index
    %c0_116 = arith.constant 0 : index
    %75 = vector.load %arg17[%c0_113, %c0_114, %c1_115, %c0_116] : memref<2x18x18x8xf32, #tpu.memory_space<vmem>>, vector<2x16x16x8xf32>
    %76 = vector.shape_cast %75 : vector<2x16x16x8xf32> to vector<512x8xf32>
    %c0_117 = arith.constant 0 : index
    %c1_118 = arith.constant 1 : index
    %c0_119 = arith.constant 0 : index
    %c0_120 = arith.constant 0 : index
    %77 = vector.load %arg6[%c0_117, %c1_118, %c0_119, %c0_120] : memref<3x3x8x8xf32, #tpu.memory_space<vmem>>, vector<1x1x8x8xf32>
    %78 = vector.shape_cast %77 : vector<1x1x8x8xf32> to vector<8x8xf32>
    %cst_121 = arith.constant dense<0.000000e+00> : vector<512x8xf32>
    %79 = tpu.matmul %76, %78, %cst_121 {dimension_numbers = #tpu.dot_dimension_numbers<[1], [0], [0], [1], [0, 0, 1, 1], [], []>} : vector<512x8xf32>, vector<8x8xf32>, vector<512x8xf32> -> vector<512x8xf32>
    %80 = arith.addf %74, %79 : vector<512x8xf32>
    %c0_122 = arith.constant 0 : index
    %c0_123 = arith.constant 0 : index
    %c2_124 = arith.constant 2 : index
    %c0_125 = arith.constant 0 : index
    %81 = vector.load %arg17[%c0_122, %c0_123, %c2_124, %c0_125] : memref<2x18x18x8xf32, #tpu.memory_space<vmem>>, vector<2x16x16x8xf32>
    %82 = vector.shape_cast %81 : vector<2x16x16x8xf32> to vector<512x8xf32>
    %c0_126 = arith.constant 0 : index
    %c2_127 = arith.constant 2 : index
    %c0_128 = arith.constant 0 : index
    %c0_129 = arith.constant 0 : index
    %83 = vector.load %arg6[%c0_126, %c2_127, %c0_128, %c0_129] : memref<3x3x8x8xf32, #tpu.memory_space<vmem>>, vector<1x1x8x8xf32>
    %84 = vector.shape_cast %83 : vector<1x1x8x8xf32> to vector<8x8xf32>
    %cst_130 = arith.constant dense<0.000000e+00> : vector<512x8xf32>
    %85 = tpu.matmul %82, %84, %cst_130 {dimension_numbers = #tpu.dot_dimension_numbers<[1], [0], [0], [1], [0, 0, 1, 1], [], []>} : vector<512x8xf32>, vector<8x8xf32>, vector<512x8xf32> -> vector<512x8xf32>
    %86 = arith.addf %80, %85 : vector<512x8xf32>
    %c0_131 = arith.constant 0 : index
    %c1_132 = arith.constant 1 : index
    %c0_133 = arith.constant 0 : index
    %c0_134 = arith.constant 0 : index
    %87 = vector.load %arg17[%c0_131, %c1_132, %c0_133, %c0_134] : memref<2x18x18x8xf32, #tpu.memory_space<vmem>>, vector<2x16x16x8xf32>
    %88 = vector.shape_cast %87 : vector<2x16x16x8xf32> to vector<512x8xf32>
    %c1_135 = arith.constant 1 : index
    %c0_136 = arith.constant 0 : index
    %c0_137 = arith.constant 0 : index
    %c0_138 = arith.constant 0 : index
    %89 = vector.load %arg6[%c1_135, %c0_136, %c0_137, %c0_138] : memref<3x3x8x8xf32, #tpu.memory_space<vmem>>, vector<1x1x8x8xf32>
    %90 = vector.shape_cast %89 : vector<1x1x8x8xf32> to vector<8x8xf32>
    %cst_139 = arith.constant dense<0.000000e+00> : vector<512x8xf32>
    %91 = tpu.matmul %88, %90, %cst_139 {dimension_numbers = #tpu.dot_dimension_numbers<[1], [0], [0], [1], [0, 0, 1, 1], [], []>} : vector<512x8xf32>, vector<8x8xf32>, vector<512x8xf32> -> vector<512x8xf32>
    %92 = arith.addf %86, %91 : vector<512x8xf32>
    %c0_140 = arith.constant 0 : index
    %c1_141 = arith.constant 1 : index
    %c1_142 = arith.constant 1 : index
    %c0_143 = arith.constant 0 : index
    %93 = vector.load %arg17[%c0_140, %c1_141, %c1_142, %c0_143] : memref<2x18x18x8xf32, #tpu.memory_space<vmem>>, vector<2x16x16x8xf32>
    %94 = vector.shape_cast %93 : vector<2x16x16x8xf32> to vector<512x8xf32>
    %c1_144 = arith.constant 1 : index
    %c1_145 = arith.constant 1 : index
    %c0_146 = arith.constant 0 : index
    %c0_147 = arith.constant 0 : index
    %95 = vector.load %arg6[%c1_144, %c1_145, %c0_146, %c0_147] : memref<3x3x8x8xf32, #tpu.memory_space<vmem>>, vector<1x1x8x8xf32>
    %96 = vector.shape_cast %95 : vector<1x1x8x8xf32> to vector<8x8xf32>
    %cst_148 = arith.constant dense<0.000000e+00> : vector<512x8xf32>
    %97 = tpu.matmul %94, %96, %cst_148 {dimension_numbers = #tpu.dot_dimension_numbers<[1], [0], [0], [1], [0, 0, 1, 1], [], []>} : vector<512x8xf32>, vector<8x8xf32>, vector<512x8xf32> -> vector<512x8xf32>
    %98 = arith.addf %92, %97 : vector<512x8xf32>
    %c0_149 = arith.constant 0 : index
    %c1_150 = arith.constant 1 : index
    %c2_151 = arith.constant 2 : index
    %c0_152 = arith.constant 0 : index
    %99 = vector.load %arg17[%c0_149, %c1_150, %c2_151, %c0_152] : memref<2x18x18x8xf32, #tpu.memory_space<vmem>>, vector<2x16x16x8xf32>
    %100 = vector.shape_cast %99 : vector<2x16x16x8xf32> to vector<512x8xf32>
    %c1_153 = arith.constant 1 : index
    %c2_154 = arith.constant 2 : index
    %c0_155 = arith.constant 0 : index
    %c0_156 = arith.constant 0 : index
    %101 = vector.load %arg6[%c1_153, %c2_154, %c0_155, %c0_156] : memref<3x3x8x8xf32, #tpu.memory_space<vmem>>, vector<1x1x8x8xf32>
    %102 = vector.shape_cast %101 : vector<1x1x8x8xf32> to vector<8x8xf32>
    %cst_157 = arith.constant dense<0.000000e+00> : vector<512x8xf32>
    %103 = tpu.matmul %100, %102, %cst_157 {dimension_numbers = #tpu.dot_dimension_numbers<[1], [0], [0], [1], [0, 0, 1, 1], [], []>} : vector<512x8xf32>, vector<8x8xf32>, vector<512x8xf32> -> vector<512x8xf32>
    %104 = arith.addf %98, %103 : vector<512x8xf32>
    %c0_158 = arith.constant 0 : index
    %c2_159 = arith.constant 2 : index
    %c0_160 = arith.constant 0 : index
    %c0_161 = arith.constant 0 : index
    %105 = vector.load %arg17[%c0_158, %c2_159, %c0_160, %c0_161] : memref<2x18x18x8xf32, #tpu.memory_space<vmem>>, vector<2x16x16x8xf32>
    %106 = vector.shape_cast %105 : vector<2x16x16x8xf32> to vector<512x8xf32>
    %c2_162 = arith.constant 2 : index
    %c0_163 = arith.constant 0 : index
    %c0_164 = arith.constant 0 : index
    %c0_165 = arith.constant 0 : index
    %107 = vector.load %arg6[%c2_162, %c0_163, %c0_164, %c0_165] : memref<3x3x8x8xf32, #tpu.memory_space<vmem>>, vector<1x1x8x8xf32>
    %108 = vector.shape_cast %107 : vector<1x1x8x8xf32> to vector<8x8xf32>
    %cst_166 = arith.constant dense<0.000000e+00> : vector<512x8xf32>
    %109 = tpu.matmul %106, %108, %cst_166 {dimension_numbers = #tpu.dot_dimension_numbers<[1], [0], [0], [1], [0, 0, 1, 1], [], []>} : vector<512x8xf32>, vector<8x8xf32>, vector<512x8xf32> -> vector<512x8xf32>
    %110 = arith.addf %104, %109 : vector<512x8xf32>
    %c0_167 = arith.constant 0 : index
    %c2_168 = arith.constant 2 : index
    %c1_169 = arith.constant 1 : index
    %c0_170 = arith.constant 0 : index
    %111 = vector.load %arg17[%c0_167, %c2_168, %c1_169, %c0_170] : memref<2x18x18x8xf32, #tpu.memory_space<vmem>>, vector<2x16x16x8xf32>
    %112 = vector.shape_cast %111 : vector<2x16x16x8xf32> to vector<512x8xf32>
    %c2_171 = arith.constant 2 : index
    %c1_172 = arith.constant 1 : index
    %c0_173 = arith.constant 0 : index
    %c0_174 = arith.constant 0 : index
    %113 = vector.load %arg6[%c2_171, %c1_172, %c0_173, %c0_174] : memref<3x3x8x8xf32, #tpu.memory_space<vmem>>, vector<1x1x8x8xf32>
    %114 = vector.shape_cast %113 : vector<1x1x8x8xf32> to vector<8x8xf32>
    %cst_175 = arith.constant dense<0.000000e+00> : vector<512x8xf32>
    %115 = tpu.matmul %112, %114, %cst_175 {dimension_numbers = #tpu.dot_dimension_numbers<[1], [0], [0], [1], [0, 0, 1, 1], [], []>} : vector<512x8xf32>, vector<8x8xf32>, vector<512x8xf32> -> vector<512x8xf32>
    %116 = arith.addf %110, %115 : vector<512x8xf32>
    %c0_176 = arith.constant 0 : index
    %c2_177 = arith.constant 2 : index
    %c2_178 = arith.constant 2 : index
    %c0_179 = arith.constant 0 : index
    %117 = vector.load %arg17[%c0_176, %c2_177, %c2_178, %c0_179] : memref<2x18x18x8xf32, #tpu.memory_space<vmem>>, vector<2x16x16x8xf32>
    %118 = vector.shape_cast %117 : vector<2x16x16x8xf32> to vector<512x8xf32>
    %c2_180 = arith.constant 2 : index
    %c2_181 = arith.constant 2 : index
    %c0_182 = arith.constant 0 : index
    %c0_183 = arith.constant 0 : index
    %119 = vector.load %arg6[%c2_180, %c2_181, %c0_182, %c0_183] : memref<3x3x8x8xf32, #tpu.memory_space<vmem>>, vector<1x1x8x8xf32>
    %120 = vector.shape_cast %119 : vector<1x1x8x8xf32> to vector<8x8xf32>
    %cst_184 = arith.constant dense<0.000000e+00> : vector<512x8xf32>
    %121 = tpu.matmul %118, %120, %cst_184 {dimension_numbers = #tpu.dot_dimension_numbers<[1], [0], [0], [1], [0, 0, 1, 1], [], []>} : vector<512x8xf32>, vector<8x8xf32>, vector<512x8xf32> -> vector<512x8xf32>
    %122 = arith.addf %116, %121 : vector<512x8xf32>
    %c0_185 = arith.constant 0 : index
    %c0_186 = arith.constant 0 : index
    %123 = vector.load %arg7[%c0_185, %c0_186] : memref<1x8xf32, #tpu.memory_space<vmem>>, vector<1x8xf32>
    %124 = vector.broadcast %123 : vector<1x8xf32> to vector<512x8xf32>
    %125 = arith.addf %122, %124 : vector<512x8xf32>
    %cst_187 = arith.constant 0.000000e+00 : f32
    %126 = vector.broadcast %cst_187 : f32 to vector<512x8xf32>
    %127 = arith.maximumf %125, %126 : vector<512x8xf32>
    %128 = vector.shape_cast %127 : vector<512x8xf32> to vector<2x16x16x8xf32>
    %129 = vector.shape_cast %128 : vector<2x16x16x8xf32> to vector<512x8xf32>
    %c0_188 = arith.constant 0 : index
    %c0_189 = arith.constant 0 : index
    %c0_190 = arith.constant 0 : index
    %c0_191 = arith.constant 0 : index
    %130 = vector.load %arg8[%c0_188, %c0_189, %c0_190, %c0_191] : memref<1x1x8x3xf32, #tpu.memory_space<vmem>>, vector<1x1x8x3xf32>
    %131 = vector.shape_cast %130 : vector<1x1x8x3xf32> to vector<8x3xf32>
    %cst_192 = arith.constant dense<0.000000e+00> : vector<512x3xf32>
    %132 = tpu.matmul %129, %131, %cst_192 {dimension_numbers = #tpu.dot_dimension_numbers<[1], [0], [0], [1], [0, 0, 1, 1], [], []>} : vector<512x8xf32>, vector<8x3xf32>, vector<512x3xf32> -> vector<512x3xf32>
    %c0_193 = arith.constant 0 : index
    %c0_194 = arith.constant 0 : index
    %133 = vector.load %arg9[%c0_193, %c0_194] : memref<1x3xf32, #tpu.memory_space<vmem>>, vector<1x3xf32>
    %134 = vector.broadcast %133 : vector<1x3xf32> to vector<512x3xf32>
    %135 = arith.addf %132, %134 : vector<512x3xf32>
    %136 = vector.shape_cast %135 : vector<512x3xf32> to vector<2x16x16x3xf32>
    %c0_195 = arith.constant 0 : index
    %c0_196 = arith.constant 0 : index
    %c0_197 = arith.constant 0 : index
    %c0_198 = arith.constant 0 : index
    %137 = vector.load %arg14[%c0_195, %c0_196, %c0_197, %c0_198] : memref<2x16x16x3xf32, #tpu.memory_space<vmem>>, vector<2x16x16x3xf32>
    tpu.vector_store %arg14[%c0_195, %c0_196, %c0_197, %c0_198], %136 {strides = array<i32>} : memref<2x16x16x3xf32, #tpu.memory_space<vmem>>, vector<2x16x16x3xf32>,
    %cst_199 = arith.constant 0.000000e+00 : f32
    %138 = vector.broadcast %cst_199 : f32 to vector<8x6x6x3xf32>
    %c0_200 = arith.constant 0 : index
    %c0_201 = arith.constant 0 : index
    %c0_202 = arith.constant 0 : index
    %c0_203 = arith.constant 0 : index
    %139 = vector.load %arg18[%c0_200, %c0_201, %c0_202, %c0_203] : memref<8x6x6x3xf32, #tpu.memory_space<vmem>>, vector<8x6x6x3xf32>
    tpu.vector_store %arg18[%c0_200, %c0_201, %c0_202, %c0_203], %138 {strides = array<i32>} : memref<8x6x6x3xf32, #tpu.memory_space<vmem>>, vector<8x6x6x3xf32>,
    %c0_204 = arith.constant 0 : index
    %140 = memref.load %arg1[%c0_204] : memref<4xi32, #tpu.memory_space<smem>>
    %c4_i32 = arith.constant 4 : i32
    %141 = arith.muli %140, %c4_i32 : i32
    %c0_205 = arith.constant 0 : index
    %142 = memref.load %arg2[%c0_205] : memref<4xi32, #tpu.memory_space<smem>>
    %c4_i32_206 = arith.constant 4 : i32
    %143 = arith.muli %142, %c4_i32_206 : i32
    %c0_207 = arith.constant 0 : index
    %144 = arith.index_cast %141 : i32 to index
    %145 = arith.index_cast %143 : i32 to index
    %c0_208 = arith.constant 0 : index
    %146 = vector.load %arg14[%c0_207, %144, %145, %c0_208] : memref<2x16x16x3xf32, #tpu.memory_space<vmem>>, vector<2x4x4x3xf32>
    %c0_209 = arith.constant 0 : index
    %c1_210 = arith.constant 1 : index
    %c1_211 = arith.constant 1 : index
    %c0_212 = arith.constant 0 : index
    %147 = vector.load %arg18[%c0_209, %c1_210, %c1_211, %c0_212] : memref<8x6x6x3xf32, #tpu.memory_space<vmem>>, vector<2x4x4x3xf32>
    tpu.vector_store %arg18[%c0_209, %c1_210, %c1_211, %c0_212], %146 {strides = array<i32>} : memref<8x6x6x3xf32, #tpu.memory_space<vmem>>, vector<2x4x4x3xf32>,
    %c1_213 = arith.constant 1 : index
    %148 = memref.load %arg1[%c1_213] : memref<4xi32, #tpu.memory_space<smem>>
    %c4_i32_214 = arith.constant 4 : i32
    %149 = arith.muli %148, %c4_i32_214 : i32
    %c1_215 = arith.constant 1 : index
    %150 = memref.load %arg2[%c1_215] : memref<4xi32, #tpu.memory_space<smem>>
    %c4_i32_216 = arith.constant 4 : i32
    %151 = arith.muli %150, %c4_i32_216 : i32
    %c0_217 = arith.constant 0 : index
    %152 = arith.index_cast %149 : i32 to index
    %153 = arith.index_cast %151 : i32 to index
    %c0_218 = arith.constant 0 : index
    %154 = vector.load %arg14[%c0_217, %152, %153, %c0_218] : memref<2x16x16x3xf32, #tpu.memory_space<vmem>>, vector<2x4x4x3xf32>
    %c2_219 = arith.constant 2 : index
    %c1_220 = arith.constant 1 : index
    %c1_221 = arith.constant 1 : index
    %c0_222 = arith.constant 0 : index
    %155 = vector.load %arg18[%c2_219, %c1_220, %c1_221, %c0_222] : memref<8x6x6x3xf32, #tpu.memory_space<vmem>>, vector<2x4x4x3xf32>
    tpu.vector_store %arg18[%c2_219, %c1_220, %c1_221, %c0_222], %154 {strides = array<i32>} : memref<8x6x6x3xf32, #tpu.memory_space<vmem>>, vector<2x4x4x3xf32>,
    %c2_223 = arith.constant 2 : index
    %156 = memref.load %arg1[%c2_223] : memref<4xi32, #tpu.memory_space<smem>>
    %c4_i32_224 = arith.constant 4 : i32
    %157 = arith.muli %156, %c4_i32_224 : i32
    %c2_225 = arith.constant 2 : index
    %158 = memref.load %arg2[%c2_225] : memref<4xi32, #tpu.memory_space<smem>>
    %c4_i32_226 = arith.constant 4 : i32
    %159 = arith.muli %158, %c4_i32_226 : i32
    %c0_227 = arith.constant 0 : index
    %160 = arith.index_cast %157 : i32 to index
    %161 = arith.index_cast %159 : i32 to index
    %c0_228 = arith.constant 0 : index
    %162 = vector.load %arg14[%c0_227, %160, %161, %c0_228] : memref<2x16x16x3xf32, #tpu.memory_space<vmem>>, vector<2x4x4x3xf32>
    %c4 = arith.constant 4 : index
    %c1_229 = arith.constant 1 : index
    %c1_230 = arith.constant 1 : index
    %c0_231 = arith.constant 0 : index
    %163 = vector.load %arg18[%c4, %c1_229, %c1_230, %c0_231] : memref<8x6x6x3xf32, #tpu.memory_space<vmem>>, vector<2x4x4x3xf32>
    tpu.vector_store %arg18[%c4, %c1_229, %c1_230, %c0_231], %162 {strides = array<i32>} : memref<8x6x6x3xf32, #tpu.memory_space<vmem>>, vector<2x4x4x3xf32>,
    %c3 = arith.constant 3 : index
    %164 = memref.load %arg1[%c3] : memref<4xi32, #tpu.memory_space<smem>>
    %c4_i32_232 = arith.constant 4 : i32
    %165 = arith.muli %164, %c4_i32_232 : i32
    %c3_233 = arith.constant 3 : index
    %166 = memref.load %arg2[%c3_233] : memref<4xi32, #tpu.memory_space<smem>>
    %c4_i32_234 = arith.constant 4 : i32
    %167 = arith.muli %166, %c4_i32_234 : i32
    %c0_235 = arith.constant 0 : index
    %168 = arith.index_cast %165 : i32 to index
    %169 = arith.index_cast %167 : i32 to index
    %c0_236 = arith.constant 0 : index
    %170 = vector.load %arg14[%c0_235, %168, %169, %c0_236] : memref<2x16x16x3xf32, #tpu.memory_space<vmem>>, vector<2x4x4x3xf32>
    %c6 = arith.constant 6 : index
    %c1_237 = arith.constant 1 : index
    %c1_238 = arith.constant 1 : index
    %c0_239 = arith.constant 0 : index
    %171 = vector.load %arg18[%c6, %c1_237, %c1_238, %c0_239] : memref<8x6x6x3xf32, #tpu.memory_space<vmem>>, vector<2x4x4x3xf32>
    tpu.vector_store %arg18[%c6, %c1_237, %c1_238, %c0_239], %170 {strides = array<i32>} : memref<8x6x6x3xf32, #tpu.memory_space<vmem>>, vector<2x4x4x3xf32>,
    %cst_240 = arith.constant 0.000000e+00 : f32
    %172 = vector.broadcast %cst_240 : f32 to vector<32x8xf32>
    %c0_241 = arith.constant 0 : index
    %c0_242 = arith.constant 0 : index
    %c0_243 = arith.constant 0 : index
    %c0_244 = arith.constant 0 : index
    %173 = vector.load %arg18[%c0_241, %c0_242, %c0_243, %c0_244] : memref<8x6x6x3xf32, #tpu.memory_space<vmem>>, vector<2x4x4x3xf32>
    %174 = vector.shape_cast %173 : vector<2x4x4x3xf32> to vector<32x3xf32>
    %c0_245 = arith.constant 0 : index
    %c0_246 = arith.constant 0 : index
    %c0_247 = arith.constant 0 : index
    %c0_248 = arith.constant 0 : index
    %175 = vector.load %arg10[%c0_245, %c0_246, %c0_247, %c0_248] : memref<3x3x12x8xf32, #tpu.memory_space<vmem>>, vector<1x1x3x8xf32>
    %176 = vector.shape_cast %175 : vector<1x1x3x8xf32> to vector<3x8xf32>
    %cst_249 = arith.constant dense<0.000000e+00> : vector<32x8xf32>
    %177 = tpu.matmul %174, %176, %cst_249 {dimension_numbers = #tpu.dot_dimension_numbers<[1], [0], [0], [1], [0, 0, 1, 1], [], []>} : vector<32x3xf32>, vector<3x8xf32>, vector<32x8xf32> -> vector<32x8xf32>
    %178 = arith.addf %172, %177 : vector<32x8xf32>
    %c0_250 = arith.constant 0 : index
    %c0_251 = arith.constant 0 : index
    %c1_252 = arith.constant 1 : index
    %c0_253 = arith.constant 0 : index
    %179 = vector.load %arg18[%c0_250, %c0_251, %c1_252, %c0_253] : memref<8x6x6x3xf32, #tpu.memory_space<vmem>>, vector<2x4x4x3xf32>
    %180 = vector.shape_cast %179 : vector<2x4x4x3xf32> to vector<32x3xf32>
    %c0_254 = arith.constant 0 : index
    %c1_255 = arith.constant 1 : index
    %c0_256 = arith.constant 0 : index
    %c0_257 = arith.constant 0 : index
    %181 = vector.load %arg10[%c0_254, %c1_255, %c0_256, %c0_257] : memref<3x3x12x8xf32, #tpu.memory_space<vmem>>, vector<1x1x3x8xf32>
    %182 = vector.shape_cast %181 : vector<1x1x3x8xf32> to vector<3x8xf32>
    %cst_258 = arith.constant dense<0.000000e+00> : vector<32x8xf32>
    %183 = tpu.matmul %180, %182, %cst_258 {dimension_numbers = #tpu.dot_dimension_numbers<[1], [0], [0], [1], [0, 0, 1, 1], [], []>} : vector<32x3xf32>, vector<3x8xf32>, vector<32x8xf32> -> vector<32x8xf32>
    %184 = arith.addf %178, %183 : vector<32x8xf32>
    %c0_259 = arith.constant 0 : index
    %c0_260 = arith.constant 0 : index
    %c2_261 = arith.constant 2 : index
    %c0_262 = arith.constant 0 : index
    %185 = vector.load %arg18[%c0_259, %c0_260, %c2_261, %c0_262] : memref<8x6x6x3xf32, #tpu.memory_space<vmem>>, vector<2x4x4x3xf32>
    %186 = vector.shape_cast %185 : vector<2x4x4x3xf32> to vector<32x3xf32>
    %c0_263 = arith.constant 0 : index
    %c2_264 = arith.constant 2 : index
    %c0_265 = arith.constant 0 : index
    %c0_266 = arith.constant 0 : index
    %187 = vector.load %arg10[%c0_263, %c2_264, %c0_265, %c0_266] : memref<3x3x12x8xf32, #tpu.memory_space<vmem>>, vector<1x1x3x8xf32>
    %188 = vector.shape_cast %187 : vector<1x1x3x8xf32> to vector<3x8xf32>
    %cst_267 = arith.constant dense<0.000000e+00> : vector<32x8xf32>
    %189 = tpu.matmul %186, %188, %cst_267 {dimension_numbers = #tpu.dot_dimension_numbers<[1], [0], [0], [1], [0, 0, 1, 1], [], []>} : vector<32x3xf32>, vector<3x8xf32>, vector<32x8xf32> -> vector<32x8xf32>
    %190 = arith.addf %184, %189 : vector<32x8xf32>
    %c0_268 = arith.constant 0 : index
    %c1_269 = arith.constant 1 : index
    %c0_270 = arith.constant 0 : index
    %c0_271 = arith.constant 0 : index
    %191 = vector.load %arg18[%c0_268, %c1_269, %c0_270, %c0_271] : memref<8x6x6x3xf32, #tpu.memory_space<vmem>>, vector<2x4x4x3xf32>
    %192 = vector.shape_cast %191 : vector<2x4x4x3xf32> to vector<32x3xf32>
    %c1_272 = arith.constant 1 : index
    %c0_273 = arith.constant 0 : index
    %c0_274 = arith.constant 0 : index
    %c0_275 = arith.constant 0 : index
    %193 = vector.load %arg10[%c1_272, %c0_273, %c0_274, %c0_275] : memref<3x3x12x8xf32, #tpu.memory_space<vmem>>, vector<1x1x3x8xf32>
    %194 = vector.shape_cast %193 : vector<1x1x3x8xf32> to vector<3x8xf32>
    %cst_276 = arith.constant dense<0.000000e+00> : vector<32x8xf32>
    %195 = tpu.matmul %192, %194, %cst_276 {dimension_numbers = #tpu.dot_dimension_numbers<[1], [0], [0], [1], [0, 0, 1, 1], [], []>} : vector<32x3xf32>, vector<3x8xf32>, vector<32x8xf32> -> vector<32x8xf32>
    %196 = arith.addf %190, %195 : vector<32x8xf32>
    %c0_277 = arith.constant 0 : index
    %c1_278 = arith.constant 1 : index
    %c1_279 = arith.constant 1 : index
    %c0_280 = arith.constant 0 : index
    %197 = vector.load %arg18[%c0_277, %c1_278, %c1_279, %c0_280] : memref<8x6x6x3xf32, #tpu.memory_space<vmem>>, vector<2x4x4x3xf32>
    %198 = vector.shape_cast %197 : vector<2x4x4x3xf32> to vector<32x3xf32>
    %c1_281 = arith.constant 1 : index
    %c1_282 = arith.constant 1 : index
    %c0_283 = arith.constant 0 : index
    %c0_284 = arith.constant 0 : index
    %199 = vector.load %arg10[%c1_281, %c1_282, %c0_283, %c0_284] : memref<3x3x12x8xf32, #tpu.memory_space<vmem>>, vector<1x1x3x8xf32>
    %200 = vector.shape_cast %199 : vector<1x1x3x8xf32> to vector<3x8xf32>
    %cst_285 = arith.constant dense<0.000000e+00> : vector<32x8xf32>
    %201 = tpu.matmul %198, %200, %cst_285 {dimension_numbers = #tpu.dot_dimension_numbers<[1], [0], [0], [1], [0, 0, 1, 1], [], []>} : vector<32x3xf32>, vector<3x8xf32>, vector<32x8xf32> -> vector<32x8xf32>
    %202 = arith.addf %196, %201 : vector<32x8xf32>
    %c0_286 = arith.constant 0 : index
    %c1_287 = arith.constant 1 : index
    %c2_288 = arith.constant 2 : index
    %c0_289 = arith.constant 0 : index
    %203 = vector.load %arg18[%c0_286, %c1_287, %c2_288, %c0_289] : memref<8x6x6x3xf32, #tpu.memory_space<vmem>>, vector<2x4x4x3xf32>
    %204 = vector.shape_cast %203 : vector<2x4x4x3xf32> to vector<32x3xf32>
    %c1_290 = arith.constant 1 : index
    %c2_291 = arith.constant 2 : index
    %c0_292 = arith.constant 0 : index
    %c0_293 = arith.constant 0 : index
    %205 = vector.load %arg10[%c1_290, %c2_291, %c0_292, %c0_293] : memref<3x3x12x8xf32, #tpu.memory_space<vmem>>, vector<1x1x3x8xf32>
    %206 = vector.shape_cast %205 : vector<1x1x3x8xf32> to vector<3x8xf32>
    %cst_294 = arith.constant dense<0.000000e+00> : vector<32x8xf32>
    %207 = tpu.matmul %204, %206, %cst_294 {dimension_numbers = #tpu.dot_dimension_numbers<[1], [0], [0], [1], [0, 0, 1, 1], [], []>} : vector<32x3xf32>, vector<3x8xf32>, vector<32x8xf32> -> vector<32x8xf32>
    %208 = arith.addf %202, %207 : vector<32x8xf32>
    %c0_295 = arith.constant 0 : index
    %c2_296 = arith.constant 2 : index
    %c0_297 = arith.constant 0 : index
    %c0_298 = arith.constant 0 : index
    %209 = vector.load %arg18[%c0_295, %c2_296, %c0_297, %c0_298] : memref<8x6x6x3xf32, #tpu.memory_space<vmem>>, vector<2x4x4x3xf32>
    %210 = vector.shape_cast %209 : vector<2x4x4x3xf32> to vector<32x3xf32>
    %c2_299 = arith.constant 2 : index
    %c0_300 = arith.constant 0 : index
    %c0_301 = arith.constant 0 : index
    %c0_302 = arith.constant 0 : index
    %211 = vector.load %arg10[%c2_299, %c0_300, %c0_301, %c0_302] : memref<3x3x12x8xf32, #tpu.memory_space<vmem>>, vector<1x1x3x8xf32>
    %212 = vector.shape_cast %211 : vector<1x1x3x8xf32> to vector<3x8xf32>
    %cst_303 = arith.constant dense<0.000000e+00> : vector<32x8xf32>
    %213 = tpu.matmul %210, %212, %cst_303 {dimension_numbers = #tpu.dot_dimension_numbers<[1], [0], [0], [1], [0, 0, 1, 1], [], []>} : vector<32x3xf32>, vector<3x8xf32>, vector<32x8xf32> -> vector<32x8xf32>
    %214 = arith.addf %208, %213 : vector<32x8xf32>
    %c0_304 = arith.constant 0 : index
    %c2_305 = arith.constant 2 : index
    %c1_306 = arith.constant 1 : index
    %c0_307 = arith.constant 0 : index
    %215 = vector.load %arg18[%c0_304, %c2_305, %c1_306, %c0_307] : memref<8x6x6x3xf32, #tpu.memory_space<vmem>>, vector<2x4x4x3xf32>
    %216 = vector.shape_cast %215 : vector<2x4x4x3xf32> to vector<32x3xf32>
    %c2_308 = arith.constant 2 : index
    %c1_309 = arith.constant 1 : index
    %c0_310 = arith.constant 0 : index
    %c0_311 = arith.constant 0 : index
    %217 = vector.load %arg10[%c2_308, %c1_309, %c0_310, %c0_311] : memref<3x3x12x8xf32, #tpu.memory_space<vmem>>, vector<1x1x3x8xf32>
    %218 = vector.shape_cast %217 : vector<1x1x3x8xf32> to vector<3x8xf32>
    %cst_312 = arith.constant dense<0.000000e+00> : vector<32x8xf32>
    %219 = tpu.matmul %216, %218, %cst_312 {dimension_numbers = #tpu.dot_dimension_numbers<[1], [0], [0], [1], [0, 0, 1, 1], [], []>} : vector<32x3xf32>, vector<3x8xf32>, vector<32x8xf32> -> vector<32x8xf32>
    %220 = arith.addf %214, %219 : vector<32x8xf32>
    %c0_313 = arith.constant 0 : index
    %c2_314 = arith.constant 2 : index
    %c2_315 = arith.constant 2 : index
    %c0_316 = arith.constant 0 : index
    %221 = vector.load %arg18[%c0_313, %c2_314, %c2_315, %c0_316] : memref<8x6x6x3xf32, #tpu.memory_space<vmem>>, vector<2x4x4x3xf32>
    %222 = vector.shape_cast %221 : vector<2x4x4x3xf32> to vector<32x3xf32>
    %c2_317 = arith.constant 2 : index
    %c2_318 = arith.constant 2 : index
    %c0_319 = arith.constant 0 : index
    %c0_320 = arith.constant 0 : index
    %223 = vector.load %arg10[%c2_317, %c2_318, %c0_319, %c0_320] : memref<3x3x12x8xf32, #tpu.memory_space<vmem>>, vector<1x1x3x8xf32>
    %224 = vector.shape_cast %223 : vector<1x1x3x8xf32> to vector<3x8xf32>
    %cst_321 = arith.constant dense<0.000000e+00> : vector<32x8xf32>
    %225 = tpu.matmul %222, %224, %cst_321 {dimension_numbers = #tpu.dot_dimension_numbers<[1], [0], [0], [1], [0, 0, 1, 1], [], []>} : vector<32x3xf32>, vector<3x8xf32>, vector<32x8xf32> -> vector<32x8xf32>
    %226 = arith.addf %220, %225 : vector<32x8xf32>
    %c2_322 = arith.constant 2 : index
    %c0_323 = arith.constant 0 : index
    %c0_324 = arith.constant 0 : index
    %c0_325 = arith.constant 0 : index
    %227 = vector.load %arg18[%c2_322, %c0_323, %c0_324, %c0_325] : memref<8x6x6x3xf32, #tpu.memory_space<vmem>>, vector<2x4x4x3xf32>
    %228 = vector.shape_cast %227 : vector<2x4x4x3xf32> to vector<32x3xf32>
    %c0_326 = arith.constant 0 : index
    %c0_327 = arith.constant 0 : index
    %c3_328 = arith.constant 3 : index
    %c0_329 = arith.constant 0 : index
    %229 = vector.load %arg10[%c0_326, %c0_327, %c3_328, %c0_329] : memref<3x3x12x8xf32, #tpu.memory_space<vmem>>, vector<1x1x3x8xf32>
    %230 = vector.shape_cast %229 : vector<1x1x3x8xf32> to vector<3x8xf32>
    %cst_330 = arith.constant dense<0.000000e+00> : vector<32x8xf32>
    %231 = tpu.matmul %228, %230, %cst_330 {dimension_numbers = #tpu.dot_dimension_numbers<[1], [0], [0], [1], [0, 0, 1, 1], [], []>} : vector<32x3xf32>, vector<3x8xf32>, vector<32x8xf32> -> vector<32x8xf32>
    %232 = arith.addf %226, %231 : vector<32x8xf32>
    %c2_331 = arith.constant 2 : index
    %c0_332 = arith.constant 0 : index
    %c1_333 = arith.constant 1 : index
    %c0_334 = arith.constant 0 : index
    %233 = vector.load %arg18[%c2_331, %c0_332, %c1_333, %c0_334] : memref<8x6x6x3xf32, #tpu.memory_space<vmem>>, vector<2x4x4x3xf32>
    %234 = vector.shape_cast %233 : vector<2x4x4x3xf32> to vector<32x3xf32>
    %c0_335 = arith.constant 0 : index
    %c1_336 = arith.constant 1 : index
    %c3_337 = arith.constant 3 : index
    %c0_338 = arith.constant 0 : index
    %235 = vector.load %arg10[%c0_335, %c1_336, %c3_337, %c0_338] : memref<3x3x12x8xf32, #tpu.memory_space<vmem>>, vector<1x1x3x8xf32>
    %236 = vector.shape_cast %235 : vector<1x1x3x8xf32> to vector<3x8xf32>
    %cst_339 = arith.constant dense<0.000000e+00> : vector<32x8xf32>
    %237 = tpu.matmul %234, %236, %cst_339 {dimension_numbers = #tpu.dot_dimension_numbers<[1], [0], [0], [1], [0, 0, 1, 1], [], []>} : vector<32x3xf32>, vector<3x8xf32>, vector<32x8xf32> -> vector<32x8xf32>
    %238 = arith.addf %232, %237 : vector<32x8xf32>
    %c2_340 = arith.constant 2 : index
    %c0_341 = arith.constant 0 : index
    %c2_342 = arith.constant 2 : index
    %c0_343 = arith.constant 0 : index
    %239 = vector.load %arg18[%c2_340, %c0_341, %c2_342, %c0_343] : memref<8x6x6x3xf32, #tpu.memory_space<vmem>>, vector<2x4x4x3xf32>
    %240 = vector.shape_cast %239 : vector<2x4x4x3xf32> to vector<32x3xf32>
    %c0_344 = arith.constant 0 : index
    %c2_345 = arith.constant 2 : index
    %c3_346 = arith.constant 3 : index
    %c0_347 = arith.constant 0 : index
    %241 = vector.load %arg10[%c0_344, %c2_345, %c3_346, %c0_347] : memref<3x3x12x8xf32, #tpu.memory_space<vmem>>, vector<1x1x3x8xf32>
    %242 = vector.shape_cast %241 : vector<1x1x3x8xf32> to vector<3x8xf32>
    %cst_348 = arith.constant dense<0.000000e+00> : vector<32x8xf32>
    %243 = tpu.matmul %240, %242, %cst_348 {dimension_numbers = #tpu.dot_dimension_numbers<[1], [0], [0], [1], [0, 0, 1, 1], [], []>} : vector<32x3xf32>, vector<3x8xf32>, vector<32x8xf32> -> vector<32x8xf32>
    %244 = arith.addf %238, %243 : vector<32x8xf32>
    %c2_349 = arith.constant 2 : index
    %c1_350 = arith.constant 1 : index
    %c0_351 = arith.constant 0 : index
    %c0_352 = arith.constant 0 : index
    %245 = vector.load %arg18[%c2_349, %c1_350, %c0_351, %c0_352] : memref<8x6x6x3xf32, #tpu.memory_space<vmem>>, vector<2x4x4x3xf32>
    %246 = vector.shape_cast %245 : vector<2x4x4x3xf32> to vector<32x3xf32>
    %c1_353 = arith.constant 1 : index
    %c0_354 = arith.constant 0 : index
    %c3_355 = arith.constant 3 : index
    %c0_356 = arith.constant 0 : index
    %247 = vector.load %arg10[%c1_353, %c0_354, %c3_355, %c0_356] : memref<3x3x12x8xf32, #tpu.memory_space<vmem>>, vector<1x1x3x8xf32>
    %248 = vector.shape_cast %247 : vector<1x1x3x8xf32> to vector<3x8xf32>
    %cst_357 = arith.constant dense<0.000000e+00> : vector<32x8xf32>
    %249 = tpu.matmul %246, %248, %cst_357 {dimension_numbers = #tpu.dot_dimension_numbers<[1], [0], [0], [1], [0, 0, 1, 1], [], []>} : vector<32x3xf32>, vector<3x8xf32>, vector<32x8xf32> -> vector<32x8xf32>
    %250 = arith.addf %244, %249 : vector<32x8xf32>
    %c2_358 = arith.constant 2 : index
    %c1_359 = arith.constant 1 : index
    %c1_360 = arith.constant 1 : index
    %c0_361 = arith.constant 0 : index
    %251 = vector.load %arg18[%c2_358, %c1_359, %c1_360, %c0_361] : memref<8x6x6x3xf32, #tpu.memory_space<vmem>>, vector<2x4x4x3xf32>
    %252 = vector.shape_cast %251 : vector<2x4x4x3xf32> to vector<32x3xf32>
    %c1_362 = arith.constant 1 : index
    %c1_363 = arith.constant 1 : index
    %c3_364 = arith.constant 3 : index
    %c0_365 = arith.constant 0 : index
    %253 = vector.load %arg10[%c1_362, %c1_363, %c3_364, %c0_365] : memref<3x3x12x8xf32, #tpu.memory_space<vmem>>, vector<1x1x3x8xf32>
    %254 = vector.shape_cast %253 : vector<1x1x3x8xf32> to vector<3x8xf32>
    %cst_366 = arith.constant dense<0.000000e+00> : vector<32x8xf32>
    %255 = tpu.matmul %252, %254, %cst_366 {dimension_numbers = #tpu.dot_dimension_numbers<[1], [0], [0], [1], [0, 0, 1, 1], [], []>} : vector<32x3xf32>, vector<3x8xf32>, vector<32x8xf32> -> vector<32x8xf32>
    %256 = arith.addf %250, %255 : vector<32x8xf32>
    %c2_367 = arith.constant 2 : index
    %c1_368 = arith.constant 1 : index
    %c2_369 = arith.constant 2 : index
    %c0_370 = arith.constant 0 : index
    %257 = vector.load %arg18[%c2_367, %c1_368, %c2_369, %c0_370] : memref<8x6x6x3xf32, #tpu.memory_space<vmem>>, vector<2x4x4x3xf32>
    %258 = vector.shape_cast %257 : vector<2x4x4x3xf32> to vector<32x3xf32>
    %c1_371 = arith.constant 1 : index
    %c2_372 = arith.constant 2 : index
    %c3_373 = arith.constant 3 : index
    %c0_374 = arith.constant 0 : index
    %259 = vector.load %arg10[%c1_371, %c2_372, %c3_373, %c0_374] : memref<3x3x12x8xf32, #tpu.memory_space<vmem>>, vector<1x1x3x8xf32>
    %260 = vector.shape_cast %259 : vector<1x1x3x8xf32> to vector<3x8xf32>
    %cst_375 = arith.constant dense<0.000000e+00> : vector<32x8xf32>
    %261 = tpu.matmul %258, %260, %cst_375 {dimension_numbers = #tpu.dot_dimension_numbers<[1], [0], [0], [1], [0, 0, 1, 1], [], []>} : vector<32x3xf32>, vector<3x8xf32>, vector<32x8xf32> -> vector<32x8xf32>
    %262 = arith.addf %256, %261 : vector<32x8xf32>
    %c2_376 = arith.constant 2 : index
    %c2_377 = arith.constant 2 : index
    %c0_378 = arith.constant 0 : index
    %c0_379 = arith.constant 0 : index
    %263 = vector.load %arg18[%c2_376, %c2_377, %c0_378, %c0_379] : memref<8x6x6x3xf32, #tpu.memory_space<vmem>>, vector<2x4x4x3xf32>
    %264 = vector.shape_cast %263 : vector<2x4x4x3xf32> to vector<32x3xf32>
    %c2_380 = arith.constant 2 : index
    %c0_381 = arith.constant 0 : index
    %c3_382 = arith.constant 3 : index
    %c0_383 = arith.constant 0 : index
    %265 = vector.load %arg10[%c2_380, %c0_381, %c3_382, %c0_383] : memref<3x3x12x8xf32, #tpu.memory_space<vmem>>, vector<1x1x3x8xf32>
    %266 = vector.shape_cast %265 : vector<1x1x3x8xf32> to vector<3x8xf32>
    %cst_384 = arith.constant dense<0.000000e+00> : vector<32x8xf32>
    %267 = tpu.matmul %264, %266, %cst_384 {dimension_numbers = #tpu.dot_dimension_numbers<[1], [0], [0], [1], [0, 0, 1, 1], [], []>} : vector<32x3xf32>, vector<3x8xf32>, vector<32x8xf32> -> vector<32x8xf32>
    %268 = arith.addf %262, %267 : vector<32x8xf32>
    %c2_385 = arith.constant 2 : index
    %c2_386 = arith.constant 2 : index
    %c1_387 = arith.constant 1 : index
    %c0_388 = arith.constant 0 : index
    %269 = vector.load %arg18[%c2_385, %c2_386, %c1_387, %c0_388] : memref<8x6x6x3xf32, #tpu.memory_space<vmem>>, vector<2x4x4x3xf32>
    %270 = vector.shape_cast %269 : vector<2x4x4x3xf32> to vector<32x3xf32>
    %c2_389 = arith.constant 2 : index
    %c1_390 = arith.constant 1 : index
    %c3_391 = arith.constant 3 : index
    %c0_392 = arith.constant 0 : index
    %271 = vector.load %arg10[%c2_389, %c1_390, %c3_391, %c0_392] : memref<3x3x12x8xf32, #tpu.memory_space<vmem>>, vector<1x1x3x8xf32>
    %272 = vector.shape_cast %271 : vector<1x1x3x8xf32> to vector<3x8xf32>
    %cst_393 = arith.constant dense<0.000000e+00> : vector<32x8xf32>
    %273 = tpu.matmul %270, %272, %cst_393 {dimension_numbers = #tpu.dot_dimension_numbers<[1], [0], [0], [1], [0, 0, 1, 1], [], []>} : vector<32x3xf32>, vector<3x8xf32>, vector<32x8xf32> -> vector<32x8xf32>
    %274 = arith.addf %268, %273 : vector<32x8xf32>
    %c2_394 = arith.constant 2 : index
    %c2_395 = arith.constant 2 : index
    %c2_396 = arith.constant 2 : index
    %c0_397 = arith.constant 0 : index
    %275 = vector.load %arg18[%c2_394, %c2_395, %c2_396, %c0_397] : memref<8x6x6x3xf32, #tpu.memory_space<vmem>>, vector<2x4x4x3xf32>
    %276 = vector.shape_cast %275 : vector<2x4x4x3xf32> to vector<32x3xf32>
    %c2_398 = arith.constant 2 : index
    %c2_399 = arith.constant 2 : index
    %c3_400 = arith.constant 3 : index
    %c0_401 = arith.constant 0 : index
    %277 = vector.load %arg10[%c2_398, %c2_399, %c3_400, %c0_401] : memref<3x3x12x8xf32, #tpu.memory_space<vmem>>, vector<1x1x3x8xf32>
    %278 = vector.shape_cast %277 : vector<1x1x3x8xf32> to vector<3x8xf32>
    %cst_402 = arith.constant dense<0.000000e+00> : vector<32x8xf32>
    %279 = tpu.matmul %276, %278, %cst_402 {dimension_numbers = #tpu.dot_dimension_numbers<[1], [0], [0], [1], [0, 0, 1, 1], [], []>} : vector<32x3xf32>, vector<3x8xf32>, vector<32x8xf32> -> vector<32x8xf32>
    %280 = arith.addf %274, %279 : vector<32x8xf32>
    %c4_403 = arith.constant 4 : index
    %c0_404 = arith.constant 0 : index
    %c0_405 = arith.constant 0 : index
    %c0_406 = arith.constant 0 : index
    %281 = vector.load %arg18[%c4_403, %c0_404, %c0_405, %c0_406] : memref<8x6x6x3xf32, #tpu.memory_space<vmem>>, vector<2x4x4x3xf32>
    %282 = vector.shape_cast %281 : vector<2x4x4x3xf32> to vector<32x3xf32>
    %c0_407 = arith.constant 0 : index
    %c0_408 = arith.constant 0 : index
    %c6_409 = arith.constant 6 : index
    %c0_410 = arith.constant 0 : index
    %283 = vector.load %arg10[%c0_407, %c0_408, %c6_409, %c0_410] : memref<3x3x12x8xf32, #tpu.memory_space<vmem>>, vector<1x1x3x8xf32>
    %284 = vector.shape_cast %283 : vector<1x1x3x8xf32> to vector<3x8xf32>
    %cst_411 = arith.constant dense<0.000000e+00> : vector<32x8xf32>
    %285 = tpu.matmul %282, %284, %cst_411 {dimension_numbers = #tpu.dot_dimension_numbers<[1], [0], [0], [1], [0, 0, 1, 1], [], []>} : vector<32x3xf32>, vector<3x8xf32>, vector<32x8xf32> -> vector<32x8xf32>
    %286 = arith.addf %280, %285 : vector<32x8xf32>
    %c4_412 = arith.constant 4 : index
    %c0_413 = arith.constant 0 : index
    %c1_414 = arith.constant 1 : index
    %c0_415 = arith.constant 0 : index
    %287 = vector.load %arg18[%c4_412, %c0_413, %c1_414, %c0_415] : memref<8x6x6x3xf32, #tpu.memory_space<vmem>>, vector<2x4x4x3xf32>
    %288 = vector.shape_cast %287 : vector<2x4x4x3xf32> to vector<32x3xf32>
    %c0_416 = arith.constant 0 : index
    %c1_417 = arith.constant 1 : index
    %c6_418 = arith.constant 6 : index
    %c0_419 = arith.constant 0 : index
    %289 = vector.load %arg10[%c0_416, %c1_417, %c6_418, %c0_419] : memref<3x3x12x8xf32, #tpu.memory_space<vmem>>, vector<1x1x3x8xf32>
    %290 = vector.shape_cast %289 : vector<1x1x3x8xf32> to vector<3x8xf32>
    %cst_420 = arith.constant dense<0.000000e+00> : vector<32x8xf32>
    %291 = tpu.matmul %288, %290, %cst_420 {dimension_numbers = #tpu.dot_dimension_numbers<[1], [0], [0], [1], [0, 0, 1, 1], [], []>} : vector<32x3xf32>, vector<3x8xf32>, vector<32x8xf32> -> vector<32x8xf32>
    %292 = arith.addf %286, %291 : vector<32x8xf32>
    %c4_421 = arith.constant 4 : index
    %c0_422 = arith.constant 0 : index
    %c2_423 = arith.constant 2 : index
    %c0_424 = arith.constant 0 : index
    %293 = vector.load %arg18[%c4_421, %c0_422, %c2_423, %c0_424] : memref<8x6x6x3xf32, #tpu.memory_space<vmem>>, vector<2x4x4x3xf32>
    %294 = vector.shape_cast %293 : vector<2x4x4x3xf32> to vector<32x3xf32>
    %c0_425 = arith.constant 0 : index
    %c2_426 = arith.constant 2 : index
    %c6_427 = arith.constant 6 : index
    %c0_428 = arith.constant 0 : index
    %295 = vector.load %arg10[%c0_425, %c2_426, %c6_427, %c0_428] : memref<3x3x12x8xf32, #tpu.memory_space<vmem>>, vector<1x1x3x8xf32>
    %296 = vector.shape_cast %295 : vector<1x1x3x8xf32> to vector<3x8xf32>
    %cst_429 = arith.constant dense<0.000000e+00> : vector<32x8xf32>
    %297 = tpu.matmul %294, %296, %cst_429 {dimension_numbers = #tpu.dot_dimension_numbers<[1], [0], [0], [1], [0, 0, 1, 1], [], []>} : vector<32x3xf32>, vector<3x8xf32>, vector<32x8xf32> -> vector<32x8xf32>
    %298 = arith.addf %292, %297 : vector<32x8xf32>
    %c4_430 = arith.constant 4 : index
    %c1_431 = arith.constant 1 : index
    %c0_432 = arith.constant 0 : index
    %c0_433 = arith.constant 0 : index
    %299 = vector.load %arg18[%c4_430, %c1_431, %c0_432, %c0_433] : memref<8x6x6x3xf32, #tpu.memory_space<vmem>>, vector<2x4x4x3xf32>
    %300 = vector.shape_cast %299 : vector<2x4x4x3xf32> to vector<32x3xf32>
    %c1_434 = arith.constant 1 : index
    %c0_435 = arith.constant 0 : index
    %c6_436 = arith.constant 6 : index
    %c0_437 = arith.constant 0 : index
    %301 = vector.load %arg10[%c1_434, %c0_435, %c6_436, %c0_437] : memref<3x3x12x8xf32, #tpu.memory_space<vmem>>, vector<1x1x3x8xf32>
    %302 = vector.shape_cast %301 : vector<1x1x3x8xf32> to vector<3x8xf32>
    %cst_438 = arith.constant dense<0.000000e+00> : vector<32x8xf32>
    %303 = tpu.matmul %300, %302, %cst_438 {dimension_numbers = #tpu.dot_dimension_numbers<[1], [0], [0], [1], [0, 0, 1, 1], [], []>} : vector<32x3xf32>, vector<3x8xf32>, vector<32x8xf32> -> vector<32x8xf32>
    %304 = arith.addf %298, %303 : vector<32x8xf32>
    %c4_439 = arith.constant 4 : index
    %c1_440 = arith.constant 1 : index
    %c1_441 = arith.constant 1 : index
    %c0_442 = arith.constant 0 : index
    %305 = vector.load %arg18[%c4_439, %c1_440, %c1_441, %c0_442] : memref<8x6x6x3xf32, #tpu.memory_space<vmem>>, vector<2x4x4x3xf32>
    %306 = vector.shape_cast %305 : vector<2x4x4x3xf32> to vector<32x3xf32>
    %c1_443 = arith.constant 1 : index
    %c1_444 = arith.constant 1 : index
    %c6_445 = arith.constant 6 : index
    %c0_446 = arith.constant 0 : index
    %307 = vector.load %arg10[%c1_443, %c1_444, %c6_445, %c0_446] : memref<3x3x12x8xf32, #tpu.memory_space<vmem>>, vector<1x1x3x8xf32>
    %308 = vector.shape_cast %307 : vector<1x1x3x8xf32> to vector<3x8xf32>
    %cst_447 = arith.constant dense<0.000000e+00> : vector<32x8xf32>
    %309 = tpu.matmul %306, %308, %cst_447 {dimension_numbers = #tpu.dot_dimension_numbers<[1], [0], [0], [1], [0, 0, 1, 1], [], []>} : vector<32x3xf32>, vector<3x8xf32>, vector<32x8xf32> -> vector<32x8xf32>
    %310 = arith.addf %304, %309 : vector<32x8xf32>
    %c4_448 = arith.constant 4 : index
    %c1_449 = arith.constant 1 : index
    %c2_450 = arith.constant 2 : index
    %c0_451 = arith.constant 0 : index
    %311 = vector.load %arg18[%c4_448, %c1_449, %c2_450, %c0_451] : memref<8x6x6x3xf32, #tpu.memory_space<vmem>>, vector<2x4x4x3xf32>
    %312 = vector.shape_cast %311 : vector<2x4x4x3xf32> to vector<32x3xf32>
    %c1_452 = arith.constant 1 : index
    %c2_453 = arith.constant 2 : index
    %c6_454 = arith.constant 6 : index
    %c0_455 = arith.constant 0 : index
    %313 = vector.load %arg10[%c1_452, %c2_453, %c6_454, %c0_455] : memref<3x3x12x8xf32, #tpu.memory_space<vmem>>, vector<1x1x3x8xf32>
    %314 = vector.shape_cast %313 : vector<1x1x3x8xf32> to vector<3x8xf32>
    %cst_456 = arith.constant dense<0.000000e+00> : vector<32x8xf32>
    %315 = tpu.matmul %312, %314, %cst_456 {dimension_numbers = #tpu.dot_dimension_numbers<[1], [0], [0], [1], [0, 0, 1, 1], [], []>} : vector<32x3xf32>, vector<3x8xf32>, vector<32x8xf32> -> vector<32x8xf32>
    %316 = arith.addf %310, %315 : vector<32x8xf32>
    %c4_457 = arith.constant 4 : index
    %c2_458 = arith.constant 2 : index
    %c0_459 = arith.constant 0 : index
    %c0_460 = arith.constant 0 : index
    %317 = vector.load %arg18[%c4_457, %c2_458, %c0_459, %c0_460] : memref<8x6x6x3xf32, #tpu.memory_space<vmem>>, vector<2x4x4x3xf32>
    %318 = vector.shape_cast %317 : vector<2x4x4x3xf32> to vector<32x3xf32>
    %c2_461 = arith.constant 2 : index
    %c0_462 = arith.constant 0 : index
    %c6_463 = arith.constant 6 : index
    %c0_464 = arith.constant 0 : index
    %319 = vector.load %arg10[%c2_461, %c0_462, %c6_463, %c0_464] : memref<3x3x12x8xf32, #tpu.memory_space<vmem>>, vector<1x1x3x8xf32>
    %320 = vector.shape_cast %319 : vector<1x1x3x8xf32> to vector<3x8xf32>
    %cst_465 = arith.constant dense<0.000000e+00> : vector<32x8xf32>
    %321 = tpu.matmul %318, %320, %cst_465 {dimension_numbers = #tpu.dot_dimension_numbers<[1], [0], [0], [1], [0, 0, 1, 1], [], []>} : vector<32x3xf32>, vector<3x8xf32>, vector<32x8xf32> -> vector<32x8xf32>
    %322 = arith.addf %316, %321 : vector<32x8xf32>
    %c4_466 = arith.constant 4 : index
    %c2_467 = arith.constant 2 : index
    %c1_468 = arith.constant 1 : index
    %c0_469 = arith.constant 0 : index
    %323 = vector.load %arg18[%c4_466, %c2_467, %c1_468, %c0_469] : memref<8x6x6x3xf32, #tpu.memory_space<vmem>>, vector<2x4x4x3xf32>
    %324 = vector.shape_cast %323 : vector<2x4x4x3xf32> to vector<32x3xf32>
    %c2_470 = arith.constant 2 : index
    %c1_471 = arith.constant 1 : index
    %c6_472 = arith.constant 6 : index
    %c0_473 = arith.constant 0 : index
    %325 = vector.load %arg10[%c2_470, %c1_471, %c6_472, %c0_473] : memref<3x3x12x8xf32, #tpu.memory_space<vmem>>, vector<1x1x3x8xf32>
    %326 = vector.shape_cast %325 : vector<1x1x3x8xf32> to vector<3x8xf32>
    %cst_474 = arith.constant dense<0.000000e+00> : vector<32x8xf32>
    %327 = tpu.matmul %324, %326, %cst_474 {dimension_numbers = #tpu.dot_dimension_numbers<[1], [0], [0], [1], [0, 0, 1, 1], [], []>} : vector<32x3xf32>, vector<3x8xf32>, vector<32x8xf32> -> vector<32x8xf32>
    %328 = arith.addf %322, %327 : vector<32x8xf32>
    %c4_475 = arith.constant 4 : index
    %c2_476 = arith.constant 2 : index
    %c2_477 = arith.constant 2 : index
    %c0_478 = arith.constant 0 : index
    %329 = vector.load %arg18[%c4_475, %c2_476, %c2_477, %c0_478] : memref<8x6x6x3xf32, #tpu.memory_space<vmem>>, vector<2x4x4x3xf32>
    %330 = vector.shape_cast %329 : vector<2x4x4x3xf32> to vector<32x3xf32>
    %c2_479 = arith.constant 2 : index
    %c2_480 = arith.constant 2 : index
    %c6_481 = arith.constant 6 : index
    %c0_482 = arith.constant 0 : index
    %331 = vector.load %arg10[%c2_479, %c2_480, %c6_481, %c0_482] : memref<3x3x12x8xf32, #tpu.memory_space<vmem>>, vector<1x1x3x8xf32>
    %332 = vector.shape_cast %331 : vector<1x1x3x8xf32> to vector<3x8xf32>
    %cst_483 = arith.constant dense<0.000000e+00> : vector<32x8xf32>
    %333 = tpu.matmul %330, %332, %cst_483 {dimension_numbers = #tpu.dot_dimension_numbers<[1], [0], [0], [1], [0, 0, 1, 1], [], []>} : vector<32x3xf32>, vector<3x8xf32>, vector<32x8xf32> -> vector<32x8xf32>
    %334 = arith.addf %328, %333 : vector<32x8xf32>
    %c6_484 = arith.constant 6 : index
    %c0_485 = arith.constant 0 : index
    %c0_486 = arith.constant 0 : index
    %c0_487 = arith.constant 0 : index
    %335 = vector.load %arg18[%c6_484, %c0_485, %c0_486, %c0_487] : memref<8x6x6x3xf32, #tpu.memory_space<vmem>>, vector<2x4x4x3xf32>
    %336 = vector.shape_cast %335 : vector<2x4x4x3xf32> to vector<32x3xf32>
    %c0_488 = arith.constant 0 : index
    %c0_489 = arith.constant 0 : index
    %c9 = arith.constant 9 : index
    %c0_490 = arith.constant 0 : index
    %337 = vector.load %arg10[%c0_488, %c0_489, %c9, %c0_490] : memref<3x3x12x8xf32, #tpu.memory_space<vmem>>, vector<1x1x3x8xf32>
    %338 = vector.shape_cast %337 : vector<1x1x3x8xf32> to vector<3x8xf32>
    %cst_491 = arith.constant dense<0.000000e+00> : vector<32x8xf32>
    %339 = tpu.matmul %336, %338, %cst_491 {dimension_numbers = #tpu.dot_dimension_numbers<[1], [0], [0], [1], [0, 0, 1, 1], [], []>} : vector<32x3xf32>, vector<3x8xf32>, vector<32x8xf32> -> vector<32x8xf32>
    %340 = arith.addf %334, %339 : vector<32x8xf32>
    %c6_492 = arith.constant 6 : index
    %c0_493 = arith.constant 0 : index
    %c1_494 = arith.constant 1 : index
    %c0_495 = arith.constant 0 : index
    %341 = vector.load %arg18[%c6_492, %c0_493, %c1_494, %c0_495] : memref<8x6x6x3xf32, #tpu.memory_space<vmem>>, vector<2x4x4x3xf32>
    %342 = vector.shape_cast %341 : vector<2x4x4x3xf32> to vector<32x3xf32>
    %c0_496 = arith.constant 0 : index
    %c1_497 = arith.constant 1 : index
    %c9_498 = arith.constant 9 : index
    %c0_499 = arith.constant 0 : index
    %343 = vector.load %arg10[%c0_496, %c1_497, %c9_498, %c0_499] : memref<3x3x12x8xf32, #tpu.memory_space<vmem>>, vector<1x1x3x8xf32>
    %344 = vector.shape_cast %343 : vector<1x1x3x8xf32> to vector<3x8xf32>
    %cst_500 = arith.constant dense<0.000000e+00> : vector<32x8xf32>
    %345 = tpu.matmul %342, %344, %cst_500 {dimension_numbers = #tpu.dot_dimension_numbers<[1], [0], [0], [1], [0, 0, 1, 1], [], []>} : vector<32x3xf32>, vector<3x8xf32>, vector<32x8xf32> -> vector<32x8xf32>
    %346 = arith.addf %340, %345 : vector<32x8xf32>
    %c6_501 = arith.constant 6 : index
    %c0_502 = arith.constant 0 : index
    %c2_503 = arith.constant 2 : index
    %c0_504 = arith.constant 0 : index
    %347 = vector.load %arg18[%c6_501, %c0_502, %c2_503, %c0_504] : memref<8x6x6x3xf32, #tpu.memory_space<vmem>>, vector<2x4x4x3xf32>
    %348 = vector.shape_cast %347 : vector<2x4x4x3xf32> to vector<32x3xf32>
    %c0_505 = arith.constant 0 : index
    %c2_506 = arith.constant 2 : index
    %c9_507 = arith.constant 9 : index
    %c0_508 = arith.constant 0 : index
    %349 = vector.load %arg10[%c0_505, %c2_506, %c9_507, %c0_508] : memref<3x3x12x8xf32, #tpu.memory_space<vmem>>, vector<1x1x3x8xf32>
    %350 = vector.shape_cast %349 : vector<1x1x3x8xf32> to vector<3x8xf32>
    %cst_509 = arith.constant dense<0.000000e+00> : vector<32x8xf32>
    %351 = tpu.matmul %348, %350, %cst_509 {dimension_numbers = #tpu.dot_dimension_numbers<[1], [0], [0], [1], [0, 0, 1, 1], [], []>} : vector<32x3xf32>, vector<3x8xf32>, vector<32x8xf32> -> vector<32x8xf32>
    %352 = arith.addf %346, %351 : vector<32x8xf32>
    %c6_510 = arith.constant 6 : index
    %c1_511 = arith.constant 1 : index
    %c0_512 = arith.constant 0 : index
    %c0_513 = arith.constant 0 : index
    %353 = vector.load %arg18[%c6_510, %c1_511, %c0_512, %c0_513] : memref<8x6x6x3xf32, #tpu.memory_space<vmem>>, vector<2x4x4x3xf32>
    %354 = vector.shape_cast %353 : vector<2x4x4x3xf32> to vector<32x3xf32>
    %c1_514 = arith.constant 1 : index
    %c0_515 = arith.constant 0 : index
    %c9_516 = arith.constant 9 : index
    %c0_517 = arith.constant 0 : index
    %355 = vector.load %arg10[%c1_514, %c0_515, %c9_516, %c0_517] : memref<3x3x12x8xf32, #tpu.memory_space<vmem>>, vector<1x1x3x8xf32>
    %356 = vector.shape_cast %355 : vector<1x1x3x8xf32> to vector<3x8xf32>
    %cst_518 = arith.constant dense<0.000000e+00> : vector<32x8xf32>
    %357 = tpu.matmul %354, %356, %cst_518 {dimension_numbers = #tpu.dot_dimension_numbers<[1], [0], [0], [1], [0, 0, 1, 1], [], []>} : vector<32x3xf32>, vector<3x8xf32>, vector<32x8xf32> -> vector<32x8xf32>
    %358 = arith.addf %352, %357 : vector<32x8xf32>
    %c6_519 = arith.constant 6 : index
    %c1_520 = arith.constant 1 : index
    %c1_521 = arith.constant 1 : index
    %c0_522 = arith.constant 0 : index
    %359 = vector.load %arg18[%c6_519, %c1_520, %c1_521, %c0_522] : memref<8x6x6x3xf32, #tpu.memory_space<vmem>>, vector<2x4x4x3xf32>
    %360 = vector.shape_cast %359 : vector<2x4x4x3xf32> to vector<32x3xf32>
    %c1_523 = arith.constant 1 : index
    %c1_524 = arith.constant 1 : index
    %c9_525 = arith.constant 9 : index
    %c0_526 = arith.constant 0 : index
    %361 = vector.load %arg10[%c1_523, %c1_524, %c9_525, %c0_526] : memref<3x3x12x8xf32, #tpu.memory_space<vmem>>, vector<1x1x3x8xf32>
    %362 = vector.shape_cast %361 : vector<1x1x3x8xf32> to vector<3x8xf32>
    %cst_527 = arith.constant dense<0.000000e+00> : vector<32x8xf32>
    %363 = tpu.matmul %360, %362, %cst_527 {dimension_numbers = #tpu.dot_dimension_numbers<[1], [0], [0], [1], [0, 0, 1, 1], [], []>} : vector<32x3xf32>, vector<3x8xf32>, vector<32x8xf32> -> vector<32x8xf32>
    %364 = arith.addf %358, %363 : vector<32x8xf32>
    %c6_528 = arith.constant 6 : index
    %c1_529 = arith.constant 1 : index
    %c2_530 = arith.constant 2 : index
    %c0_531 = arith.constant 0 : index
    %365 = vector.load %arg18[%c6_528, %c1_529, %c2_530, %c0_531] : memref<8x6x6x3xf32, #tpu.memory_space<vmem>>, vector<2x4x4x3xf32>
    %366 = vector.shape_cast %365 : vector<2x4x4x3xf32> to vector<32x3xf32>
    %c1_532 = arith.constant 1 : index
    %c2_533 = arith.constant 2 : index
    %c9_534 = arith.constant 9 : index
    %c0_535 = arith.constant 0 : index
    %367 = vector.load %arg10[%c1_532, %c2_533, %c9_534, %c0_535] : memref<3x3x12x8xf32, #tpu.memory_space<vmem>>, vector<1x1x3x8xf32>
    %368 = vector.shape_cast %367 : vector<1x1x3x8xf32> to vector<3x8xf32>
    %cst_536 = arith.constant dense<0.000000e+00> : vector<32x8xf32>
    %369 = tpu.matmul %366, %368, %cst_536 {dimension_numbers = #tpu.dot_dimension_numbers<[1], [0], [0], [1], [0, 0, 1, 1], [], []>} : vector<32x3xf32>, vector<3x8xf32>, vector<32x8xf32> -> vector<32x8xf32>
    %370 = arith.addf %364, %369 : vector<32x8xf32>
    %c6_537 = arith.constant 6 : index
    %c2_538 = arith.constant 2 : index
    %c0_539 = arith.constant 0 : index
    %c0_540 = arith.constant 0 : index
    %371 = vector.load %arg18[%c6_537, %c2_538, %c0_539, %c0_540] : memref<8x6x6x3xf32, #tpu.memory_space<vmem>>, vector<2x4x4x3xf32>
    %372 = vector.shape_cast %371 : vector<2x4x4x3xf32> to vector<32x3xf32>
    %c2_541 = arith.constant 2 : index
    %c0_542 = arith.constant 0 : index
    %c9_543 = arith.constant 9 : index
    %c0_544 = arith.constant 0 : index
    %373 = vector.load %arg10[%c2_541, %c0_542, %c9_543, %c0_544] : memref<3x3x12x8xf32, #tpu.memory_space<vmem>>, vector<1x1x3x8xf32>
    %374 = vector.shape_cast %373 : vector<1x1x3x8xf32> to vector<3x8xf32>
    %cst_545 = arith.constant dense<0.000000e+00> : vector<32x8xf32>
    %375 = tpu.matmul %372, %374, %cst_545 {dimension_numbers = #tpu.dot_dimension_numbers<[1], [0], [0], [1], [0, 0, 1, 1], [], []>} : vector<32x3xf32>, vector<3x8xf32>, vector<32x8xf32> -> vector<32x8xf32>
    %376 = arith.addf %370, %375 : vector<32x8xf32>
    %c6_546 = arith.constant 6 : index
    %c2_547 = arith.constant 2 : index
    %c1_548 = arith.constant 1 : index
    %c0_549 = arith.constant 0 : index
    %377 = vector.load %arg18[%c6_546, %c2_547, %c1_548, %c0_549] : memref<8x6x6x3xf32, #tpu.memory_space<vmem>>, vector<2x4x4x3xf32>
    %378 = vector.shape_cast %377 : vector<2x4x4x3xf32> to vector<32x3xf32>
    %c2_550 = arith.constant 2 : index
    %c1_551 = arith.constant 1 : index
    %c9_552 = arith.constant 9 : index
    %c0_553 = arith.constant 0 : index
    %379 = vector.load %arg10[%c2_550, %c1_551, %c9_552, %c0_553] : memref<3x3x12x8xf32, #tpu.memory_space<vmem>>, vector<1x1x3x8xf32>
    %380 = vector.shape_cast %379 : vector<1x1x3x8xf32> to vector<3x8xf32>
    %cst_554 = arith.constant dense<0.000000e+00> : vector<32x8xf32>
    %381 = tpu.matmul %378, %380, %cst_554 {dimension_numbers = #tpu.dot_dimension_numbers<[1], [0], [0], [1], [0, 0, 1, 1], [], []>} : vector<32x3xf32>, vector<3x8xf32>, vector<32x8xf32> -> vector<32x8xf32>
    %382 = arith.addf %376, %381 : vector<32x8xf32>
    %c6_555 = arith.constant 6 : index
    %c2_556 = arith.constant 2 : index
    %c2_557 = arith.constant 2 : index
    %c0_558 = arith.constant 0 : index
    %383 = vector.load %arg18[%c6_555, %c2_556, %c2_557, %c0_558] : memref<8x6x6x3xf32, #tpu.memory_space<vmem>>, vector<2x4x4x3xf32>
    %384 = vector.shape_cast %383 : vector<2x4x4x3xf32> to vector<32x3xf32>
    %c2_559 = arith.constant 2 : index
    %c2_560 = arith.constant 2 : index
    %c9_561 = arith.constant 9 : index
    %c0_562 = arith.constant 0 : index
    %385 = vector.load %arg10[%c2_559, %c2_560, %c9_561, %c0_562] : memref<3x3x12x8xf32, #tpu.memory_space<vmem>>, vector<1x1x3x8xf32>
    %386 = vector.shape_cast %385 : vector<1x1x3x8xf32> to vector<3x8xf32>
    %cst_563 = arith.constant dense<0.000000e+00> : vector<32x8xf32>
    %387 = tpu.matmul %384, %386, %cst_563 {dimension_numbers = #tpu.dot_dimension_numbers<[1], [0], [0], [1], [0, 0, 1, 1], [], []>} : vector<32x3xf32>, vector<3x8xf32>, vector<32x8xf32> -> vector<32x8xf32>
    %388 = arith.addf %382, %387 : vector<32x8xf32>
    %c0_564 = arith.constant 0 : index
    %c0_565 = arith.constant 0 : index
    %389 = vector.load %arg11[%c0_564, %c0_565] : memref<1x8xf32, #tpu.memory_space<vmem>>, vector<1x8xf32>
    %390 = vector.broadcast %389 : vector<1x8xf32> to vector<32x8xf32>
    %391 = arith.addf %388, %390 : vector<32x8xf32>
    %cst_566 = arith.constant 0.000000e+00 : f32
    %392 = vector.broadcast %cst_566 : f32 to vector<32x8xf32>
    %393 = arith.maximumf %391, %392 : vector<32x8xf32>
    %394 = vector.shape_cast %393 : vector<32x8xf32> to vector<2x4x4x8xf32>
    %cst_567 = arith.constant 0.000000e+00 : f32
    %395 = vector.broadcast %cst_567 : f32 to vector<2x6x6x8xf32>
    %c0_568 = arith.constant 0 : index
    %c0_569 = arith.constant 0 : index
    %c0_570 = arith.constant 0 : index
    %c0_571 = arith.constant 0 : index
    %396 = vector.load %arg19[%c0_568, %c0_569, %c0_570, %c0_571] : memref<2x6x6x8xf32, #tpu.memory_space<vmem>>, vector<2x6x6x8xf32>
    tpu.vector_store %arg19[%c0_568, %c0_569, %c0_570, %c0_571], %395 {strides = array<i32>} : memref<2x6x6x8xf32, #tpu.memory_space<vmem>>, vector<2x6x6x8xf32>,
    %c0_572 = arith.constant 0 : index
    %c1_573 = arith.constant 1 : index
    %c1_574 = arith.constant 1 : index
    %c0_575 = arith.constant 0 : index
    %397 = vector.load %arg19[%c0_572, %c1_573, %c1_574, %c0_575] : memref<2x6x6x8xf32, #tpu.memory_space<vmem>>, vector<2x4x4x8xf32>
    tpu.vector_store %arg19[%c0_572, %c1_573, %c1_574, %c0_575], %394 {strides = array<i32>} : memref<2x6x6x8xf32, #tpu.memory_space<vmem>>, vector<2x4x4x8xf32>,
    %cst_576 = arith.constant 0.000000e+00 : f32
    %398 = vector.broadcast %cst_576 : f32 to vector<32x3xf32>
    %c0_577 = arith.constant 0 : index
    %c0_578 = arith.constant 0 : index
    %c0_579 = arith.constant 0 : index
    %c0_580 = arith.constant 0 : index
    %399 = vector.load %arg19[%c0_577, %c0_578, %c0_579, %c0_580] : memref<2x6x6x8xf32, #tpu.memory_space<vmem>>, vector<2x4x4x8xf32>
    %400 = vector.shape_cast %399 : vector<2x4x4x8xf32> to vector<32x8xf32>
    %c0_581 = arith.constant 0 : index
    %c0_582 = arith.constant 0 : index
    %c0_583 = arith.constant 0 : index
    %c0_584 = arith.constant 0 : index
    %401 = vector.load %arg12[%c0_581, %c0_582, %c0_583, %c0_584] : memref<3x3x8x3xf32, #tpu.memory_space<vmem>>, vector<1x1x8x3xf32>
    %402 = vector.shape_cast %401 : vector<1x1x8x3xf32> to vector<8x3xf32>
    %cst_585 = arith.constant dense<0.000000e+00> : vector<32x3xf32>
    %403 = tpu.matmul %400, %402, %cst_585 {dimension_numbers = #tpu.dot_dimension_numbers<[1], [0], [0], [1], [0, 0, 1, 1], [], []>} : vector<32x8xf32>, vector<8x3xf32>, vector<32x3xf32> -> vector<32x3xf32>
    %404 = arith.addf %398, %403 : vector<32x3xf32>
    %c0_586 = arith.constant 0 : index
    %c0_587 = arith.constant 0 : index
    %c1_588 = arith.constant 1 : index
    %c0_589 = arith.constant 0 : index
    %405 = vector.load %arg19[%c0_586, %c0_587, %c1_588, %c0_589] : memref<2x6x6x8xf32, #tpu.memory_space<vmem>>, vector<2x4x4x8xf32>
    %406 = vector.shape_cast %405 : vector<2x4x4x8xf32> to vector<32x8xf32>
    %c0_590 = arith.constant 0 : index
    %c1_591 = arith.constant 1 : index
    %c0_592 = arith.constant 0 : index
    %c0_593 = arith.constant 0 : index
    %407 = vector.load %arg12[%c0_590, %c1_591, %c0_592, %c0_593] : memref<3x3x8x3xf32, #tpu.memory_space<vmem>>, vector<1x1x8x3xf32>
    %408 = vector.shape_cast %407 : vector<1x1x8x3xf32> to vector<8x3xf32>
    %cst_594 = arith.constant dense<0.000000e+00> : vector<32x3xf32>
    %409 = tpu.matmul %406, %408, %cst_594 {dimension_numbers = #tpu.dot_dimension_numbers<[1], [0], [0], [1], [0, 0, 1, 1], [], []>} : vector<32x8xf32>, vector<8x3xf32>, vector<32x3xf32> -> vector<32x3xf32>
    %410 = arith.addf %404, %409 : vector<32x3xf32>
    %c0_595 = arith.constant 0 : index
    %c0_596 = arith.constant 0 : index
    %c2_597 = arith.constant 2 : index
    %c0_598 = arith.constant 0 : index
    %411 = vector.load %arg19[%c0_595, %c0_596, %c2_597, %c0_598] : memref<2x6x6x8xf32, #tpu.memory_space<vmem>>, vector<2x4x4x8xf32>
    %412 = vector.shape_cast %411 : vector<2x4x4x8xf32> to vector<32x8xf32>
    %c0_599 = arith.constant 0 : index
    %c2_600 = arith.constant 2 : index
    %c0_601 = arith.constant 0 : index
    %c0_602 = arith.constant 0 : index
    %413 = vector.load %arg12[%c0_599, %c2_600, %c0_601, %c0_602] : memref<3x3x8x3xf32, #tpu.memory_space<vmem>>, vector<1x1x8x3xf32>
    %414 = vector.shape_cast %413 : vector<1x1x8x3xf32> to vector<8x3xf32>
    %cst_603 = arith.constant dense<0.000000e+00> : vector<32x3xf32>
    %415 = tpu.matmul %412, %414, %cst_603 {dimension_numbers = #tpu.dot_dimension_numbers<[1], [0], [0], [1], [0, 0, 1, 1], [], []>} : vector<32x8xf32>, vector<8x3xf32>, vector<32x3xf32> -> vector<32x3xf32>
    %416 = arith.addf %410, %415 : vector<32x3xf32>
    %c0_604 = arith.constant 0 : index
    %c1_605 = arith.constant 1 : index
    %c0_606 = arith.constant 0 : index
    %c0_607 = arith.constant 0 : index
    %417 = vector.load %arg19[%c0_604, %c1_605, %c0_606, %c0_607] : memref<2x6x6x8xf32, #tpu.memory_space<vmem>>, vector<2x4x4x8xf32>
    %418 = vector.shape_cast %417 : vector<2x4x4x8xf32> to vector<32x8xf32>
    %c1_608 = arith.constant 1 : index
    %c0_609 = arith.constant 0 : index
    %c0_610 = arith.constant 0 : index
    %c0_611 = arith.constant 0 : index
    %419 = vector.load %arg12[%c1_608, %c0_609, %c0_610, %c0_611] : memref<3x3x8x3xf32, #tpu.memory_space<vmem>>, vector<1x1x8x3xf32>
    %420 = vector.shape_cast %419 : vector<1x1x8x3xf32> to vector<8x3xf32>
    %cst_612 = arith.constant dense<0.000000e+00> : vector<32x3xf32>
    %421 = tpu.matmul %418, %420, %cst_612 {dimension_numbers = #tpu.dot_dimension_numbers<[1], [0], [0], [1], [0, 0, 1, 1], [], []>} : vector<32x8xf32>, vector<8x3xf32>, vector<32x3xf32> -> vector<32x3xf32>
    %422 = arith.addf %416, %421 : vector<32x3xf32>
    %c0_613 = arith.constant 0 : index
    %c1_614 = arith.constant 1 : index
    %c1_615 = arith.constant 1 : index
    %c0_616 = arith.constant 0 : index
    %423 = vector.load %arg19[%c0_613, %c1_614, %c1_615, %c0_616] : memref<2x6x6x8xf32, #tpu.memory_space<vmem>>, vector<2x4x4x8xf32>
    %424 = vector.shape_cast %423 : vector<2x4x4x8xf32> to vector<32x8xf32>
    %c1_617 = arith.constant 1 : index
    %c1_618 = arith.constant 1 : index
    %c0_619 = arith.constant 0 : index
    %c0_620 = arith.constant 0 : index
    %425 = vector.load %arg12[%c1_617, %c1_618, %c0_619, %c0_620] : memref<3x3x8x3xf32, #tpu.memory_space<vmem>>, vector<1x1x8x3xf32>
    %426 = vector.shape_cast %425 : vector<1x1x8x3xf32> to vector<8x3xf32>
    %cst_621 = arith.constant dense<0.000000e+00> : vector<32x3xf32>
    %427 = tpu.matmul %424, %426, %cst_621 {dimension_numbers = #tpu.dot_dimension_numbers<[1], [0], [0], [1], [0, 0, 1, 1], [], []>} : vector<32x8xf32>, vector<8x3xf32>, vector<32x3xf32> -> vector<32x3xf32>
    %428 = arith.addf %422, %427 : vector<32x3xf32>
    %c0_622 = arith.constant 0 : index
    %c1_623 = arith.constant 1 : index
    %c2_624 = arith.constant 2 : index
    %c0_625 = arith.constant 0 : index
    %429 = vector.load %arg19[%c0_622, %c1_623, %c2_624, %c0_625] : memref<2x6x6x8xf32, #tpu.memory_space<vmem>>, vector<2x4x4x8xf32>
    %430 = vector.shape_cast %429 : vector<2x4x4x8xf32> to vector<32x8xf32>
    %c1_626 = arith.constant 1 : index
    %c2_627 = arith.constant 2 : index
    %c0_628 = arith.constant 0 : index
    %c0_629 = arith.constant 0 : index
    %431 = vector.load %arg12[%c1_626, %c2_627, %c0_628, %c0_629] : memref<3x3x8x3xf32, #tpu.memory_space<vmem>>, vector<1x1x8x3xf32>
    %432 = vector.shape_cast %431 : vector<1x1x8x3xf32> to vector<8x3xf32>
    %cst_630 = arith.constant dense<0.000000e+00> : vector<32x3xf32>
    %433 = tpu.matmul %430, %432, %cst_630 {dimension_numbers = #tpu.dot_dimension_numbers<[1], [0], [0], [1], [0, 0, 1, 1], [], []>} : vector<32x8xf32>, vector<8x3xf32>, vector<32x3xf32> -> vector<32x3xf32>
    %434 = arith.addf %428, %433 : vector<32x3xf32>
    %c0_631 = arith.constant 0 : index
    %c2_632 = arith.constant 2 : index
    %c0_633 = arith.constant 0 : index
    %c0_634 = arith.constant 0 : index
    %435 = vector.load %arg19[%c0_631, %c2_632, %c0_633, %c0_634] : memref<2x6x6x8xf32, #tpu.memory_space<vmem>>, vector<2x4x4x8xf32>
    %436 = vector.shape_cast %435 : vector<2x4x4x8xf32> to vector<32x8xf32>
    %c2_635 = arith.constant 2 : index
    %c0_636 = arith.constant 0 : index
    %c0_637 = arith.constant 0 : index
    %c0_638 = arith.constant 0 : index
    %437 = vector.load %arg12[%c2_635, %c0_636, %c0_637, %c0_638] : memref<3x3x8x3xf32, #tpu.memory_space<vmem>>, vector<1x1x8x3xf32>
    %438 = vector.shape_cast %437 : vector<1x1x8x3xf32> to vector<8x3xf32>
    %cst_639 = arith.constant dense<0.000000e+00> : vector<32x3xf32>
    %439 = tpu.matmul %436, %438, %cst_639 {dimension_numbers = #tpu.dot_dimension_numbers<[1], [0], [0], [1], [0, 0, 1, 1], [], []>} : vector<32x8xf32>, vector<8x3xf32>, vector<32x3xf32> -> vector<32x3xf32>
    %440 = arith.addf %434, %439 : vector<32x3xf32>
    %c0_640 = arith.constant 0 : index
    %c2_641 = arith.constant 2 : index
    %c1_642 = arith.constant 1 : index
    %c0_643 = arith.constant 0 : index
    %441 = vector.load %arg19[%c0_640, %c2_641, %c1_642, %c0_643] : memref<2x6x6x8xf32, #tpu.memory_space<vmem>>, vector<2x4x4x8xf32>
    %442 = vector.shape_cast %441 : vector<2x4x4x8xf32> to vector<32x8xf32>
    %c2_644 = arith.constant 2 : index
    %c1_645 = arith.constant 1 : index
    %c0_646 = arith.constant 0 : index
    %c0_647 = arith.constant 0 : index
    %443 = vector.load %arg12[%c2_644, %c1_645, %c0_646, %c0_647] : memref<3x3x8x3xf32, #tpu.memory_space<vmem>>, vector<1x1x8x3xf32>
    %444 = vector.shape_cast %443 : vector<1x1x8x3xf32> to vector<8x3xf32>
    %cst_648 = arith.constant dense<0.000000e+00> : vector<32x3xf32>
    %445 = tpu.matmul %442, %444, %cst_648 {dimension_numbers = #tpu.dot_dimension_numbers<[1], [0], [0], [1], [0, 0, 1, 1], [], []>} : vector<32x8xf32>, vector<8x3xf32>, vector<32x3xf32> -> vector<32x3xf32>
    %446 = arith.addf %440, %445 : vector<32x3xf32>
    %c0_649 = arith.constant 0 : index
    %c2_650 = arith.constant 2 : index
    %c2_651 = arith.constant 2 : index
    %c0_652 = arith.constant 0 : index
    %447 = vector.load %arg19[%c0_649, %c2_650, %c2_651, %c0_652] : memref<2x6x6x8xf32, #tpu.memory_space<vmem>>, vector<2x4x4x8xf32>
    %448 = vector.shape_cast %447 : vector<2x4x4x8xf32> to vector<32x8xf32>
    %c2_653 = arith.constant 2 : index
    %c2_654 = arith.constant 2 : index
    %c0_655 = arith.constant 0 : index
    %c0_656 = arith.constant 0 : index
    %449 = vector.load %arg12[%c2_653, %c2_654, %c0_655, %c0_656] : memref<3x3x8x3xf32, #tpu.memory_space<vmem>>, vector<1x1x8x3xf32>
    %450 = vector.shape_cast %449 : vector<1x1x8x3xf32> to vector<8x3xf32>
    %cst_657 = arith.constant dense<0.000000e+00> : vector<32x3xf32>
    %451 = tpu.matmul %448, %450, %cst_657 {dimension_numbers = #tpu.dot_dimension_numbers<[1], [0], [0], [1], [0, 0, 1, 1], [], []>} : vector<32x8xf32>, vector<8x3xf32>, vector<32x3xf32> -> vector<32x3xf32>
    %452 = arith.addf %446, %451 : vector<32x3xf32>
    %c0_658 = arith.constant 0 : index
    %c0_659 = arith.constant 0 : index
    %453 = vector.load %arg13[%c0_658, %c0_659] : memref<1x3xf32, #tpu.memory_space<vmem>>, vector<1x3xf32>
    %454 = vector.broadcast %453 : vector<1x3xf32> to vector<32x3xf32>
    %455 = arith.addf %452, %454 : vector<32x3xf32>
    %456 = vector.shape_cast %455 : vector<32x3xf32> to vector<2x4x4x3xf32>
    %c0_660 = arith.constant 0 : index
    %c0_661 = arith.constant 0 : index
    %c0_662 = arith.constant 0 : index
    %c0_663 = arith.constant 0 : index
    %457 = vector.load %arg15[%c0_660, %c0_661, %c0_662, %c0_663] : memref<2x4x4x3xf32, #tpu.memory_space<vmem>>, vector<2x4x4x3xf32>
    tpu.vector_store %arg15[%c0_660, %c0_661, %c0_662, %c0_663], %456 {strides = array<i32>} : memref<2x4x4x3xf32, #tpu.memory_space<vmem>>, vector<2x4x4x3xf32>,
    return
  }
  func.func @transform_0(%arg0: i32, %arg1: memref<4xi32, #tpu.memory_space<smem>>, %arg2: memref<4xi32, #tpu.memory_space<smem>>) -> (i32, i32, i32, i32) {
    %c0_i32 = arith.constant 0 : i32
    %c0_i32_0 = arith.constant 0 : i32
    %c0_i32_1 = arith.constant 0 : i32
    %c0_i32_2 = arith.constant 0 : i32
    %c0_i32_3 = arith.constant 0 : i32
    return %c0_i32, %c0_i32_0, %c0_i32_1, %c0_i32_2 : i32, i32, i32, i32
  }
  func.func @transform_1(%arg0: i32, %arg1: memref<4xi32, #tpu.memory_space<smem>>, %arg2: memref<4xi32, #tpu.memory_space<smem>>) -> (i32, i32, i32, i32) {
    %c0_i32 = arith.constant 0 : i32
    %c0_i32_0 = arith.constant 0 : i32
    %c0_i32_1 = arith.constant 0 : i32
    %c0_i32_2 = arith.constant 0 : i32
    %c0_i32_3 = arith.constant 0 : i32
    return %c0_i32, %c0_i32_0, %c0_i32_1, %c0_i32_2 : i32, i32, i32, i32
  }
  func.func @transform_2(%arg0: i32, %arg1: memref<4xi32, #tpu.memory_space<smem>>, %arg2: memref<4xi32, #tpu.memory_space<smem>>) -> (i32, i32) {
    %c0_i32 = arith.constant 0 : i32
    %c0_i32_0 = arith.constant 0 : i32
    %c0_i32_1 = arith.constant 0 : i32
    return %c0_i32, %c0_i32_0 : i32, i32
  }
  func.func @transform_3(%arg0: i32, %arg1: memref<4xi32, #tpu.memory_space<smem>>, %arg2: memref<4xi32, #tpu.memory_space<smem>>) -> (i32, i32, i32, i32) {
    %c0_i32 = arith.constant 0 : i32
    %c0_i32_0 = arith.constant 0 : i32
    %c0_i32_1 = arith.constant 0 : i32
    %c0_i32_2 = arith.constant 0 : i32
    %c0_i32_3 = arith.constant 0 : i32
    return %c0_i32, %c0_i32_0, %c0_i32_1, %c0_i32_2 : i32, i32, i32, i32
  }
  func.func @transform_4(%arg0: i32, %arg1: memref<4xi32, #tpu.memory_space<smem>>, %arg2: memref<4xi32, #tpu.memory_space<smem>>) -> (i32, i32) {
    %c0_i32 = arith.constant 0 : i32
    %c0_i32_0 = arith.constant 0 : i32
    %c0_i32_1 = arith.constant 0 : i32
    return %c0_i32, %c0_i32_0 : i32, i32
  }
  func.func @transform_5(%arg0: i32, %arg1: memref<4xi32, #tpu.memory_space<smem>>, %arg2: memref<4xi32, #tpu.memory_space<smem>>) -> (i32, i32, i32, i32) {
    %c0_i32 = arith.constant 0 : i32
    %c0_i32_0 = arith.constant 0 : i32
    %c0_i32_1 = arith.constant 0 : i32
    %c0_i32_2 = arith.constant 0 : i32
    %c0_i32_3 = arith.constant 0 : i32
    return %c0_i32, %c0_i32_0, %c0_i32_1, %c0_i32_2 : i32, i32, i32, i32
  }
  func.func @transform_6(%arg0: i32, %arg1: memref<4xi32, #tpu.memory_space<smem>>, %arg2: memref<4xi32, #tpu.memory_space<smem>>) -> (i32, i32) {
    %c0_i32 = arith.constant 0 : i32
    %c0_i32_0 = arith.constant 0 : i32
    %c0_i32_1 = arith.constant 0 : i32
    return %c0_i32, %c0_i32_0 : i32, i32
  }
  func.func @transform_7(%arg0: i32, %arg1: memref<4xi32, #tpu.memory_space<smem>>, %arg2: memref<4xi32, #tpu.memory_space<smem>>) -> (i32, i32, i32, i32) {
    %c0_i32 = arith.constant 0 : i32
    %c0_i32_0 = arith.constant 0 : i32
    %c0_i32_1 = arith.constant 0 : i32
    %c0_i32_2 = arith.constant 0 : i32
    %c0_i32_3 = arith.constant 0 : i32
    return %c0_i32, %c0_i32_0, %c0_i32_1, %c0_i32_2 : i32, i32, i32, i32
  }
  func.func @transform_8(%arg0: i32, %arg1: memref<4xi32, #tpu.memory_space<smem>>, %arg2: memref<4xi32, #tpu.memory_space<smem>>) -> (i32, i32) {
    %c0_i32 = arith.constant 0 : i32
    %c0_i32_0 = arith.constant 0 : i32
    %c0_i32_1 = arith.constant 0 : i32
    return %c0_i32, %c0_i32_0 : i32, i32
  }
  func.func @transform_9(%arg0: i32, %arg1: memref<4xi32, #tpu.memory_space<smem>>, %arg2: memref<4xi32, #tpu.memory_space<smem>>) -> (i32, i32, i32, i32) {
    %c0_i32 = arith.constant 0 : i32
    %c0_i32_0 = arith.constant 0 : i32
    %c0_i32_1 = arith.constant 0 : i32
    %c0_i32_2 = arith.constant 0 : i32
    %c0_i32_3 = arith.constant 0 : i32
    return %c0_i32, %c0_i32_0, %c0_i32_1, %c0_i32_2 : i32, i32, i32, i32
  }
  func.func @transform_10(%arg0: i32, %arg1: memref<4xi32, #tpu.memory_space<smem>>, %arg2: memref<4xi32, #tpu.memory_space<smem>>) -> (i32, i32) {
    %c0_i32 = arith.constant 0 : i32
    %c0_i32_0 = arith.constant 0 : i32
    %c0_i32_1 = arith.constant 0 : i32
    return %c0_i32, %c0_i32_0 : i32, i32
  }
  func.func @transform_11(%arg0: i32, %arg1: memref<4xi32, #tpu.memory_space<smem>>, %arg2: memref<4xi32, #tpu.memory_space<smem>>) -> (i32, i32, i32, i32) {
    %c0_i32 = arith.constant 0 : i32
    %c0_i32_0 = arith.constant 0 : i32
    %c0_i32_1 = arith.constant 0 : i32
    %c0_i32_2 = arith.constant 0 : i32
    %c0_i32_3 = arith.constant 0 : i32
    return %c0_i32, %c0_i32_0, %c0_i32_1, %c0_i32_2 : i32, i32, i32, i32
  }
  func.func @transform_12(%arg0: i32, %arg1: memref<4xi32, #tpu.memory_space<smem>>, %arg2: memref<4xi32, #tpu.memory_space<smem>>) -> (i32, i32, i32, i32) {
    %c0_i32 = arith.constant 0 : i32
    %c0_i32_0 = arith.constant 0 : i32
    %c0_i32_1 = arith.constant 0 : i32
    %c0_i32_2 = arith.constant 0 : i32
    %c0_i32_3 = arith.constant 0 : i32
    return %c0_i32, %c0_i32_0, %c0_i32_1, %c0_i32_2 : i32, i32, i32, i32
  }
}

</mosaic_0001>

<bundles_post_ra>
// kernel: encoder_recovery_forward.1
= control target key start
LH: loop header
LB: loop body
LE: loop exit
PB: predicated region body
PF: predicated region fallthrough
CT: control target
= control target key end

     0   :  { %s31016_s0 = inlined_call_operand.vmem [shape: s32[4], index: 0, kind: input, shape index: {}]   ;;  %s31017_s2 = inlined_call_operand.vmem [shape: f32[2,16,16,3], index: 2, kind: input, shape index: {}]   ;;  %s31018_s3 = inlined_call_operand.vmem [shape: f32[3,3,3,8], index: 3, kind: input, shape index: {}]   ;;  %s31019_s4 = inlined_call_operand.vmem [shape: f32[1,8], index: 4, kind: input, shape index: {}]   ;;  %s31020_s5 = inlined_call_operand.vmem [shape: f32[3,3,8,8], index: 5, kind: input, shape index: {}]   ;;  %s31021_s6 = inlined_call_operand.vmem [shape: f32[1,8], index: 6, kind: input, shape index: {}]   ;;  %s31022_s7 = inlined_call_operand.vmem [shape: f32[1,1,8,3], index: 7, kind: input, shape index: {}]   ;;  %s31023_s8 = inlined_call_operand.vmem [shape: f32[1,3], index: 8, kind: input, shape index: {}]   ;;  %s31024_s9 = inlined_call_operand.vmem [shape: f32[3,3,12,8], index: 9, kind: input, shape index: {}]   ;;  %s31025_s10 = inlined_call_operand.vmem [shape: f32[1,8], index: 10, kind: input, shape index: {}]   ;;  %s31026_s11 = inlined_call_operand.vmem [shape: f32[3,3,8,3], index: 11, kind: input, shape index: {}]   ;;  %s31027_s12 = inlined_call_operand.vmem [shape: f32[1,3], index: 12, kind: input, shape index: {}]   ;;  %s31028_s13 = inlined_call_operand.vmem [shape: f32[2,16,16,3], index: 13, kind: output, shape index: {0}]   ;;  %s31029_s14 = inlined_call_operand.vmem [shape: f32[2,4,4,3], index: 14, kind: output, shape index: {1}]   ;;  %s31030_s1 = inlined_call_operand.vmem [shape: s32[4], index: 1, kind: input, shape index: {}]  }
   0x1   :  { %s20_s15 = sshll.u32 %s31016_s0, 4  ;;  %s24_s18 = sshll.u32 %s31030_s1, 4  ;;  %s21_s15 = int_to_ptr.vmem [resolvable:$true] %s20_s15  ;;  %s25_s18 = int_to_ptr.vmem [resolvable:$true] %s24_s18 }
   0x2   :  { %s26147_s19 = scalar_lea.vmem %s21_s15, 16  ;;  %p26152_p1 = scmp.lt.s32.totalorder %s21_s15, %s21_s15 }
   0x3   :  { %p26148_p0 = scmp.ne.s32.totalorder %s21_s15, %s26147_s19  ;;  %p26153_p2 = scmp.lt.s32.totalorder %s26147_s19, %s26147_s19 }
   0x5   :  { %p26154_p3 = por %p26153_p2, %p26152_p1 }
   0x7   :  { %p26155_p4 = pnand %p26154_p3, %p26148_p0 }
   0x9   :  { %26158 = shalt.err (!%p26155_p4)  }
   0xa   :  { %s26173_s20 = smov [#allocation7]   ;;  %s26159_s21 = scalar_lea.vmem %s25_s18, 16 }
   0xb   :  { %23 = dma.vmem_to_smem %s21_s15, 16, %s26173_s20, [#allocation6] }
   0xc   :  { %p26160_p5 = scmp.ne.s32.totalorder %s25_s18, %s26159_s21  ;;  %p26164_p6 = scmp.lt.s32.totalorder %s25_s18, %s25_s18 }
   0xd   :  { %p26165_p7 = scmp.lt.s32.totalorder %s26159_s21, %s26159_s21 }
   0xf   :  { %p26166_p8 = por %p26165_p7, %p26164_p6 }
  0x11   :  { %p26167_p9 = pnand %p26166_p8, %p26160_p5 }
  0x13   :  { %26170 = shalt.err (!%p26167_p9)  }
  0x14   :  { %s26174_s0 = smov [#allocation8]  }
  0x15   :  { %27 = dma.vmem_to_smem %s25_s18, 16, %s26174_s0, [#allocation6] }
  0x16   :  { %26171 = dma.done.wait [#allocation6], 32 }
  0x17   :  { %26172 = vsyncadd [#allocation6], 4294967264 }
  0x18   :  { %29 = sfence }
  0x19   :  { %v26260_v0 = vld [vmem:[%s31018_s3 + $0x4] sm:$0x7]  ;;  %vm614_vm0 = vcmask 1042432   ;;  %vm116_vm1 = vcmask 23552   ;;  %vm119_vm2 = vcmask 17408   ;;  %v31031_v1 = vmov 0.0  }
  0x1a   :  { %22544 = vmatprep.subr.msk.mxu0 %vm614_vm0, %v26260_v0  ;;  %117 = vst.msk [vmem:[#allocation2] sm:$0xff] %vm116_vm1, %v31031_v1  ;;  %118 = vst.msk [vmem:[#allocation2 + $0x8] sm:$0xff] %vm116_vm1, %v31031_v1  ;;  %v26411_v2 = vld [vmem:[%s31018_s3] sm:$0x7]  ;;  %v53_v4 = vld [vmem:[%s31017_s2 + $0x8] sm:$0xff]  ;;  %vm6689_vm3 = vcmask 64512  }
  0x1b   :  { %121 = vst.msk [vmem:[#allocation2 + $0x18] sm:$0xff] %vm116_vm1, %v31031_v1  ;;  %122 = vst.msk [vmem:[#allocation2 + $0x20] sm:$0xff] %vm116_vm1, %v31031_v1  ;;  %v52_v3 = vld [vmem:[%s31017_s2] sm:$0xff]  ;;  %22545 = vmatpush3.msk.msra.mxu0 %vm614_vm0, %v26260_v0  ;;  %v54_v5 = vld [vmem:[%s31017_s2 + $0x10] sm:$0xff]  ;;  %vm6692_vm4 = vcmask 58368   ;;  %vm13883_vm5 = vcmask 21504  }
  0x1c   :  { %124 = vst.msk [vmem:[#allocation2 + $0x30] sm:$0xff] %vm116_vm1, %v31031_v1  ;;  %125 = vst.msk [vmem:[#allocation2 + $0x38] sm:$0xff] %vm116_vm1, %v31031_v1  ;;  %v55_v6 = vld [vmem:[%s31017_s2 + $0x18] sm:$0xff]  ;;  %v56_v7 = vld [vmem:[%s31017_s2 + $0x20] sm:$0xff]  ;;  %22642 = vmatprep.subr.msk.mxu0 %vm614_vm0, %v26411_v2  ;;  %s13932_s1 = sld [smem:[#allocation7]]  ;;  %s20807_s22 = sld [smem:[#allocation7 + $0x1]] }
  0x1d   :  { %127 = vst.msk [vmem:[#allocation2 + $0x48] sm:$0xff] %vm116_vm1, %v31031_v1  ;;  %128 = vst.msk [vmem:[#allocation2 + $0x50] sm:$0xff] %vm116_vm1, %v31031_v1  ;;  %v57_v8 = vld [vmem:[%s31017_s2 + $0x28] sm:$0xff]  ;;  %v58_v9 = vld [vmem:[%s31017_s2 + $0x30] sm:$0xff]  ;;  %s20809_s23 = sld [smem:[#allocation8 + $0x1]]  ;;  %s20814_s27 = sld [smem:[#allocation8 + $0x2]] }
  0x1e   :  { %130 = vst.msk [vmem:[#allocation2 + $0x60] sm:$0xff] %vm116_vm1, %v31031_v1  ;;  %131 = vst.msk [vmem:[#allocation2 + $0x68] sm:$0xff] %vm116_vm1, %v31031_v1  ;;  %v59_v10 = vld [vmem:[%s31017_s2 + $0x38] sm:$0xff]  ;;  %v60_v11 = vld [vmem:[%s31017_s2 + $0x40] sm:$0xff]  ;;  %vm13948_vm6 = vcmask 19456   ;;  %s20819_s26 = sld [smem:[#allocation8 + $0x3]] }
  0x1f   :  { %133 = vst.msk [vmem:[#allocation2 + $0x78] sm:$0xff] %vm116_vm1, %v31031_v1  ;;  %134 = vst.msk [vmem:[#allocation2 + $0x80] sm:$0xff] %vm116_vm1, %v31031_v1  ;;  %v61_v12 = vld [vmem:[%s31017_s2 + $0x48] sm:$0xff]  ;;  %v62_v13 = vld [vmem:[%s31017_s2 + $0x50] sm:$0xff]  ;;  %vm18419_vm7 = vcmask 62464   ;;  %vm18433_vm8 = vcmask 60416  }
  0x20   :  { %136 = vst.msk [vmem:[#allocation2 + $0x90] sm:$0xff] %vm116_vm1, %v31031_v1  ;;  %137 = vst.msk [vmem:[#allocation2 + $0x98] sm:$0xff] %vm116_vm1, %v31031_v1  ;;  %v63_v14 = vld [vmem:[%s31017_s2 + $0x58] sm:$0xff]  ;;  %v64_v15 = vld [vmem:[%s31017_s2 + $0x60] sm:$0xff] }
  0x21   :  { %139 = vst.msk [vmem:[#allocation2 + $0xa8] sm:$0xff] %vm116_vm1, %v31031_v1  ;;  %140 = vst.msk [vmem:[#allocation2 + $0xb0] sm:$0xff] %vm116_vm1, %v31031_v1  ;;  %v65_v16 = vld [vmem:[%s31017_s2 + $0x68] sm:$0xff]  ;;  %v66_v17 = vld [vmem:[%s31017_s2 + $0x70] sm:$0xff] }
  0x22   :  { %142 = vst.msk [vmem:[#allocation2 + $0xc0] sm:$0xff] %vm116_vm1, %v31031_v1  ;;  %143 = vst.msk [vmem:[#allocation2 + $0xc8] sm:$0xff] %vm116_vm1, %v31031_v1  ;;  %v67_v18 = vld [vmem:[%s31017_s2 + $0x78] sm:$0xff]  ;;  %v68_v19 = vld [vmem:[%s31017_s2 + $0x80] sm:$0xff]  ;;  %s21080_s15 = sshll.u32 %s13932_s1, 6  ;;  %s21081_s18 = sshll.u32 %s20807_s22, 6 }
  0x23   :  { %145 = vst.msk [vmem:[#allocation2 + $0xd8] sm:$0xff] %vm116_vm1, %v31031_v1  ;;  %146 = vst.msk [vmem:[#allocation2 + $0xe0] sm:$0xff] %vm116_vm1, %v31031_v1  ;;  %v69_v20 = vld [vmem:[%s31017_s2 + $0x88] sm:$0xff]  ;;  %v70_v21 = vld [vmem:[%s31017_s2 + $0x90] sm:$0xff]  ;;  %s20810_s17 = sshll.u32 %s20809_s23, 2 }
  0x24   :  { %148 = vst.msk [vmem:[#allocation2 + $0xf0] sm:$0xff] %vm116_vm1, %v31031_v1  ;;  %149 = vst.msk [vmem:[#allocation2 + $0xf8] sm:$0xff] %vm116_vm1, %v31031_v1  ;;  %v71_v22 = vld [vmem:[%s31017_s2 + $0x98] sm:$0xff]  ;;  %v356_v23 = vld [vmem:[#allocation2 + $0x1] sm:$0xff]  ;;  %s13962_s0 = sadd.s32 %s21081_s18, %s20810_s17  ;;  %s20820_s28 = sshll.u32 %s20819_s26, 2 }
  0x25   :  { %151 = vst.msk [vmem:[#allocation2 + $0x108] sm:$0xff] %vm116_vm1, %v31031_v1  ;;  %152 = vst.msk [vmem:[#allocation2 + $0x110] sm:$0xff] %vm116_vm1, %v31031_v1  ;;  %v72_v25 = vld [vmem:[%s31017_s2 + $0xa0] sm:$0xff]  ;;  %22546 = vmatprep.mubr.msk.f32.mxu0 %vm116_vm1, %v356_v23  ;;  %v73_v27 = vld [vmem:[%s31017_s2 + $0xa8] sm:$0xff]  ;;  %s30518_s25 = scalar_lea.vmem %s31028_s13, %s13962_s0 }
  0x26   :  { %154 = vst.msk [vmem:[#allocation2 + $0x120] sm:$0xff] %vm116_vm1, %v31031_v1  ;;  %155 = vst.msk [vmem:[#allocation2 + $0x128] sm:$0xff] %vm116_vm1, %v31031_v1  ;;  %v74_v32 = vld [vmem:[%s31017_s2 + $0xb0] sm:$0xff]  ;;  %v75_v33 = vld [vmem:[%s31017_s2 + $0xb8] sm:$0xff] }
  0x27   :  { %157 = vst.msk [vmem:[#allocation2 + $0x138] sm:$0xff] %vm116_vm1, %v31031_v1  ;;  %158 = vst.msk [vmem:[#allocation2 + $0x140] sm:$0xff] %vm116_vm1, %v31031_v1  ;;  %v76_v34 = vld [vmem:[%s31017_s2 + $0xc0] sm:$0xff]  ;;  %v77_v35 = vld [vmem:[%s31017_s2 + $0xc8] sm:$0xff] }
  0x28   :  { %160 = vst.msk [vmem:[#allocation2 + $0x150] sm:$0xff] %vm116_vm1, %v31031_v1  ;;  %161 = vst.msk [vmem:[#allocation2 + $0x158] sm:$0xff] %vm116_vm1, %v31031_v1  ;;  %v78_v36 = vld [vmem:[%s31017_s2 + $0xd0] sm:$0xff]  ;;  %v79_v37 = vld [vmem:[%s31017_s2 + $0xd8] sm:$0xff] }
  0x29   :  { %163 = vst.msk [vmem:[#allocation2 + $0x168] sm:$0xff] %vm116_vm1, %v31031_v1  ;;  %164 = vst.msk [vmem:[#allocation2 + $0x170] sm:$0xff] %vm116_vm1, %v31031_v1  ;;  %v80_v38 = vld [vmem:[%s31017_s2 + $0xe0] sm:$0xff]  ;;  %v81_v41 = vld [vmem:[%s31017_s2 + $0xe8] sm:$0xff] }
  0x2a   :  { %166 = vst.msk [vmem:[#allocation2 + $0x180] sm:$0xff] %vm116_vm1, %v31031_v1  ;;  %167 = vst.msk [vmem:[#allocation2 + $0x188] sm:$0xff] %vm116_vm1, %v31031_v1  ;;  %v84_v42 = vld [vmem:[%s31017_s2 + $0x100] sm:$0xff]  ;;  %v85_v43 = vld [vmem:[%s31017_s2 + $0x108] sm:$0xff] }
  0x2b   :  { %169 = vst.msk [vmem:[#allocation2 + $0x198] sm:$0xff] %vm116_vm1, %v31031_v1  ;;  %170 = vst.msk [vmem:[#allocation2 + $0x1a0] sm:$0xff] %vm116_vm1, %v31031_v1  ;;  %v86_v44 = vld [vmem:[%s31017_s2 + $0x110] sm:$0xff]  ;;  %v87_v46 = vld [vmem:[%s31017_s2 + $0x118] sm:$0xff] }
  0x2c   :  { %172 = vst.msk [vmem:[#allocation2 + $0x1b0] sm:$0xff] %vm116_vm1, %v31031_v1  ;;  %173 = vst.msk [vmem:[#allocation2 + $0x1b8] sm:$0xff] %vm116_vm1, %v31031_v1  ;;  %v88_v47 = vld [vmem:[%s31017_s2 + $0x120] sm:$0xff]  ;;  %v89_v48 = vld [vmem:[%s31017_s2 + $0x128] sm:$0xff] }
  0x2d   :  { %175 = vst.msk [vmem:[#allocation2 + $0x1c8] sm:$0xff] %vm116_vm1, %v31031_v1  ;;  %176 = vst.msk [vmem:[#allocation2 + $0x1d0] sm:$0xff] %vm116_vm1, %v31031_v1  ;;  %v90_v49 = vld [vmem:[%s31017_s2 + $0x130] sm:$0xff]  ;;  %v91_v50 = vld [vmem:[%s31017_s2 + $0x138] sm:$0xff] }
  0x2e   :  { %178 = vst.msk [vmem:[#allocation2 + $0x1e0] sm:$0xff] %vm116_vm1, %v31031_v1  ;;  %179 = vst.msk [vmem:[#allocation2 + $0x1e8] sm:$0xff] %vm116_vm1, %v31031_v1  ;;  %v92_v51 = vld [vmem:[%s31017_s2 + $0x140] sm:$0xff]  ;;  %v93_v52 = vld [vmem:[%s31017_s2 + $0x148] sm:$0xff] }
  0x2f   :  { %181 = vst.msk [vmem:[#allocation2 + $0x1f8] sm:$0xff] %vm116_vm1, %v31031_v1  ;;  %182 = vst.msk [vmem:[#allocation2 + $0x200] sm:$0xff] %vm116_vm1, %v31031_v1  ;;  %v94_v53 = vld [vmem:[%s31017_s2 + $0x150] sm:$0xff]  ;;  %v95_v54 = vld [vmem:[%s31017_s2 + $0x158] sm:$0xff] }
  0x30   :  { %184 = vst.msk [vmem:[#allocation2 + $0x210] sm:$0xff] %vm116_vm1, %v31031_v1  ;;  %185 = vst.msk [vmem:[#allocation2 + $0x218] sm:$0xff] %vm116_vm1, %v31031_v1  ;;  %v96_v56 = vld [vmem:[%s31017_s2 + $0x160] sm:$0xff]  ;;  %v97_v57 = vld [vmem:[%s31017_s2 + $0x168] sm:$0xff] }
  0x31   :  { %187 = vst.msk [vmem:[#allocation2 + $0x228] sm:$0xff] %vm116_vm1, %v31031_v1  ;;  %188 = vst.msk [vmem:[#allocation2 + $0x230] sm:$0xff] %vm116_vm1, %v31031_v1  ;;  %v98_v59 = vld [vmem:[%s31017_s2 + $0x170] sm:$0xff]  ;;  %v99_v60 = vld [vmem:[%s31017_s2 + $0x178] sm:$0xff] }
  0x32   :  { %190 = vst.msk [vmem:[#allocation2 + $0x240] sm:$0xff] %vm116_vm1, %v31031_v1  ;;  %191 = vst.msk [vmem:[#allocation2 + $0x248] sm:$0xff] %vm116_vm1, %v31031_v1  ;;  %v100_v0 = vld [vmem:[%s31017_s2 + $0x180] sm:$0xff] }
  0x33   :  { %193 = vst.msk [vmem:[#allocation2 + $0x258] sm:$0xff] %vm116_vm1, %v31031_v1  ;;  %194 = vst.msk [vmem:[#allocation2 + $0x260] sm:$0xff] %vm116_vm1, %v31031_v1 }
  0x34   :  { %196 = vst.msk [vmem:[#allocation2 + $0x270] sm:$0xff] %vm116_vm1, %v31031_v1  ;;  %197 = vst.msk [vmem:[#allocation2 + $0x278] sm:$0xff] %vm116_vm1, %v31031_v1 }
  0x35   :  { %199 = vst.msk [vmem:[#allocation2 + $0x288] sm:$0xff] %vm116_vm1, %v31031_v1  ;;  %200 = vst.msk [vmem:[#allocation2 + $0x290] sm:$0xff] %vm116_vm1, %v31031_v1 }
  0x36   :  { %202 = vst.msk [vmem:[#allocation2 + $0x2a0] sm:$0xff] %vm116_vm1, %v31031_v1  ;;  %203 = vst.msk [vmem:[#allocation2 + $0x2a8] sm:$0xff] %vm116_vm1, %v31031_v1 }
  0x37   :  { %205 = vst.msk [vmem:[#allocation2 + $0x2b8] sm:$0xff] %vm116_vm1, %v31031_v1  ;;  %206 = vst.msk [vmem:[#allocation2 + $0x2c0] sm:$0xff] %vm116_vm1, %v31031_v1 }
  0x38   :  { %208 = vst.msk [vmem:[#allocation2 + $0x2d0] sm:$0xff] %vm116_vm1, %v31031_v1  ;;  %209 = vst.msk [vmem:[#allocation2 + $0x2d8] sm:$0xff] %vm116_vm1, %v31031_v1 }
  0x39   :  { %211 = vst.msk [vmem:[#allocation2 + $0x2e8] sm:$0xff] %vm116_vm1, %v31031_v1  ;;  %212 = vst.msk [vmem:[#allocation2 + $0x2f0] sm:$0xff] %vm116_vm1, %v31031_v1 }
  0x3a   :  { %214 = vst.msk [vmem:[#allocation2 + $0x300] sm:$0xff] %vm116_vm1, %v31031_v1  ;;  %215 = vst.msk [vmem:[#allocation2 + $0x308] sm:$0xff] %vm116_vm1, %v31031_v1 }
  0x3b   :  { %217 = vst.msk [vmem:[#allocation2 + $0x318] sm:$0xff] %vm116_vm1, %v31031_v1  ;;  %218 = vst.msk [vmem:[#allocation2 + $0x320] sm:$0xff] %vm116_vm1, %v31031_v1 }
  0x3c   :  { %220 = vst.msk [vmem:[#allocation2 + $0x330] sm:$0xff] %vm116_vm1, %v31031_v1  ;;  %221 = vst.msk [vmem:[#allocation2 + $0x338] sm:$0xff] %vm116_vm1, %v31031_v1 }
  0x3d   :  { %223 = vst.msk [vmem:[#allocation2 + $0x348] sm:$0xff] %vm116_vm1, %v31031_v1  ;;  %224 = vst.msk [vmem:[#allocation2 + $0x350] sm:$0xff] %vm116_vm1, %v31031_v1 }
  0x3e   :  { %120 = vst.msk [vmem:[#allocation2 + $0x10] sm:$0x3] %vm119_vm2, %v31031_v1  ;;  %123 = vst.msk [vmem:[#allocation2 + $0x28] sm:$0x3] %vm119_vm2, %v31031_v1 }
  0x3f   :  { %126 = vst.msk [vmem:[#allocation2 + $0x40] sm:$0x3] %vm119_vm2, %v31031_v1  ;;  %129 = vst.msk [vmem:[#allocation2 + $0x58] sm:$0x3] %vm119_vm2, %v31031_v1 }
  0x40   :  { %132 = vst.msk [vmem:[#allocation2 + $0x70] sm:$0x3] %vm119_vm2, %v31031_v1  ;;  %135 = vst.msk [vmem:[#allocation2 + $0x88] sm:$0x3] %vm119_vm2, %v31031_v1 }
  0x41   :  { %138 = vst.msk [vmem:[#allocation2 + $0xa0] sm:$0x3] %vm119_vm2, %v31031_v1  ;;  %141 = vst.msk [vmem:[#allocation2 + $0xb8] sm:$0x3] %vm119_vm2, %v31031_v1 }
  0x42   :  { %144 = vst.msk [vmem:[#allocation2 + $0xd0] sm:$0x3] %vm119_vm2, %v31031_v1  ;;  %147 = vst.msk [vmem:[#allocation2 + $0xe8] sm:$0x3] %vm119_vm2, %v31031_v1 }
  0x43   :  { %150 = vst.msk [vmem:[#allocation2 + $0x100] sm:$0x3] %vm119_vm2, %v31031_v1  ;;  %153 = vst.msk [vmem:[#allocation2 + $0x118] sm:$0x3] %vm119_vm2, %v31031_v1 }
  0x44   :  { %156 = vst.msk [vmem:[#allocation2 + $0x130] sm:$0x3] %vm119_vm2, %v31031_v1  ;;  %159 = vst.msk [vmem:[#allocation2 + $0x148] sm:$0x3] %vm119_vm2, %v31031_v1 }
  0x45   :  { %162 = vst.msk [vmem:[#allocation2 + $0x160] sm:$0x3] %vm119_vm2, %v31031_v1  ;;  %165 = vst.msk [vmem:[#allocation2 + $0x178] sm:$0x3] %vm119_vm2, %v31031_v1  ;;  %v357_v24 = vld [vmem:[#allocation2 + $0x9] sm:$0xff] }
  0x46   :  { %168 = vst.msk [vmem:[#allocation2 + $0x190] sm:$0x3] %vm119_vm2, %v31031_v1  ;;  %171 = vst.msk [vmem:[#allocation2 + $0x1a8] sm:$0x3] %vm119_vm2, %v31031_v1  ;;  %22547 = vmatmul.mubr.msk.f32.vlgmr.msra.gmra.mrb[0].mxu0 %vm116_vm1, %v357_v24 }
  0x47   :  { %174 = vst.msk [vmem:[#allocation2 + $0x1c0] sm:$0x3] %vm119_vm2, %v31031_v1  ;;  %177 = vst.msk [vmem:[#allocation2 + $0x1d8] sm:$0x3] %vm119_vm2, %v31031_v1  ;;  %22643 = vmatpush3.msk.msra.mxu0 %vm614_vm0, %v26411_v2  ;;  %v101_v2 = vld [vmem:[%s31017_s2 + $0x188] sm:$0xff] }
  0x48   :  { %180 = vst.msk [vmem:[#allocation2 + $0x1f0] sm:$0x3] %vm119_vm2, %v31031_v1  ;;  %183 = vst.msk [vmem:[#allocation2 + $0x208] sm:$0x3] %vm119_vm2, %v31031_v1 }
  0x49   :  { %186 = vst.msk [vmem:[#allocation2 + $0x220] sm:$0x3] %vm119_vm2, %v31031_v1  ;;  %189 = vst.msk [vmem:[#allocation2 + $0x238] sm:$0x3] %vm119_vm2, %v31031_v1 }
  0x4a   :  { %192 = vst.msk [vmem:[#allocation2 + $0x250] sm:$0x3] %vm119_vm2, %v31031_v1  ;;  %195 = vst.msk [vmem:[#allocation2 + $0x268] sm:$0x3] %vm119_vm2, %v31031_v1 }
  0x4b   :  { %198 = vst.msk [vmem:[#allocation2 + $0x280] sm:$0x3] %vm119_vm2, %v31031_v1  ;;  %201 = vst.msk [vmem:[#allocation2 + $0x298] sm:$0x3] %vm119_vm2, %v31031_v1 }
  0x4c   :  { %204 = vst.msk [vmem:[#allocation2 + $0x2b0] sm:$0x3] %vm119_vm2, %v31031_v1  ;;  %207 = vst.msk [vmem:[#allocation2 + $0x2c8] sm:$0x3] %vm119_vm2, %v31031_v1 }
  0x4d   :  { %210 = vst.msk [vmem:[#allocation2 + $0x2e0] sm:$0x3] %vm119_vm2, %v31031_v1  ;;  %213 = vst.msk [vmem:[#allocation2 + $0x2f8] sm:$0x3] %vm119_vm2, %v31031_v1 }
  0x4e   :  { %216 = vst.msk [vmem:[#allocation2 + $0x310] sm:$0x3] %vm119_vm2, %v31031_v1  ;;  %219 = vst.msk [vmem:[#allocation2 + $0x328] sm:$0x3] %vm119_vm2, %v31031_v1 }
  0x4f   :  { %222 = vst.msk [vmem:[#allocation2 + $0x340] sm:$0x3] %vm119_vm2, %v31031_v1  ;;  %225 = vst.msk [vmem:[#allocation2 + $0x358] sm:$0x3] %vm119_vm2, %v31031_v1 }
  0x50   :  { %227 = vst.msk [vmem:[#allocation2 + $0x19] sm:$0xff] %vm116_vm1, %v52_v3  ;;  %228 = vst.msk [vmem:[#allocation2 + $0x21] sm:$0xff] %vm116_vm1, %v53_v4  ;;  %v102_v3 = vld [vmem:[%s31017_s2 + $0x190] sm:$0xff]  ;;  %v103_v4 = vld [vmem:[%s31017_s2 + $0x198] sm:$0xff] }
  0x51   :  { %229 = vst.msk [vmem:[#allocation2 + $0x31] sm:$0xff] %vm116_vm1, %v54_v5  ;;  %230 = vst.msk [vmem:[#allocation2 + $0x39] sm:$0xff] %vm116_vm1, %v55_v6  ;;  %v104_v5 = vld [vmem:[%s31017_s2 + $0x1a0] sm:$0xff]  ;;  %v105_v6 = vld [vmem:[%s31017_s2 + $0x1a8] sm:$0xff] }
  0x52   :  { %231 = vst.msk [vmem:[#allocation2 + $0x49] sm:$0xff] %vm116_vm1, %v56_v7  ;;  %232 = vst.msk [vmem:[#allocation2 + $0x51] sm:$0xff] %vm116_vm1, %v57_v8  ;;  %v106_v7 = vld [vmem:[%s31017_s2 + $0x1b0] sm:$0xff] }
  0x53   :  { %233 = vst.msk [vmem:[#allocation2 + $0x61] sm:$0xff] %vm116_vm1, %v58_v9  ;;  %234 = vst.msk [vmem:[#allocation2 + $0x69] sm:$0xff] %vm116_vm1, %v59_v10  ;;  %v107_v10 = vld [vmem:[%s31017_s2 + $0x1b8] sm:$0xff] }
  0x54   :  { %235 = vst.msk [vmem:[#allocation2 + $0x79] sm:$0xff] %vm116_vm1, %v60_v11  ;;  %236 = vst.msk [vmem:[#allocation2 + $0x81] sm:$0xff] %vm116_vm1, %v61_v12  ;;  %v108_v11 = vld [vmem:[%s31017_s2 + $0x1c0] sm:$0xff]  ;;  %v109_v12 = vld [vmem:[%s31017_s2 + $0x1c8] sm:$0xff] }
  0x55   :  { %237 = vst.msk [vmem:[#allocation2 + $0x91] sm:$0xff] %vm116_vm1, %v62_v13  ;;  %238 = vst.msk [vmem:[#allocation2 + $0x99] sm:$0xff] %vm116_vm1, %v63_v14  ;;  %v110_v13 = vld [vmem:[%s31017_s2 + $0x1d0] sm:$0xff]  ;;  %v111_v14 = vld [vmem:[%s31017_s2 + $0x1d8] sm:$0xff] }
  0x56   :  { %239 = vst.msk [vmem:[#allocation2 + $0xa9] sm:$0xff] %vm116_vm1, %v64_v15  ;;  %240 = vst.msk [vmem:[#allocation2 + $0xb1] sm:$0xff] %vm116_vm1, %v65_v16  ;;  %v112_v15 = vld [vmem:[%s31017_s2 + $0x1e0] sm:$0xff]  ;;  %v113_v16 = vld [vmem:[%s31017_s2 + $0x1e8] sm:$0xff] }
  0x57   :  { %241 = vst.msk [vmem:[#allocation2 + $0xc1] sm:$0xff] %vm116_vm1, %v66_v17  ;;  %242 = vst.msk [vmem:[#allocation2 + $0xc9] sm:$0xff] %vm116_vm1, %v67_v18  ;;  %v358_v26 = vld [vmem:[#allocation2 + $0x19] sm:$0xff]  ;;  %v359_v28 = vld [vmem:[#allocation2 + $0x21] sm:$0xff] }
  0x58   :  { %243 = vst.msk [vmem:[#allocation2 + $0xd9] sm:$0xff] %vm116_vm1, %v68_v19  ;;  %244 = vst.msk [vmem:[#allocation2 + $0xe1] sm:$0xff] %vm116_vm1, %v69_v20  ;;  %22549 = vmatprep.mubr.msk.f32.mxu0 %vm116_vm1, %v358_v26  ;;  %v360_v29 = vld [vmem:[#allocation2 + $0x31] sm:$0xff]  ;;  %v361_v30 = vld [vmem:[#allocation2 + $0x39] sm:$0xff] }
  0x59   :  { %245 = vst.msk [vmem:[#allocation2 + $0xf1] sm:$0xff] %vm116_vm1, %v70_v21  ;;  %246 = vst.msk [vmem:[#allocation2 + $0xf9] sm:$0xff] %vm116_vm1, %v71_v22  ;;  %22550 = vmatmul.mubr.msk.f32.gmra.mrb[2].mxu0 %vm116_vm1, %v359_v28  ;;  %v362_v31 = vld [vmem:[#allocation2 + $0x49] sm:$0xff]  ;;  %v363_v39 = vld [vmem:[#allocation2 + $0x51] sm:$0xff] }
  0x5a   :  { %247 = vst.msk [vmem:[#allocation2 + $0x109] sm:$0xff] %vm116_vm1, %v72_v25  ;;  %248 = vst.msk [vmem:[#allocation2 + $0x111] sm:$0xff] %vm116_vm1, %v73_v27  ;;  %22552 = vmatprep.mubr.msk.f32.mxu0 %vm116_vm1, %v360_v29  ;;  %v364_v40 = vld [vmem:[#allocation2 + $0x61] sm:$0xff]  ;;  %v365_v45 = vld [vmem:[#allocation2 + $0x69] sm:$0xff] }
  0x5b   :  { %249 = vst.msk [vmem:[#allocation2 + $0x121] sm:$0xff] %vm116_vm1, %v74_v32  ;;  %250 = vst.msk [vmem:[#allocation2 + $0x129] sm:$0xff] %vm116_vm1, %v75_v33  ;;  %v366_v55 = vld [vmem:[#allocation2 + $0x79] sm:$0xff]  ;;  %v367_v58 = vld [vmem:[#allocation2 + $0x81] sm:$0xff] }
  0x5c   :  { %251 = vst.msk [vmem:[#allocation2 + $0x139] sm:$0xff] %vm116_vm1, %v76_v34  ;;  %252 = vst.msk [vmem:[#allocation2 + $0x141] sm:$0xff] %vm116_vm1, %v77_v35  ;;  %v368_v61 = vld [vmem:[#allocation2 + $0x91] sm:$0xff]  ;;  %v369_v62 = vld [vmem:[#allocation2 + $0x99] sm:$0xff] }
  0x5d   :  { %22553 = vmatmul.mubr.msk.f32.gmra.mrb[4].mxu0 %vm116_vm1, %v361_v30  ;;  %253 = vst.msk [vmem:[#allocation2 + $0x151] sm:$0xff] %vm116_vm1, %v78_v36  ;;  %254 = vst.msk [vmem:[#allocation2 + $0x159] sm:$0xff] %vm116_vm1, %v79_v37  ;;  %v370_v63 = vld [vmem:[#allocation2 + $0xa9] sm:$0xff]  ;;  %v371_v8 = vld [vmem:[#allocation2 + $0xb1] sm:$0xff] }
  0x5e   :  { %22555 = vmatprep.mubr.msk.f32.mxu0 %vm116_vm1, %v362_v31  ;;  %255 = vst.msk [vmem:[#allocation2 + $0x169] sm:$0xff] %vm116_vm1, %v80_v38  ;;  %256 = vst.msk [vmem:[#allocation2 + $0x171] sm:$0xff] %vm116_vm1, %v81_v41  ;;  %v372_v9 = vld [vmem:[#allocation2 + $0xc1] sm:$0xff]  ;;  %v373_v18 = vld [vmem:[#allocation2 + $0xc9] sm:$0xff] }
  0x5f   :  { %259 = vst.msk [vmem:[#allocation2 + $0x1c9] sm:$0xff] %vm116_vm1, %v84_v42  ;;  %260 = vst.msk [vmem:[#allocation2 + $0x1d1] sm:$0xff] %vm116_vm1, %v85_v43  ;;  %v26750_v17 = vld [vmem:[%s31018_s3 + $0x8] sm:$0x7]  ;;  %v374_v19 = vld [vmem:[#allocation2 + $0xd9] sm:$0xff] }
  0x60   :  { %261 = vst.msk [vmem:[#allocation2 + $0x1e1] sm:$0xff] %vm116_vm1, %v86_v44  ;;  %262 = vst.msk [vmem:[#allocation2 + $0x1e9] sm:$0xff] %vm116_vm1, %v87_v46  ;;  %22740 = vmatprep.subr.msk.mxu0 %vm614_vm0, %v26750_v17  ;;  %v375_v20 = vld [vmem:[#allocation2 + $0xe1] sm:$0xff]  ;;  %v376_v21 = vld [vmem:[#allocation2 + $0xf1] sm:$0xff] }
  0x61   :  { %22556 = vmatmul.mubr.msk.f32.gmra.mrb[6].mxu0 %vm116_vm1, %v363_v39  ;;  %263 = vst.msk [vmem:[#allocation2 + $0x1f9] sm:$0xff] %vm116_vm1, %v88_v47  ;;  %264 = vst.msk [vmem:[#allocation2 + $0x201] sm:$0xff] %vm116_vm1, %v89_v48  ;;  %v377_v22 = vld [vmem:[#allocation2 + $0xf9] sm:$0xff]  ;;  %v378_v23 = vld [vmem:[#allocation2 + $0x109] sm:$0xff] }
  0x62   :  { %22558 = vmatprep.mubr.msk.f32.mxu0 %vm116_vm1, %v364_v40  ;;  %265 = vst.msk [vmem:[#allocation2 + $0x211] sm:$0xff] %vm116_vm1, %v90_v49  ;;  %266 = vst.msk [vmem:[#allocation2 + $0x219] sm:$0xff] %vm116_vm1, %v91_v50  ;;  %v379_v24 = vld [vmem:[#allocation2 + $0x111] sm:$0xff]  ;;  %v380_v25 = vld [vmem:[#allocation2 + $0x121] sm:$0xff] }
  0x63   :  { %267 = vst.msk [vmem:[#allocation2 + $0x229] sm:$0xff] %vm116_vm1, %v92_v51  ;;  %268 = vst.msk [vmem:[#allocation2 + $0x231] sm:$0xff] %vm116_vm1, %v93_v52  ;;  %v381_v26 = vld [vmem:[#allocation2 + $0x129] sm:$0xff]  ;;  %v382_v27 = vld [vmem:[#allocation2 + $0x139] sm:$0xff] }
  0x64   :  { %269 = vst.msk [vmem:[#allocation2 + $0x241] sm:$0xff] %vm116_vm1, %v94_v53  ;;  %270 = vst.msk [vmem:[#allocation2 + $0x249] sm:$0xff] %vm116_vm1, %v95_v54  ;;  %v383_v28 = vld [vmem:[#allocation2 + $0x141] sm:$0xff]  ;;  %v384_v29 = vld [vmem:[#allocation2 + $0x151] sm:$0xff] }
  0x65   :  { %271 = vst.msk [vmem:[#allocation2 + $0x259] sm:$0xff] %vm116_vm1, %v96_v56  ;;  %22559 = vmatmul.mubr.msk.f32.gmra.mrb[8].mxu0 %vm116_vm1, %v365_v45  ;;  %272 = vst.msk [vmem:[#allocation2 + $0x261] sm:$0xff] %vm116_vm1, %v97_v57  ;;  %v385_v30 = vld [vmem:[#allocation2 + $0x159] sm:$0xff]  ;;  %v386_v31 = vld [vmem:[#allocation2 + $0x169] sm:$0xff] }
  0x66   :  { %22561 = vmatprep.mubr.msk.f32.mxu0 %vm116_vm1, %v366_v55  ;;  %273 = vst.msk [vmem:[#allocation2 + $0x271] sm:$0xff] %vm116_vm1, %v98_v59  ;;  %274 = vst.msk [vmem:[#allocation2 + $0x279] sm:$0xff] %vm116_vm1, %v99_v60  ;;  %v387_v32 = vld [vmem:[#allocation2 + $0x171] sm:$0xff]  ;;  %v389_v34 = vld [vmem:[#allocation2 + $0x1b9] sm:$0xff] }
  0x67   :  { %275 = vst.msk [vmem:[#allocation2 + $0x289] sm:$0xff] %vm116_vm1, %v100_v0  ;;  %276 = vst.msk [vmem:[#allocation2 + $0x291] sm:$0xff] %vm116_vm1, %v101_v2  ;;  %v388_v33 = vld [vmem:[#allocation2 + $0x1b1] sm:$0xff]  ;;  %v390_v35 = vld [vmem:[#allocation2 + $0x1c9] sm:$0xff] }
  0x68   :  { %277 = vst.msk [vmem:[#allocation2 + $0x2a1] sm:$0xff] %vm116_vm1, %v102_v3  ;;  %278 = vst.msk [vmem:[#allocation2 + $0x2a9] sm:$0xff] %vm116_vm1, %v103_v4  ;;  %v391_v36 = vld [vmem:[#allocation2 + $0x1d1] sm:$0xff]  ;;  %v392_v37 = vld [vmem:[#allocation2 + $0x1e1] sm:$0xff] }
  0x69   :  { %22562 = vmatmul.mubr.msk.f32.gmra.mrb[10].mxu0 %vm116_vm1, %v367_v58  ;;  %279 = vst.msk [vmem:[#allocation2 + $0x2b9] sm:$0xff] %vm116_vm1, %v104_v5  ;;  %280 = vst.msk [vmem:[#allocation2 + $0x2c1] sm:$0xff] %vm116_vm1, %v105_v6  ;;  %v393_v38 = vld [vmem:[#allocation2 + $0x1e9] sm:$0xff]  ;;  %v394_v39 = vld [vmem:[#allocation2 + $0x1f9] sm:$0xff] }
  0x6a   :  { %22564 = vmatprep.mubr.msk.f32.mxu0 %vm116_vm1, %v368_v61  ;;  %281 = vst.msk [vmem:[#allocation2 + $0x2d1] sm:$0xff] %vm116_vm1, %v106_v7  ;;  %282 = vst.msk [vmem:[#allocation2 + $0x2d9] sm:$0xff] %vm116_vm1, %v107_v10  ;;  %v395_v40 = vld [vmem:[#allocation2 + $0x201] sm:$0xff]  ;;  %v396_v41 = vld [vmem:[#allocation2 + $0x211] sm:$0xff] }
  0x6b   :  { %283 = vst.msk [vmem:[#allocation2 + $0x2e9] sm:$0xff] %vm116_vm1, %v108_v11  ;;  %284 = vst.msk [vmem:[#allocation2 + $0x2f1] sm:$0xff] %vm116_vm1, %v109_v12  ;;  %v397_v42 = vld [vmem:[#allocation2 + $0x219] sm:$0xff]  ;;  %v398_v43 = vld [vmem:[#allocation2 + $0x229] sm:$0xff] }
  0x6c   :  { %285 = vst.msk [vmem:[#allocation2 + $0x301] sm:$0xff] %vm116_vm1, %v110_v13  ;;  %286 = vst.msk [vmem:[#allocation2 + $0x309] sm:$0xff] %vm116_vm1, %v111_v14  ;;  %v399_v44 = vld [vmem:[#allocation2 + $0x231] sm:$0xff]  ;;  %v400_v45 = vld [vmem:[#allocation2 + $0x241] sm:$0xff] }
  0x6d   :  { %22565 = vmatmul.mubr.msk.f32.gmra.mrb[12].mxu0 %vm116_vm1, %v369_v62  ;;  %287 = vst.msk [vmem:[#allocation2 + $0x319] sm:$0xff] %vm116_vm1, %v112_v15  ;;  %288 = vst.msk [vmem:[#allocation2 + $0x321] sm:$0xff] %vm116_vm1, %v113_v16  ;;  %v401_v46 = vld [vmem:[#allocation2 + $0x249] sm:$0xff]  ;;  %v402_v47 = vld [vmem:[#allocation2 + $0x259] sm:$0xff] }
  0x6e   :  { %22567 = vmatprep.mubr.msk.f32.mxu0 %vm116_vm1, %v370_v63  ;;  %v403_v48 = vld [vmem:[#allocation2 + $0x261] sm:$0xff]  ;;  %v404_v49 = vld [vmem:[#allocation2 + $0x271] sm:$0xff]  ;;  %v405_v50 = vld [vmem:[#allocation2 + $0x279] sm:$0xff] }
  0x6f   :  { %v406_v51 = vld [vmem:[#allocation2 + $0x289] sm:$0xff]  ;;  %v407_v52 = vld [vmem:[#allocation2 + $0x291] sm:$0xff]  ;;  %v408_v53 = vld [vmem:[#allocation2 + $0x2a1] sm:$0xff] }
  0x70   :  { %v409_v54 = vld [vmem:[#allocation2 + $0x2a9] sm:$0xff]  ;;  %v410_v55 = vld [vmem:[#allocation2 + $0x2b9] sm:$0xff]  ;;  %v411_v56 = vld [vmem:[#allocation2 + $0x2c1] sm:$0xff] }
  0x71   :  { %22568 = vmatmul.mubr.msk.f32.gmra.mrb[14].mxu0 %vm116_vm1, %v371_v8  ;;  %v412_v57 = vld [vmem:[#allocation2 + $0x2d1] sm:$0xff]  ;;  %v413_v58 = vld [vmem:[#allocation2 + $0x2d9] sm:$0xff]  ;;  %v292_v3 = vld [vmem:[#allocation2 + $0x8] sm:$0xff] }
  0x72   :  { %22570 = vmatprep.mubr.msk.f32.mxu0 %vm116_vm1, %v372_v9  ;;  %v414_v59 = vld [vmem:[#allocation2 + $0x2e9] sm:$0xff]  ;;  %v415_v60 = vld [vmem:[#allocation2 + $0x2f1] sm:$0xff]  ;;  %v291_v2 = vld [vmem:[#allocation2] sm:$0xff] }
  0x73   :  { %v416_v61 = vld [vmem:[#allocation2 + $0x301] sm:$0xff]  ;;  %v417_v62 = vld [vmem:[#allocation2 + $0x309] sm:$0xff]  ;;  %v26803_v4 = vld [vmem:[#allocation2 + $0x18] sm:$0xff] }
  0x74   :  { %v418_v63 = vld [vmem:[#allocation2 + $0x319] sm:$0xff]  ;;  %v419_v0 = vld [vmem:[#allocation2 + $0x321] sm:$0xff]  ;;  %v26808_v5 = vld [vmem:[%s31018_s3 + $0xc] sm:$0x7] }
  0x75   :  { %22571 = vmatmul.mubr.msk.f32.gmra.mrb[16].mxu0 %vm116_vm1, %v373_v18  ;;  %v26815_v6 = vld [vmem:[#allocation2 + $0x20] sm:$0xff]  ;;  %v26817_v7 = vld [vmem:[#allocation2 + $0x30] sm:$0xff]  ;;  %v26825_v8 = vld [vmem:[#allocation2 + $0x38] sm:$0xff] }
  0x76   :  { %22573 = vmatprep.mubr.msk.f32.mxu0 %vm116_vm1, %v374_v19  ;;  %v26827_v9 = vld [vmem:[#allocation2 + $0x48] sm:$0xff]  ;;  %v26833_v10 = vld [vmem:[#allocation2 + $0x50] sm:$0xff]  ;;  %v26835_v11 = vld [vmem:[#allocation2 + $0x60] sm:$0xff] }
  0x77   :  { %v26841_v12 = vld [vmem:[#allocation2 + $0x68] sm:$0xff]  ;;  %v26843_v13 = vld [vmem:[#allocation2 + $0x78] sm:$0xff]  ;;  %v26849_v14 = vld [vmem:[#allocation2 + $0x80] sm:$0xff] }
  0x78   :  { %v26851_v15 = vld [vmem:[#allocation2 + $0x90] sm:$0xff]  ;;  %v26857_v16 = vld [vmem:[#allocation2 + $0x98] sm:$0xff]  ;;  %v26867_v19 = vld [vmem:[#allocation2 + $0xc0] sm:$0xff] }
  0x79   :  { %22574 = vmatmul.mubr.msk.f32.gmra.mrb[18].mxu0 %vm116_vm1, %v375_v20  ;;  %v26865_v18 = vld [vmem:[#allocation2 + $0xb0] sm:$0xff]  ;;  %v26873_v20 = vld [vmem:[#allocation2 + $0xc8] sm:$0xff]  ;;  %v27056_v1 = vld [vmem:[#allocation2 + $0x1a] sm:$0xff] }
  0x7a   :  { %22576 = vmatprep.mubr.msk.f32.mxu0 %vm116_vm1, %v376_v21  ;;  %v26875_v21 = vld [vmem:[#allocation2 + $0xd8] sm:$0xff]  ;;  %31185 = vst [vmem:[#allocation14_spill] sm:$0xff] %v27056_v1 }
  0x7d   :  { %22577 = vmatmul.mubr.msk.f32.gmra.mrb[20].mxu0 %vm116_vm1, %v377_v22  ;;  %v26881_v22 = vld [vmem:[#allocation2 + $0xe0] sm:$0xff] }
  0x7e   :  { %22579 = vmatprep.mubr.msk.f32.mxu0 %vm116_vm1, %v378_v23  ;;  %v26883_v23 = vld [vmem:[#allocation2 + $0xf0] sm:$0xff] }
  0x81   :  { %22580 = vmatmul.mubr.msk.f32.gmra.mrb[22].mxu0 %vm116_vm1, %v379_v24  ;;  %v26889_v24 = vld [vmem:[#allocation2 + $0xf8] sm:$0xff] }
  0x82   :  { %22582 = vmatprep.mubr.msk.f32.mxu0 %vm116_vm1, %v380_v25  ;;  %v26891_v25 = vld [vmem:[#allocation2 + $0x108] sm:$0xff] }
  0x85   :  { %22583 = vmatmul.mubr.msk.f32.gmra.mrb[24].mxu0 %vm116_vm1, %v381_v26  ;;  %v26897_v26 = vld [vmem:[#allocation2 + $0x110] sm:$0xff] }
  0x86   :  { %22585 = vmatprep.mubr.msk.f32.mxu0 %vm116_vm1, %v382_v27  ;;  %v26899_v27 = vld [vmem:[#allocation2 + $0x120] sm:$0xff] }
  0x89   :  { %22586 = vmatmul.mubr.msk.f32.gmra.mrb[26].mxu0 %vm116_vm1, %v383_v28  ;;  %v26905_v28 = vld [vmem:[#allocation2 + $0x128] sm:$0xff] }
  0x8a   :  { %22588 = vmatprep.mubr.msk.f32.mxu0 %vm116_vm1, %v384_v29  ;;  %v26907_v29 = vld [vmem:[#allocation2 + $0x138] sm:$0xff] }
  0x8d   :  { %22589 = vmatmul.mubr.msk.f32.gmra.mrb[28].mxu0 %vm116_vm1, %v385_v30  ;;  %v26913_v30 = vld [vmem:[#allocation2 + $0x140] sm:$0xff] }
  0x8e   :  { %22591 = vmatprep.mubr.msk.f32.mxu0 %vm116_vm1, %v386_v31  ;;  %v26915_v31 = vld [vmem:[#allocation2 + $0x150] sm:$0xff] }
  0x91   :  { %22592 = vmatmul.mubr.msk.f32.gmra.mrb[30].mxu0 %vm116_vm1, %v387_v32  ;;  %v26921_v32 = vld [vmem:[#allocation2 + $0x158] sm:$0xff] }
  0x92   :  { %22594 = vmatprep.mubr.msk.f32.mxu0 %vm116_vm1, %v388_v33  ;;  %v26923_v33 = vld [vmem:[#allocation2 + $0x168] sm:$0xff] }
  0x95   :  { %22595 = vmatmul.mubr.msk.f32.gmra.mrb[32].mxu0 %vm116_vm1, %v389_v34  ;;  %v26929_v34 = vld [vmem:[#allocation2 + $0x170] sm:$0xff] }
  0x96   :  { %22597 = vmatprep.mubr.msk.f32.mxu0 %vm116_vm1, %v390_v35  ;;  %v323_v35 = vld [vmem:[#allocation2 + $0x1b0] sm:$0xff] }
  0x99   :  { %22598 = vmatmul.mubr.msk.f32.gmra.mrb[34].mxu0 %vm116_vm1, %v391_v36  ;;  %v324_v36 = vld [vmem:[#allocation2 + $0x1b8] sm:$0xff] }
  0x9a   :  { %22600 = vmatprep.mubr.msk.f32.mxu0 %vm116_vm1, %v392_v37  ;;  %v26934_v37 = vld [vmem:[#allocation2 + $0x1c8] sm:$0xff] }
  0x9d   :  { %22601 = vmatmul.mubr.msk.f32.gmra.mrb[36].mxu0 %vm116_vm1, %v393_v38  ;;  %v26939_v38 = vld [vmem:[#allocation2 + $0x1d0] sm:$0xff] }
  0x9e   :  { %22603 = vmatprep.mubr.msk.f32.mxu0 %vm116_vm1, %v394_v39  ;;  %v26941_v39 = vld [vmem:[#allocation2 + $0x1e0] sm:$0xff] }
  0xa1   :  { %22604 = vmatmul.mubr.msk.f32.gmra.mrb[38].mxu0 %vm116_vm1, %v395_v40  ;;  %v26947_v40 = vld [vmem:[#allocation2 + $0x1e8] sm:$0xff] }
  0xa2   :  { %22606 = vmatprep.mubr.msk.f32.mxu0 %vm116_vm1, %v396_v41  ;;  %v26949_v41 = vld [vmem:[#allocation2 + $0x1f8] sm:$0xff] }
  0xa5   :  { %22607 = vmatmul.mubr.msk.f32.gmra.mrb[40].mxu0 %vm116_vm1, %v397_v42  ;;  %v26955_v42 = vld [vmem:[#allocation2 + $0x200] sm:$0xff] }
  0xa6   :  { %22609 = vmatprep.mubr.msk.f32.mxu0 %vm116_vm1, %v398_v43  ;;  %v26957_v43 = vld [vmem:[#allocation2 + $0x210] sm:$0xff] }
  0xa9   :  { %22610 = vmatmul.mubr.msk.f32.gmra.mrb[42].mxu0 %vm116_vm1, %v399_v44  ;;  %v26963_v44 = vld [vmem:[#allocation2 + $0x218] sm:$0xff] }
  0xaa   :  { %22612 = vmatprep.mubr.msk.f32.mxu0 %vm116_vm1, %v400_v45  ;;  %v26965_v45 = vld [vmem:[#allocation2 + $0x228] sm:$0xff] }
  0xad   :  { %22613 = vmatmul.mubr.msk.f32.gmra.mrb[44].mxu0 %vm116_vm1, %v401_v46  ;;  %v26971_v46 = vld [vmem:[#allocation2 + $0x230] sm:$0xff] }
  0xae   :  { %22615 = vmatprep.mubr.msk.f32.mxu0 %vm116_vm1, %v402_v47  ;;  %v26973_v47 = vld [vmem:[#allocation2 + $0x240] sm:$0xff] }
  0xb1   :  { %22616 = vmatmul.mubr.msk.f32.gmra.mrb[46].mxu0 %vm116_vm1, %v403_v48  ;;  %v26979_v48 = vld [vmem:[#allocation2 + $0x248] sm:$0xff] }
  0xb2   :  { %22618 = vmatprep.mubr.msk.f32.mxu0 %vm116_vm1, %v404_v49  ;;  %v26981_v49 = vld [vmem:[#allocation2 + $0x258] sm:$0xff] }
  0xb5   :  { %22619 = vmatmul.mubr.msk.f32.gmra.mrb[48].mxu0 %vm116_vm1, %v405_v50  ;;  %v26987_v50 = vld [vmem:[#allocation2 + $0x260] sm:$0xff] }
  0xb6   :  { %22621 = vmatprep.mubr.msk.f32.mxu0 %vm116_vm1, %v406_v51  ;;  %v26989_v51 = vld [vmem:[#allocation2 + $0x270] sm:$0xff] }
  0xb9   :  { %22622 = vmatmul.mubr.msk.f32.gmra.mrb[50].mxu0 %vm116_vm1, %v407_v52  ;;  %v26995_v52 = vld [vmem:[#allocation2 + $0x278] sm:$0xff] }
  0xba   :  { %22624 = vmatprep.mubr.msk.f32.mxu0 %vm116_vm1, %v408_v53  ;;  %v26997_v53 = vld [vmem:[#allocation2 + $0x288] sm:$0xff] }
  0xbd   :  { %22625 = vmatmul.mubr.msk.f32.gmra.mrb[52].mxu0 %vm116_vm1, %v409_v54  ;;  %v27003_v54 = vld [vmem:[#allocation2 + $0x290] sm:$0xff] }
  0xbe   :  { %22627 = vmatprep.mubr.msk.f32.mxu0 %vm116_vm1, %v410_v55  ;;  %v27005_v55 = vld [vmem:[#allocation2 + $0x2a0] sm:$0xff] }
  0xc1   :  { %22628 = vmatmul.mubr.msk.f32.gmra.mrb[54].mxu0 %vm116_vm1, %v411_v56  ;;  %v27011_v56 = vld [vmem:[#allocation2 + $0x2a8] sm:$0xff] }
  0xc2   :  { %22630 = vmatprep.mubr.msk.f32.mxu0 %vm116_vm1, %v412_v57  ;;  %v27013_v57 = vld [vmem:[#allocation2 + $0x2b8] sm:$0xff] }
  0xc5   :  { %22631 = vmatmul.mubr.msk.f32.gmra.mrb[56].mxu0 %vm116_vm1, %v413_v58  ;;  %v27019_v58 = vld [vmem:[#allocation2 + $0x2c0] sm:$0xff] }
  0xc6   :  { %22633 = vmatprep.mubr.msk.f32.mxu0 %vm116_vm1, %v414_v59  ;;  %v27021_v59 = vld [vmem:[#allocation2 + $0x2d0] sm:$0xff] }
  0xc9   :  { %22634 = vmatmul.mubr.msk.f32.gmra.mrb[58].mxu0 %vm116_vm1, %v415_v60  ;;  %v27027_v60 = vld [vmem:[#allocation2 + $0x2d8] sm:$0xff] }
  0xca   :  { %22636 = vmatprep.mubr.msk.f32.mxu0 %vm116_vm1, %v416_v61  ;;  %v27029_v61 = vld [vmem:[#allocation2 + $0x2e8] sm:$0xff] }
  0xcd   :  { %22637 = vmatmul.mubr.msk.f32.gmra.mrb[60].mxu0 %vm116_vm1, %v417_v62  ;;  %v27035_v62 = vld [vmem:[#allocation2 + $0x2f0] sm:$0xff] }
  0xce   :  { %22639 = vmatprep.mubr.msk.f32.mxu0 %vm116_vm1, %v418_v63  ;;  %v27037_v63 = vld [vmem:[#allocation2 + $0x300] sm:$0xff] }
  0xcf   :  { %31181 = vst [vmem:[#allocation10_spill] sm:$0xff] %v27037_v63 }
  0xd1   :  { %22640 = vmatmul.mubr.msk.f32.gmra.mrb[62].mxu0 %vm116_vm1, %v419_v0  ;;  %v27043_v0 = vld [vmem:[#allocation2 + $0x308] sm:$0xff] }
  0xd2   :  { %22644 = vmatprep.mubr.msk.f32.mxu0 %vm116_vm1, %v291_v2  ;;  %31182 = vst [vmem:[#allocation11_spill] sm:$0xff] %v27043_v0  ;;  %v27045_v2 = vld [vmem:[#allocation2 + $0x318] sm:$0xff] }
  0xd3   :  { %31183 = vst [vmem:[#allocation12_spill] sm:$0xff] %v27045_v2 }
  0xd5   :  { %22645 = vmatmul.mubr.msk.f32.vlgmr.msra.gmra.mrb[0].mxu0 %vm116_vm1, %v292_v3  ;;  %v27051_v3 = vld [vmem:[#allocation2 + $0x320] sm:$0xff] }
  0xd6   :  { %22741 = vmatpush3.msk.msra.mxu0 %vm614_vm0, %v26750_v17  ;;  %22647 = vmatprep.mubr.msk.f32.mxu0 %vm116_vm1, %v26803_v4  ;;  %v26859_v17 = vld [vmem:[#allocation2 + $0xa8] sm:$0xff]  ;;  %31184 = vst [vmem:[#allocation13_spill] sm:$0xff] %v27051_v3 }
  0xd7   :  { %22838 = vmatprep.subr.msk.mxu0 %vm614_vm0, %v26808_v5 }
  0xd9   :  { %22648 = vmatmul.mubr.msk.f32.gmra.mrb[2].mxu0 %vm116_vm1, %v26815_v6 }
  0xda   :  { %22650 = vmatprep.mubr.msk.f32.mxu0 %vm116_vm1, %v26817_v7 }
  0xdd   :  { %22651 = vmatmul.mubr.msk.f32.gmra.mrb[4].mxu0 %vm116_vm1, %v26825_v8 }
  0xde   :  { %22653 = vmatprep.mubr.msk.f32.mxu0 %vm116_vm1, %v26827_v9 }
  0xe1   :  { %22654 = vmatmul.mubr.msk.f32.gmra.mrb[6].mxu0 %vm116_vm1, %v26833_v10 }
  0xe2   :  { %22656 = vmatprep.mubr.msk.f32.mxu0 %vm116_vm1, %v26835_v11 }
  0xe5   :  { %22657 = vmatmul.mubr.msk.f32.gmra.mrb[8].mxu0 %vm116_vm1, %v26841_v12 }
  0xe6   :  { %22659 = vmatprep.mubr.msk.f32.mxu0 %vm116_vm1, %v26843_v13 }
  0xe9   :  { %22660 = vmatmul.mubr.msk.f32.gmra.mrb[10].mxu0 %vm116_vm1, %v26849_v14 }
  0xea   :  { %22662 = vmatprep.mubr.msk.f32.mxu0 %vm116_vm1, %v26851_v15 }
  0xed   :  { %22663 = vmatmul.mubr.msk.f32.gmra.mrb[12].mxu0 %vm116_vm1, %v26857_v16 }
  0xee   :  { %22665 = vmatprep.mubr.msk.f32.mxu0 %vm116_vm1, %v26859_v17 }
  0xf1   :  { %22666 = vmatmul.mubr.msk.f32.gmra.mrb[14].mxu0 %vm116_vm1, %v26865_v18 }
  0xf2   :  { %22668 = vmatprep.mubr.msk.f32.mxu0 %vm116_vm1, %v26867_v19 }
  0xf5   :  { %22669 = vmatmul.mubr.msk.f32.gmra.mrb[16].mxu0 %vm116_vm1, %v26873_v20 }
  0xf6   :  { %22671 = vmatprep.mubr.msk.f32.mxu0 %vm116_vm1, %v26875_v21 }
  0xf9   :  { %22672 = vmatmul.mubr.msk.f32.gmra.mrb[18].mxu0 %vm116_vm1, %v26881_v22 }
  0xfa   :  { %22674 = vmatprep.mubr.msk.f32.mxu0 %vm116_vm1, %v26883_v23 }
  0xfd   :  { %22675 = vmatmul.mubr.msk.f32.gmra.mrb[20].mxu0 %vm116_vm1, %v26889_v24 }
  0xfe   :  { %22677 = vmatprep.mubr.msk.f32.mxu0 %vm116_vm1, %v26891_v25 }
 0x101   :  { %22678 = vmatmul.mubr.msk.f32.gmra.mrb[22].mxu0 %vm116_vm1, %v26897_v26 }
 0x102   :  { %22680 = vmatprep.mubr.msk.f32.mxu0 %vm116_vm1, %v26899_v27 }
 0x105   :  { %22681 = vmatmul.mubr.msk.f32.gmra.mrb[24].mxu0 %vm116_vm1, %v26905_v28 }
 0x106   :  { %22683 = vmatprep.mubr.msk.f32.mxu0 %vm116_vm1, %v26907_v29 }
 0x109   :  { %22684 = vmatmul.mubr.msk.f32.gmra.mrb[26].mxu0 %vm116_vm1, %v26913_v30 }
 0x10a   :  { %22686 = vmatprep.mubr.msk.f32.mxu0 %vm116_vm1, %v26915_v31 }
 0x10d   :  { %22687 = vmatmul.mubr.msk.f32.gmra.mrb[28].mxu0 %vm116_vm1, %v26921_v32 }
 0x10e   :  { %22689 = vmatprep.mubr.msk.f32.mxu0 %vm116_vm1, %v26923_v33 }
 0x111   :  { %22690 = vmatmul.mubr.msk.f32.gmra.mrb[30].mxu0 %vm116_vm1, %v26929_v34 }
 0x112   :  { %22692 = vmatprep.mubr.msk.f32.mxu0 %vm116_vm1, %v323_v35  ;;  %v1583_v35 = vld [vmem:[#allocation2 + $0x2] sm:$0xff] }
 0x115   :  { %22693 = vmatmul.mubr.msk.f32.gmra.mrb[32].mxu0 %vm116_vm1, %v324_v36  ;;  %v1584_v36 = vld [vmem:[#allocation2 + $0xa] sm:$0xff] }
 0x116   :  { %22695 = vmatprep.mubr.msk.f32.mxu0 %vm116_vm1, %v26934_v37 }
 0x119   :  { %22696 = vmatmul.mubr.msk.f32.gmra.mrb[34].mxu0 %vm116_vm1, %v26939_v38 }
 0x11a   :  { %22698 = vmatprep.mubr.msk.f32.mxu0 %vm116_vm1, %v26941_v39 }
 0x11d   :  { %22699 = vmatmul.mubr.msk.f32.gmra.mrb[36].mxu0 %vm116_vm1, %v26947_v40 }
 0x11e   :  { %22701 = vmatprep.mubr.msk.f32.mxu0 %vm116_vm1, %v26949_v41 }
 0x121   :  { %22702 = vmatmul.mubr.msk.f32.gmra.mrb[38].mxu0 %vm116_vm1, %v26955_v42 }
 0x122   :  { %22704 = vmatprep.mubr.msk.f32.mxu0 %vm116_vm1, %v26957_v43 }
 0x125   :  { %22705 = vmatmul.mubr.msk.f32.gmra.mrb[40].mxu0 %vm116_vm1, %v26963_v44 }
 0x126   :  { %22707 = vmatprep.mubr.msk.f32.mxu0 %vm116_vm1, %v26965_v45 }
 0x129   :  { %22708 = vmatmul.mubr.msk.f32.gmra.mrb[42].mxu0 %vm116_vm1, %v26971_v46 }
 0x12a   :  { %22710 = vmatprep.mubr.msk.f32.mxu0 %vm116_vm1, %v26973_v47 }
 0x12d   :  { %22711 = vmatmul.mubr.msk.f32.gmra.mrb[44].mxu0 %vm116_vm1, %v26979_v48 }
 0x12e   :  { %22713 = vmatprep.mubr.msk.f32.mxu0 %vm116_vm1, %v26981_v49 }
 0x131   :  { %22714 = vmatmul.mubr.msk.f32.gmra.mrb[46].mxu0 %vm116_vm1, %v26987_v50 }
 0x132   :  { %22716 = vmatprep.mubr.msk.f32.mxu0 %vm116_vm1, %v26989_v51 }
 0x135   :  { %22717 = vmatmul.mubr.msk.f32.gmra.mrb[48].mxu0 %vm116_vm1, %v26995_v52 }
 0x136   :  { %22719 = vmatprep.mubr.msk.f32.mxu0 %vm116_vm1, %v26997_v53 }
 0x139   :  { %22720 = vmatmul.mubr.msk.f32.gmra.mrb[50].mxu0 %vm116_vm1, %v27003_v54 }
 0x13a   :  { %22722 = vmatprep.mubr.msk.f32.mxu0 %vm116_vm1, %v27005_v55 }
 0x13d   :  { %22723 = vmatmul.mubr.msk.f32.gmra.mrb[52].mxu0 %vm116_vm1, %v27011_v56 }
 0x13e   :  { %22725 = vmatprep.mubr.msk.f32.mxu0 %vm116_vm1, %v27013_v57 }
 0x141   :  { %22726 = vmatmul.mubr.msk.f32.gmra.mrb[54].mxu0 %vm116_vm1, %v27019_v58 }
 0x142   :  { %22728 = vmatprep.mubr.msk.f32.mxu0 %vm116_vm1, %v27021_v59 }
 0x145   :  { %22729 = vmatmul.mubr.msk.f32.gmra.mrb[56].mxu0 %vm116_vm1, %v27027_v60 }
 0x146   :  { %22731 = vmatprep.mubr.msk.f32.mxu0 %vm116_vm1, %v27029_v61 }
 0x149   :  { %22732 = vmatmul.mubr.msk.f32.gmra.mrb[58].mxu0 %vm116_vm1, %v27035_v62 }
 0x14a   :  { %22734 = vmatprep.mubr.msk.f32.mxu0 %vm116_vm1, %v27037_v63  ;;  %v27061_v63 = vld [vmem:[%s31018_s3 + $0x10] sm:$0x7] }
 0x14d   :  { %22735 = vmatmul.mubr.msk.f32.gmra.mrb[60].mxu0 %vm116_vm1, %v27043_v0  ;;  %v1615_v0 = vld [vmem:[#allocation2 + $0x1b2] sm:$0xff] }
 0x14e   :  { %22737 = vmatprep.mubr.msk.f32.mxu0 %vm116_vm1, %v27045_v2  ;;  %v27068_v2 = vld [vmem:[#allocation2 + $0x22] sm:$0xff] }
 0x14f   :  { %31186 = vst [vmem:[#allocation15_spill] sm:$0xff] %v27068_v2 }
 0x151   :  { %22738 = vmatmul.mubr.msk.f32.gmra.mrb[62].mxu0 %vm116_vm1, %v27051_v3  ;;  %v27070_v3 = vld [vmem:[#allocation2 + $0x32] sm:$0xff] }
 0x152   :  { %22742 = vmatprep.mubr.msk.f32.mxu0 %vm116_vm1, %v1583_v35  ;;  %31187 = vst [vmem:[#allocation16_spill] sm:$0xff] %v27070_v3  ;;  %v27078_v35 = vld [vmem:[#allocation2 + $0x3a] sm:$0xff] }
 0x153   :  { %31188 = vst [vmem:[#allocation17_spill] sm:$0xff] %v27078_v35 }
 0x155   :  { %22743 = vmatmul.mubr.msk.f32.vlgmr.msra.gmra.mrb[0].mxu0 %vm116_vm1, %v1584_v36  ;;  %v27080_v36 = vld [vmem:[#allocation2 + $0x4a] sm:$0xff] }
 0x156   :  { %22839 = vmatpush3.msk.msra.mxu0 %vm614_vm0, %v26808_v5  ;;  %22745 = vmatprep.mubr.msk.f32.mxu0 %vm116_vm1, %v27056_v1  ;;  %31189 = vst [vmem:[#allocation18_spill] sm:$0xff] %v27080_v36  ;;  %v27086_v5 = vld [vmem:[#allocation2 + $0x52] sm:$0xff]  ;;  %v27088_v1 = vld [vmem:[#allocation2 + $0x62] sm:$0xff] }
 0x157   :  { %22936 = vmatprep.subr.msk.mxu0 %vm614_vm0, %v27061_v63  ;;  %31190 = vst [vmem:[#allocation19_spill] sm:$0xff] %v27086_v5  ;;  %31191 = vst [vmem:[#allocation20_spill] sm:$0xff] %v27088_v1 }
 0x159   :  { %22746 = vmatmul.mubr.msk.f32.gmra.mrb[2].mxu0 %vm116_vm1, %v27068_v2  ;;  %v27096_v2 = vld [vmem:[#allocation2 + $0x7a] sm:$0xff] }
 0x15a   :  { %22748 = vmatprep.mubr.msk.f32.mxu0 %vm116_vm1, %v27070_v3  ;;  %v27094_v3 = vld [vmem:[#allocation2 + $0x6a] sm:$0xff]  ;;  %31193 = vst [vmem:[#allocation22_spill] sm:$0xff] %v27096_v2 }
 0x15b   :  { %31192 = vst [vmem:[#allocation21_spill] sm:$0xff] %v27094_v3 }
 0x15d   :  { %22749 = vmatmul.mubr.msk.f32.gmra.mrb[4].mxu0 %vm116_vm1, %v27078_v35  ;;  %v27104_v35 = vld [vmem:[#allocation2 + $0x92] sm:$0xff] }
 0x15e   :  { %22751 = vmatprep.mubr.msk.f32.mxu0 %vm116_vm1, %v27080_v36  ;;  %v27102_v36 = vld [vmem:[#allocation2 + $0x82] sm:$0xff]  ;;  %31195 = vst [vmem:[#allocation24_spill] sm:$0xff] %v27104_v35 }
 0x15f   :  { %31194 = vst [vmem:[#allocation23_spill] sm:$0xff] %v27102_v36 }
 0x161   :  { %22752 = vmatmul.mubr.msk.f32.gmra.mrb[6].mxu0 %vm116_vm1, %v27086_v5  ;;  %v27112_v5 = vld [vmem:[#allocation2 + $0xaa] sm:$0xff] }
 0x162   :  { %22754 = vmatprep.mubr.msk.f32.mxu0 %vm116_vm1, %v27088_v1  ;;  %v27110_v1 = vld [vmem:[#allocation2 + $0x9a] sm:$0xff]  ;;  %31197 = vst [vmem:[#allocation26_spill] sm:$0xff] %v27112_v5 }
 0x163   :  { %31196 = vst [vmem:[#allocation25_spill] sm:$0xff] %v27110_v1 }
 0x165   :  { %22755 = vmatmul.mubr.msk.f32.gmra.mrb[8].mxu0 %vm116_vm1, %v27094_v3  ;;  %v27120_v3 = vld [vmem:[#allocation2 + $0xc2] sm:$0xff] }
 0x166   :  { %22757 = vmatprep.mubr.msk.f32.mxu0 %vm116_vm1, %v27096_v2  ;;  %v27118_v2 = vld [vmem:[#allocation2 + $0xb2] sm:$0xff]  ;;  %31199 = vst [vmem:[#allocation28_spill] sm:$0xff] %v27120_v3 }
 0x167   :  { %31198 = vst [vmem:[#allocation27_spill] sm:$0xff] %v27118_v2 }
 0x169   :  { %22758 = vmatmul.mubr.msk.f32.gmra.mrb[10].mxu0 %vm116_vm1, %v27102_v36  ;;  %v27128_v36 = vld [vmem:[#allocation2 + $0xda] sm:$0xff] }
 0x16a   :  { %22760 = vmatprep.mubr.msk.f32.mxu0 %vm116_vm1, %v27104_v35  ;;  %v27126_v35 = vld [vmem:[#allocation2 + $0xca] sm:$0xff]  ;;  %31201 = vst [vmem:[#allocation30_spill] sm:$0xff] %v27128_v36 }
 0x16b   :  { %31200 = vst [vmem:[#allocation29_spill] sm:$0xff] %v27126_v35 }
 0x16d   :  { %22761 = vmatmul.mubr.msk.f32.gmra.mrb[12].mxu0 %vm116_vm1, %v27110_v1  ;;  %v27136_v1 = vld [vmem:[#allocation2 + $0xf2] sm:$0xff] }
 0x16e   :  { %22763 = vmatprep.mubr.msk.f32.mxu0 %vm116_vm1, %v27112_v5  ;;  %v27134_v5 = vld [vmem:[#allocation2 + $0xe2] sm:$0xff]  ;;  %31203 = vst [vmem:[#allocation32_spill] sm:$0xff] %v27136_v1 }
 0x16f   :  { %31202 = vst [vmem:[#allocation31_spill] sm:$0xff] %v27134_v5 }
 0x171   :  { %22764 = vmatmul.mubr.msk.f32.gmra.mrb[14].mxu0 %vm116_vm1, %v27118_v2  ;;  %v27144_v2 = vld [vmem:[#allocation2 + $0x10a] sm:$0xff] }
 0x172   :  { %22766 = vmatprep.mubr.msk.f32.mxu0 %vm116_vm1, %v27120_v3  ;;  %v27142_v3 = vld [vmem:[#allocation2 + $0xfa] sm:$0xff]  ;;  %31205 = vst [vmem:[#allocation34_spill] sm:$0xff] %v27144_v2 }
 0x173   :  { %31204 = vst [vmem:[#allocation33_spill] sm:$0xff] %v27142_v3 }
 0x175   :  { %22767 = vmatmul.mubr.msk.f32.gmra.mrb[16].mxu0 %vm116_vm1, %v27126_v35  ;;  %v27152_v35 = vld [vmem:[#allocation2 + $0x122] sm:$0xff] }
 0x176   :  { %22769 = vmatprep.mubr.msk.f32.mxu0 %vm116_vm1, %v27128_v36  ;;  %v27150_v36 = vld [vmem:[#allocation2 + $0x112] sm:$0xff]  ;;  %31207 = vst [vmem:[#allocation36_spill] sm:$0xff] %v27152_v35 }
 0x177   :  { %31206 = vst [vmem:[#allocation35_spill] sm:$0xff] %v27150_v36 }
 0x179   :  { %22770 = vmatmul.mubr.msk.f32.gmra.mrb[18].mxu0 %vm116_vm1, %v27134_v5  ;;  %v27160_v5 = vld [vmem:[#allocation2 + $0x13a] sm:$0xff] }
 0x17a   :  { %22772 = vmatprep.mubr.msk.f32.mxu0 %vm116_vm1, %v27136_v1  ;;  %v27158_v1 = vld [vmem:[#allocation2 + $0x12a] sm:$0xff]  ;;  %31209 = vst [vmem:[#allocation38_spill] sm:$0xff] %v27160_v5 }
 0x17b   :  { %31208 = vst [vmem:[#allocation37_spill] sm:$0xff] %v27158_v1 }
 0x17d   :  { %22773 = vmatmul.mubr.msk.f32.gmra.mrb[20].mxu0 %vm116_vm1, %v27142_v3  ;;  %v27168_v3 = vld [vmem:[#allocation2 + $0x152] sm:$0xff] }
 0x17e   :  { %22775 = vmatprep.mubr.msk.f32.mxu0 %vm116_vm1, %v27144_v2  ;;  %v27166_v2 = vld [vmem:[#allocation2 + $0x142] sm:$0xff]  ;;  %31211 = vst [vmem:[#allocation40_spill] sm:$0xff] %v27168_v3 }
 0x17f   :  { %31210 = vst [vmem:[#allocation39_spill] sm:$0xff] %v27166_v2 }
 0x181   :  { %22776 = vmatmul.mubr.msk.f32.gmra.mrb[22].mxu0 %vm116_vm1, %v27150_v36  ;;  %v82_v36 = vld [vmem:[%s31017_s2 + $0xf0] sm:$0xff] }
 0x182   :  { %22778 = vmatprep.mubr.msk.f32.mxu0 %vm116_vm1, %v27152_v35  ;;  %257 = vst.msk [vmem:[#allocation2 + $0x181] sm:$0xff] %vm116_vm1, %v82_v36  ;;  %v83_v35 = vld [vmem:[%s31017_s2 + $0xf8] sm:$0xff] }
 0x183   :  { %258 = vst.msk [vmem:[#allocation2 + $0x189] sm:$0xff] %vm116_vm1, %v83_v35  ;;  %v27190_v36 = vld [vmem:[#allocation2 + $0x172] sm:$0xff]  ;;  %v1616_v35 = vld [vmem:[#allocation2 + $0x1ba] sm:$0xff] }
 0x184   :  { %31213 = vst [vmem:[#allocation42_spill] sm:$0xff] %v27190_v36 }
 0x185   :  { %22779 = vmatmul.mubr.msk.f32.gmra.mrb[24].mxu0 %vm116_vm1, %v27158_v1  ;;  %v27184_v1 = vld [vmem:[#allocation2 + $0x16a] sm:$0xff] }
 0x186   :  { %22781 = vmatprep.mubr.msk.f32.mxu0 %vm116_vm1, %v27160_v5  ;;  %v27182_v5 = vld [vmem:[#allocation2 + $0x15a] sm:$0xff] }
 0x187   :  { %31212 = vst [vmem:[#allocation41_spill] sm:$0xff] %v27182_v5 }
 0x189   :  { %22782 = vmatmul.mubr.msk.f32.gmra.mrb[26].mxu0 %vm116_vm1, %v27166_v2  ;;  %v27202_v2 = vld [vmem:[#allocation2 + $0x1e2] sm:$0xff] }
 0x18a   :  { %22784 = vmatprep.mubr.msk.f32.mxu0 %vm116_vm1, %v27168_v3  ;;  %v27195_v3 = vld [vmem:[#allocation2 + $0x1ca] sm:$0xff]  ;;  %31216 = vst [vmem:[#allocation45_spill] sm:$0xff] %v27202_v2 }
 0x18b   :  { %31214 = vst [vmem:[#allocation43_spill] sm:$0xff] %v27195_v3 }
 0x18d   :  { %22785 = vmatmul.mubr.msk.f32.gmra.mrb[28].mxu0 %vm116_vm1, %v27182_v5  ;;  %v27200_v5 = vld [vmem:[#allocation2 + $0x1d2] sm:$0xff] }
 0x18e   :  { %22787 = vmatprep.mubr.msk.f32.mxu0 %vm116_vm1, %v27184_v1  ;;  %31215 = vst [vmem:[#allocation44_spill] sm:$0xff] %v27200_v5 }
 0x191   :  { %22788 = vmatmul.mubr.msk.f32.gmra.mrb[30].mxu0 %vm116_vm1, %v27190_v36  ;;  %v27208_v36 = vld [vmem:[#allocation2 + $0x1ea] sm:$0xff] }
 0x192   :  { %22790 = vmatprep.mubr.msk.f32.mxu0 %vm116_vm1, %v1615_v0  ;;  %31217 = vst [vmem:[#allocation46_spill] sm:$0xff] %v27208_v36  ;;  %v27210_v0 = vld [vmem:[#allocation2 + $0x1fa] sm:$0xff] }
 0x193   :  { %31218 = vst [vmem:[#allocation47_spill] sm:$0xff] %v27210_v0 }
 0x195   :  { %22791 = vmatmul.mubr.msk.f32.gmra.mrb[32].mxu0 %vm116_vm1, %v1616_v35  ;;  %v27216_v35 = vld [vmem:[#allocation2 + $0x202] sm:$0xff] }
 0x196   :  { %22793 = vmatprep.mubr.msk.f32.mxu0 %vm116_vm1, %v27195_v3  ;;  %31219 = vst [vmem:[#allocation48_spill] sm:$0xff] %v27216_v35  ;;  %v27218_v3 = vld [vmem:[#allocation2 + $0x212] sm:$0xff] }
 0x197   :  { %31220 = vst [vmem:[#allocation49_spill] sm:$0xff] %v27218_v3 }
 0x199   :  { %22794 = vmatmul.mubr.msk.f32.gmra.mrb[34].mxu0 %vm116_vm1, %v27200_v5  ;;  %v27226_v5 = vld [vmem:[#allocation2 + $0x22a] sm:$0xff] }
 0x19a   :  { %22796 = vmatprep.mubr.msk.f32.mxu0 %vm116_vm1, %v27202_v2  ;;  %v27224_v2 = vld [vmem:[#allocation2 + $0x21a] sm:$0xff]  ;;  %31222 = vst [vmem:[#allocation51_spill] sm:$0xff] %v27226_v5 }
 0x19b   :  { %31221 = vst [vmem:[#allocation50_spill] sm:$0xff] %v27224_v2 }
 0x19d   :  { %22797 = vmatmul.mubr.msk.f32.gmra.mrb[36].mxu0 %vm116_vm1, %v27208_v36  ;;  %v27234_v36 = vld [vmem:[#allocation2 + $0x242] sm:$0xff] }
 0x19e   :  { %22799 = vmatprep.mubr.msk.f32.mxu0 %vm116_vm1, %v27210_v0  ;;  %v27232_v0 = vld [vmem:[#allocation2 + $0x232] sm:$0xff]  ;;  %31224 = vst [vmem:[#allocation53_spill] sm:$0xff] %v27234_v36 }
 0x19f   :  { %31223 = vst [vmem:[#allocation52_spill] sm:$0xff] %v27232_v0 }
 0x1a1   :  { %22800 = vmatmul.mubr.msk.f32.gmra.mrb[38].mxu0 %vm116_vm1, %v27216_v35  ;;  %v27242_v35 = vld [vmem:[#allocation2 + $0x25a] sm:$0xff] }
 0x1a2   :  { %22802 = vmatprep.mubr.msk.f32.mxu0 %vm116_vm1, %v27218_v3  ;;  %v27240_v3 = vld [vmem:[#allocation2 + $0x24a] sm:$0xff]  ;;  %31226 = vst [vmem:[#allocation55_spill] sm:$0xff] %v27242_v35 }
 0x1a3   :  { %31225 = vst [vmem:[#allocation54_spill] sm:$0xff] %v27240_v3 }
 0x1a5   :  { %22803 = vmatmul.mubr.msk.f32.gmra.mrb[40].mxu0 %vm116_vm1, %v27224_v2  ;;  %v27250_v2 = vld [vmem:[#allocation2 + $0x272] sm:$0xff] }
 0x1a6   :  { %22805 = vmatprep.mubr.msk.f32.mxu0 %vm116_vm1, %v27226_v5  ;;  %v27248_v5 = vld [vmem:[#allocation2 + $0x262] sm:$0xff]  ;;  %31228 = vst [vmem:[#allocation57_spill] sm:$0xff] %v27250_v2 }
 0x1a7   :  { %31227 = vst [vmem:[#allocation56_spill] sm:$0xff] %v27248_v5 }
 0x1a9   :  { %22806 = vmatmul.mubr.msk.f32.gmra.mrb[42].mxu0 %vm116_vm1, %v27232_v0  ;;  %v27258_v0 = vld [vmem:[#allocation2 + $0x28a] sm:$0xff] }
 0x1aa   :  { %22808 = vmatprep.mubr.msk.f32.mxu0 %vm116_vm1, %v27234_v36  ;;  %v27256_v36 = vld [vmem:[#allocation2 + $0x27a] sm:$0xff]  ;;  %31230 = vst [vmem:[#allocation59_spill] sm:$0xff] %v27258_v0 }
 0x1ab   :  { %31229 = vst [vmem:[#allocation58_spill] sm:$0xff] %v27256_v36 }
 0x1ad   :  { %22809 = vmatmul.mubr.msk.f32.gmra.mrb[44].mxu0 %vm116_vm1, %v27240_v3  ;;  %v27266_v3 = vld [vmem:[#allocation2 + $0x2a2] sm:$0xff] }
 0x1ae   :  { %22811 = vmatprep.mubr.msk.f32.mxu0 %vm116_vm1, %v27242_v35  ;;  %v27264_v35 = vld [vmem:[#allocation2 + $0x292] sm:$0xff]  ;;  %31232 = vst [vmem:[#allocation61_spill] sm:$0xff] %v27266_v3 }
 0x1af   :  { %31231 = vst [vmem:[#allocation60_spill] sm:$0xff] %v27264_v35 }
 0x1b1   :  { %22812 = vmatmul.mubr.msk.f32.gmra.mrb[46].mxu0 %vm116_vm1, %v27248_v5  ;;  %v27274_v5 = vld [vmem:[#allocation2 + $0x2ba] sm:$0xff] }
 0x1b2   :  { %22814 = vmatprep.mubr.msk.f32.mxu0 %vm116_vm1, %v27250_v2  ;;  %v27272_v2 = vld [vmem:[#allocation2 + $0x2aa] sm:$0xff]  ;;  %31234 = vst [vmem:[#allocation63_spill] sm:$0xff] %v27274_v5 }
 0x1b3   :  { %31233 = vst [vmem:[#allocation62_spill] sm:$0xff] %v27272_v2 }
 0x1b5   :  { %22815 = vmatmul.mubr.msk.f32.gmra.mrb[48].mxu0 %vm116_vm1, %v27256_v36  ;;  %v27282_v36 = vld [vmem:[#allocation2 + $0x2d2] sm:$0xff] }
 0x1b6   :  { %22817 = vmatprep.mubr.msk.f32.mxu0 %vm116_vm1, %v27258_v0  ;;  %v27280_v0 = vld [vmem:[#allocation2 + $0x2c2] sm:$0xff]  ;;  %31236 = vst [vmem:[#allocation65_spill] sm:$0xff] %v27282_v36 }
 0x1b7   :  { %31235 = vst [vmem:[#allocation64_spill] sm:$0xff] %v27280_v0 }
 0x1b9   :  { %22818 = vmatmul.mubr.msk.f32.gmra.mrb[50].mxu0 %vm116_vm1, %v27264_v35  ;;  %v27290_v35 = vld [vmem:[#allocation2 + $0x2ea] sm:$0xff] }
 0x1ba   :  { %22820 = vmatprep.mubr.msk.f32.mxu0 %vm116_vm1, %v27266_v3  ;;  %v27288_v3 = vld [vmem:[#allocation2 + $0x2da] sm:$0xff]  ;;  %31238 = vst [vmem:[#allocation67_spill] sm:$0xff] %v27290_v35 }
 0x1bb   :  { %31237 = vst [vmem:[#allocation66_spill] sm:$0xff] %v27288_v3 }
 0x1bd   :  { %22821 = vmatmul.mubr.msk.f32.gmra.mrb[52].mxu0 %vm116_vm1, %v27272_v2  ;;  %v27298_v2 = vld [vmem:[#allocation2 + $0x302] sm:$0xff] }
 0x1be   :  { %22823 = vmatprep.mubr.msk.f32.mxu0 %vm116_vm1, %v27274_v5  ;;  %v27296_v5 = vld [vmem:[#allocation2 + $0x2f2] sm:$0xff] }
 0x1c1   :  { %22824 = vmatmul.mubr.msk.f32.gmra.mrb[54].mxu0 %vm116_vm1, %v27280_v0  ;;  %v114_v0 = vld [vmem:[%s31017_s2 + $0x1f0] sm:$0xff] }
 0x1c2   :  { %22826 = vmatprep.mubr.msk.f32.mxu0 %vm116_vm1, %v27282_v36  ;;  %289 = vst.msk [vmem:[#allocation2 + $0x331] sm:$0xff] %vm116_vm1, %v114_v0  ;;  %v115_v36 = vld [vmem:[%s31017_s2 + $0x1f8] sm:$0xff]  ;;  %v27320_v0 = vld [vmem:[#allocation2 + $0x322] sm:$0xff] }
 0x1c3   :  { %290 = vst.msk [vmem:[#allocation2 + $0x339] sm:$0xff] %vm116_vm1, %v115_v36  ;;  %v27329_v36 = vld [vmem:[%s31018_s3 + $0x14] sm:$0x7] }
 0x1c5   :  { %22827 = vmatmul.mubr.msk.f32.gmra.mrb[56].mxu0 %vm116_vm1, %v27288_v3  ;;  %v27314_v3 = vld [vmem:[#allocation2 + $0x31a] sm:$0xff] }
 0x1c6   :  { %22829 = vmatprep.mubr.msk.f32.mxu0 %vm116_vm1, %v27290_v35  ;;  %v27312_v35 = vld [vmem:[#allocation2 + $0x30a] sm:$0xff] }
 0x1c9   :  { %22830 = vmatmul.mubr.msk.f32.gmra.mrb[58].mxu0 %vm116_vm1, %v27296_v5 }
 0x1ca   :  { %22832 = vmatprep.mubr.msk.f32.mxu0 %vm116_vm1, %v27298_v2 }
 0x1cd   :  { %22833 = vmatmul.mubr.msk.f32.gmra.mrb[60].mxu0 %vm116_vm1, %v27312_v35 }
 0x1ce   :  { %22835 = vmatprep.mubr.msk.f32.mxu0 %vm116_vm1, %v27314_v3 }
 0x1d1   :  { %22836 = vmatmul.mubr.msk.f32.gmra.mrb[62].mxu0 %vm116_vm1, %v27320_v0 }
 0x1d2   :  { %22840 = vmatprep.mubr.msk.f32.mxu0 %vm116_vm1, %v26803_v4  ;;  %v27391_v4 = vld [vmem:[#allocation2 + $0x180] sm:$0xff] }
 0x1d5   :  { %22841 = vmatmul.mubr.msk.f32.vlgmr.msra.gmra.mrb[0].mxu0 %vm116_vm1, %v26815_v6  ;;  %v27397_v6 = vld [vmem:[#allocation2 + $0x188] sm:$0xff] }
 0x1d6   :  { %22937 = vmatpush3.msk.msra.mxu0 %vm614_vm0, %v27061_v63  ;;  %22843 = vmatprep.mubr.msk.f32.mxu0 %vm116_vm1, %v26817_v7  ;;  %v31239_v7 = vld [vmem:[#allocation10_spill] sm:$0xff] }
 0x1d7   :  { %23034 = vmatprep.subr.msk.mxu0 %vm614_vm0, %v27329_v36  ;;  %v27654_v63 = vld [vmem:[#allocation2 + $0x279] sm:$0xff] }
 0x1d9   :  { %22844 = vmatmul.mubr.msk.f32.gmra.mrb[2].mxu0 %vm116_vm1, %v26825_v8  ;;  %v31240_v8 = vld [vmem:[#allocation11_spill] sm:$0xff] }
 0x1da   :  { %22846 = vmatprep.mubr.msk.f32.mxu0 %vm116_vm1, %v26827_v9  ;;  %v31241_v9 = vld [vmem:[#allocation12_spill] sm:$0xff] }
 0x1dd   :  { %22847 = vmatmul.mubr.msk.f32.gmra.mrb[4].mxu0 %vm116_vm1, %v26833_v10  ;;  %v27459_v10 = vld [vmem:[#allocation2 + $0x330] sm:$0xff] }
 0x1de   :  { %22849 = vmatprep.mubr.msk.f32.mxu0 %vm116_vm1, %v26835_v11  ;;  %v31242_v11 = vld [vmem:[#allocation13_spill] sm:$0xff] }
 0x1e1   :  { %22850 = vmatmul.mubr.msk.f32.gmra.mrb[6].mxu0 %vm116_vm1, %v26841_v12  ;;  %v27465_v12 = vld [vmem:[#allocation2 + $0x338] sm:$0xff] }
 0x1e2   :  { %22852 = vmatprep.mubr.msk.f32.mxu0 %vm116_vm1, %v26843_v13  ;;  %v3003_v13 = vld [vmem:[#allocation2 + $0x19] sm:$0xff] }
 0x1e5   :  { %22853 = vmatmul.mubr.msk.f32.gmra.mrb[8].mxu0 %vm116_vm1, %v26849_v14  ;;  %v3004_v14 = vld [vmem:[#allocation2 + $0x21] sm:$0xff] }
 0x1e6   :  { %22855 = vmatprep.mubr.msk.f32.mxu0 %vm116_vm1, %v26851_v15  ;;  %v27470_v15 = vld [vmem:[#allocation2 + $0x31] sm:$0xff] }
 0x1e9   :  { %22856 = vmatmul.mubr.msk.f32.gmra.mrb[10].mxu0 %vm116_vm1, %v26857_v16  ;;  %v27475_v16 = vld [vmem:[%s31018_s3 + $0x18] sm:$0x7] }
 0x1ea   :  { %22858 = vmatprep.mubr.msk.f32.mxu0 %vm116_vm1, %v26859_v17  ;;  %v27482_v17 = vld [vmem:[#allocation2 + $0x39] sm:$0xff] }
 0x1ed   :  { %22859 = vmatmul.mubr.msk.f32.gmra.mrb[12].mxu0 %vm116_vm1, %v26865_v18  ;;  %v27484_v18 = vld [vmem:[#allocation2 + $0x49] sm:$0xff] }
 0x1ee   :  { %22861 = vmatprep.mubr.msk.f32.mxu0 %vm116_vm1, %v26867_v19  ;;  %v27492_v19 = vld [vmem:[#allocation2 + $0x51] sm:$0xff] }
 0x1f1   :  { %22862 = vmatmul.mubr.msk.f32.gmra.mrb[14].mxu0 %vm116_vm1, %v26873_v20  ;;  %v27494_v20 = vld [vmem:[#allocation2 + $0x61] sm:$0xff] }
 0x1f2   :  { %22864 = vmatprep.mubr.msk.f32.mxu0 %vm116_vm1, %v26875_v21  ;;  %v27500_v21 = vld [vmem:[#allocation2 + $0x69] sm:$0xff] }
 0x1f5   :  { %22865 = vmatmul.mubr.msk.f32.gmra.mrb[16].mxu0 %vm116_vm1, %v26881_v22  ;;  %v27502_v22 = vld [vmem:[#allocation2 + $0x79] sm:$0xff] }
 0x1f6   :  { %22867 = vmatprep.mubr.msk.f32.mxu0 %vm116_vm1, %v26883_v23  ;;  %v27508_v23 = vld [vmem:[#allocation2 + $0x81] sm:$0xff] }
 0x1f9   :  { %22868 = vmatmul.mubr.msk.f32.gmra.mrb[18].mxu0 %vm116_vm1, %v26889_v24  ;;  %v27510_v24 = vld [vmem:[#allocation2 + $0x91] sm:$0xff] }
 0x1fa   :  { %22870 = vmatprep.mubr.msk.f32.mxu0 %vm116_vm1, %v26891_v25  ;;  %v27516_v25 = vld [vmem:[#allocation2 + $0x99] sm:$0xff] }
 0x1fd   :  { %22871 = vmatmul.mubr.msk.f32.gmra.mrb[20].mxu0 %vm116_vm1, %v26897_v26  ;;  %v27518_v26 = vld [vmem:[#allocation2 + $0xa9] sm:$0xff] }
 0x1fe   :  { %22873 = vmatprep.mubr.msk.f32.mxu0 %vm116_vm1, %v26899_v27  ;;  %v27524_v27 = vld [vmem:[#allocation2 + $0xb1] sm:$0xff] }
 0x201   :  { %22874 = vmatmul.mubr.msk.f32.gmra.mrb[22].mxu0 %vm116_vm1, %v26905_v28  ;;  %v27526_v28 = vld [vmem:[#allocation2 + $0xc1] sm:$0xff] }
 0x202   :  { %22876 = vmatprep.mubr.msk.f32.mxu0 %vm116_vm1, %v26907_v29  ;;  %v27532_v29 = vld [vmem:[#allocation2 + $0xc9] sm:$0xff] }
 0x205   :  { %22877 = vmatmul.mubr.msk.f32.gmra.mrb[24].mxu0 %vm116_vm1, %v26913_v30  ;;  %v27534_v30 = vld [vmem:[#allocation2 + $0xd9] sm:$0xff] }
 0x206   :  { %22879 = vmatprep.mubr.msk.f32.mxu0 %vm116_vm1, %v26915_v31  ;;  %v27540_v31 = vld [vmem:[#allocation2 + $0xe1] sm:$0xff] }
 0x209   :  { %22880 = vmatmul.mubr.msk.f32.gmra.mrb[26].mxu0 %vm116_vm1, %v26921_v32  ;;  %v27542_v32 = vld [vmem:[#allocation2 + $0xf1] sm:$0xff] }
 0x20a   :  { %22882 = vmatprep.mubr.msk.f32.mxu0 %vm116_vm1, %v26923_v33  ;;  %v27548_v33 = vld [vmem:[#allocation2 + $0xf9] sm:$0xff] }
 0x20d   :  { %22883 = vmatmul.mubr.msk.f32.gmra.mrb[28].mxu0 %vm116_vm1, %v26929_v34  ;;  %v27550_v34 = vld [vmem:[#allocation2 + $0x109] sm:$0xff] }
 0x20e   :  { %22885 = vmatprep.mubr.msk.f32.mxu0 %vm116_vm1, %v27391_v4 }
 0x211   :  { %22886 = vmatmul.mubr.msk.f32.gmra.mrb[30].mxu0 %vm116_vm1, %v27397_v6 }
 0x212   :  { %22888 = vmatprep.mubr.msk.f32.mxu0 %vm116_vm1, %v26934_v37  ;;  %v27556_v37 = vld [vmem:[#allocation2 + $0x111] sm:$0xff] }
 0x215   :  { %22889 = vmatmul.mubr.msk.f32.gmra.mrb[32].mxu0 %vm116_vm1, %v26939_v38  ;;  %v27558_v38 = vld [vmem:[#allocation2 + $0x121] sm:$0xff] }
 0x216   :  { %22891 = vmatprep.mubr.msk.f32.mxu0 %vm116_vm1, %v26941_v39  ;;  %v27564_v39 = vld [vmem:[#allocation2 + $0x129] sm:$0xff] }
 0x219   :  { %22892 = vmatmul.mubr.msk.f32.gmra.mrb[34].mxu0 %vm116_vm1, %v26947_v40  ;;  %v27566_v40 = vld [vmem:[#allocation2 + $0x139] sm:$0xff] }
 0x21a   :  { %22894 = vmatprep.mubr.msk.f32.mxu0 %vm116_vm1, %v26949_v41  ;;  %v27572_v41 = vld [vmem:[#allocation2 + $0x141] sm:$0xff] }
 0x21d   :  { %22895 = vmatmul.mubr.msk.f32.gmra.mrb[36].mxu0 %vm116_vm1, %v26955_v42  ;;  %v27574_v42 = vld [vmem:[#allocation2 + $0x151] sm:$0xff] }
 0x21e   :  { %22897 = vmatprep.mubr.msk.f32.mxu0 %vm116_vm1, %v26957_v43  ;;  %v27580_v43 = vld [vmem:[#allocation2 + $0x159] sm:$0xff] }
 0x221   :  { %22898 = vmatmul.mubr.msk.f32.gmra.mrb[38].mxu0 %vm116_vm1, %v26963_v44  ;;  %v27582_v44 = vld [vmem:[#allocation2 + $0x169] sm:$0xff] }
 0x222   :  { %22900 = vmatprep.mubr.msk.f32.mxu0 %vm116_vm1, %v26965_v45  ;;  %v27588_v45 = vld [vmem:[#allocation2 + $0x171] sm:$0xff] }
 0x225   :  { %22901 = vmatmul.mubr.msk.f32.gmra.mrb[40].mxu0 %vm116_vm1, %v26971_v46  ;;  %v27590_v46 = vld [vmem:[#allocation2 + $0x181] sm:$0xff] }
 0x226   :  { %22903 = vmatprep.mubr.msk.f32.mxu0 %vm116_vm1, %v26973_v47  ;;  %v27596_v47 = vld [vmem:[#allocation2 + $0x189] sm:$0xff] }
 0x229   :  { %22904 = vmatmul.mubr.msk.f32.gmra.mrb[42].mxu0 %vm116_vm1, %v26979_v48  ;;  %v3035_v48 = vld [vmem:[#allocation2 + $0x1c9] sm:$0xff] }
 0x22a   :  { %22906 = vmatprep.mubr.msk.f32.mxu0 %vm116_vm1, %v26981_v49  ;;  %v3036_v49 = vld [vmem:[#allocation2 + $0x1d1] sm:$0xff] }
 0x22d   :  { %22907 = vmatmul.mubr.msk.f32.gmra.mrb[44].mxu0 %vm116_vm1, %v26987_v50  ;;  %v27601_v50 = vld [vmem:[#allocation2 + $0x1e1] sm:$0xff] }
 0x22e   :  { %22909 = vmatprep.mubr.msk.f32.mxu0 %vm116_vm1, %v26989_v51  ;;  %v27606_v51 = vld [vmem:[#allocation2 + $0x1e9] sm:$0xff] }
 0x231   :  { %22910 = vmatmul.mubr.msk.f32.gmra.mrb[46].mxu0 %vm116_vm1, %v26995_v52  ;;  %v27608_v52 = vld [vmem:[#allocation2 + $0x1f9] sm:$0xff] }
 0x232   :  { %22912 = vmatprep.mubr.msk.f32.mxu0 %vm116_vm1, %v26997_v53  ;;  %v27614_v53 = vld [vmem:[#allocation2 + $0x201] sm:$0xff] }
 0x235   :  { %22913 = vmatmul.mubr.msk.f32.gmra.mrb[48].mxu0 %vm116_vm1, %v27003_v54  ;;  %v27616_v54 = vld [vmem:[#allocation2 + $0x211] sm:$0xff] }
 0x236   :  { %22915 = vmatprep.mubr.msk.f32.mxu0 %vm116_vm1, %v27005_v55  ;;  %v27622_v55 = vld [vmem:[#allocation2 + $0x219] sm:$0xff] }
 0x239   :  { %22916 = vmatmul.mubr.msk.f32.gmra.mrb[50].mxu0 %vm116_vm1, %v27011_v56  ;;  %v27624_v56 = vld [vmem:[#allocation2 + $0x229] sm:$0xff] }
 0x23a   :  { %22918 = vmatprep.mubr.msk.f32.mxu0 %vm116_vm1, %v27013_v57  ;;  %v27630_v57 = vld [vmem:[#allocation2 + $0x231] sm:$0xff] }
 0x23d   :  { %22919 = vmatmul.mubr.msk.f32.gmra.mrb[52].mxu0 %vm116_vm1, %v27019_v58  ;;  %v27632_v58 = vld [vmem:[#allocation2 + $0x241] sm:$0xff] }
 0x23e   :  { %22921 = vmatprep.mubr.msk.f32.mxu0 %vm116_vm1, %v27021_v59  ;;  %v27638_v59 = vld [vmem:[#allocation2 + $0x249] sm:$0xff] }
 0x241   :  { %22922 = vmatmul.mubr.msk.f32.gmra.mrb[54].mxu0 %vm116_vm1, %v27027_v60  ;;  %v27640_v60 = vld [vmem:[#allocation2 + $0x259] sm:$0xff] }
 0x242   :  { %22924 = vmatprep.mubr.msk.f32.mxu0 %vm116_vm1, %v27029_v61  ;;  %v27646_v61 = vld [vmem:[#allocation2 + $0x261] sm:$0xff] }
 0x245   :  { %22925 = vmatmul.mubr.msk.f32.gmra.mrb[56].mxu0 %vm116_vm1, %v27035_v62  ;;  %v27648_v62 = vld [vmem:[#allocation2 + $0x271] sm:$0xff] }
 0x246   :  { %22927 = vmatprep.mubr.msk.f32.mxu0 %vm116_vm1, %v31239_v7  ;;  %v27662_v7 = vld [vmem:[#allocation2 + $0x291] sm:$0xff] }
 0x247   :  { %31243 = vst [vmem:[#allocation10_spill] sm:$0xff] %v27662_v7 }
 0x249   :  { %22928 = vmatmul.mubr.msk.f32.gmra.mrb[58].mxu0 %vm116_vm1, %v31240_v8  ;;  %v27664_v8 = vld [vmem:[#allocation2 + $0x2a1] sm:$0xff] }
 0x24a   :  { %22930 = vmatprep.mubr.msk.f32.mxu0 %vm116_vm1, %v31241_v9  ;;  %31244 = vst [vmem:[#allocation11_spill] sm:$0xff] %v27664_v8  ;;  %v27670_v9 = vld [vmem:[#allocation2 + $0x2a9] sm:$0xff] }
 0x24b   :  { %31245 = vst [vmem:[#allocation12_spill] sm:$0xff] %v27670_v9 }
 0x24d   :  { %22931 = vmatmul.mubr.msk.f32.gmra.mrb[60].mxu0 %vm116_vm1, %v31242_v11  ;;  %v27672_v11 = vld [vmem:[#allocation2 + $0x2b9] sm:$0xff] }
 0x24e   :  { %22933 = vmatprep.mubr.msk.f32.mxu0 %vm116_vm1, %v27459_v10  ;;  %31246 = vst [vmem:[#allocation13_spill] sm:$0xff] %v27672_v11 }
 0x251   :  { %22934 = vmatmul.mubr.msk.f32.gmra.mrb[62].mxu0 %vm116_vm1, %v27465_v12 }
 0x252   :  { %22938 = vmatprep.mubr.msk.f32.mxu0 %vm116_vm1, %v3003_v13  ;;  %v27678_v13 = vld [vmem:[#allocation2 + $0x2c1] sm:$0xff] }
 0x253   :  { %31247 = vst [vmem:[#allocation68_spill] sm:$0xff] %v27678_v13 }
 0x255   :  { %22939 = vmatmul.mubr.msk.f32.vlgmr.msra.gmra.mrb[0].mxu0 %vm116_vm1, %v3004_v14  ;;  %v27680_v14 = vld [vmem:[#allocation2 + $0x2d1] sm:$0xff] }
 0x256   :  { %23035 = vmatpush3.msk.msra.mxu0 %vm614_vm0, %v27329_v36  ;;  %22941 = vmatprep.mubr.msk.f32.mxu0 %vm116_vm1, %v27470_v15  ;;  %v27656_v36 = vld [vmem:[#allocation2 + $0x289] sm:$0xff]  ;;  %31248 = vst [vmem:[#allocation69_spill] sm:$0xff] %v27680_v14 }
 0x257   :  { %23132 = vmatprep.subr.msk.mxu0 %vm614_vm0, %v27475_v16 }
 0x259   :  { %22942 = vmatmul.mubr.msk.f32.gmra.mrb[2].mxu0 %vm116_vm1, %v27482_v17 }
 0x25a   :  { %22944 = vmatprep.mubr.msk.f32.mxu0 %vm116_vm1, %v27484_v18 }
 0x25d   :  { %22945 = vmatmul.mubr.msk.f32.gmra.mrb[4].mxu0 %vm116_vm1, %v27492_v19 }
 0x25e   :  { %22947 = vmatprep.mubr.msk.f32.mxu0 %vm116_vm1, %v27494_v20 }
 0x261   :  { %22948 = vmatmul.mubr.msk.f32.gmra.mrb[6].mxu0 %vm116_vm1, %v27500_v21 }
 0x262   :  { %22950 = vmatprep.mubr.msk.f32.mxu0 %vm116_vm1, %v27502_v22 }
 0x265   :  { %22951 = vmatmul.mubr.msk.f32.gmra.mrb[8].mxu0 %vm116_vm1, %v27508_v23 }
 0x266   :  { %22953 = vmatprep.mubr.msk.f32.mxu0 %vm116_vm1, %v27510_v24 }
 0x269   :  { %22954 = vmatmul.mubr.msk.f32.gmra.mrb[10].mxu0 %vm116_vm1, %v27516_v25 }
 0x26a   :  { %22956 = vmatprep.mubr.msk.f32.mxu0 %vm116_vm1, %v27518_v26 }
 0x26d   :  { %22957 = vmatmul.mubr.msk.f32.gmra.mrb[12].mxu0 %vm116_vm1, %v27524_v27 }
 0x26e   :  { %22959 = vmatprep.mubr.msk.f32.mxu0 %vm116_vm1, %v27526_v28 }
 0x271   :  { %22960 = vmatmul.mubr.msk.f32.gmra.mrb[14].mxu0 %vm116_vm1, %v27532_v29 }
 0x272   :  { %22962 = vmatprep.mubr.msk.f32.mxu0 %vm116_vm1, %v27534_v30 }
 0x275   :  { %22963 = vmatmul.mubr.msk.f32.gmra.mrb[16].mxu0 %vm116_vm1, %v27540_v31 }
 0x276   :  { %22965 = vmatprep.mubr.msk.f32.mxu0 %vm116_vm1, %v27542_v32 }
 0x279   :  { %22966 = vmatmul.mubr.msk.f32.gmra.mrb[18].mxu0 %vm116_vm1, %v27548_v33 }
 0x27a   :  { %22968 = vmatprep.mubr.msk.f32.mxu0 %vm116_vm1, %v27550_v34 }
 0x27d   :  { %22969 = vmatmul.mubr.msk.f32.gmra.mrb[20].mxu0 %vm116_vm1, %v27556_v37 }
 0x27e   :  { %22971 = vmatprep.mubr.msk.f32.mxu0 %vm116_vm1, %v27558_v38 }
 0x281   :  { %22972 = vmatmul.mubr.msk.f32.gmra.mrb[22].mxu0 %vm116_vm1, %v27564_v39 }
 0x282   :  { %22974 = vmatprep.mubr.msk.f32.mxu0 %vm116_vm1, %v27566_v40 }
 0x285   :  { %22975 = vmatmul.mubr.msk.f32.gmra.mrb[24].mxu0 %vm116_vm1, %v27572_v41 }
 0x286   :  { %22977 = vmatprep.mubr.msk.f32.mxu0 %vm116_vm1, %v27574_v42 }
 0x289   :  { %22978 = vmatmul.mubr.msk.f32.gmra.mrb[26].mxu0 %vm116_vm1, %v27580_v43 }
 0x28a   :  { %22980 = vmatprep.mubr.msk.f32.mxu0 %vm116_vm1, %v27582_v44 }
 0x28d   :  { %22981 = vmatmul.mubr.msk.f32.gmra.mrb[28].mxu0 %vm116_vm1, %v27588_v45 }
 0x28e   :  { %22983 = vmatprep.mubr.msk.f32.mxu0 %vm116_vm1, %v27590_v46 }
 0x291   :  { %22984 = vmatmul.mubr.msk.f32.gmra.mrb[30].mxu0 %vm116_vm1, %v27596_v47 }
 0x292   :  { %22986 = vmatprep.mubr.msk.f32.mxu0 %vm116_vm1, %v3035_v48  ;;  %v27686_v48 = vld [vmem:[#allocation2 + $0x2d9] sm:$0xff] }
 0x293   :  { %31249 = vst [vmem:[#allocation70_spill] sm:$0xff] %v27686_v48 }
 0x295   :  { %22987 = vmatmul.mubr.msk.f32.gmra.mrb[32].mxu0 %vm116_vm1, %v3036_v49  ;;  %v27688_v49 = vld [vmem:[#allocation2 + $0x2e9] sm:$0xff] }
 0x296   :  { %22989 = vmatprep.mubr.msk.f32.mxu0 %vm116_vm1, %v27601_v50  ;;  %31250 = vst [vmem:[#allocation71_spill] sm:$0xff] %v27688_v49 }
 0x299   :  { %22990 = vmatmul.mubr.msk.f32.gmra.mrb[34].mxu0 %vm116_vm1, %v27606_v51 }
 0x29a   :  { %22992 = vmatprep.mubr.msk.f32.mxu0 %vm116_vm1, %v27608_v52 }
 0x29d   :  { %22993 = vmatmul.mubr.msk.f32.gmra.mrb[36].mxu0 %vm116_vm1, %v27614_v53 }
 0x29e   :  { %22995 = vmatprep.mubr.msk.f32.mxu0 %vm116_vm1, %v27616_v54 }
 0x2a1   :  { %22996 = vmatmul.mubr.msk.f32.gmra.mrb[38].mxu0 %vm116_vm1, %v27622_v55 }
 0x2a2   :  { %22998 = vmatprep.mubr.msk.f32.mxu0 %vm116_vm1, %v27624_v56 }
 0x2a5   :  { %22999 = vmatmul.mubr.msk.f32.gmra.mrb[40].mxu0 %vm116_vm1, %v27630_v57 }
 0x2a6   :  { %23001 = vmatprep.mubr.msk.f32.mxu0 %vm116_vm1, %v27632_v58 }
 0x2a9   :  { %23002 = vmatmul.mubr.msk.f32.gmra.mrb[42].mxu0 %vm116_vm1, %v27638_v59 }
 0x2aa   :  { %23004 = vmatprep.mubr.msk.f32.mxu0 %vm116_vm1, %v27640_v60 }
 0x2ad   :  { %23005 = vmatmul.mubr.msk.f32.gmra.mrb[44].mxu0 %vm116_vm1, %v27646_v61 }
 0x2ae   :  { %23007 = vmatprep.mubr.msk.f32.mxu0 %vm116_vm1, %v27648_v62 }
 0x2b1   :  { %23008 = vmatmul.mubr.msk.f32.gmra.mrb[46].mxu0 %vm116_vm1, %v27654_v63 }
 0x2b2   :  { %23010 = vmatprep.mubr.msk.f32.mxu0 %vm116_vm1, %v27656_v36 }
 0x2b5   :  { %23011 = vmatmul.mubr.msk.f32.gmra.mrb[48].mxu0 %vm116_vm1, %v27662_v7  ;;  %v31268_v7 = vld [vmem:[#allocation24_spill] sm:$0xff] }
 0x2b6   :  { %23013 = vmatprep.mubr.msk.f32.mxu0 %vm116_vm1, %v27664_v8  ;;  %v31264_v8 = vld [vmem:[#allocation20_spill] sm:$0xff] }
 0x2b9   :  { %23014 = vmatmul.mubr.msk.f32.gmra.mrb[50].mxu0 %vm116_vm1, %v27670_v9  ;;  %v27696_v9 = vld [vmem:[#allocation2 + $0x301] sm:$0xff] }
 0x2ba   :  { %23016 = vmatprep.mubr.msk.f32.mxu0 %vm116_vm1, %v27672_v11  ;;  %v27694_v11 = vld [vmem:[#allocation2 + $0x2f1] sm:$0xff]  ;;  %31252 = vst [vmem:[#allocation73_spill] sm:$0xff] %v27696_v9 }
 0x2bb   :  { %31251 = vst [vmem:[#allocation72_spill] sm:$0xff] %v27694_v11 }
 0x2bd   :  { %23017 = vmatmul.mubr.msk.f32.gmra.mrb[52].mxu0 %vm116_vm1, %v27678_v13  ;;  %v27704_v13 = vld [vmem:[#allocation2 + $0x319] sm:$0xff] }
 0x2be   :  { %23019 = vmatprep.mubr.msk.f32.mxu0 %vm116_vm1, %v27680_v14  ;;  %v27702_v14 = vld [vmem:[#allocation2 + $0x309] sm:$0xff]  ;;  %31254 = vst [vmem:[#allocation75_spill] sm:$0xff] %v27704_v13 }
 0x2bf   :  { %31253 = vst [vmem:[#allocation74_spill] sm:$0xff] %v27702_v14 }
 0x2c1   :  { %23020 = vmatmul.mubr.msk.f32.gmra.mrb[54].mxu0 %vm116_vm1, %v27686_v48  ;;  %v27712_v48 = vld [vmem:[#allocation2 + $0x331] sm:$0xff] }
 0x2c2   :  { %23022 = vmatprep.mubr.msk.f32.mxu0 %vm116_vm1, %v27688_v49  ;;  %v27710_v49 = vld [vmem:[#allocation2 + $0x321] sm:$0xff]  ;;  %31256 = vst [vmem:[#allocation77_spill] sm:$0xff] %v27712_v48 }
 0x2c3   :  { %31255 = vst [vmem:[#allocation76_spill] sm:$0xff] %v27710_v49 }
 0x2c5   :  { %23023 = vmatmul.mubr.msk.f32.gmra.mrb[56].mxu0 %vm116_vm1, %v27694_v11  ;;  %v31258_v11 = vld [vmem:[#allocation14_spill] sm:$0xff] }
 0x2c6   :  { %23025 = vmatprep.mubr.msk.f32.mxu0 %vm116_vm1, %v27696_v9  ;;  %v27718_v9 = vld [vmem:[#allocation2 + $0x339] sm:$0xff] }
 0x2c7   :  { %31257 = vst [vmem:[#allocation78_spill] sm:$0xff] %v27718_v9 }
 0x2c9   :  { %23026 = vmatmul.mubr.msk.f32.gmra.mrb[58].mxu0 %vm116_vm1, %v27702_v14  ;;  %v31259_v14 = vld [vmem:[#allocation15_spill] sm:$0xff] }
 0x2ca   :  { %23028 = vmatprep.mubr.msk.f32.mxu0 %vm116_vm1, %v27704_v13  ;;  %v27727_v13 = vld [vmem:[%s31018_s3 + $0x1c] sm:$0x7] }
 0x2cd   :  { %23029 = vmatmul.mubr.msk.f32.gmra.mrb[60].mxu0 %vm116_vm1, %v27710_v49  ;;  %v31263_v49 = vld [vmem:[#allocation19_spill] sm:$0xff] }
 0x2ce   :  { %23031 = vmatprep.mubr.msk.f32.mxu0 %vm116_vm1, %v27712_v48  ;;  %v31260_v48 = vld [vmem:[#allocation16_spill] sm:$0xff] }
 0x2d1   :  { %23032 = vmatmul.mubr.msk.f32.gmra.mrb[62].mxu0 %vm116_vm1, %v27718_v9  ;;  %v31261_v9 = vld [vmem:[#allocation17_spill] sm:$0xff] }
 0x2d2   :  { %23036 = vmatprep.mubr.msk.f32.mxu0 %vm116_vm1, %v31258_v11  ;;  %v31262_v11 = vld [vmem:[#allocation18_spill] sm:$0xff] }
 0x2d5   :  { %23037 = vmatmul.mubr.msk.f32.vlgmr.msra.gmra.mrb[0].mxu0 %vm116_vm1, %v31259_v14  ;;  %v31265_v14 = vld [vmem:[#allocation21_spill] sm:$0xff] }
 0x2d6   :  { %23133 = vmatpush3.msk.msra.mxu0 %vm614_vm0, %v27475_v16  ;;  %23039 = vmatprep.mubr.msk.f32.mxu0 %vm116_vm1, %v31260_v48  ;;  %v31266_v16 = vld [vmem:[#allocation22_spill] sm:$0xff]  ;;  %v31267_v48 = vld [vmem:[#allocation23_spill] sm:$0xff] }
 0x2d7   :  { %23230 = vmatprep.subr.msk.mxu0 %vm614_vm0, %v27727_v13 }
 0x2d9   :  { %23040 = vmatmul.mubr.msk.f32.gmra.mrb[2].mxu0 %vm116_vm1, %v31261_v9  ;;  %v31269_v9 = vld [vmem:[#allocation25_spill] sm:$0xff] }
 0x2da   :  { %23042 = vmatprep.mubr.msk.f32.mxu0 %vm116_vm1, %v31262_v11  ;;  %v31270_v11 = vld [vmem:[#allocation26_spill] sm:$0xff] }
 0x2dd   :  { %23043 = vmatmul.mubr.msk.f32.gmra.mrb[4].mxu0 %vm116_vm1, %v31263_v49  ;;  %v31271_v49 = vld [vmem:[#allocation27_spill] sm:$0xff] }
 0x2de   :  { %23045 = vmatprep.mubr.msk.f32.mxu0 %vm116_vm1, %v31264_v8  ;;  %v31272_v8 = vld [vmem:[#allocation28_spill] sm:$0xff] }
 0x2e1   :  { %23046 = vmatmul.mubr.msk.f32.gmra.mrb[6].mxu0 %vm116_vm1, %v31265_v14  ;;  %v31273_v14 = vld [vmem:[#allocation29_spill] sm:$0xff] }
 0x2e2   :  { %23048 = vmatprep.mubr.msk.f32.mxu0 %vm116_vm1, %v31266_v16  ;;  %v31274_v16 = vld [vmem:[#allocation30_spill] sm:$0xff] }
 0x2e5   :  { %23049 = vmatmul.mubr.msk.f32.gmra.mrb[8].mxu0 %vm116_vm1, %v31267_v48  ;;  %v31275_v48 = vld [vmem:[#allocation31_spill] sm:$0xff] }
 0x2e6   :  { %23051 = vmatprep.mubr.msk.f32.mxu0 %vm116_vm1, %v31268_v7  ;;  %v31276_v7 = vld [vmem:[#allocation32_spill] sm:$0xff] }
 0x2e9   :  { %23052 = vmatmul.mubr.msk.f32.gmra.mrb[10].mxu0 %vm116_vm1, %v31269_v9  ;;  %v31277_v9 = vld [vmem:[#allocation33_spill] sm:$0xff] }
 0x2ea   :  { %23054 = vmatprep.mubr.msk.f32.mxu0 %vm116_vm1, %v31270_v11  ;;  %v31278_v11 = vld [vmem:[#allocation34_spill] sm:$0xff] }
 0x2ed   :  { %23055 = vmatmul.mubr.msk.f32.gmra.mrb[12].mxu0 %vm116_vm1, %v31271_v49  ;;  %v31279_v49 = vld [vmem:[#allocation35_spill] sm:$0xff] }
 0x2ee   :  { %23057 = vmatprep.mubr.msk.f32.mxu0 %vm116_vm1, %v31272_v8  ;;  %v31280_v8 = vld [vmem:[#allocation36_spill] sm:$0xff] }
 0x2f1   :  { %23058 = vmatmul.mubr.msk.f32.gmra.mrb[14].mxu0 %vm116_vm1, %v31273_v14  ;;  %v31281_v14 = vld [vmem:[#allocation37_spill] sm:$0xff] }
 0x2f2   :  { %23060 = vmatprep.mubr.msk.f32.mxu0 %vm116_vm1, %v31274_v16  ;;  %v31282_v16 = vld [vmem:[#allocation38_spill] sm:$0xff] }
 0x2f5   :  { %23061 = vmatmul.mubr.msk.f32.gmra.mrb[16].mxu0 %vm116_vm1, %v31275_v48  ;;  %v31283_v48 = vld [vmem:[#allocation39_spill] sm:$0xff] }
 0x2f6   :  { %23063 = vmatprep.mubr.msk.f32.mxu0 %vm116_vm1, %v31276_v7  ;;  %v31284_v7 = vld [vmem:[#allocation40_spill] sm:$0xff] }
 0x2f9   :  { %23064 = vmatmul.mubr.msk.f32.gmra.mrb[18].mxu0 %vm116_vm1, %v31277_v9  ;;  %v31285_v9 = vld [vmem:[#allocation41_spill] sm:$0xff] }
 0x2fa   :  { %23066 = vmatprep.mubr.msk.f32.mxu0 %vm116_vm1, %v31278_v11  ;;  %v27789_v11 = vld [vmem:[#allocation2 + $0x182] sm:$0xff] }
 0x2fd   :  { %23067 = vmatmul.mubr.msk.f32.gmra.mrb[20].mxu0 %vm116_vm1, %v31279_v49  ;;  %v31286_v49 = vld [vmem:[#allocation42_spill] sm:$0xff] }
 0x2fe   :  { %23069 = vmatprep.mubr.msk.f32.mxu0 %vm116_vm1, %v31280_v8  ;;  %v27795_v8 = vld [vmem:[#allocation2 + $0x18a] sm:$0xff] }
 0x2ff   :  { %31287 = vst [vmem:[#allocation14_spill] sm:$0xff] %v27795_v8 }
 0x301   :  { %23070 = vmatmul.mubr.msk.f32.gmra.mrb[22].mxu0 %vm116_vm1, %v31281_v14  ;;  %v31288_v14 = vld [vmem:[#allocation43_spill] sm:$0xff] }
 0x302   :  { %23072 = vmatprep.mubr.msk.f32.mxu0 %vm116_vm1, %v31282_v16  ;;  %v31289_v16 = vld [vmem:[#allocation44_spill] sm:$0xff] }
 0x305   :  { %23073 = vmatmul.mubr.msk.f32.gmra.mrb[24].mxu0 %vm116_vm1, %v31283_v48  ;;  %v31291_v48 = vld [vmem:[#allocation46_spill] sm:$0xff] }
 0x306   :  { %23075 = vmatprep.mubr.msk.f32.mxu0 %vm116_vm1, %v31284_v7  ;;  %v31292_v7 = vld [vmem:[#allocation47_spill] sm:$0xff] }
 0x309   :  { %23076 = vmatmul.mubr.msk.f32.gmra.mrb[26].mxu0 %vm116_vm1, %v31285_v9  ;;  %v31293_v9 = vld [vmem:[#allocation48_spill] sm:$0xff] }
 0x30a   :  { %23078 = vmatprep.mubr.msk.f32.mxu0 %vm116_vm1, %v27184_v1  ;;  %v31290_v1 = vld [vmem:[#allocation45_spill] sm:$0xff] }
 0x30d   :  { %23079 = vmatmul.mubr.msk.f32.gmra.mrb[28].mxu0 %vm116_vm1, %v31286_v49  ;;  %v31294_v49 = vld [vmem:[#allocation49_spill] sm:$0xff] }
 0x30e   :  { %23081 = vmatprep.mubr.msk.f32.mxu0 %vm116_vm1, %v27789_v11 }
 0x311   :  { %23082 = vmatmul.mubr.msk.f32.gmra.mrb[30].mxu0 %vm116_vm1, %v27795_v8  ;;  %v31295_v8 = vld [vmem:[#allocation50_spill] sm:$0xff] }
 0x312   :  { %23084 = vmatprep.mubr.msk.f32.mxu0 %vm116_vm1, %v31288_v14  ;;  %v31296_v14 = vld [vmem:[#allocation51_spill] sm:$0xff] }
 0x315   :  { %23085 = vmatmul.mubr.msk.f32.gmra.mrb[32].mxu0 %vm116_vm1, %v31289_v16  ;;  %v31297_v16 = vld [vmem:[#allocation52_spill] sm:$0xff] }
 0x316   :  { %23087 = vmatprep.mubr.msk.f32.mxu0 %vm116_vm1, %v31290_v1  ;;  %v31298_v1 = vld [vmem:[#allocation53_spill] sm:$0xff] }
 0x319   :  { %23088 = vmatmul.mubr.msk.f32.gmra.mrb[34].mxu0 %vm116_vm1, %v31291_v48  ;;  %v31299_v48 = vld [vmem:[#allocation54_spill] sm:$0xff] }
 0x31a   :  { %23090 = vmatprep.mubr.msk.f32.mxu0 %vm116_vm1, %v31292_v7  ;;  %v31300_v7 = vld [vmem:[#allocation55_spill] sm:$0xff] }
 0x31d   :  { %23091 = vmatmul.mubr.msk.f32.gmra.mrb[36].mxu0 %vm116_vm1, %v31293_v9  ;;  %v31301_v9 = vld [vmem:[#allocation56_spill] sm:$0xff] }
 0x31e   :  { %23093 = vmatprep.mubr.msk.f32.mxu0 %vm116_vm1, %v31294_v49  ;;  %v31302_v49 = vld [vmem:[#allocation57_spill] sm:$0xff] }
 0x321   :  { %23094 = vmatmul.mubr.msk.f32.gmra.mrb[38].mxu0 %vm116_vm1, %v31295_v8  ;;  %v31303_v8 = vld [vmem:[#allocation58_spill] sm:$0xff] }
 0x322   :  { %23096 = vmatprep.mubr.msk.f32.mxu0 %vm116_vm1, %v31296_v14  ;;  %v31304_v14 = vld [vmem:[#allocation59_spill] sm:$0xff] }
 0x325   :  { %23097 = vmatmul.mubr.msk.f32.gmra.mrb[40].mxu0 %vm116_vm1, %v31297_v16  ;;  %v31305_v16 = vld [vmem:[#allocation60_spill] sm:$0xff] }
 0x326   :  { %23099 = vmatprep.mubr.msk.f32.mxu0 %vm116_vm1, %v31298_v1  ;;  %v31306_v1 = vld [vmem:[#allocation61_spill] sm:$0xff] }
 0x329   :  { %23100 = vmatmul.mubr.msk.f32.gmra.mrb[42].mxu0 %vm116_vm1, %v31299_v48  ;;  %v31307_v48 = vld [vmem:[#allocation62_spill] sm:$0xff] }
 0x32a   :  { %23102 = vmatprep.mubr.msk.f32.mxu0 %vm116_vm1, %v31300_v7  ;;  %v31308_v7 = vld [vmem:[#allocation63_spill] sm:$0xff] }
 0x32d   :  { %23103 = vmatmul.mubr.msk.f32.gmra.mrb[44].mxu0 %vm116_vm1, %v31301_v9  ;;  %v31309_v9 = vld [vmem:[#allocation64_spill] sm:$0xff] }
 0x32e   :  { %23105 = vmatprep.mubr.msk.f32.mxu0 %vm116_vm1, %v31302_v49  ;;  %v31310_v49 = vld [vmem:[#allocation65_spill] sm:$0xff] }
 0x331   :  { %23106 = vmatmul.mubr.msk.f32.gmra.mrb[46].mxu0 %vm116_vm1, %v31303_v8  ;;  %v31311_v8 = vld [vmem:[#allocation66_spill] sm:$0xff] }
 0x332   :  { %23108 = vmatprep.mubr.msk.f32.mxu0 %vm116_vm1, %v31304_v14  ;;  %v31312_v14 = vld [vmem:[#allocation67_spill] sm:$0xff] }
 0x335   :  { %23109 = vmatmul.mubr.msk.f32.gmra.mrb[48].mxu0 %vm116_vm1, %v31305_v16  ;;  %v27857_v16 = vld [vmem:[#allocation2 + $0x332] sm:$0xff] }
 0x336   :  { %23111 = vmatprep.mubr.msk.f32.mxu0 %vm116_vm1, %v31306_v1  ;;  %v27863_v1 = vld [vmem:[#allocation2 + $0x33a] sm:$0xff] }
 0x339   :  { %23112 = vmatmul.mubr.msk.f32.gmra.mrb[50].mxu0 %vm116_vm1, %v31307_v48  ;;  %v4428_v48 = vld [vmem:[#allocation2 + $0x60] sm:$0xff] }
 0x33a   :  { %23114 = vmatprep.mubr.msk.f32.mxu0 %vm116_vm1, %v31308_v7  ;;  %v4429_v7 = vld [vmem:[#allocation2 + $0x68] sm:$0xff] }
 0x33d   :  { %23115 = vmatmul.mubr.msk.f32.gmra.mrb[52].mxu0 %vm116_vm1, %v31309_v9  ;;  %v4430_v9 = vld [vmem:[#allocation2 + $0x78] sm:$0xff] }
 0x33e   :  { %23117 = vmatprep.mubr.msk.f32.mxu0 %vm116_vm1, %v31310_v49  ;;  %v4431_v49 = vld [vmem:[#allocation2 + $0x80] sm:$0xff] }
 0x341   :  { %23118 = vmatmul.mubr.msk.f32.gmra.mrb[54].mxu0 %vm116_vm1, %v31311_v8  ;;  %v4432_v8 = vld [vmem:[#allocation2 + $0x90] sm:$0xff] }
 0x342   :  { %23120 = vmatprep.mubr.msk.f32.mxu0 %vm116_vm1, %v31312_v14  ;;  %v4434_v14 = vld [vmem:[#allocation2 + $0xa8] sm:$0xff] }
 0x345   :  { %23121 = vmatmul.mubr.msk.f32.gmra.mrb[56].mxu0 %vm116_vm1, %v27296_v5  ;;  %v4424_v5 = vld [vmem:[#allocation2 + $0x30] sm:$0xff] }
 0x346   :  { %23123 = vmatprep.mubr.msk.f32.mxu0 %vm116_vm1, %v27298_v2  ;;  %v4425_v2 = vld [vmem:[#allocation2 + $0x38] sm:$0xff] }
 0x349   :  { %23124 = vmatmul.mubr.msk.f32.gmra.mrb[58].mxu0 %vm116_vm1, %v27312_v35  ;;  %v4426_v35 = vld [vmem:[#allocation2 + $0x48] sm:$0xff] }
 0x34a   :  { %23126 = vmatprep.mubr.msk.f32.mxu0 %vm116_vm1, %v27314_v3  ;;  %v27871_v3 = vld [vmem:[%s31018_s3 + $0x20] sm:$0x7] }
 0x34d   :  { %23127 = vmatmul.mubr.msk.f32.gmra.mrb[60].mxu0 %vm116_vm1, %v27320_v0  ;;  %v4427_v0 = vld [vmem:[#allocation2 + $0x50] sm:$0xff] }
 0x34e   :  { %23129 = vmatprep.mubr.msk.f32.mxu0 %vm116_vm1, %v27857_v16 }
 0x351   :  { %23130 = vmatmul.mubr.msk.f32.gmra.mrb[62].mxu0 %vm116_vm1, %v27863_v1 }
 0x352   :  { %23134 = vmatprep.mubr.msk.f32.mxu0 %vm116_vm1, %v4424_v5  ;;  %v4435_v5 = vld [vmem:[#allocation2 + $0xb0] sm:$0xff] }
 0x355   :  { %23135 = vmatmul.mubr.msk.f32.vlgmr.msra.gmra.mrb[0].mxu0 %vm116_vm1, %v4425_v2  ;;  %v4436_v2 = vld [vmem:[#allocation2 + $0xc0] sm:$0xff] }
 0x356   :  { %23231 = vmatpush3.msk.msra.mxu0 %vm614_vm0, %v27727_v13  ;;  %23137 = vmatprep.mubr.msk.f32.mxu0 %vm116_vm1, %v4426_v35  ;;  %v4433_v13 = vld [vmem:[#allocation2 + $0x98] sm:$0xff]  ;;  %v4437_v35 = vld [vmem:[#allocation2 + $0xc8] sm:$0xff] }
 0x357   :  { %23328 = vmatprep.subr.msk.mxu0 %vm614_vm0, %v27871_v3 }
 0x359   :  { %23138 = vmatmul.mubr.msk.f32.gmra.mrb[2].mxu0 %vm116_vm1, %v4427_v0  ;;  %v4438_v0 = vld [vmem:[#allocation2 + $0xd8] sm:$0xff] }
 0x35a   :  { %23140 = vmatprep.mubr.msk.f32.mxu0 %vm116_vm1, %v4428_v48  ;;  %v4439_v48 = vld [vmem:[#allocation2 + $0xe0] sm:$0xff] }
 0x35d   :  { %23141 = vmatmul.mubr.msk.f32.gmra.mrb[4].mxu0 %vm116_vm1, %v4429_v7  ;;  %v4440_v7 = vld [vmem:[#allocation2 + $0xf0] sm:$0xff] }
 0x35e   :  { %23143 = vmatprep.mubr.msk.f32.mxu0 %vm116_vm1, %v4430_v9  ;;  %v4441_v9 = vld [vmem:[#allocation2 + $0xf8] sm:$0xff] }
 0x361   :  { %23144 = vmatmul.mubr.msk.f32.gmra.mrb[6].mxu0 %vm116_vm1, %v4431_v49  ;;  %v4442_v49 = vld [vmem:[#allocation2 + $0x108] sm:$0xff] }
 0x362   :  { %23146 = vmatprep.mubr.msk.f32.mxu0 %vm116_vm1, %v4432_v8  ;;  %v4443_v8 = vld [vmem:[#allocation2 + $0x110] sm:$0xff] }
 0x365   :  { %23147 = vmatmul.mubr.msk.f32.gmra.mrb[8].mxu0 %vm116_vm1, %v4433_v13  ;;  %v4444_v13 = vld [vmem:[#allocation2 + $0x120] sm:$0xff] }
 0x366   :  { %23149 = vmatprep.mubr.msk.f32.mxu0 %vm116_vm1, %v4434_v14  ;;  %v4445_v14 = vld [vmem:[#allocation2 + $0x128] sm:$0xff] }
 0x369   :  { %23150 = vmatmul.mubr.msk.f32.gmra.mrb[10].mxu0 %vm116_vm1, %v4435_v5  ;;  %v4446_v5 = vld [vmem:[#allocation2 + $0x138] sm:$0xff] }
 0x36a   :  { %23152 = vmatprep.mubr.msk.f32.mxu0 %vm116_vm1, %v4436_v2  ;;  %v4447_v2 = vld [vmem:[#allocation2 + $0x140] sm:$0xff] }
 0x36d   :  { %23153 = vmatmul.mubr.msk.f32.gmra.mrb[12].mxu0 %vm116_vm1, %v4437_v35  ;;  %v4448_v35 = vld [vmem:[#allocation2 + $0x150] sm:$0xff] }
 0x36e   :  { %23155 = vmatprep.mubr.msk.f32.mxu0 %vm116_vm1, %v4438_v0  ;;  %v4449_v0 = vld [vmem:[#allocation2 + $0x158] sm:$0xff] }
 0x371   :  { %23156 = vmatmul.mubr.msk.f32.gmra.mrb[14].mxu0 %vm116_vm1, %v4439_v48  ;;  %v4450_v48 = vld [vmem:[#allocation2 + $0x168] sm:$0xff] }
 0x372   :  { %23158 = vmatprep.mubr.msk.f32.mxu0 %vm116_vm1, %v4440_v7  ;;  %v4451_v7 = vld [vmem:[#allocation2 + $0x170] sm:$0xff] }
 0x375   :  { %23159 = vmatmul.mubr.msk.f32.gmra.mrb[16].mxu0 %vm116_vm1, %v4441_v9  ;;  %v4454_v9 = vld [vmem:[#allocation2 + $0x198] sm:$0xff] }
 0x376   :  { %23161 = vmatprep.mubr.msk.f32.mxu0 %vm116_vm1, %v4442_v49  ;;  %v4455_v49 = vld [vmem:[#allocation2 + $0x1a0] sm:$0xff] }
 0x379   :  { %23162 = vmatmul.mubr.msk.f32.gmra.mrb[18].mxu0 %vm116_vm1, %v4443_v8  ;;  %v4456_v8 = vld [vmem:[#allocation2 + $0x1e0] sm:$0xff] }
 0x37a   :  { %23164 = vmatprep.mubr.msk.f32.mxu0 %vm116_vm1, %v4444_v13  ;;  %v4457_v13 = vld [vmem:[#allocation2 + $0x1e8] sm:$0xff] }
 0x37d   :  { %23165 = vmatmul.mubr.msk.f32.gmra.mrb[20].mxu0 %vm116_vm1, %v4445_v14  ;;  %v4458_v14 = vld [vmem:[#allocation2 + $0x1f8] sm:$0xff] }
 0x37e   :  { %23167 = vmatprep.mubr.msk.f32.mxu0 %vm116_vm1, %v4446_v5  ;;  %v4459_v5 = vld [vmem:[#allocation2 + $0x200] sm:$0xff] }
 0x381   :  { %23168 = vmatmul.mubr.msk.f32.gmra.mrb[22].mxu0 %vm116_vm1, %v4447_v2  ;;  %v4462_v2 = vld [vmem:[#allocation2 + $0x228] sm:$0xff] }
 0x382   :  { %23170 = vmatprep.mubr.msk.f32.mxu0 %vm116_vm1, %v4448_v35  ;;  %v4463_v35 = vld [vmem:[#allocation2 + $0x230] sm:$0xff] }
 0x385   :  { %23171 = vmatmul.mubr.msk.f32.gmra.mrb[24].mxu0 %vm116_vm1, %v4449_v0  ;;  %v4464_v0 = vld [vmem:[#allocation2 + $0x240] sm:$0xff] }
 0x386   :  { %23173 = vmatprep.mubr.msk.f32.mxu0 %vm116_vm1, %v4450_v48  ;;  %v4465_v48 = vld [vmem:[#allocation2 + $0x248] sm:$0xff] }
 0x389   :  { %23174 = vmatmul.mubr.msk.f32.gmra.mrb[26].mxu0 %vm116_vm1, %v4451_v7  ;;  %v4466_v7 = vld [vmem:[#allocation2 + $0x258] sm:$0xff] }
 0x38a   :  { %23176 = vmatprep.mubr.msk.f32.mxu0 %vm116_vm1, %v27391_v4  ;;  %v4460_v4 = vld [vmem:[#allocation2 + $0x210] sm:$0xff] }
 0x38d   :  { %23177 = vmatmul.mubr.msk.f32.gmra.mrb[28].mxu0 %vm116_vm1, %v27397_v6  ;;  %v4461_v6 = vld [vmem:[#allocation2 + $0x218] sm:$0xff] }
 0x38e   :  { %23179 = vmatprep.mubr.msk.f32.mxu0 %vm116_vm1, %v4454_v9  ;;  %v4467_v9 = vld [vmem:[#allocation2 + $0x260] sm:$0xff] }
 0x391   :  { %23180 = vmatmul.mubr.msk.f32.gmra.mrb[30].mxu0 %vm116_vm1, %v4455_v49  ;;  %v4468_v49 = vld [vmem:[#allocation2 + $0x270] sm:$0xff] }
 0x392   :  { %23182 = vmatprep.mubr.msk.f32.mxu0 %vm116_vm1, %v4456_v8  ;;  %v4469_v8 = vld [vmem:[#allocation2 + $0x278] sm:$0xff] }
 0x395   :  { %23183 = vmatmul.mubr.msk.f32.gmra.mrb[32].mxu0 %vm116_vm1, %v4457_v13  ;;  %v4470_v13 = vld [vmem:[#allocation2 + $0x288] sm:$0xff] }
 0x396   :  { %23185 = vmatprep.mubr.msk.f32.mxu0 %vm116_vm1, %v4458_v14  ;;  %v4471_v14 = vld [vmem:[#allocation2 + $0x290] sm:$0xff] }
 0x399   :  { %23186 = vmatmul.mubr.msk.f32.gmra.mrb[34].mxu0 %vm116_vm1, %v4459_v5  ;;  %v4472_v5 = vld [vmem:[#allocation2 + $0x2a0] sm:$0xff] }
 0x39a   :  { %23188 = vmatprep.mubr.msk.f32.mxu0 %vm116_vm1, %v4460_v4  ;;  %v4473_v4 = vld [vmem:[#allocation2 + $0x2a8] sm:$0xff] }
 0x39d   :  { %23189 = vmatmul.mubr.msk.f32.gmra.mrb[36].mxu0 %vm116_vm1, %v4461_v6  ;;  %v4474_v6 = vld [vmem:[#allocation2 + $0x2b8] sm:$0xff] }
 0x39e   :  { %23191 = vmatprep.mubr.msk.f32.mxu0 %vm116_vm1, %v4462_v2  ;;  %v4475_v2 = vld [vmem:[#allocation2 + $0x2c0] sm:$0xff] }
 0x3a1   :  { %23192 = vmatmul.mubr.msk.f32.gmra.mrb[38].mxu0 %vm116_vm1, %v4463_v35  ;;  %v4476_v35 = vld [vmem:[#allocation2 + $0x2d0] sm:$0xff] }
 0x3a2   :  { %23194 = vmatprep.mubr.msk.f32.mxu0 %vm116_vm1, %v4464_v0  ;;  %v4477_v0 = vld [vmem:[#allocation2 + $0x2d8] sm:$0xff] }
 0x3a5   :  { %23195 = vmatmul.mubr.msk.f32.gmra.mrb[40].mxu0 %vm116_vm1, %v4465_v48  ;;  %v4478_v48 = vld [vmem:[#allocation2 + $0x2e8] sm:$0xff] }
 0x3a6   :  { %23197 = vmatprep.mubr.msk.f32.mxu0 %vm116_vm1, %v4466_v7  ;;  %v4479_v7 = vld [vmem:[#allocation2 + $0x2f0] sm:$0xff] }
 0x3a9   :  { %23198 = vmatmul.mubr.msk.f32.gmra.mrb[42].mxu0 %vm116_vm1, %v4467_v9  ;;  %v4480_v9 = vld [vmem:[#allocation2 + $0x300] sm:$0xff] }
 0x3aa   :  { %23200 = vmatprep.mubr.msk.f32.mxu0 %vm116_vm1, %v4468_v49  ;;  %v4481_v49 = vld [vmem:[#allocation2 + $0x308] sm:$0xff] }
 0x3ad   :  { %23201 = vmatmul.mubr.msk.f32.gmra.mrb[44].mxu0 %vm116_vm1, %v4469_v8  ;;  %v4482_v8 = vld [vmem:[#allocation2 + $0x318] sm:$0xff] }
 0x3ae   :  { %23203 = vmatprep.mubr.msk.f32.mxu0 %vm116_vm1, %v4470_v13  ;;  %v4483_v13 = vld [vmem:[#allocation2 + $0x320] sm:$0xff] }
 0x3b1   :  { %23204 = vmatmul.mubr.msk.f32.gmra.mrb[46].mxu0 %vm116_vm1, %v4471_v14  ;;  %v4486_v14 = vld [vmem:[#allocation2 + $0x348] sm:$0xff] }
 0x3b2   :  { %23206 = vmatprep.mubr.msk.f32.mxu0 %vm116_vm1, %v4472_v5  ;;  %v4487_v5 = vld [vmem:[#allocation2 + $0x350] sm:$0xff] }
 0x3b5   :  { %23207 = vmatmul.mubr.msk.f32.gmra.mrb[48].mxu0 %vm116_vm1, %v4473_v4  ;;  %v31328_v4 = vld [vmem:[#allocation14_spill] sm:$0xff] }
 0x3b6   :  { %23209 = vmatprep.mubr.msk.f32.mxu0 %vm116_vm1, %v4474_v6  ;;  %v5875_v6 = vld [vmem:[#allocation2 + $0x1a2] sm:$0xff] }
 0x3b9   :  { %23210 = vmatmul.mubr.msk.f32.gmra.mrb[50].mxu0 %vm116_vm1, %v4475_v2  ;;  %v5876_v2 = vld [vmem:[#allocation2 + $0x1e2] sm:$0xff] }
 0x3ba   :  { %23212 = vmatprep.mubr.msk.f32.mxu0 %vm116_vm1, %v4476_v35  ;;  %v5877_v35 = vld [vmem:[#allocation2 + $0x1ea] sm:$0xff] }
 0x3bd   :  { %23213 = vmatmul.mubr.msk.f32.gmra.mrb[52].mxu0 %vm116_vm1, %v4477_v0  ;;  %v5878_v0 = vld [vmem:[#allocation2 + $0x1fa] sm:$0xff] }
 0x3be   :  { %23215 = vmatprep.mubr.msk.f32.mxu0 %vm116_vm1, %v4478_v48  ;;  %v5879_v48 = vld [vmem:[#allocation2 + $0x202] sm:$0xff] }
 0x3c1   :  { %23216 = vmatmul.mubr.msk.f32.gmra.mrb[54].mxu0 %vm116_vm1, %v4479_v7  ;;  %v5881_v7 = vld [vmem:[#allocation2 + $0x21a] sm:$0xff] }
 0x3c2   :  { %23218 = vmatprep.mubr.msk.f32.mxu0 %vm116_vm1, %v4480_v9  ;;  %v5882_v9 = vld [vmem:[#allocation2 + $0x22a] sm:$0xff] }
 0x3c5   :  { %23219 = vmatmul.mubr.msk.f32.gmra.mrb[56].mxu0 %vm116_vm1, %v4481_v49  ;;  %v5883_v49 = vld [vmem:[#allocation2 + $0x232] sm:$0xff] }
 0x3c6   :  { %23221 = vmatprep.mubr.msk.f32.mxu0 %vm116_vm1, %v4482_v8  ;;  %v5884_v8 = vld [vmem:[#allocation2 + $0x242] sm:$0xff] }
 0x3c9   :  { %23222 = vmatmul.mubr.msk.f32.gmra.mrb[58].mxu0 %vm116_vm1, %v4483_v13  ;;  %v5885_v13 = vld [vmem:[#allocation2 + $0x24a] sm:$0xff] }
 0x3ca   :  { %23224 = vmatprep.mubr.msk.f32.mxu0 %vm116_vm1, %v27459_v10  ;;  %v5164_v10 = vld [vmem:[#allocation2 + $0x199] sm:$0xff] }
 0x3cd   :  { %23225 = vmatmul.mubr.msk.f32.gmra.mrb[60].mxu0 %vm116_vm1, %v27465_v12  ;;  %v5165_v12 = vld [vmem:[#allocation2 + $0x1a1] sm:$0xff] }
 0x3ce   :  { %23227 = vmatprep.mubr.msk.f32.mxu0 %vm116_vm1, %v4486_v14  ;;  %v5886_v14 = vld [vmem:[#allocation2 + $0x25a] sm:$0xff] }
 0x3d1   :  { %23228 = vmatmul.mubr.msk.f32.gmra.mrb[62].mxu0 %vm116_vm1, %v4487_v5  ;;  %v5887_v5 = vld [vmem:[#allocation2 + $0x262] sm:$0xff] }
 0x3d2   :  { %23232 = vmatprep.mubr.msk.f32.mxu0 %vm116_vm1, %v27470_v15  ;;  %v31313_v15 = vld [vmem:[#allocation10_spill] sm:$0xff] }
 0x3d5   :  { %23233 = vmatmul.mubr.msk.f32.vlgmr.msra.gmra.mrb[0].mxu0 %vm116_vm1, %v27482_v17  ;;  %v31314_v17 = vld [vmem:[#allocation11_spill] sm:$0xff] }
 0x3d6   :  { %23329 = vmatpush3.msk.msra.mxu0 %vm614_vm0, %v27871_v3  ;;  %23235 = vmatprep.mubr.msk.f32.mxu0 %vm116_vm1, %v27484_v18  ;;  %v31315_v18 = vld [vmem:[#allocation12_spill] sm:$0xff]  ;;  %v5874_v3 = vld [vmem:[#allocation2 + $0x19a] sm:$0xff] }
 0x3d9   :  { %23236 = vmatmul.mubr.msk.f32.gmra.mrb[2].mxu0 %vm116_vm1, %v27492_v19  ;;  %v31316_v19 = vld [vmem:[#allocation13_spill] sm:$0xff] }
 0x3da   :  { %23238 = vmatprep.mubr.msk.f32.mxu0 %vm116_vm1, %v27494_v20  ;;  %v31317_v20 = vld [vmem:[#allocation68_spill] sm:$0xff] }
 0x3dd   :  { %23239 = vmatmul.mubr.msk.f32.gmra.mrb[4].mxu0 %vm116_vm1, %v27500_v21  ;;  %v31318_v21 = vld [vmem:[#allocation69_spill] sm:$0xff] }
 0x3de   :  { %23241 = vmatprep.mubr.msk.f32.mxu0 %vm116_vm1, %v27502_v22  ;;  %v31319_v22 = vld [vmem:[#allocation70_spill] sm:$0xff] }
 0x3e1   :  { %23242 = vmatmul.mubr.msk.f32.gmra.mrb[6].mxu0 %vm116_vm1, %v27508_v23  ;;  %v31320_v23 = vld [vmem:[#allocation71_spill] sm:$0xff] }
 0x3e2   :  { %23244 = vmatprep.mubr.msk.f32.mxu0 %vm116_vm1, %v27510_v24  ;;  %v31321_v24 = vld [vmem:[#allocation72_spill] sm:$0xff] }
 0x3e5   :  { %23245 = vmatmul.mubr.msk.f32.gmra.mrb[8].mxu0 %vm116_vm1, %v27516_v25  ;;  %v31322_v25 = vld [vmem:[#allocation73_spill] sm:$0xff] }
 0x3e6   :  { %23247 = vmatprep.mubr.msk.f32.mxu0 %vm116_vm1, %v27518_v26  ;;  %v31323_v26 = vld [vmem:[#allocation74_spill] sm:$0xff] }
 0x3e9   :  { %23248 = vmatmul.mubr.msk.f32.gmra.mrb[10].mxu0 %vm116_vm1, %v27524_v27  ;;  %v31324_v27 = vld [vmem:[#allocation75_spill] sm:$0xff] }
 0x3ea   :  { %23250 = vmatprep.mubr.msk.f32.mxu0 %vm116_vm1, %v27526_v28  ;;  %v31325_v28 = vld [vmem:[#allocation76_spill] sm:$0xff] }
 0x3ed   :  { %23251 = vmatmul.mubr.msk.f32.gmra.mrb[12].mxu0 %vm116_vm1, %v27532_v29  ;;  %v31326_v29 = vld [vmem:[#allocation77_spill] sm:$0xff] }
 0x3ee   :  { %23253 = vmatprep.mubr.msk.f32.mxu0 %vm116_vm1, %v27534_v30  ;;  %v5196_v30 = vld [vmem:[#allocation2 + $0x349] sm:$0xff] }
 0x3f1   :  { %23254 = vmatmul.mubr.msk.f32.gmra.mrb[14].mxu0 %vm116_vm1, %v27540_v31  ;;  %v31327_v31 = vld [vmem:[#allocation78_spill] sm:$0xff] }
 0x3f2   :  { %23256 = vmatprep.mubr.msk.f32.mxu0 %vm116_vm1, %v27542_v32  ;;  %v5197_v32 = vld [vmem:[#allocation2 + $0x351] sm:$0xff] }
 0x3f5   :  { %23257 = vmatmul.mubr.msk.f32.gmra.mrb[16].mxu0 %vm116_vm1, %v27548_v33  ;;  %v5844_v33 = vld [vmem:[#allocation2 + $0x32] sm:$0xff] }
 0x3f6   :  { %23259 = vmatprep.mubr.msk.f32.mxu0 %vm116_vm1, %v27550_v34  ;;  %v5845_v34 = vld [vmem:[#allocation2 + $0x3a] sm:$0xff] }
 0x3f9   :  { %23260 = vmatmul.mubr.msk.f32.gmra.mrb[18].mxu0 %vm116_vm1, %v27556_v37  ;;  %v5846_v37 = vld [vmem:[#allocation2 + $0x4a] sm:$0xff] }
 0x3fa   :  { %23262 = vmatprep.mubr.msk.f32.mxu0 %vm116_vm1, %v27558_v38  ;;  %v5847_v38 = vld [vmem:[#allocation2 + $0x52] sm:$0xff] }
 0x3fd   :  { %23263 = vmatmul.mubr.msk.f32.gmra.mrb[20].mxu0 %vm116_vm1, %v27564_v39  ;;  %v5848_v39 = vld [vmem:[#allocation2 + $0x62] sm:$0xff] }
 0x3fe   :  { %23265 = vmatprep.mubr.msk.f32.mxu0 %vm116_vm1, %v27566_v40  ;;  %v5849_v40 = vld [vmem:[#allocation2 + $0x6a] sm:$0xff] }
 0x401   :  { %23266 = vmatmul.mubr.msk.f32.gmra.mrb[22].mxu0 %vm116_vm1, %v27572_v41  ;;  %v5850_v41 = vld [vmem:[#allocation2 + $0x7a] sm:$0xff] }
 0x402   :  { %23268 = vmatprep.mubr.msk.f32.mxu0 %vm116_vm1, %v27574_v42  ;;  %v5851_v42 = vld [vmem:[#allocation2 + $0x82] sm:$0xff] }
 0x405   :  { %23269 = vmatmul.mubr.msk.f32.gmra.mrb[24].mxu0 %vm116_vm1, %v27580_v43  ;;  %v5852_v43 = vld [vmem:[#allocation2 + $0x92] sm:$0xff] }
 0x406   :  { %23271 = vmatprep.mubr.msk.f32.mxu0 %vm116_vm1, %v27582_v44  ;;  %v5853_v44 = vld [vmem:[#allocation2 + $0x9a] sm:$0xff] }
 0x409   :  { %23272 = vmatmul.mubr.msk.f32.gmra.mrb[26].mxu0 %vm116_vm1, %v27588_v45  ;;  %v5854_v45 = vld [vmem:[#allocation2 + $0xaa] sm:$0xff] }
 0x40a   :  { %23274 = vmatprep.mubr.msk.f32.mxu0 %vm116_vm1, %v27590_v46  ;;  %v5855_v46 = vld [vmem:[#allocation2 + $0xb2] sm:$0xff] }
 0x40d   :  { %23275 = vmatmul.mubr.msk.f32.gmra.mrb[28].mxu0 %vm116_vm1, %v27596_v47  ;;  %v5856_v47 = vld [vmem:[#allocation2 + $0xc2] sm:$0xff] }
 0x40e   :  { %23277 = vmatprep.mubr.msk.f32.mxu0 %vm116_vm1, %v5164_v10  ;;  %v5888_v10 = vld [vmem:[#allocation2 + $0x272] sm:$0xff] }
 0x411   :  { %23278 = vmatmul.mubr.msk.f32.gmra.mrb[30].mxu0 %vm116_vm1, %v5165_v12  ;;  %v28117_v12 = vld [vmem:[#allocation2 + $0x27a] sm:$0xff] }
 0x412   :  { %23280 = vmatprep.mubr.msk.f32.mxu0 %vm116_vm1, %v27601_v50  ;;  %v5857_v50 = vld [vmem:[#allocation2 + $0xca] sm:$0xff] }
 0x415   :  { %23281 = vmatmul.mubr.msk.f32.gmra.mrb[32].mxu0 %vm116_vm1, %v27606_v51  ;;  %v5858_v51 = vld [vmem:[#allocation2 + $0xda] sm:$0xff] }
 0x416   :  { %23283 = vmatprep.mubr.msk.f32.mxu0 %vm116_vm1, %v27608_v52  ;;  %v5859_v52 = vld [vmem:[#allocation2 + $0xe2] sm:$0xff] }
 0x419   :  { %23284 = vmatmul.mubr.msk.f32.gmra.mrb[34].mxu0 %vm116_vm1, %v27614_v53  ;;  %v5860_v53 = vld [vmem:[#allocation2 + $0xf2] sm:$0xff] }
 0x41a   :  { %23286 = vmatprep.mubr.msk.f32.mxu0 %vm116_vm1, %v27616_v54  ;;  %v5861_v54 = vld [vmem:[#allocation2 + $0xfa] sm:$0xff] }
 0x41d   :  { %23287 = vmatmul.mubr.msk.f32.gmra.mrb[36].mxu0 %vm116_vm1, %v27622_v55  ;;  %v5862_v55 = vld [vmem:[#allocation2 + $0x10a] sm:$0xff] }
 0x41e   :  { %23289 = vmatprep.mubr.msk.f32.mxu0 %vm116_vm1, %v27624_v56  ;;  %v5863_v56 = vld [vmem:[#allocation2 + $0x112] sm:$0xff] }
 0x421   :  { %23290 = vmatmul.mubr.msk.f32.gmra.mrb[38].mxu0 %vm116_vm1, %v27630_v57  ;;  %v5864_v57 = vld [vmem:[#allocation2 + $0x122] sm:$0xff] }
 0x422   :  { %23292 = vmatprep.mubr.msk.f32.mxu0 %vm116_vm1, %v27632_v58  ;;  %v5865_v58 = vld [vmem:[#allocation2 + $0x12a] sm:$0xff] }
 0x425   :  { %23293 = vmatmul.mubr.msk.f32.gmra.mrb[40].mxu0 %vm116_vm1, %v27638_v59  ;;  %v5866_v59 = vld [vmem:[#allocation2 + $0x13a] sm:$0xff] }
 0x426   :  { %23295 = vmatprep.mubr.msk.f32.mxu0 %vm116_vm1, %v27640_v60  ;;  %v5867_v60 = vld [vmem:[#allocation2 + $0x142] sm:$0xff] }
 0x429   :  { %23296 = vmatmul.mubr.msk.f32.gmra.mrb[42].mxu0 %vm116_vm1, %v27646_v61  ;;  %v5868_v61 = vld [vmem:[#allocation2 + $0x152] sm:$0xff] }
 0x42a   :  { %23298 = vmatprep.mubr.msk.f32.mxu0 %vm116_vm1, %v27648_v62  ;;  %v5869_v62 = vld [vmem:[#allocation2 + $0x15a] sm:$0xff] }
 0x42d   :  { %23299 = vmatmul.mubr.msk.f32.gmra.mrb[44].mxu0 %vm116_vm1, %v27654_v63  ;;  %v5870_v63 = vld [vmem:[#allocation2 + $0x16a] sm:$0xff] }
 0x42e   :  { %23301 = vmatprep.mubr.msk.f32.mxu0 %vm116_vm1, %v27656_v36  ;;  %v5871_v36 = vld [vmem:[#allocation2 + $0x172] sm:$0xff] }
 0x431   :  { %23302 = vmatmul.mubr.msk.f32.gmra.mrb[46].mxu0 %vm116_vm1, %v31313_v15  ;;  %v31329_v15 = vmov 0.0  }
 0x432   :  { %23304 = vmatprep.mubr.msk.f32.mxu0 %vm116_vm1, %v31314_v17  ;;  %6695 = vst.msk [vmem:[#allocation3 + $0x20] sm:$0xff] %vm6689_vm3, %v31329_v15  ;;  %6690 = vst.msk [vmem:[#allocation3] sm:$0xff] %vm6689_vm3, %v31329_v15  ;;  %v5890_v17 = vld [vmem:[#allocation2 + $0x28a] sm:$0xff] }
 0x433   :  { %6691 = vst.msk [vmem:[#allocation3 + $0x8] sm:$0xff] %vm6689_vm3, %v31329_v15  ;;  %6694 = vst.msk [vmem:[#allocation3 + $0x18] sm:$0xff] %vm6689_vm3, %v31329_v15 }
 0x434   :  { %6697 = vst.msk [vmem:[#allocation3 + $0x30] sm:$0xff] %vm6689_vm3, %v31329_v15  ;;  %6698 = vst.msk [vmem:[#allocation3 + $0x38] sm:$0xff] %vm6689_vm3, %v31329_v15 }
 0x435   :  { %23305 = vmatmul.mubr.msk.f32.gmra.mrb[48].mxu0 %vm116_vm1, %v31315_v18  ;;  %6700 = vst.msk [vmem:[#allocation3 + $0x48] sm:$0xff] %vm6689_vm3, %v31329_v15  ;;  %6701 = vst.msk [vmem:[#allocation3 + $0x50] sm:$0xff] %vm6689_vm3, %v31329_v15  ;;  %v5891_v18 = vld [vmem:[#allocation2 + $0x292] sm:$0xff] }
 0x436   :  { %23307 = vmatprep.mubr.msk.f32.mxu0 %vm116_vm1, %v31316_v19  ;;  %6703 = vst.msk [vmem:[#allocation3 + $0x60] sm:$0xff] %vm6689_vm3, %v31329_v15  ;;  %6704 = vst.msk [vmem:[#allocation3 + $0x68] sm:$0xff] %vm6689_vm3, %v31329_v15  ;;  %v5892_v19 = vld [vmem:[#allocation2 + $0x2a2] sm:$0xff] }
 0x437   :  { %6706 = vst.msk [vmem:[#allocation3 + $0x78] sm:$0xff] %vm6689_vm3, %v31329_v15  ;;  %6707 = vst.msk [vmem:[#allocation3 + $0x80] sm:$0xff] %vm6689_vm3, %v31329_v15 }
 0x438   :  { %6709 = vst.msk [vmem:[#allocation3 + $0x90] sm:$0xff] %vm6689_vm3, %v31329_v15  ;;  %6710 = vst.msk [vmem:[#allocation3 + $0x98] sm:$0xff] %vm6689_vm3, %v31329_v15 }
 0x439   :  { %23308 = vmatmul.mubr.msk.f32.gmra.mrb[50].mxu0 %vm116_vm1, %v31317_v20  ;;  %6712 = vst.msk [vmem:[#allocation3 + $0xa8] sm:$0xff] %vm6689_vm3, %v31329_v15  ;;  %6713 = vst.msk [vmem:[#allocation3 + $0xb0] sm:$0xff] %vm6689_vm3, %v31329_v15  ;;  %v20154_v20 = vld [vmem:[%s31020_s5 + $0x8] sm:$0xff] }
 0x43a   :  { %23310 = vmatprep.mubr.msk.f32.mxu0 %vm116_vm1, %v31318_v21  ;;  %6715 = vst.msk [vmem:[#allocation3 + $0xc0] sm:$0xff] %vm6689_vm3, %v31329_v15  ;;  %6716 = vst.msk [vmem:[#allocation3 + $0xc8] sm:$0xff] %vm6689_vm3, %v31329_v15  ;;  %23426 = vmatprep.subr.mxu0 %v20154_v20  ;;  %v5893_v21 = vld [vmem:[#allocation2 + $0x2aa] sm:$0xff] }
 0x43b   :  { %6718 = vst.msk [vmem:[#allocation3 + $0xd8] sm:$0xff] %vm6689_vm3, %v31329_v15  ;;  %6719 = vst.msk [vmem:[#allocation3 + $0xe0] sm:$0xff] %vm6689_vm3, %v31329_v15  ;;  %24766 = vmatprep.subr.mxu1 %v20154_v20 }
 0x43c   :  { %6721 = vst.msk [vmem:[#allocation3 + $0xf0] sm:$0xff] %vm6689_vm3, %v31329_v15  ;;  %6722 = vst.msk [vmem:[#allocation3 + $0xf8] sm:$0xff] %vm6689_vm3, %v31329_v15  ;;  %24767 = vmatpush3.msra.mxu1 %v20154_v20 }
 0x43d   :  { %23311 = vmatmul.mubr.msk.f32.gmra.mrb[52].mxu0 %vm116_vm1, %v31319_v22  ;;  %6724 = vst.msk [vmem:[#allocation3 + $0x108] sm:$0xff] %vm6689_vm3, %v31329_v15  ;;  %6725 = vst.msk [vmem:[#allocation3 + $0x110] sm:$0xff] %vm6689_vm3, %v31329_v15  ;;  %v5894_v22 = vld [vmem:[#allocation2 + $0x2ba] sm:$0xff] }
 0x43e   :  { %23313 = vmatprep.mubr.msk.f32.mxu0 %vm116_vm1, %v31320_v23  ;;  %6727 = vst.msk [vmem:[#allocation3 + $0x120] sm:$0xff] %vm6689_vm3, %v31329_v15  ;;  %6728 = vst.msk [vmem:[#allocation3 + $0x128] sm:$0xff] %vm6689_vm3, %v31329_v15  ;;  %v5895_v23 = vld [vmem:[#allocation2 + $0x2c2] sm:$0xff] }
 0x43f   :  { %6730 = vst.msk [vmem:[#allocation3 + $0x138] sm:$0xff] %vm6689_vm3, %v31329_v15  ;;  %6731 = vst.msk [vmem:[#allocation3 + $0x140] sm:$0xff] %vm6689_vm3, %v31329_v15 }
 0x440   :  { %6733 = vst.msk [vmem:[#allocation3 + $0x150] sm:$0xff] %vm6689_vm3, %v31329_v15  ;;  %6734 = vst.msk [vmem:[#allocation3 + $0x158] sm:$0xff] %vm6689_vm3, %v31329_v15 }
 0x441   :  { %23314 = vmatmul.mubr.msk.f32.gmra.mrb[54].mxu0 %vm116_vm1, %v31321_v24  ;;  %6736 = vst.msk [vmem:[#allocation3 + $0x168] sm:$0xff] %vm6689_vm3, %v31329_v15  ;;  %6737 = vst.msk [vmem:[#allocation3 + $0x170] sm:$0xff] %vm6689_vm3, %v31329_v15  ;;  %v5896_v24 = vld [vmem:[#allocation2 + $0x2d2] sm:$0xff] }
 0x442   :  { %23316 = vmatprep.mubr.msk.f32.mxu0 %vm116_vm1, %v31322_v25  ;;  %6739 = vst.msk [vmem:[#allocation3 + $0x180] sm:$0xff] %vm6689_vm3, %v31329_v15  ;;  %6740 = vst.msk [vmem:[#allocation3 + $0x188] sm:$0xff] %vm6689_vm3, %v31329_v15  ;;  %v5897_v25 = vld [vmem:[#allocation2 + $0x2da] sm:$0xff] }
 0x443   :  { %6742 = vst.msk [vmem:[#allocation3 + $0x198] sm:$0xff] %vm6689_vm3, %v31329_v15  ;;  %6743 = vst.msk [vmem:[#allocation3 + $0x1a0] sm:$0xff] %vm6689_vm3, %v31329_v15 }
 0x444   :  { %6745 = vst.msk [vmem:[#allocation3 + $0x1b0] sm:$0xff] %vm6689_vm3, %v31329_v15  ;;  %6746 = vst.msk [vmem:[#allocation3 + $0x1b8] sm:$0xff] %vm6689_vm3, %v31329_v15 }
 0x445   :  { %23317 = vmatmul.mubr.msk.f32.gmra.mrb[56].mxu0 %vm116_vm1, %v31323_v26  ;;  %6748 = vst.msk [vmem:[#allocation3 + $0x1c8] sm:$0xff] %vm6689_vm3, %v31329_v15  ;;  %6749 = vst.msk [vmem:[#allocation3 + $0x1d0] sm:$0xff] %vm6689_vm3, %v31329_v15  ;;  %v5898_v26 = vld [vmem:[#allocation2 + $0x2ea] sm:$0xff] }
 0x446   :  { %23319 = vmatprep.mubr.msk.f32.mxu0 %vm116_vm1, %v31324_v27  ;;  %6751 = vst.msk [vmem:[#allocation3 + $0x1e0] sm:$0xff] %vm6689_vm3, %v31329_v15  ;;  %6752 = vst.msk [vmem:[#allocation3 + $0x1e8] sm:$0xff] %vm6689_vm3, %v31329_v15  ;;  %v5899_v27 = vld [vmem:[#allocation2 + $0x2f2] sm:$0xff] }
 0x447   :  { %6754 = vst.msk [vmem:[#allocation3 + $0x1f8] sm:$0xff] %vm6689_vm3, %v31329_v15  ;;  %6755 = vst.msk [vmem:[#allocation3 + $0x200] sm:$0xff] %vm6689_vm3, %v31329_v15 }
 0x448   :  { %6757 = vst.msk [vmem:[#allocation3 + $0x210] sm:$0xff] %vm6689_vm3, %v31329_v15  ;;  %6758 = vst.msk [vmem:[#allocation3 + $0x218] sm:$0xff] %vm6689_vm3, %v31329_v15 }
 0x449   :  { %23320 = vmatmul.mubr.msk.f32.gmra.mrb[58].mxu0 %vm116_vm1, %v31325_v28  ;;  %6760 = vst.msk [vmem:[#allocation3 + $0x228] sm:$0xff] %vm6689_vm3, %v31329_v15  ;;  %6761 = vst.msk [vmem:[#allocation3 + $0x230] sm:$0xff] %vm6689_vm3, %v31329_v15  ;;  %v5900_v28 = vld [vmem:[#allocation2 + $0x302] sm:$0xff] }
 0x44a   :  { %23322 = vmatprep.mubr.msk.f32.mxu0 %vm116_vm1, %v31326_v29  ;;  %6763 = vst.msk [vmem:[#allocation3 + $0x240] sm:$0xff] %vm6689_vm3, %v31329_v15  ;;  %6764 = vst.msk [vmem:[#allocation3 + $0x248] sm:$0xff] %vm6689_vm3, %v31329_v15  ;;  %v5901_v29 = vld [vmem:[#allocation2 + $0x30a] sm:$0xff] }
 0x44b   :  { %6766 = vst.msk [vmem:[#allocation3 + $0x258] sm:$0xff] %vm6689_vm3, %v31329_v15  ;;  %6767 = vst.msk [vmem:[#allocation3 + $0x260] sm:$0xff] %vm6689_vm3, %v31329_v15 }
 0x44c   :  { %6769 = vst.msk [vmem:[#allocation3 + $0x270] sm:$0xff] %vm6689_vm3, %v31329_v15  ;;  %6770 = vst.msk [vmem:[#allocation3 + $0x278] sm:$0xff] %vm6689_vm3, %v31329_v15 }
 0x44d   :  { %23323 = vmatmul.mubr.msk.f32.gmra.mrb[60].mxu0 %vm116_vm1, %v31327_v31  ;;  %6772 = vst.msk [vmem:[#allocation3 + $0x288] sm:$0xff] %vm6689_vm3, %v31329_v15  ;;  %6773 = vst.msk [vmem:[#allocation3 + $0x290] sm:$0xff] %vm6689_vm3, %v31329_v15  ;;  %v5903_v31 = vld [vmem:[#allocation2 + $0x322] sm:$0xff] }
 0x44e   :  { %23325 = vmatprep.mubr.msk.f32.mxu0 %vm116_vm1, %v5196_v30  ;;  %6775 = vst.msk [vmem:[#allocation3 + $0x2a0] sm:$0xff] %vm6689_vm3, %v31329_v15  ;;  %6776 = vst.msk [vmem:[#allocation3 + $0x2a8] sm:$0xff] %vm6689_vm3, %v31329_v15  ;;  %v5902_v30 = vld [vmem:[#allocation2 + $0x31a] sm:$0xff] }
 0x44f   :  { %6778 = vst.msk [vmem:[#allocation3 + $0x2b8] sm:$0xff] %vm6689_vm3, %v31329_v15  ;;  %6779 = vst.msk [vmem:[#allocation3 + $0x2c0] sm:$0xff] %vm6689_vm3, %v31329_v15 }
 0x450   :  { %6781 = vst.msk [vmem:[#allocation3 + $0x2d0] sm:$0xff] %vm6689_vm3, %v31329_v15  ;;  %6782 = vst.msk [vmem:[#allocation3 + $0x2d8] sm:$0xff] %vm6689_vm3, %v31329_v15 }
 0x451   :  { %23326 = vmatmul.mubr.msk.f32.gmra.mrb[62].mxu0 %vm116_vm1, %v5197_v32  ;;  %6784 = vst.msk [vmem:[#allocation3 + $0x2e8] sm:$0xff] %vm6689_vm3, %v31329_v15  ;;  %6785 = vst.msk [vmem:[#allocation3 + $0x2f0] sm:$0xff] %vm6689_vm3, %v31329_v15  ;;  %v5906_v32 = vld [vmem:[#allocation2 + $0x34a] sm:$0xff] }
 0x452   :  { %23330 = vmatprep.mubr.msk.f32.mxu0 %vm116_vm1, %v5844_v33  ;;  %6787 = vst.msk [vmem:[#allocation3 + $0x300] sm:$0xff] %vm6689_vm3, %v31329_v15  ;;  %6788 = vst.msk [vmem:[#allocation3 + $0x308] sm:$0xff] %vm6689_vm3, %v31329_v15  ;;  %v5907_v33 = vld [vmem:[#allocation2 + $0x352] sm:$0xff] }
 0x453   :  { %6790 = vst.msk [vmem:[#allocation3 + $0x318] sm:$0xff] %vm6689_vm3, %v31329_v15  ;;  %6791 = vst.msk [vmem:[#allocation3 + $0x320] sm:$0xff] %vm6689_vm3, %v31329_v15 }
 0x454   :  { %6793 = vst.msk [vmem:[#allocation3 + $0x330] sm:$0xff] %vm6689_vm3, %v31329_v15  ;;  %6794 = vst.msk [vmem:[#allocation3 + $0x338] sm:$0xff] %vm6689_vm3, %v31329_v15 }
 0x455   :  { %23331 = vmatmul.mubr.msk.f32.vlgmr.msra.gmra.mrb[0].mxu0 %vm116_vm1, %v5845_v34  ;;  %6796 = vst.msk [vmem:[#allocation3 + $0x348] sm:$0xff] %vm6689_vm3, %v31329_v15  ;;  %6797 = vst.msk [vmem:[#allocation3 + $0x350] sm:$0xff] %vm6689_vm3, %v31329_v15  ;;  %v6929_v34 = vld [vmem:[#allocation3 + $0x1] sm:$0xff] }
 0x456   :  { %23333 = vmatprep.mubr.msk.f32.mxu0 %vm116_vm1, %v5846_v37  ;;  %6696 = vst.msk [vmem:[#allocation3 + $0x28] sm:$0x3] %vm6692_vm4, %v31329_v15  ;;  %6693 = vst.msk [vmem:[#allocation3 + $0x10] sm:$0x3] %vm6692_vm4, %v31329_v15  ;;  %23427 = vmatpush3.msra.mxu0 %v20154_v20 }
 0x457   :  { %6699 = vst.msk [vmem:[#allocation3 + $0x40] sm:$0x3] %vm6692_vm4, %v31329_v15  ;;  %6702 = vst.msk [vmem:[#allocation3 + $0x58] sm:$0x3] %vm6692_vm4, %v31329_v15 }
 0x458   :  { %6705 = vst.msk [vmem:[#allocation3 + $0x70] sm:$0x3] %vm6692_vm4, %v31329_v15  ;;  %6708 = vst.msk [vmem:[#allocation3 + $0x88] sm:$0x3] %vm6692_vm4, %v31329_v15 }
 0x459   :  { %23334 = vmatmul.mubr.msk.f32.gmra.mrb[2].mxu0 %vm116_vm1, %v5847_v38  ;;  %6711 = vst.msk [vmem:[#allocation3 + $0xa0] sm:$0x3] %vm6692_vm4, %v31329_v15  ;;  %6714 = vst.msk [vmem:[#allocation3 + $0xb8] sm:$0x3] %vm6692_vm4, %v31329_v15  ;;  %v28365_v38 = vld [vmem:[%s31020_s5] sm:$0xff] }
 0x45a   :  { %23336 = vmatprep.mubr.msk.f32.mxu0 %vm116_vm1, %v5848_v39  ;;  %6717 = vst.msk [vmem:[#allocation3 + $0xd0] sm:$0x3] %vm6692_vm4, %v31329_v15  ;;  %6720 = vst.msk [vmem:[#allocation3 + $0xe8] sm:$0x3] %vm6692_vm4, %v31329_v15  ;;  %23524 = vmatprep.subr.mxu1 %v28365_v38 }
 0x45b   :  { %6723 = vst.msk [vmem:[#allocation3 + $0x100] sm:$0x3] %vm6692_vm4, %v31329_v15  ;;  %6726 = vst.msk [vmem:[#allocation3 + $0x118] sm:$0x3] %vm6692_vm4, %v31329_v15 }
 0x45c   :  { %6729 = vst.msk [vmem:[#allocation3 + $0x130] sm:$0x3] %vm6692_vm4, %v31329_v15  ;;  %6732 = vst.msk [vmem:[#allocation3 + $0x148] sm:$0x3] %vm6692_vm4, %v31329_v15 }
 0x45d   :  { %23337 = vmatmul.mubr.msk.f32.gmra.mrb[4].mxu0 %vm116_vm1, %v5849_v40  ;;  %6735 = vst.msk [vmem:[#allocation3 + $0x160] sm:$0x3] %vm6692_vm4, %v31329_v15  ;;  %6738 = vst.msk [vmem:[#allocation3 + $0x178] sm:$0x3] %vm6692_vm4, %v31329_v15  ;;  %v6930_v37 = vld [vmem:[#allocation3 + $0x9] sm:$0xff] }
 0x45e   :  { %23339 = vmatprep.mubr.msk.f32.mxu0 %vm116_vm1, %v5850_v41  ;;  %6741 = vst.msk [vmem:[#allocation3 + $0x190] sm:$0x3] %vm6692_vm4, %v31329_v15  ;;  %6744 = vst.msk [vmem:[#allocation3 + $0x1a8] sm:$0x3] %vm6692_vm4, %v31329_v15 }
 0x45f   :  { %6747 = vst.msk [vmem:[#allocation3 + $0x1c0] sm:$0x3] %vm6692_vm4, %v31329_v15  ;;  %6750 = vst.msk [vmem:[#allocation3 + $0x1d8] sm:$0x3] %vm6692_vm4, %v31329_v15 }
 0x460   :  { %6753 = vst.msk [vmem:[#allocation3 + $0x1f0] sm:$0x3] %vm6692_vm4, %v31329_v15  ;;  %6756 = vst.msk [vmem:[#allocation3 + $0x208] sm:$0x3] %vm6692_vm4, %v31329_v15 }
 0x461   :  { %23340 = vmatmul.mubr.msk.f32.gmra.mrb[6].mxu0 %vm116_vm1, %v5851_v42  ;;  %6759 = vst.msk [vmem:[#allocation3 + $0x220] sm:$0x3] %vm6692_vm4, %v31329_v15  ;;  %6762 = vst.msk [vmem:[#allocation3 + $0x238] sm:$0x3] %vm6692_vm4, %v31329_v15 }
 0x462   :  { %23342 = vmatprep.mubr.msk.f32.mxu0 %vm116_vm1, %v5852_v43  ;;  %6765 = vst.msk [vmem:[#allocation3 + $0x250] sm:$0x3] %vm6692_vm4, %v31329_v15  ;;  %6768 = vst.msk [vmem:[#allocation3 + $0x268] sm:$0x3] %vm6692_vm4, %v31329_v15 }
 0x463   :  { %6771 = vst.msk [vmem:[#allocation3 + $0x280] sm:$0x3] %vm6692_vm4, %v31329_v15  ;;  %6774 = vst.msk [vmem:[#allocation3 + $0x298] sm:$0x3] %vm6692_vm4, %v31329_v15 }
 0x464   :  { %6777 = vst.msk [vmem:[#allocation3 + $0x2b0] sm:$0x3] %vm6692_vm4, %v31329_v15  ;;  %6780 = vst.msk [vmem:[#allocation3 + $0x2c8] sm:$0x3] %vm6692_vm4, %v31329_v15 }
 0x465   :  { %23343 = vmatmul.mubr.msk.f32.gmra.mrb[8].mxu0 %vm116_vm1, %v5853_v44  ;;  %6783 = vst.msk [vmem:[#allocation3 + $0x2e0] sm:$0x3] %vm6692_vm4, %v31329_v15  ;;  %6786 = vst.msk [vmem:[#allocation3 + $0x2f8] sm:$0x3] %vm6692_vm4, %v31329_v15 }
 0x466   :  { %23345 = vmatprep.mubr.msk.f32.mxu0 %vm116_vm1, %v5854_v45  ;;  %6789 = vst.msk [vmem:[#allocation3 + $0x310] sm:$0x3] %vm6692_vm4, %v31329_v15  ;;  %6792 = vst.msk [vmem:[#allocation3 + $0x328] sm:$0x3] %vm6692_vm4, %v31329_v15 }
 0x467   :  { %6795 = vst.msk [vmem:[#allocation3 + $0x340] sm:$0x3] %vm6692_vm4, %v31329_v15  ;;  %6798 = vst.msk [vmem:[#allocation3 + $0x358] sm:$0x3] %vm6692_vm4, %v31329_v15 }
 0x469   :  { %23346 = vmatmul.mubr.msk.f32.gmra.mrb[10].mxu0 %vm116_vm1, %v5855_v46 }
 0x46a   :  { %23348 = vmatprep.mubr.msk.f32.mxu0 %vm116_vm1, %v5856_v47 }
 0x46d   :  { %23349 = vmatmul.mubr.msk.f32.gmra.mrb[12].mxu0 %vm116_vm1, %v5857_v50 }
 0x46e   :  { %23351 = vmatprep.mubr.msk.f32.mxu0 %vm116_vm1, %v5858_v51 }
 0x471   :  { %23352 = vmatmul.mubr.msk.f32.gmra.mrb[14].mxu0 %vm116_vm1, %v5859_v52 }
 0x472   :  { %23354 = vmatprep.mubr.msk.f32.mxu0 %vm116_vm1, %v5860_v53 }
 0x475   :  { %23355 = vmatmul.mubr.msk.f32.gmra.mrb[16].mxu0 %vm116_vm1, %v5861_v54 }
 0x476   :  { %23357 = vmatprep.mubr.msk.f32.mxu0 %vm116_vm1, %v5862_v55 }
 0x479   :  { %23358 = vmatmul.mubr.msk.f32.gmra.mrb[18].mxu0 %vm116_vm1, %v5863_v56 }
 0x47a   :  { %23360 = vmatprep.mubr.msk.f32.mxu0 %vm116_vm1, %v5864_v57 }
 0x47d   :  { %23361 = vmatmul.mubr.msk.f32.gmra.mrb[20].mxu0 %vm116_vm1, %v5865_v58 }
 0x47e   :  { %23363 = vmatprep.mubr.msk.f32.mxu0 %vm116_vm1, %v5866_v59 }
 0x481   :  { %23364 = vmatmul.mubr.msk.f32.gmra.mrb[22].mxu0 %vm116_vm1, %v5867_v60 }
 0x482   :  { %23366 = vmatprep.mubr.msk.f32.mxu0 %vm116_vm1, %v5868_v61 }
 0x485   :  { %23367 = vmatmul.mubr.msk.f32.gmra.mrb[24].mxu0 %vm116_vm1, %v5869_v62 }
 0x486   :  { %23369 = vmatprep.mubr.msk.f32.mxu0 %vm116_vm1, %v5870_v63 }
 0x489   :  { %23370 = vmatmul.mubr.msk.f32.gmra.mrb[26].mxu0 %vm116_vm1, %v5871_v36 }
 0x48a   :  { %23372 = vmatprep.mubr.msk.f32.mxu0 %vm116_vm1, %v27789_v11  ;;  %v5880_v11 = vld [vmem:[#allocation2 + $0x212] sm:$0xff] }
 0x48d   :  { %23373 = vmatmul.mubr.msk.f32.gmra.mrb[28].mxu0 %vm116_vm1, %v31328_v4 }
 0x48e   :  { %23375 = vmatprep.mubr.msk.f32.mxu0 %vm116_vm1, %v5874_v3 }
 0x491   :  { %23376 = vmatmul.mubr.msk.f32.gmra.mrb[30].mxu0 %vm116_vm1, %v5875_v6 }
 0x492   :  { %23378 = vmatprep.mubr.msk.f32.mxu0 %vm116_vm1, %v5876_v2 }
 0x495   :  { %23379 = vmatmul.mubr.msk.f32.gmra.mrb[32].mxu0 %vm116_vm1, %v5877_v35 }
 0x496   :  { %23381 = vmatprep.mubr.msk.f32.mxu0 %vm116_vm1, %v5878_v0 }
 0x499   :  { %23382 = vmatmul.mubr.msk.f32.gmra.mrb[34].mxu0 %vm116_vm1, %v5879_v48 }
 0x49a   :  { %23384 = vmatprep.mubr.msk.f32.mxu0 %vm116_vm1, %v5880_v11 }
 0x49d   :  { %23385 = vmatmul.mubr.msk.f32.gmra.mrb[36].mxu0 %vm116_vm1, %v5881_v7 }
 0x49e   :  { %23387 = vmatprep.mubr.msk.f32.mxu0 %vm116_vm1, %v5882_v9 }
 0x4a1   :  { %23388 = vmatmul.mubr.msk.f32.gmra.mrb[38].mxu0 %vm116_vm1, %v5883_v49 }
 0x4a2   :  { %23390 = vmatprep.mubr.msk.f32.mxu0 %vm116_vm1, %v5884_v8 }
 0x4a5   :  { %23391 = vmatmul.mubr.msk.f32.gmra.mrb[40].mxu0 %vm116_vm1, %v5885_v13 }
 0x4a6   :  { %23393 = vmatprep.mubr.msk.f32.mxu0 %vm116_vm1, %v5886_v14 }
 0x4a9   :  { %23394 = vmatmul.mubr.msk.f32.gmra.mrb[42].mxu0 %vm116_vm1, %v5887_v5 }
 0x4aa   :  { %23396 = vmatprep.mubr.msk.f32.mxu0 %vm116_vm1, %v5888_v10 }
 0x4ad   :  { %23397 = vmatmul.mubr.msk.f32.gmra.mrb[44].mxu0 %vm116_vm1, %v28117_v12 }
 0x4ae   :  { %23399 = vmatprep.mubr.msk.f32.mxu0 %vm116_vm1, %v5890_v17 }
 0x4b1   :  { %23400 = vmatmul.mubr.msk.f32.gmra.mrb[46].mxu0 %vm116_vm1, %v5891_v18 }
 0x4b2   :  { %23402 = vmatprep.mubr.msk.f32.mxu0 %vm116_vm1, %v5892_v19 }
 0x4b5   :  { %23403 = vmatmul.mubr.msk.f32.gmra.mrb[48].mxu0 %vm116_vm1, %v5893_v21 }
 0x4b6   :  { %23405 = vmatprep.mubr.msk.f32.mxu0 %vm116_vm1, %v5894_v22 }
 0x4b9   :  { %23406 = vmatmul.mubr.msk.f32.gmra.mrb[50].mxu0 %vm116_vm1, %v5895_v23 }
 0x4ba   :  { %23408 = vmatprep.mubr.msk.f32.mxu0 %vm116_vm1, %v5896_v24 }
 0x4bd   :  { %23409 = vmatmul.mubr.msk.f32.gmra.mrb[52].mxu0 %vm116_vm1, %v5897_v25 }
 0x4be   :  { %23411 = vmatprep.mubr.msk.f32.mxu0 %vm116_vm1, %v5898_v26 }
 0x4c1   :  { %23412 = vmatmul.mubr.msk.f32.gmra.mrb[54].mxu0 %vm116_vm1, %v5899_v27 }
 0x4c2   :  { %23414 = vmatprep.mubr.msk.f32.mxu0 %vm116_vm1, %v5900_v28 }
 0x4c5   :  { %23415 = vmatmul.mubr.msk.f32.gmra.mrb[56].mxu0 %vm116_vm1, %v5901_v29 }
 0x4c6   :  { %23417 = vmatprep.mubr.msk.f32.mxu0 %vm116_vm1, %v5902_v30 }
 0x4c9   :  { %23418 = vmatmul.mubr.msk.f32.gmra.mrb[58].mxu0 %vm116_vm1, %v5903_v31 }
 0x4ca   :  { %23420 = vmatprep.mubr.msk.f32.mxu0 %vm116_vm1, %v27857_v16  ;;  %v28371_v16 = vld [vmem:[%s31019_s4] ss:$0 sm:$0xff]  ;;  %s20812_s4 = sld [smem:[#allocation7 + $0x2]] }
 0x4cd   :  { %23421 = vmatmul.mubr.msk.f32.gmra.mrb[60].mxu0 %vm116_vm1, %v27863_v1 }
 0x4ce   :  { %23423 = vmatprep.mubr.msk.f32.mxu0 %vm116_vm1, %v5906_v32 }
 0x4d0   :  { %s21082_s3 = sshll.u32 %s20812_s4, 6 }
 0x4d1   :  { %23424 = vmatmul.mubr.msk.f32.gmra.mrb[62].mxu0 %vm116_vm1, %v5907_v33 }
 0x4d2   :  { %23428 = vmatprep.mubr.msk.f32.mxu0 %vm6689_vm3, %v6929_v34 }
 0x4d5   :  { %23429 = vmatmul.mubr.msk.f32.vlgmr.msra.gmra.mrb[64].mxu0 %vm6689_vm3, %v6930_v37 }
 0x528   :  { %v23332_v1 = vpop.f32.mrb[0].mxu0 }
 0x529   :  { %v6562_v39 = vadd.f32 %v23332_v1, %v28371_v16  ;;  %v6171_v40 = vpop.f32.mrb[1].mxu0 }
 0x52a   :  { %v6561_v41 = vadd.f32 %v28371_v16, %v6171_v40 }
 0x52b   :  { %v6626_v42 = vmax.f32 %v6562_v39, 0.0 }
 0x52c   :  { %v6625_v43 = vmax.f32 %v6561_v41, 0.0  ;;  %v23335_v44 = vpop.f32.mrb[2].mxu0 }
 0x52d   :  { %6801 = vst.msk [vmem:[#allocation3 + $0x21] sm:$0xff] %vm6689_vm3, %v6626_v42  ;;  %v6564_v45 = vadd.f32 %v23335_v44, %v28371_v16  ;;  %v6181_v46 = vpop.f32.mrb[3].mxu0 }
 0x52e   :  { %6800 = vst.msk [vmem:[#allocation3 + $0x19] sm:$0xff] %vm6689_vm3, %v6625_v43  ;;  %v6563_v47 = vadd.f32 %v28371_v16, %v6181_v46 }
 0x52f   :  { %v6628_v50 = vmax.f32 %v6564_v45, 0.0 }
 0x530   :  { %v6627_v51 = vmax.f32 %v6563_v47, 0.0  ;;  %v23338_v52 = vpop.f32.mrb[4].mxu0 }
 0x531   :  { %6803 = vst.msk [vmem:[#allocation3 + $0x39] sm:$0xff] %vm6689_vm3, %v6628_v50  ;;  %v6566_v53 = vadd.f32 %v23338_v52, %v28371_v16  ;;  %v6191_v54 = vpop.f32.mrb[5].mxu0 }
 0x532   :  { %6802 = vst.msk [vmem:[#allocation3 + $0x31] sm:$0xff] %vm6689_vm3, %v6627_v51  ;;  %v6565_v55 = vadd.f32 %v28371_v16, %v6191_v54 }
 0x533   :  { %v6630_v56 = vmax.f32 %v6566_v53, 0.0 }
 0x534   :  { %v6629_v57 = vmax.f32 %v6565_v55, 0.0  ;;  %v23341_v58 = vpop.f32.mrb[6].mxu0  ;;  %v6932_v63 = vld [vmem:[#allocation3 + $0x21] sm:$0xff] }
 0x535   :  { %6805 = vst.msk [vmem:[#allocation3 + $0x51] sm:$0xff] %vm6689_vm3, %v6630_v56  ;;  %v6568_v59 = vadd.f32 %v23341_v58, %v28371_v16  ;;  %v6201_v60 = vpop.f32.mrb[7].mxu0  ;;  %v6931_v61 = vld [vmem:[#allocation3 + $0x19] sm:$0xff] }
 0x536   :  { %6804 = vst.msk [vmem:[#allocation3 + $0x49] sm:$0xff] %vm6689_vm3, %v6629_v57  ;;  %v6567_v62 = vadd.f32 %v28371_v16, %v6201_v60  ;;  %23431 = vmatprep.mubr.msk.f32.mxu0 %vm6689_vm3, %v6931_v61 }
 0x537   :  { %v6632_v36 = vmax.f32 %v6568_v59, 0.0  ;;  %23432 = vmatmul.mubr.msk.f32.gmra.mrb[66].mxu0 %vm6689_vm3, %v6932_v63 }
 0x538   :  { %v6631_v3 = vmax.f32 %v6567_v62, 0.0  ;;  %v23344_v4 = vpop.f32.mrb[8].mxu0  ;;  %v6934_v48 = vld [vmem:[#allocation3 + $0x39] sm:$0xff] }
 0x539   :  { %6807 = vst.msk [vmem:[#allocation3 + $0x69] sm:$0xff] %vm6689_vm3, %v6632_v36  ;;  %v6570_v6 = vadd.f32 %v23344_v4, %v28371_v16  ;;  %v6211_v2 = vpop.f32.mrb[9].mxu0  ;;  %v6933_v35 = vld [vmem:[#allocation3 + $0x31] sm:$0xff] }
 0x53a   :  { %6806 = vst.msk [vmem:[#allocation3 + $0x61] sm:$0xff] %vm6689_vm3, %v6631_v3  ;;  %v6569_v0 = vadd.f32 %v28371_v16, %v6211_v2  ;;  %23434 = vmatprep.mubr.msk.f32.mxu0 %vm6689_vm3, %v6933_v35 }
 0x53b   :  { %v6634_v11 = vmax.f32 %v6570_v6, 0.0  ;;  %23435 = vmatmul.mubr.msk.f32.gmra.mrb[68].mxu0 %vm6689_vm3, %v6934_v48 }
 0x53c   :  { %v6633_v7 = vmax.f32 %v6569_v0, 0.0  ;;  %v23347_v9 = vpop.f32.mrb[10].mxu0  ;;  %v6936_v5 = vld [vmem:[#allocation3 + $0x51] sm:$0xff] }
 0x53d   :  { %6809 = vst.msk [vmem:[#allocation3 + $0x81] sm:$0xff] %vm6689_vm3, %v6634_v11  ;;  %v6572_v49 = vadd.f32 %v23347_v9, %v28371_v16  ;;  %v6221_v8 = vpop.f32.mrb[11].mxu0  ;;  %v6935_v13 = vld [vmem:[#allocation3 + $0x49] sm:$0xff] }
 0x53e   :  { %6808 = vst.msk [vmem:[#allocation3 + $0x79] sm:$0xff] %vm6689_vm3, %v6633_v7  ;;  %v6571_v14 = vadd.f32 %v28371_v16, %v6221_v8  ;;  %23437 = vmatprep.mubr.msk.f32.mxu0 %vm6689_vm3, %v6935_v13 }
 0x53f   :  { %v6636_v10 = vmax.f32 %v6572_v49, 0.0  ;;  %23438 = vmatmul.mubr.msk.f32.gmra.mrb[70].mxu0 %vm6689_vm3, %v6936_v5 }
 0x540   :  { %v6635_v12 = vmax.f32 %v6571_v14, 0.0  ;;  %v23350_v17 = vpop.f32.mrb[12].mxu0  ;;  %v6938_v22 = vld [vmem:[#allocation3 + $0x69] sm:$0xff] }
 0x541   :  { %6811 = vst.msk [vmem:[#allocation3 + $0x99] sm:$0xff] %vm6689_vm3, %v6636_v10  ;;  %v6574_v18 = vadd.f32 %v23350_v17, %v28371_v16  ;;  %v6231_v19 = vpop.f32.mrb[13].mxu0  ;;  %v6937_v20 = vld [vmem:[#allocation3 + $0x61] sm:$0xff] }
 0x542   :  { %6810 = vst.msk [vmem:[#allocation3 + $0x91] sm:$0xff] %vm6689_vm3, %v6635_v12  ;;  %v6573_v21 = vadd.f32 %v28371_v16, %v6231_v19  ;;  %23440 = vmatprep.mubr.msk.f32.mxu0 %vm6689_vm3, %v6937_v20 }
 0x543   :  { %v6638_v23 = vmax.f32 %v6574_v18, 0.0  ;;  %23441 = vmatmul.mubr.msk.f32.gmra.mrb[72].mxu0 %vm6689_vm3, %v6938_v22  ;;  %v28451_v18 = vld [vmem:[%s31020_s5 + $0x10] sm:$0xff] }
 0x544   :  { %v6637_v24 = vmax.f32 %v6573_v21, 0.0  ;;  %v23353_v25 = vpop.f32.mrb[14].mxu0  ;;  %v6940_v30 = vld [vmem:[#allocation3 + $0x81] sm:$0xff] }
 0x545   :  { %6813 = vst.msk [vmem:[#allocation3 + $0xb1] sm:$0xff] %vm6689_vm3, %v6638_v23  ;;  %v6576_v26 = vadd.f32 %v23353_v25, %v28371_v16  ;;  %v6241_v27 = vpop.f32.mrb[15].mxu0  ;;  %v6939_v28 = vld [vmem:[#allocation3 + $0x79] sm:$0xff] }
 0x546   :  { %6812 = vst.msk [vmem:[#allocation3 + $0xa9] sm:$0xff] %vm6689_vm3, %v6637_v24  ;;  %v6575_v29 = vadd.f32 %v28371_v16, %v6241_v27  ;;  %23443 = vmatprep.mubr.msk.f32.mxu0 %vm6689_vm3, %v6939_v28 }
 0x547   :  { %v6640_v31 = vmax.f32 %v6576_v26, 0.0  ;;  %23444 = vmatmul.mubr.msk.f32.gmra.mrb[74].mxu0 %vm6689_vm3, %v6940_v30 }
 0x548   :  { %v6639_v32 = vmax.f32 %v6575_v29, 0.0  ;;  %v23356_v33 = vpop.f32.mrb[16].mxu0  ;;  %v6942_v40 = vld [vmem:[#allocation3 + $0x99] sm:$0xff] }
 0x549   :  { %6815 = vst.msk [vmem:[#allocation3 + $0xc9] sm:$0xff] %vm6689_vm3, %v6640_v31  ;;  %v6578_v34 = vadd.f32 %v23356_v33, %v28371_v16  ;;  %v6251_v37 = vpop.f32.mrb[17].mxu0  ;;  %v6941_v1 = vld [vmem:[#allocation3 + $0x91] sm:$0xff] }
 0x54a   :  { %6814 = vst.msk [vmem:[#allocation3 + $0xc1] sm:$0xff] %vm6689_vm3, %v6639_v32  ;;  %v6577_v39 = vadd.f32 %v28371_v16, %v6251_v37  ;;  %23446 = vmatprep.mubr.msk.f32.mxu0 %vm6689_vm3, %v6941_v1 }
 0x54b   :  { %v6642_v41 = vmax.f32 %v6578_v34, 0.0  ;;  %23447 = vmatmul.mubr.msk.f32.gmra.mrb[76].mxu0 %vm6689_vm3, %v6942_v40 }
 0x54c   :  { %v6641_v42 = vmax.f32 %v6577_v39, 0.0  ;;  %v23359_v43 = vpop.f32.mrb[18].mxu0  ;;  %v6944_v50 = vld [vmem:[#allocation3 + $0xb1] sm:$0xff] }
 0x54d   :  { %6817 = vst.msk [vmem:[#allocation3 + $0xe1] sm:$0xff] %vm6689_vm3, %v6642_v41  ;;  %v6580_v44 = vadd.f32 %v23359_v43, %v28371_v16  ;;  %v6261_v45 = vpop.f32.mrb[19].mxu0  ;;  %v6943_v46 = vld [vmem:[#allocation3 + $0xa9] sm:$0xff] }
 0x54e   :  { %6816 = vst.msk [vmem:[#allocation3 + $0xd9] sm:$0xff] %vm6689_vm3, %v6641_v42  ;;  %v6579_v47 = vadd.f32 %v28371_v16, %v6261_v45  ;;  %23449 = vmatprep.mubr.msk.f32.mxu0 %vm6689_vm3, %v6943_v46 }
 0x54f   :  { %v6644_v51 = vmax.f32 %v6580_v44, 0.0  ;;  %23450 = vmatmul.mubr.msk.f32.gmra.mrb[78].mxu0 %vm6689_vm3, %v6944_v50 }
 0x550   :  { %v6643_v52 = vmax.f32 %v6579_v47, 0.0  ;;  %v23362_v53 = vpop.f32.mrb[20].mxu0  ;;  %v6946_v58 = vld [vmem:[#allocation3 + $0xc9] sm:$0xff] }
 0x551   :  { %6819 = vst.msk [vmem:[#allocation3 + $0xf9] sm:$0xff] %vm6689_vm3, %v6644_v51  ;;  %v6582_v54 = vadd.f32 %v23362_v53, %v28371_v16  ;;  %v6271_v55 = vpop.f32.mrb[21].mxu0  ;;  %v6945_v56 = vld [vmem:[#allocation3 + $0xc1] sm:$0xff] }
 0x552   :  { %6818 = vst.msk [vmem:[#allocation3 + $0xf1] sm:$0xff] %vm6689_vm3, %v6643_v52  ;;  %v6581_v57 = vadd.f32 %v28371_v16, %v6271_v55  ;;  %23452 = vmatprep.mubr.msk.f32.mxu0 %vm6689_vm3, %v6945_v56  ;;  %v6961_v52 = vld [vmem:[#allocation3 + $0x1b1] sm:$0xff] }
 0x553   :  { %v6646_v59 = vmax.f32 %v6582_v54, 0.0  ;;  %23453 = vmatmul.mubr.msk.f32.gmra.mrb[80].mxu0 %vm6689_vm3, %v6946_v58  ;;  %v6962_v58 = vld [vmem:[#allocation3 + $0x1b9] sm:$0xff] }
 0x554   :  { %v6645_v60 = vmax.f32 %v6581_v57, 0.0  ;;  %v23365_v61 = vpop.f32.mrb[22].mxu0  ;;  %v6948_v4 = vld [vmem:[#allocation3 + $0xe1] sm:$0xff] }
 0x555   :  { %6821 = vst.msk [vmem:[#allocation3 + $0x111] sm:$0xff] %vm6689_vm3, %v6646_v59  ;;  %v6584_v62 = vadd.f32 %v23365_v61, %v28371_v16  ;;  %v6281_v63 = vpop.f32.mrb[23].mxu0  ;;  %v6947_v36 = vld [vmem:[#allocation3 + $0xd9] sm:$0xff] }
 0x556   :  { %6820 = vst.msk [vmem:[#allocation3 + $0x109] sm:$0xff] %vm6689_vm3, %v6645_v60  ;;  %v6583_v3 = vadd.f32 %v28371_v16, %v6281_v63  ;;  %23455 = vmatprep.mubr.msk.f32.mxu0 %vm6689_vm3, %v6947_v36 }
 0x557   :  { %v6648_v6 = vmax.f32 %v6584_v62, 0.0  ;;  %23456 = vmatmul.mubr.msk.f32.gmra.mrb[82].mxu0 %vm6689_vm3, %v6948_v4 }
 0x558   :  { %v6647_v2 = vmax.f32 %v6583_v3, 0.0  ;;  %v23368_v35 = vpop.f32.mrb[24].mxu0  ;;  %v6950_v9 = vld [vmem:[#allocation3 + $0xf9] sm:$0xff] }
 0x559   :  { %6823 = vst.msk [vmem:[#allocation3 + $0x129] sm:$0xff] %vm6689_vm3, %v6648_v6  ;;  %v6586_v0 = vadd.f32 %v23368_v35, %v28371_v16  ;;  %v6291_v48 = vpop.f32.mrb[25].mxu0  ;;  %v6949_v11 = vld [vmem:[#allocation3 + $0xf1] sm:$0xff] }
 0x55a   :  { %6822 = vst.msk [vmem:[#allocation3 + $0x121] sm:$0xff] %vm6689_vm3, %v6647_v2  ;;  %v6585_v7 = vadd.f32 %v28371_v16, %v6291_v48  ;;  %23458 = vmatprep.mubr.msk.f32.mxu0 %vm6689_vm3, %v6949_v11 }
 0x55b   :  { %v6650_v49 = vmax.f32 %v6586_v0, 0.0  ;;  %23459 = vmatmul.mubr.msk.f32.gmra.mrb[84].mxu0 %vm6689_vm3, %v6950_v9 }
 0x55c   :  { %v6649_v8 = vmax.f32 %v6585_v7, 0.0  ;;  %v23371_v13 = vpop.f32.mrb[26].mxu0  ;;  %v6952_v17 = vld [vmem:[#allocation3 + $0x111] sm:$0xff] }
 0x55d   :  { %6825 = vst.msk [vmem:[#allocation3 + $0x141] sm:$0xff] %vm6689_vm3, %v6650_v49  ;;  %v6588_v14 = vadd.f32 %v23371_v13, %v28371_v16  ;;  %v6301_v5 = vpop.f32.mrb[27].mxu0  ;;  %v6951_v10 = vld [vmem:[#allocation3 + $0x109] sm:$0xff] }
 0x55e   :  { %6824 = vst.msk [vmem:[#allocation3 + $0x139] sm:$0xff] %vm6689_vm3, %v6649_v8  ;;  %v6587_v12 = vadd.f32 %v28371_v16, %v6301_v5  ;;  %23461 = vmatprep.mubr.msk.f32.mxu1 %vm6689_vm3, %v6951_v10 }
 0x55f   :  { %v6652_v19 = vmax.f32 %v6588_v14, 0.0  ;;  %23462 = vmatmul.mubr.msk.f32.vlgmr.msra.gmra.mrb[0].mxu1 %vm6689_vm3, %v6952_v17 }
 0x560   :  { %v6651_v20 = vmax.f32 %v6587_v12, 0.0  ;;  %23525 = vmatpush3.msra.mxu1 %v28365_v38  ;;  %v23374_v21 = vpop.f32.mrb[28].mxu0  ;;  %v6954_v26 = vld [vmem:[#allocation3 + $0x129] sm:$0xff] }
 0x561   :  { %6827 = vst.msk [vmem:[#allocation3 + $0x159] sm:$0xff] %vm6689_vm3, %v6652_v19  ;;  %v6590_v22 = vadd.f32 %v23374_v21, %v28371_v16  ;;  %v6311_v23 = vpop.f32.mrb[29].mxu0  ;;  %v6953_v24 = vld [vmem:[#allocation3 + $0x121] sm:$0xff]  ;;  %23622 = vmatprep.subr.mxu1 %v28451_v18 }
 0x562   :  { %6826 = vst.msk [vmem:[#allocation3 + $0x151] sm:$0xff] %vm6689_vm3, %v6651_v20  ;;  %v6589_v25 = vadd.f32 %v28371_v16, %v6311_v23  ;;  %23464 = vmatprep.mubr.msk.f32.mxu1 %vm6689_vm3, %v6953_v24 }
 0x563   :  { %v6654_v27 = vmax.f32 %v6590_v22, 0.0  ;;  %23465 = vmatmul.mubr.msk.f32.gmra.mrb[2].mxu1 %vm6689_vm3, %v6954_v26 }
 0x564   :  { %v6653_v38 = vmax.f32 %v6589_v25, 0.0  ;;  %v23377_v28 = vpop.f32.mrb[30].mxu0  ;;  %v6956_v33 = vld [vmem:[#allocation3 + $0x141] sm:$0xff] }
 0x565   :  { %6829 = vst.msk [vmem:[#allocation3 + $0x171] sm:$0xff] %vm6689_vm3, %v6654_v27  ;;  %v6592_v29 = vadd.f32 %v23377_v28, %v28371_v16  ;;  %v6321_v30 = vpop.f32.mrb[31].mxu0  ;;  %v6955_v31 = vld [vmem:[#allocation3 + $0x139] sm:$0xff] }
 0x566   :  { %6828 = vst.msk [vmem:[#allocation3 + $0x169] sm:$0xff] %vm6689_vm3, %v6653_v38  ;;  %v6591_v32 = vadd.f32 %v28371_v16, %v6321_v30  ;;  %23467 = vmatprep.mubr.msk.f32.mxu1 %vm6689_vm3, %v6955_v31 }
 0x567   :  { %v6656_v34 = vmax.f32 %v6592_v29, 0.0  ;;  %23468 = vmatmul.mubr.msk.f32.gmra.mrb[4].mxu1 %vm6689_vm3, %v6956_v33 }
 0x568   :  { %v6655_v37 = vmax.f32 %v6591_v32, 0.0  ;;  %v23380_v1 = vpop.f32.mrb[32].mxu0  ;;  %v6958_v43 = vld [vmem:[#allocation3 + $0x159] sm:$0xff] }
 0x569   :  { %6831 = vst.msk [vmem:[#allocation3 + $0x189] sm:$0xff] %vm6689_vm3, %v6656_v34  ;;  %v6594_v39 = vadd.f32 %v23380_v1, %v28371_v16  ;;  %v6331_v40 = vpop.f32.mrb[33].mxu0  ;;  %v6957_v41 = vld [vmem:[#allocation3 + $0x151] sm:$0xff] }
 0x56a   :  { %6830 = vst.msk [vmem:[#allocation3 + $0x181] sm:$0xff] %vm6689_vm3, %v6655_v37  ;;  %v6593_v42 = vadd.f32 %v28371_v16, %v6331_v40  ;;  %23470 = vmatprep.mubr.msk.f32.mxu1 %vm6689_vm3, %v6957_v41 }
 0x56b   :  { %v6658_v44 = vmax.f32 %v6594_v39, 0.0  ;;  %23471 = vmatmul.mubr.msk.f32.gmra.mrb[6].mxu1 %vm6689_vm3, %v6958_v43 }
 0x56c   :  { %v6657_v45 = vmax.f32 %v6593_v42, 0.0  ;;  %v23383_v46 = vpop.f32.mrb[34].mxu0  ;;  %v6960_v54 = vld [vmem:[#allocation3 + $0x171] sm:$0xff] }
 0x56d   :  { %6833 = vst.msk [vmem:[#allocation3 + $0x1d1] sm:$0xff] %vm6689_vm3, %v6658_v44  ;;  %v6596_v47 = vadd.f32 %v23383_v46, %v28371_v16  ;;  %v6341_v50 = vpop.f32.mrb[35].mxu0  ;;  %v6959_v51 = vld [vmem:[#allocation3 + $0x169] sm:$0xff] }
 0x56e   :  { %6832 = vst.msk [vmem:[#allocation3 + $0x1c9] sm:$0xff] %vm6689_vm3, %v6657_v45  ;;  %v6595_v53 = vadd.f32 %v28371_v16, %v6341_v50  ;;  %23473 = vmatprep.mubr.msk.f32.mxu1 %vm6689_vm3, %v6959_v51 }
 0x56f   :  { %v6660_v55 = vmax.f32 %v6596_v47, 0.0  ;;  %23474 = vmatmul.mubr.msk.f32.gmra.mrb[8].mxu1 %vm6689_vm3, %v6960_v54 }
 0x570   :  { %v6659_v56 = vmax.f32 %v6595_v53, 0.0  ;;  %v23386_v57 = vpop.f32.mrb[36].mxu0  ;;  %23476 = vmatprep.mubr.msk.f32.mxu1 %vm6689_vm3, %v6961_v52 }
 0x571   :  { %6835 = vst.msk [vmem:[#allocation3 + $0x1e9] sm:$0xff] %vm6689_vm3, %v6660_v55  ;;  %v6598_v59 = vadd.f32 %v23386_v57, %v28371_v16  ;;  %v6351_v60 = vpop.f32.mrb[37].mxu0 }
 0x572   :  { %6834 = vst.msk [vmem:[#allocation3 + $0x1e1] sm:$0xff] %vm6689_vm3, %v6659_v56  ;;  %v6597_v61 = vadd.f32 %v28371_v16, %v6351_v60 }
 0x573   :  { %v6662_v62 = vmax.f32 %v6598_v59, 0.0  ;;  %23477 = vmatmul.mubr.msk.f32.gmra.mrb[10].mxu1 %vm6689_vm3, %v6962_v58 }
 0x574   :  { %v6661_v63 = vmax.f32 %v6597_v61, 0.0  ;;  %v23389_v36 = vpop.f32.mrb[38].mxu0  ;;  %v6964_v35 = vld [vmem:[#allocation3 + $0x1d1] sm:$0xff] }
 0x575   :  { %6837 = vst.msk [vmem:[#allocation3 + $0x201] sm:$0xff] %vm6689_vm3, %v6662_v62  ;;  %v6600_v3 = vadd.f32 %v23389_v36, %v28371_v16  ;;  %v6361_v4 = vpop.f32.mrb[39].mxu0  ;;  %v6963_v6 = vld [vmem:[#allocation3 + $0x1c9] sm:$0xff] }
 0x576   :  { %6836 = vst.msk [vmem:[#allocation3 + $0x1f9] sm:$0xff] %vm6689_vm3, %v6661_v63  ;;  %v6599_v2 = vadd.f32 %v28371_v16, %v6361_v4  ;;  %23479 = vmatprep.mubr.msk.f32.mxu1 %vm6689_vm3, %v6963_v6 }
 0x577   :  { %v6664_v0 = vmax.f32 %v6600_v3, 0.0  ;;  %23480 = vmatmul.mubr.msk.f32.gmra.mrb[12].mxu1 %vm6689_vm3, %v6964_v35 }
 0x578   :  { %v6663_v48 = vmax.f32 %v6599_v2, 0.0  ;;  %v23392_v11 = vpop.f32.mrb[40].mxu0  ;;  %v6966_v13 = vld [vmem:[#allocation3 + $0x1e9] sm:$0xff] }
 0x579   :  { %6839 = vst.msk [vmem:[#allocation3 + $0x219] sm:$0xff] %vm6689_vm3, %v6664_v0  ;;  %v6602_v7 = vadd.f32 %v23392_v11, %v28371_v16  ;;  %v6371_v9 = vpop.f32.mrb[41].mxu0  ;;  %v6965_v49 = vld [vmem:[#allocation3 + $0x1e1] sm:$0xff] }
 0x57a   :  { %6838 = vst.msk [vmem:[#allocation3 + $0x211] sm:$0xff] %vm6689_vm3, %v6663_v48  ;;  %v6601_v8 = vadd.f32 %v28371_v16, %v6371_v9  ;;  %23482 = vmatprep.mubr.msk.f32.mxu1 %vm6689_vm3, %v6965_v49 }
 0x57b   :  { %v6666_v14 = vmax.f32 %v6602_v7, 0.0  ;;  %23483 = vmatmul.mubr.msk.f32.gmra.mrb[14].mxu1 %vm6689_vm3, %v6966_v13 }
 0x57c   :  { %v6665_v5 = vmax.f32 %v6601_v8, 0.0  ;;  %v23395_v10 = vpop.f32.mrb[42].mxu0  ;;  %v6968_v21 = vld [vmem:[#allocation3 + $0x201] sm:$0xff] }
 0x57d   :  { %6841 = vst.msk [vmem:[#allocation3 + $0x231] sm:$0xff] %vm6689_vm3, %v6666_v14  ;;  %v6604_v12 = vadd.f32 %v23395_v10, %v28371_v16  ;;  %v6381_v17 = vpop.f32.mrb[43].mxu0  ;;  %v6967_v19 = vld [vmem:[#allocation3 + $0x1f9] sm:$0xff] }
 0x57e   :  { %6840 = vst.msk [vmem:[#allocation3 + $0x229] sm:$0xff] %vm6689_vm3, %v6665_v5  ;;  %v6603_v20 = vadd.f32 %v28371_v16, %v6381_v17  ;;  %23485 = vmatprep.mubr.msk.f32.mxu1 %vm6689_vm3, %v6967_v19 }
 0x57f   :  { %v6668_v22 = vmax.f32 %v6604_v12, 0.0  ;;  %23486 = vmatmul.mubr.msk.f32.gmra.mrb[16].mxu1 %vm6689_vm3, %v6968_v21 }
 0x580   :  { %v6667_v23 = vmax.f32 %v6603_v20, 0.0  ;;  %v23398_v24 = vpop.f32.mrb[44].mxu0  ;;  %v6970_v28 = vld [vmem:[#allocation3 + $0x219] sm:$0xff] }
 0x581   :  { %6843 = vst.msk [vmem:[#allocation3 + $0x249] sm:$0xff] %vm6689_vm3, %v6668_v22  ;;  %v6606_v25 = vadd.f32 %v23398_v24, %v28371_v16  ;;  %v6391_v26 = vpop.f32.mrb[45].mxu0  ;;  %v6969_v27 = vld [vmem:[#allocation3 + $0x211] sm:$0xff] }
 0x582   :  { %6842 = vst.msk [vmem:[#allocation3 + $0x241] sm:$0xff] %vm6689_vm3, %v6667_v23  ;;  %v6605_v38 = vadd.f32 %v28371_v16, %v6391_v26  ;;  %23488 = vmatprep.mubr.msk.f32.mxu1 %vm6689_vm3, %v6969_v27 }
 0x583   :  { %v6670_v29 = vmax.f32 %v6606_v25, 0.0  ;;  %23489 = vmatmul.mubr.msk.f32.gmra.mrb[18].mxu1 %vm6689_vm3, %v6970_v28 }
 0x584   :  { %v6669_v30 = vmax.f32 %v6605_v38, 0.0  ;;  %v23401_v31 = vpop.f32.mrb[46].mxu0  ;;  %v6972_v1 = vld [vmem:[#allocation3 + $0x231] sm:$0xff] }
 0x585   :  { %6845 = vst.msk [vmem:[#allocation3 + $0x261] sm:$0xff] %vm6689_vm3, %v6670_v29  ;;  %v6608_v32 = vadd.f32 %v23401_v31, %v28371_v16  ;;  %v6401_v33 = vpop.f32.mrb[47].mxu0  ;;  %v6971_v34 = vld [vmem:[#allocation3 + $0x229] sm:$0xff] }
 0x586   :  { %6844 = vst.msk [vmem:[#allocation3 + $0x259] sm:$0xff] %vm6689_vm3, %v6669_v30  ;;  %v6607_v37 = vadd.f32 %v28371_v16, %v6401_v33  ;;  %23491 = vmatprep.mubr.msk.f32.mxu1 %vm6689_vm3, %v6971_v34 }
 0x587   :  { %v6672_v39 = vmax.f32 %v6608_v32, 0.0  ;;  %23492 = vmatmul.mubr.msk.f32.gmra.mrb[20].mxu1 %vm6689_vm3, %v6972_v1 }
 0x588   :  { %v6671_v40 = vmax.f32 %v6607_v37, 0.0  ;;  %v23404_v41 = vpop.f32.mrb[48].mxu0  ;;  %v6974_v46 = vld [vmem:[#allocation3 + $0x249] sm:$0xff] }
 0x589   :  { %6847 = vst.msk [vmem:[#allocation3 + $0x279] sm:$0xff] %vm6689_vm3, %v6672_v39  ;;  %v6610_v42 = vadd.f32 %v23404_v41, %v28371_v16  ;;  %v6411_v43 = vpop.f32.mrb[49].mxu0  ;;  %v6973_v44 = vld [vmem:[#allocation3 + $0x241] sm:$0xff] }
 0x58a   :  { %6846 = vst.msk [vmem:[#allocation3 + $0x271] sm:$0xff] %vm6689_vm3, %v6671_v40  ;;  %v6609_v45 = vadd.f32 %v28371_v16, %v6411_v43  ;;  %23494 = vmatprep.mubr.msk.f32.mxu1 %vm6689_vm3, %v6973_v44 }
 0x58b   :  { %v6674_v47 = vmax.f32 %v6610_v42, 0.0  ;;  %23495 = vmatmul.mubr.msk.f32.gmra.mrb[22].mxu1 %vm6689_vm3, %v6974_v46 }
 0x58c   :  { %v6673_v50 = vmax.f32 %v6609_v45, 0.0  ;;  %v23407_v51 = vpop.f32.mrb[50].mxu0  ;;  %v6976_v56 = vld [vmem:[#allocation3 + $0x261] sm:$0xff] }
 0x58d   :  { %6849 = vst.msk [vmem:[#allocation3 + $0x291] sm:$0xff] %vm6689_vm3, %v6674_v47  ;;  %v6612_v52 = vadd.f32 %v23407_v51, %v28371_v16  ;;  %v6421_v53 = vpop.f32.mrb[51].mxu0  ;;  %v6975_v54 = vld [vmem:[#allocation3 + $0x259] sm:$0xff] }
 0x58e   :  { %6848 = vst.msk [vmem:[#allocation3 + $0x289] sm:$0xff] %vm6689_vm3, %v6673_v50  ;;  %v6611_v55 = vadd.f32 %v28371_v16, %v6421_v53  ;;  %23497 = vmatprep.mubr.msk.f32.mxu1 %vm6689_vm3, %v6975_v54  ;;  %v6864_v50 = vld [vmem:[#allocation3] sm:$0xff]  ;;  %v28578_v53 = vld [vmem:[%s31020_s5 + $0x18] sm:$0xff] }
 0x58f   :  { %v6676_v57 = vmax.f32 %v6612_v52, 0.0  ;;  %23498 = vmatmul.mubr.msk.f32.gmra.mrb[24].mxu1 %vm6689_vm3, %v6976_v56  ;;  %v6865_v52 = vld [vmem:[#allocation3 + $0x8] sm:$0xff]  ;;  %v28581_v54 = vld [vmem:[#allocation3 + $0x18] sm:$0xff]  ;;  %v28591_v56 = vld [vmem:[#allocation3 + $0x30] sm:$0xff] }
 0x590   :  { %v6675_v58 = vmax.f32 %v6611_v55, 0.0  ;;  %v23410_v59 = vpop.f32.mrb[52].mxu0  ;;  %v6978_v36 = vld [vmem:[#allocation3 + $0x279] sm:$0xff] }
 0x591   :  { %6851 = vst.msk [vmem:[#allocation3 + $0x2a9] sm:$0xff] %vm6689_vm3, %v6676_v57  ;;  %v6614_v60 = vadd.f32 %v23410_v59, %v28371_v16  ;;  %v6431_v61 = vpop.f32.mrb[53].mxu0  ;;  %v6977_v62 = vld [vmem:[#allocation3 + $0x271] sm:$0xff]  ;;  %v28587_v55 = vld [vmem:[#allocation3 + $0x20] sm:$0xff] }
 0x592   :  { %6850 = vst.msk [vmem:[#allocation3 + $0x2a1] sm:$0xff] %vm6689_vm3, %v6675_v58  ;;  %v6613_v63 = vadd.f32 %v28371_v16, %v6431_v61  ;;  %23500 = vmatprep.mubr.msk.f32.mxu1 %vm6689_vm3, %v6977_v62  ;;  %v28595_v57 = vld [vmem:[#allocation3 + $0x38] sm:$0xff]  ;;  %v28603_v58 = vld [vmem:[#allocation3 + $0x50] sm:$0xff]  ;;  %v28607_v59 = vld [vmem:[#allocation3 + $0x60] sm:$0xff] }
 0x593   :  { %v6678_v3 = vmax.f32 %v6614_v60, 0.0  ;;  %23501 = vmatmul.mubr.msk.f32.gmra.mrb[26].mxu1 %vm6689_vm3, %v6978_v36  ;;  %v28611_v60 = vld [vmem:[#allocation3 + $0x68] sm:$0xff]  ;;  %v28615_v61 = vld [vmem:[#allocation3 + $0x78] sm:$0xff]  ;;  %v28619_v62 = vld [vmem:[#allocation3 + $0x80] sm:$0xff] }
 0x594   :  { %v6677_v4 = vmax.f32 %v6613_v63, 0.0  ;;  %v23413_v6 = vpop.f32.mrb[54].mxu0  ;;  %v6980_v11 = vld [vmem:[#allocation3 + $0x291] sm:$0xff] }
 0x595   :  { %6853 = vst.msk [vmem:[#allocation3 + $0x2c1] sm:$0xff] %vm6689_vm3, %v6678_v3  ;;  %v6616_v2 = vadd.f32 %v23413_v6, %v28371_v16  ;;  %v6441_v35 = vpop.f32.mrb[55].mxu0  ;;  %v6979_v0 = vld [vmem:[#allocation3 + $0x289] sm:$0xff]  ;;  %v28627_v36 = vld [vmem:[#allocation3 + $0x98] sm:$0xff]  ;;  %v28639_v6 = vld [vmem:[#allocation3 + $0xc0] sm:$0xff] }
 0x596   :  { %6852 = vst.msk [vmem:[#allocation3 + $0x2b9] sm:$0xff] %vm6689_vm3, %v6677_v4  ;;  %v6615_v48 = vadd.f32 %v28371_v16, %v6441_v35  ;;  %23503 = vmatprep.mubr.msk.f32.mxu1 %vm6689_vm3, %v6979_v0  ;;  %v28623_v63 = vld [vmem:[#allocation3 + $0x90] sm:$0xff]  ;;  %v28631_v3 = vld [vmem:[#allocation3 + $0xa8] sm:$0xff]  ;;  %v28647_v35 = vld [vmem:[#allocation3 + $0xd8] sm:$0xff] }
 0x597   :  { %v6680_v7 = vmax.f32 %v6616_v2, 0.0  ;;  %23504 = vmatmul.mubr.msk.f32.gmra.mrb[28].mxu1 %vm6689_vm3, %v6980_v11  ;;  %v28635_v4 = vld [vmem:[#allocation3 + $0xb0] sm:$0xff]  ;;  %v28643_v2 = vld [vmem:[#allocation3 + $0xc8] sm:$0xff]  ;;  %v28651_v0 = vld [vmem:[#allocation3 + $0xe0] sm:$0xff] }
 0x598   :  { %v6679_v9 = vmax.f32 %v6615_v48, 0.0  ;;  %v23416_v49 = vpop.f32.mrb[56].mxu0  ;;  %v6982_v10 = vld [vmem:[#allocation3 + $0x2a9] sm:$0xff]  ;;  %v28659_v11 = vld [vmem:[#allocation3 + $0xf8] sm:$0xff] }
 0x599   :  { %6855 = vst.msk [vmem:[#allocation3 + $0x2d9] sm:$0xff] %vm6689_vm3, %v6680_v7  ;;  %v6618_v8 = vadd.f32 %v23416_v49, %v28371_v16  ;;  %v6451_v13 = vpop.f32.mrb[57].mxu0  ;;  %v6981_v14 = vld [vmem:[#allocation3 + $0x2a1] sm:$0xff]  ;;  %v28655_v48 = vld [vmem:[#allocation3 + $0xf0] sm:$0xff] }
 0x59a   :  { %6854 = vst.msk [vmem:[#allocation3 + $0x2d1] sm:$0xff] %vm6689_vm3, %v6679_v9  ;;  %v6617_v5 = vadd.f32 %v28371_v16, %v6451_v13  ;;  %23506 = vmatprep.mubr.msk.f32.mxu1 %vm6689_vm3, %v6981_v14  ;;  %v28663_v7 = vld [vmem:[#allocation3 + $0x108] sm:$0xff]  ;;  %v28667_v9 = vld [vmem:[#allocation3 + $0x110] sm:$0xff]  ;;  %v28671_v49 = vld [vmem:[#allocation3 + $0x120] sm:$0xff] }
 0x59b   :  { %v6682_v12 = vmax.f32 %v6618_v8, 0.0  ;;  %23507 = vmatmul.mubr.msk.f32.gmra.mrb[30].mxu1 %vm6689_vm3, %v6982_v10  ;;  %v28675_v8 = vld [vmem:[#allocation3 + $0x128] sm:$0xff]  ;;  %v28679_v13 = vld [vmem:[#allocation3 + $0x138] sm:$0xff]  ;;  %v28683_v14 = vld [vmem:[#allocation3 + $0x140] sm:$0xff] }
 0x59c   :  { %v6681_v17 = vmax.f32 %v6617_v5, 0.0  ;;  %v23419_v19 = vpop.f32.mrb[58].mxu0  ;;  %v6984_v24 = vld [vmem:[#allocation3 + $0x2c1] sm:$0xff]  ;;  %v28687_v5 = vld [vmem:[#allocation3 + $0x150] sm:$0xff]  ;;  %v28691_v10 = vld [vmem:[#allocation3 + $0x158] sm:$0xff] }
 0x59d   :  { %6857 = vst.msk [vmem:[#allocation3 + $0x2f1] sm:$0xff] %vm6689_vm3, %v6682_v12  ;;  %v6620_v20 = vadd.f32 %v23419_v19, %v28371_v16  ;;  %v6461_v21 = vpop.f32.mrb[59].mxu0  ;;  %v6983_v22 = vld [vmem:[#allocation3 + $0x2b9] sm:$0xff]  ;;  %v28695_v12 = vld [vmem:[#allocation3 + $0x168] sm:$0xff]  ;;  %v28699_v19 = vld [vmem:[#allocation3 + $0x170] sm:$0xff] }
 0x59e   :  { %6856 = vst.msk [vmem:[#allocation3 + $0x2e9] sm:$0xff] %vm6689_vm3, %v6681_v17  ;;  %v6619_v23 = vadd.f32 %v28371_v16, %v6461_v21  ;;  %23509 = vmatprep.mubr.msk.f32.mxu1 %vm6689_vm3, %v6983_v22  ;;  %v6896_v17 = vld [vmem:[#allocation3 + $0x1b0] sm:$0xff]  ;;  %v28705_v21 = vld [vmem:[#allocation3 + $0x1c8] sm:$0xff]  ;;  %v28805_v15 = vld [vmem:[#allocation3 + $0x2b8] sm:$0xff] }
 0x59f   :  { %v6684_v25 = vmax.f32 %v6620_v20, 0.0  ;;  %23510 = vmatmul.mubr.msk.f32.gmra.mrb[32].mxu1 %vm6689_vm3, %v6984_v24  ;;  %v6897_v20 = vld [vmem:[#allocation3 + $0x1b8] sm:$0xff]  ;;  %v28709_v22 = vld [vmem:[#allocation3 + $0x1d0] sm:$0xff]  ;;  %v28717_v24 = vld [vmem:[#allocation3 + $0x1e8] sm:$0xff] }
 0x5a0   :  { %v6683_v26 = vmax.f32 %v6619_v23, 0.0  ;;  %v23422_v27 = vpop.f32.mrb[60].mxu0  ;;  %v6986_v31 = vld [vmem:[#allocation3 + $0x2d9] sm:$0xff] }
 0x5a1   :  { %6859 = vst.msk [vmem:[#allocation3 + $0x309] sm:$0xff] %vm6689_vm3, %v6684_v25  ;;  %v6622_v38 = vadd.f32 %v23422_v27, %v28371_v16  ;;  %v6471_v28 = vpop.f32.mrb[61].mxu0  ;;  %v6985_v29 = vld [vmem:[#allocation3 + $0x2d1] sm:$0xff]  ;;  %v28713_v23 = vld [vmem:[#allocation3 + $0x1e0] sm:$0xff] }
 0x5a2   :  { %6858 = vst.msk [vmem:[#allocation3 + $0x301] sm:$0xff] %vm6689_vm3, %v6683_v26  ;;  %v6621_v30 = vadd.f32 %v28371_v16, %v6471_v28  ;;  %23512 = vmatprep.mubr.msk.f32.mxu1 %vm6689_vm3, %v6985_v29  ;;  %v28721_v25 = vld [vmem:[#allocation3 + $0x1f8] sm:$0xff]  ;;  %v28725_v26 = vld [vmem:[#allocation3 + $0x200] sm:$0xff]  ;;  %v28729_v27 = vld [vmem:[#allocation3 + $0x210] sm:$0xff] }
 0x5a3   :  { %v6686_v32 = vmax.f32 %v6622_v38, 0.0  ;;  %23513 = vmatmul.mubr.msk.f32.gmra.mrb[34].mxu1 %vm6689_vm3, %v6986_v31  ;;  %v28733_v38 = vld [vmem:[#allocation3 + $0x218] sm:$0xff]  ;;  %v28737_v28 = vld [vmem:[#allocation3 + $0x228] sm:$0xff]  ;;  %v28741_v29 = vld [vmem:[#allocation3 + $0x230] sm:$0xff] }
 0x5a4   :  { %v6685_v33 = vmax.f32 %v6621_v30, 0.0  ;;  %v23425_v34 = vpop.f32.mrb[62].mxu0  ;;  %v6988_v41 = vld [vmem:[#allocation3 + $0x2f1] sm:$0xff]  ;;  %v28745_v30 = vld [vmem:[#allocation3 + $0x240] sm:$0xff] }
 0x5a5   :  { %6861 = vst.msk [vmem:[#allocation3 + $0x321] sm:$0xff] %vm6689_vm3, %v6686_v32  ;;  %v6624_v37 = vadd.f32 %v23425_v34, %v28371_v16  ;;  %v6481_v1 = vpop.f32.mrb[63].mxu0  ;;  %v6987_v39 = vld [vmem:[#allocation3 + $0x2e9] sm:$0xff]  ;;  %v28757_v34 = vld [vmem:[#allocation3 + $0x258] sm:$0xff] }
 0x5a6   :  { %6860 = vst.msk [vmem:[#allocation3 + $0x319] sm:$0xff] %vm6689_vm3, %v6685_v33  ;;  %v6623_v40 = vadd.f32 %v28371_v16, %v6481_v1  ;;  %23515 = vmatprep.mubr.msk.f32.mxu1 %vm6689_vm3, %v6987_v39  ;;  %v28751_v32 = vld [vmem:[#allocation3 + $0x248] sm:$0xff]  ;;  %v28763_v1 = vld [vmem:[#allocation3 + $0x260] sm:$0xff] }
 0x5a7   :  { %v6688_v42 = vmax.f32 %v6624_v37, 0.0  ;;  %23516 = vmatmul.mubr.msk.f32.gmra.mrb[36].mxu1 %vm6689_vm3, %v6988_v41 }
 0x5a8   :  { %v6687_v43 = vmax.f32 %v6623_v40, 0.0  ;;  %v28564_v44 = vpop.f32.mrb[64].mxu0  ;;  %v6990_v47 = vld [vmem:[#allocation3 + $0x309] sm:$0xff] }
 0x5a9   :  { %31330 = vst [vmem:[#allocation15_spill] sm:$0xff] %v28564_v44  ;;  %6863 = vst.msk [vmem:[#allocation3 + $0x339] sm:$0xff] %vm6689_vm3, %v6688_v42  ;;  %v6989_v45 = vld [vmem:[#allocation3 + $0x301] sm:$0xff]  ;;  %v28567_v46 = vpop.f32.mrb[65].mxu0  ;;  %v28769_v40 = vld [vmem:[#allocation3 + $0x270] sm:$0xff] }
 0x5aa   :  { %31331 = vst [vmem:[#allocation16_spill] sm:$0xff] %v28567_v46  ;;  %6862 = vst.msk [vmem:[#allocation3 + $0x331] sm:$0xff] %vm6689_vm3, %v6687_v43  ;;  %23518 = vmatprep.mubr.msk.f32.mxu1 %vm6689_vm3, %v6989_v45  ;;  %v28775_v42 = vld [vmem:[#allocation3 + $0x278] sm:$0xff]  ;;  %v28781_v45 = vld [vmem:[#allocation3 + $0x288] sm:$0xff] }
 0x5ab   :  { %23519 = vmatmul.mubr.msk.f32.gmra.mrb[38].mxu1 %vm6689_vm3, %v6990_v47 }
 0x5ac   :  { %v6992_v51 = vld [vmem:[#allocation3 + $0x321] sm:$0xff] }
 0x5ad   :  { %v6991_v16 = vld [vmem:[#allocation3 + $0x319] sm:$0xff] }
 0x5ae   :  { %23521 = vmatprep.mubr.msk.f32.mxu1 %vm6689_vm3, %v6991_v16  ;;  %v28787_v16 = vld [vmem:[#allocation3 + $0x290] sm:$0xff] }
 0x5af   :  { %23522 = vmatmul.mubr.msk.f32.gmra.mrb[40].mxu1 %vm6689_vm3, %v6992_v51  ;;  %v28793_v51 = vld [vmem:[#allocation3 + $0x2a0] sm:$0xff] }
 0x5b0   :  { %23526 = vmatprep.mubr.msk.f32.mxu1 %vm6689_vm3, %v6864_v50 }
 0x5b3   :  { %23527 = vmatmul.mubr.msk.f32.vlgmr.msra.gmra.mrb[42].mxu1 %vm6689_vm3, %v6865_v52 }
 0x5b4   :  { %23623 = vmatpush3.msra.mxu1 %v28451_v18  ;;  %23529 = vmatprep.mubr.msk.f32.mxu1 %vm6689_vm3, %v28581_v54  ;;  %v28599_v18 = vld [vmem:[#allocation3 + $0x48] sm:$0xff] }
 0x5b5   :  { %23720 = vmatprep.subr.mxu1 %v28578_v53 }
 0x5b7   :  { %23530 = vmatmul.mubr.msk.f32.gmra.mrb[44].mxu1 %vm6689_vm3, %v28587_v55 }
 0x5b8   :  { %23532 = vmatprep.mubr.msk.f32.mxu1 %vm6689_vm3, %v28591_v56 }
 0x5bb   :  { %23533 = vmatmul.mubr.msk.f32.gmra.mrb[46].mxu1 %vm6689_vm3, %v28595_v57 }
 0x5bc   :  { %23535 = vmatprep.mubr.msk.f32.mxu1 %vm6689_vm3, %v28599_v18 }
 0x5bf   :  { %23536 = vmatmul.mubr.msk.f32.gmra.mrb[48].mxu1 %vm6689_vm3, %v28603_v58 }
 0x5c0   :  { %23538 = vmatprep.mubr.msk.f32.mxu1 %vm6689_vm3, %v28607_v59 }
 0x5c3   :  { %23539 = vmatmul.mubr.msk.f32.gmra.mrb[50].mxu1 %vm6689_vm3, %v28611_v60 }
 0x5c4   :  { %23541 = vmatprep.mubr.msk.f32.mxu1 %vm6689_vm3, %v28615_v61 }
 0x5c7   :  { %23542 = vmatmul.mubr.msk.f32.gmra.mrb[52].mxu1 %vm6689_vm3, %v28619_v62 }
 0x5c8   :  { %23544 = vmatprep.mubr.msk.f32.mxu1 %vm6689_vm3, %v28623_v63 }
 0x5cb   :  { %23545 = vmatmul.mubr.msk.f32.gmra.mrb[54].mxu1 %vm6689_vm3, %v28627_v36 }
 0x5cc   :  { %23547 = vmatprep.mubr.msk.f32.mxu1 %vm6689_vm3, %v28631_v3 }
 0x5cf   :  { %23548 = vmatmul.mubr.msk.f32.gmra.mrb[56].mxu1 %vm6689_vm3, %v28635_v4 }
 0x5d0   :  { %23550 = vmatprep.mubr.msk.f32.mxu1 %vm6689_vm3, %v28639_v6 }
 0x5d3   :  { %23551 = vmatmul.mubr.msk.f32.gmra.mrb[58].mxu1 %vm6689_vm3, %v28643_v2 }
 0x5d4   :  { %23553 = vmatprep.mubr.msk.f32.mxu1 %vm6689_vm3, %v28647_v35 }
 0x5d7   :  { %23554 = vmatmul.mubr.msk.f32.gmra.mrb[60].mxu1 %vm6689_vm3, %v28651_v0 }
 0x5d8   :  { %23556 = vmatprep.mubr.msk.f32.mxu1 %vm6689_vm3, %v28655_v48 }
 0x5db   :  { %23557 = vmatmul.mubr.msk.f32.gmra.mrb[62].mxu1 %vm6689_vm3, %v28659_v11 }
 0x5dc   :  { %23559 = vmatprep.mubr.msk.f32.mxu1 %vm6689_vm3, %v28663_v7 }
 0x5df   :  { %23560 = vmatmul.mubr.msk.f32.gmra.mrb[0].mxu1 %vm6689_vm3, %v28667_v9 }
 0x5e0   :  { %23562 = vmatprep.mubr.msk.f32.mxu1 %vm6689_vm3, %v28671_v49 }
 0x5e3   :  { %23563 = vmatmul.mubr.msk.f32.gmra.mrb[2].mxu1 %vm6689_vm3, %v28675_v8 }
 0x5e4   :  { %23565 = vmatprep.mubr.msk.f32.mxu1 %vm6689_vm3, %v28679_v13 }
 0x5e7   :  { %23566 = vmatmul.mubr.msk.f32.gmra.mrb[4].mxu1 %vm6689_vm3, %v28683_v14 }
 0x5e8   :  { %23568 = vmatprep.mubr.msk.f32.mxu1 %vm6689_vm3, %v28687_v5 }
 0x5eb   :  { %23569 = vmatmul.mubr.msk.f32.gmra.mrb[6].mxu1 %vm6689_vm3, %v28691_v10 }
 0x5ec   :  { %23571 = vmatprep.mubr.msk.f32.mxu1 %vm6689_vm3, %v28695_v12 }
 0x5ef   :  { %23572 = vmatmul.mubr.msk.f32.gmra.mrb[8].mxu1 %vm6689_vm3, %v28699_v19 }
 0x5f0   :  { %23574 = vmatprep.mubr.msk.f32.mxu1 %vm6689_vm3, %v6896_v17  ;;  %v28799_v17 = vld [vmem:[#allocation3 + $0x2a8] sm:$0xff] }
 0x5f3   :  { %23575 = vmatmul.mubr.msk.f32.gmra.mrb[10].mxu1 %vm6689_vm3, %v6897_v20 }
 0x5f4   :  { %23577 = vmatprep.mubr.msk.f32.mxu1 %vm6689_vm3, %v28705_v21 }
 0x5f7   :  { %23578 = vmatmul.mubr.msk.f32.gmra.mrb[12].mxu1 %vm6689_vm3, %v28709_v22 }
 0x5f8   :  { %23580 = vmatprep.mubr.msk.f32.mxu1 %vm6689_vm3, %v28713_v23 }
 0x5fb   :  { %23581 = vmatmul.mubr.msk.f32.gmra.mrb[14].mxu1 %vm6689_vm3, %v28717_v24 }
 0x5fc   :  { %23583 = vmatprep.mubr.msk.f32.mxu1 %vm6689_vm3, %v28721_v25 }
 0x5ff   :  { %23584 = vmatmul.mubr.msk.f32.gmra.mrb[16].mxu1 %vm6689_vm3, %v28725_v26 }
 0x600   :  { %23586 = vmatprep.mubr.msk.f32.mxu1 %vm6689_vm3, %v28729_v27 }
 0x603   :  { %23587 = vmatmul.mubr.msk.f32.gmra.mrb[18].mxu1 %vm6689_vm3, %v28733_v38 }
 0x604   :  { %23589 = vmatprep.mubr.msk.f32.mxu1 %vm6689_vm3, %v28737_v28 }
 0x607   :  { %23590 = vmatmul.mubr.msk.f32.gmra.mrb[20].mxu1 %vm6689_vm3, %v28741_v29 }
 0x608   :  { %23592 = vmatprep.mubr.msk.f32.mxu1 %vm6689_vm3, %v28745_v30 }
 0x60a   :  { %v28749_v31 = vpop.f32.mrb[66].mxu0 }
 0x60b   :  { %31332 = vst [vmem:[#allocation17_spill] sm:$0xff] %v28749_v31  ;;  %v28753_v33 = vpop.f32.mrb[67].mxu0  ;;  %23593 = vmatmul.mubr.msk.f32.gmra.mrb[22].mxu1 %vm6689_vm3, %v28751_v32  ;;  %v28847_v31 = vld [vmem:[#allocation3 + $0x308] sm:$0xff] }
 0x60c   :  { %31333 = vst [vmem:[#allocation18_spill] sm:$0xff] %v28753_v33  ;;  %23595 = vmatprep.mubr.msk.f32.mxu1 %vm6689_vm3, %v28757_v34 }
 0x60e   :  { %v28761_v37 = vpop.f32.mrb[68].mxu0 }
 0x60f   :  { %31334 = vst [vmem:[#allocation19_spill] sm:$0xff] %v28761_v37  ;;  %v28765_v39 = vpop.f32.mrb[69].mxu0  ;;  %23596 = vmatmul.mubr.msk.f32.gmra.mrb[24].mxu1 %vm6689_vm3, %v28763_v1  ;;  %v28835_v37 = vld [vmem:[#allocation3 + $0x2f0] sm:$0xff] }
 0x610   :  { %31335 = vst [vmem:[#allocation20_spill] sm:$0xff] %v28765_v39  ;;  %23598 = vmatprep.mubr.msk.f32.mxu1 %vm6689_vm3, %v28769_v40  ;;  %31347 = vst [vmem:[#allocation32_spill] sm:$0xff] %v28835_v37 }
 0x612   :  { %v28773_v41 = vpop.f32.mrb[70].mxu0 }
 0x613   :  { %31336 = vst [vmem:[#allocation21_spill] sm:$0xff] %v28773_v41  ;;  %v28777_v43 = vpop.f32.mrb[71].mxu0  ;;  %23599 = vmatmul.mubr.msk.f32.gmra.mrb[26].mxu1 %vm6689_vm3, %v28775_v42  ;;  %v28823_v41 = vld [vmem:[#allocation3 + $0x2d8] sm:$0xff] }
 0x614   :  { %31337 = vst [vmem:[#allocation22_spill] sm:$0xff] %v28777_v43  ;;  %23601 = vmatprep.mubr.msk.f32.mxu1 %vm6689_vm3, %v28781_v45 }
 0x616   :  { %v28785_v47 = vpop.f32.mrb[72].mxu0 }
 0x617   :  { %31338 = vst [vmem:[#allocation23_spill] sm:$0xff] %v28785_v47  ;;  %v28789_v50 = vpop.f32.mrb[73].mxu0  ;;  %23602 = vmatmul.mubr.msk.f32.gmra.mrb[28].mxu1 %vm6689_vm3, %v28787_v16  ;;  %v28811_v47 = vld [vmem:[#allocation3 + $0x2c0] sm:$0xff] }
 0x618   :  { %31339 = vst [vmem:[#allocation24_spill] sm:$0xff] %v28789_v50  ;;  %23604 = vmatprep.mubr.msk.f32.mxu1 %vm6689_vm3, %v28793_v51 }
 0x61a   :  { %v28797_v52 = vpop.f32.mrb[74].mxu0 }
 0x61b   :  { %31340 = vst [vmem:[#allocation25_spill] sm:$0xff] %v28797_v52  ;;  %v28801_v20 = vpop.f32.mrb[75].mxu0  ;;  %23605 = vmatmul.mubr.msk.f32.gmra.mrb[30].mxu1 %vm6689_vm3, %v28799_v17  ;;  %v28817_v52 = vld [vmem:[#allocation3 + $0x2d0] sm:$0xff] }
 0x61c   :  { %31341 = vst [vmem:[#allocation26_spill] sm:$0xff] %v28801_v20  ;;  %23607 = vmatprep.mubr.msk.f32.mxu1 %vm6689_vm3, %v28805_v15 }
 0x61e   :  { %v28809_v50 = vpop.f32.mrb[76].mxu0 }
 0x61f   :  { %31342 = vst [vmem:[#allocation27_spill] sm:$0xff] %v28809_v50  ;;  %v28813_v43 = vpop.f32.mrb[77].mxu0  ;;  %23608 = vmatmul.mubr.msk.f32.gmra.mrb[32].mxu1 %vm6689_vm3, %v28811_v47  ;;  %v28829_v50 = vld [vmem:[#allocation3 + $0x2e8] sm:$0xff] }
 0x620   :  { %31343 = vst [vmem:[#allocation28_spill] sm:$0xff] %v28813_v43  ;;  %23610 = vmatprep.mubr.msk.f32.mxu1 %vm6689_vm3, %v28817_v52 }
 0x622   :  { %v28821_v20 = vpop.f32.mrb[78].mxu0 }
 0x623   :  { %31344 = vst [vmem:[#allocation29_spill] sm:$0xff] %v28821_v20  ;;  %v28825_v39 = vpop.f32.mrb[79].mxu0  ;;  %23611 = vmatmul.mubr.msk.f32.gmra.mrb[34].mxu1 %vm6689_vm3, %v28823_v41  ;;  %v28841_v20 = vld [vmem:[#allocation3 + $0x300] sm:$0xff] }
 0x624   :  { %31345 = vst [vmem:[#allocation30_spill] sm:$0xff] %v28825_v39  ;;  %23613 = vmatprep.mubr.msk.f32.mxu1 %vm6689_vm3, %v28829_v50  ;;  %31349 = vst [vmem:[#allocation34_spill] sm:$0xff] %v28841_v20 }
 0x626   :  { %v28833_v43 = vpop.f32.mrb[80].mxu0 }
 0x627   :  { %31346 = vst [vmem:[#allocation31_spill] sm:$0xff] %v28833_v43  ;;  %v28837_v33 = vpop.f32.mrb[81].mxu0  ;;  %23614 = vmatmul.mubr.msk.f32.gmra.mrb[36].mxu1 %vm6689_vm3, %v28835_v37  ;;  %v28853_v43 = vld [vmem:[#allocation3 + $0x318] sm:$0xff]  ;;  %v28859_v37 = vld [vmem:[#allocation3 + $0x320] sm:$0xff] }
 0x628   :  { %31348 = vst [vmem:[#allocation33_spill] sm:$0xff] %v28837_v33  ;;  %23616 = vmatprep.mubr.msk.f32.mxu1 %vm6689_vm3, %v28841_v20  ;;  %31352 = vst [vmem:[#allocation37_spill] sm:$0xff] %v28853_v43  ;;  %v8149_v33 = vld [vmem:[#allocation3 + $0x2] sm:$0xff] }
 0x62a   :  { %v28845_v39 = vpop.f32.mrb[82].mxu0 }
 0x62b   :  { %31350 = vst [vmem:[#allocation35_spill] sm:$0xff] %v28845_v39  ;;  %v28849_v46 = vpop.f32.mrb[83].mxu0  ;;  %23617 = vmatmul.mubr.msk.f32.gmra.mrb[38].mxu1 %vm6689_vm3, %v28847_v31  ;;  %v28869_v39 = vld [vmem:[%s31020_s5 + $0x20] sm:$0xff] }
 0x62c   :  { %31351 = vst [vmem:[#allocation36_spill] sm:$0xff] %v28849_v46  ;;  %23619 = vmatprep.mubr.msk.f32.mxu1 %vm6689_vm3, %v28853_v43  ;;  %v8150_v46 = vld [vmem:[#allocation3 + $0xa] sm:$0xff]  ;;  %v28872_v43 = vld [vmem:[#allocation3 + $0x1a] sm:$0xff] }
 0x62d   :  { %31355 = vst [vmem:[#allocation40_spill] sm:$0xff] %v28872_v43 }
 0x62e   :  { %v28857_v44 = vpop.f32.mrb[84].mxu0 }
 0x62f   :  { %31353 = vst [vmem:[#allocation38_spill] sm:$0xff] %v28857_v44  ;;  %v28861_v20 = vpop.f32.mrb[85].mxu0  ;;  %23620 = vmatmul.mubr.msk.f32.gmra.mrb[40].mxu1 %vm6689_vm3, %v28859_v37  ;;  %v28894_v44 = vld [vmem:[#allocation3 + $0x52] sm:$0xff] }
 0x630   :  { %31354 = vst [vmem:[#allocation39_spill] sm:$0xff] %v28861_v20  ;;  %23624 = vmatprep.mubr.msk.f32.mxu1 %vm6689_vm3, %v8149_v33  ;;  %v28878_v20 = vld [vmem:[#allocation3 + $0x22] sm:$0xff]  ;;  %v28882_v33 = vld [vmem:[#allocation3 + $0x32] sm:$0xff]  ;;  %31360 = vst [vmem:[#allocation45_spill] sm:$0xff] %v28894_v44 }
 0x631   :  { %31356 = vst [vmem:[#allocation41_spill] sm:$0xff] %v28878_v20  ;;  %31357 = vst [vmem:[#allocation42_spill] sm:$0xff] %v28882_v33 }
 0x633   :  { %23625 = vmatmul.mubr.msk.f32.vlgmr.msra.gmra.mrb[42].mxu1 %vm6689_vm3, %v8150_v46  ;;  %v28886_v46 = vld [vmem:[#allocation3 + $0x3a] sm:$0xff] }
 0x634   :  { %23721 = vmatpush3.msra.mxu1 %v28578_v53  ;;  %23627 = vmatprep.mubr.msk.f32.mxu1 %vm6689_vm3, %v28872_v43  ;;  %31358 = vst [vmem:[#allocation43_spill] sm:$0xff] %v28886_v46  ;;  %v28890_v53 = vld [vmem:[#allocation3 + $0x4a] sm:$0xff]  ;;  %v28990_v43 = vld [vmem:[#allocation3 + $0x172] sm:$0xff] }
 0x635   :  { %23818 = vmatprep.subr.mxu1 %v28869_v39  ;;  %31359 = vst [vmem:[#allocation44_spill] sm:$0xff] %v28890_v53  ;;  %31384 = vst [vmem:[#allocation11_spill] sm:$0xff] %v28990_v43 }
 0x637   :  { %23628 = vmatmul.mubr.msk.f32.gmra.mrb[44].mxu1 %vm6689_vm3, %v28878_v20  ;;  %v28898_v20 = vld [vmem:[#allocation3 + $0x62] sm:$0xff] }
 0x638   :  { %23630 = vmatprep.mubr.msk.f32.mxu1 %vm6689_vm3, %v28882_v33  ;;  %31361 = vst [vmem:[#allocation46_spill] sm:$0xff] %v28898_v20  ;;  %v28902_v33 = vld [vmem:[#allocation3 + $0x6a] sm:$0xff] }
 0x639   :  { %31362 = vst [vmem:[#allocation47_spill] sm:$0xff] %v28902_v33 }
 0x63b   :  { %23631 = vmatmul.mubr.msk.f32.gmra.mrb[46].mxu1 %vm6689_vm3, %v28886_v46  ;;  %v28906_v46 = vld [vmem:[#allocation3 + $0x7a] sm:$0xff] }
 0x63c   :  { %23633 = vmatprep.mubr.msk.f32.mxu1 %vm6689_vm3, %v28890_v53  ;;  %31363 = vst [vmem:[#allocation48_spill] sm:$0xff] %v28906_v46  ;;  %v28910_v53 = vld [vmem:[#allocation3 + $0x82] sm:$0xff] }
 0x63d   :  { %31364 = vst [vmem:[#allocation49_spill] sm:$0xff] %v28910_v53 }
 0x63f   :  { %23634 = vmatmul.mubr.msk.f32.gmra.mrb[48].mxu1 %vm6689_vm3, %v28894_v44  ;;  %v28914_v44 = vld [vmem:[#allocation3 + $0x92] sm:$0xff] }
 0x640   :  { %23636 = vmatprep.mubr.msk.f32.mxu1 %vm6689_vm3, %v28898_v20  ;;  %31365 = vst [vmem:[#allocation50_spill] sm:$0xff] %v28914_v44  ;;  %v28918_v20 = vld [vmem:[#allocation3 + $0x9a] sm:$0xff] }
 0x641   :  { %31366 = vst [vmem:[#allocation51_spill] sm:$0xff] %v28918_v20 }
 0x643   :  { %23637 = vmatmul.mubr.msk.f32.gmra.mrb[50].mxu1 %vm6689_vm3, %v28902_v33  ;;  %v28922_v33 = vld [vmem:[#allocation3 + $0xaa] sm:$0xff] }
 0x644   :  { %23639 = vmatprep.mubr.msk.f32.mxu1 %vm6689_vm3, %v28906_v46  ;;  %31367 = vst [vmem:[#allocation52_spill] sm:$0xff] %v28922_v33  ;;  %v28926_v46 = vld [vmem:[#allocation3 + $0xb2] sm:$0xff] }
 0x645   :  { %31368 = vst [vmem:[#allocation53_spill] sm:$0xff] %v28926_v46 }
 0x647   :  { %23640 = vmatmul.mubr.msk.f32.gmra.mrb[52].mxu1 %vm6689_vm3, %v28910_v53  ;;  %v28930_v53 = vld [vmem:[#allocation3 + $0xc2] sm:$0xff] }
 0x648   :  { %23642 = vmatprep.mubr.msk.f32.mxu1 %vm6689_vm3, %v28914_v44  ;;  %31369 = vst [vmem:[#allocation54_spill] sm:$0xff] %v28930_v53  ;;  %v28934_v44 = vld [vmem:[#allocation3 + $0xca] sm:$0xff] }
 0x649   :  { %31370 = vst [vmem:[#allocation55_spill] sm:$0xff] %v28934_v44 }
 0x64b   :  { %23643 = vmatmul.mubr.msk.f32.gmra.mrb[54].mxu1 %vm6689_vm3, %v28918_v20  ;;  %v28938_v20 = vld [vmem:[#allocation3 + $0xda] sm:$0xff] }
 0x64c   :  { %23645 = vmatprep.mubr.msk.f32.mxu1 %vm6689_vm3, %v28922_v33  ;;  %31371 = vst [vmem:[#allocation56_spill] sm:$0xff] %v28938_v20  ;;  %v28942_v33 = vld [vmem:[#allocation3 + $0xe2] sm:$0xff] }
 0x64d   :  { %31372 = vst [vmem:[#allocation57_spill] sm:$0xff] %v28942_v33 }
 0x64f   :  { %23646 = vmatmul.mubr.msk.f32.gmra.mrb[56].mxu1 %vm6689_vm3, %v28926_v46  ;;  %v28946_v46 = vld [vmem:[#allocation3 + $0xf2] sm:$0xff] }
 0x650   :  { %23648 = vmatprep.mubr.msk.f32.mxu1 %vm6689_vm3, %v28930_v53  ;;  %31373 = vst [vmem:[#allocation58_spill] sm:$0xff] %v28946_v46  ;;  %v28950_v53 = vld [vmem:[#allocation3 + $0xfa] sm:$0xff] }
 0x651   :  { %31374 = vst [vmem:[#allocation59_spill] sm:$0xff] %v28950_v53 }
 0x653   :  { %23649 = vmatmul.mubr.msk.f32.gmra.mrb[58].mxu1 %vm6689_vm3, %v28934_v44  ;;  %v28954_v44 = vld [vmem:[#allocation3 + $0x10a] sm:$0xff] }
 0x654   :  { %23651 = vmatprep.mubr.msk.f32.mxu1 %vm6689_vm3, %v28938_v20  ;;  %31375 = vst [vmem:[#allocation60_spill] sm:$0xff] %v28954_v44  ;;  %v28958_v20 = vld [vmem:[#allocation3 + $0x112] sm:$0xff] }
 0x655   :  { %31376 = vst [vmem:[#allocation61_spill] sm:$0xff] %v28958_v20 }
 0x657   :  { %23652 = vmatmul.mubr.msk.f32.gmra.mrb[60].mxu1 %vm6689_vm3, %v28942_v33  ;;  %v28962_v33 = vld [vmem:[#allocation3 + $0x122] sm:$0xff] }
 0x658   :  { %23654 = vmatprep.mubr.msk.f32.mxu1 %vm6689_vm3, %v28946_v46  ;;  %31377 = vst [vmem:[#allocation62_spill] sm:$0xff] %v28962_v33  ;;  %v28966_v46 = vld [vmem:[#allocation3 + $0x12a] sm:$0xff] }
 0x659   :  { %31378 = vst [vmem:[#allocation63_spill] sm:$0xff] %v28966_v46 }
 0x65b   :  { %23655 = vmatmul.mubr.msk.f32.gmra.mrb[62].mxu1 %vm6689_vm3, %v28950_v53  ;;  %v28970_v53 = vld [vmem:[#allocation3 + $0x13a] sm:$0xff] }
 0x65c   :  { %23657 = vmatprep.mubr.msk.f32.mxu1 %vm6689_vm3, %v28954_v44  ;;  %31379 = vst [vmem:[#allocation64_spill] sm:$0xff] %v28970_v53  ;;  %v28974_v44 = vld [vmem:[#allocation3 + $0x142] sm:$0xff] }
 0x65d   :  { %31380 = vst [vmem:[#allocation65_spill] sm:$0xff] %v28974_v44 }
 0x65f   :  { %23658 = vmatmul.mubr.msk.f32.gmra.mrb[0].mxu1 %vm6689_vm3, %v28958_v20  ;;  %v28978_v20 = vld [vmem:[#allocation3 + $0x152] sm:$0xff] }
 0x660   :  { %23660 = vmatprep.mubr.msk.f32.mxu1 %vm6689_vm3, %v28962_v33  ;;  %31381 = vst [vmem:[#allocation66_spill] sm:$0xff] %v28978_v20  ;;  %v28982_v33 = vld [vmem:[#allocation3 + $0x15a] sm:$0xff] }
 0x661   :  { %31382 = vst [vmem:[#allocation67_spill] sm:$0xff] %v28982_v33 }
 0x663   :  { %23661 = vmatmul.mubr.msk.f32.gmra.mrb[2].mxu1 %vm6689_vm3, %v28966_v46  ;;  %v28986_v46 = vld [vmem:[#allocation3 + $0x16a] sm:$0xff] }
 0x664   :  { %23663 = vmatprep.mubr.msk.f32.mxu1 %vm6689_vm3, %v28970_v53  ;;  %31383 = vst [vmem:[#allocation10_spill] sm:$0xff] %v28986_v46  ;;  %v8181_v53 = vld [vmem:[#allocation3 + $0x1b2] sm:$0xff] }
 0x667   :  { %23664 = vmatmul.mubr.msk.f32.gmra.mrb[4].mxu1 %vm6689_vm3, %v28974_v44  ;;  %v8182_v44 = vld [vmem:[#allocation3 + $0x1ba] sm:$0xff] }
 0x668   :  { %23666 = vmatprep.mubr.msk.f32.mxu1 %vm6689_vm3, %v28978_v20  ;;  %v28996_v20 = vld [vmem:[#allocation3 + $0x1ca] sm:$0xff] }
 0x66b   :  { %23667 = vmatmul.mubr.msk.f32.gmra.mrb[6].mxu1 %vm6689_vm3, %v28982_v33  ;;  %v29000_v33 = vld [vmem:[#allocation3 + $0x1d2] sm:$0xff] }
 0x66c   :  { %23669 = vmatprep.mubr.msk.f32.mxu1 %vm6689_vm3, %v28986_v46  ;;  %31385 = vst [vmem:[#allocation12_spill] sm:$0xff] %v29000_v33  ;;  %v29004_v46 = vld [vmem:[#allocation3 + $0x1e2] sm:$0xff] }
 0x66d   :  { %31386 = vst [vmem:[#allocation13_spill] sm:$0xff] %v29004_v46 }
 0x66f   :  { %23670 = vmatmul.mubr.msk.f32.gmra.mrb[8].mxu1 %vm6689_vm3, %v28990_v43  ;;  %v29008_v43 = vld [vmem:[#allocation3 + $0x1ea] sm:$0xff] }
 0x670   :  { %23672 = vmatprep.mubr.msk.f32.mxu1 %vm6689_vm3, %v8181_v53  ;;  %31387 = vst [vmem:[#allocation68_spill] sm:$0xff] %v29008_v43  ;;  %v29016_v53 = vld [vmem:[#allocation3 + $0x202] sm:$0xff] }
 0x671   :  { %31389 = vst [vmem:[#allocation70_spill] sm:$0xff] %v29016_v53 }
 0x673   :  { %23673 = vmatmul.mubr.msk.f32.gmra.mrb[10].mxu1 %vm6689_vm3, %v8182_v44  ;;  %v29012_v44 = vld [vmem:[#allocation3 + $0x1fa] sm:$0xff] }
 0x674   :  { %23675 = vmatprep.mubr.msk.f32.mxu1 %vm6689_vm3, %v28996_v20  ;;  %31388 = vst [vmem:[#allocation69_spill] sm:$0xff] %v29012_v44 }
 0x677   :  { %23676 = vmatmul.mubr.msk.f32.gmra.mrb[12].mxu1 %vm6689_vm3, %v29000_v33  ;;  %v29020_v33 = vld [vmem:[#allocation3 + $0x212] sm:$0xff] }
 0x678   :  { %23678 = vmatprep.mubr.msk.f32.mxu1 %vm6689_vm3, %v29004_v46  ;;  %31390 = vst [vmem:[#allocation71_spill] sm:$0xff] %v29020_v33  ;;  %v29024_v46 = vld [vmem:[#allocation3 + $0x21a] sm:$0xff] }
 0x679   :  { %31391 = vst [vmem:[#allocation72_spill] sm:$0xff] %v29024_v46 }
 0x67b   :  { %23679 = vmatmul.mubr.msk.f32.gmra.mrb[14].mxu1 %vm6689_vm3, %v29008_v43  ;;  %v29028_v43 = vld [vmem:[#allocation3 + $0x22a] sm:$0xff] }
 0x67c   :  { %23681 = vmatprep.mubr.msk.f32.mxu1 %vm6689_vm3, %v29012_v44  ;;  %31392 = vst [vmem:[#allocation73_spill] sm:$0xff] %v29028_v43  ;;  %v29032_v44 = vld [vmem:[#allocation3 + $0x232] sm:$0xff] }
 0x67d   :  { %31393 = vst [vmem:[#allocation74_spill] sm:$0xff] %v29032_v44 }
 0x67f   :  { %23682 = vmatmul.mubr.msk.f32.gmra.mrb[16].mxu1 %vm6689_vm3, %v29016_v53  ;;  %v29036_v53 = vld [vmem:[#allocation3 + $0x242] sm:$0xff] }
 0x680   :  { %23684 = vmatprep.mubr.msk.f32.mxu1 %vm6689_vm3, %v29020_v33  ;;  %31394 = vst [vmem:[#allocation75_spill] sm:$0xff] %v29036_v53  ;;  %v29040_v33 = vld [vmem:[#allocation3 + $0x24a] sm:$0xff] }
 0x681   :  { %31395 = vst [vmem:[#allocation76_spill] sm:$0xff] %v29040_v33 }
 0x683   :  { %23685 = vmatmul.mubr.msk.f32.gmra.mrb[18].mxu1 %vm6689_vm3, %v29024_v46  ;;  %v29044_v46 = vld [vmem:[#allocation3 + $0x25a] sm:$0xff] }
 0x684   :  { %23687 = vmatprep.mubr.msk.f32.mxu1 %vm6689_vm3, %v29028_v43  ;;  %31396 = vst [vmem:[#allocation77_spill] sm:$0xff] %v29044_v46  ;;  %v29048_v43 = vld [vmem:[#allocation3 + $0x262] sm:$0xff] }
 0x685   :  { %31397 = vst [vmem:[#allocation78_spill] sm:$0xff] %v29048_v43 }
 0x687   :  { %23688 = vmatmul.mubr.msk.f32.gmra.mrb[20].mxu1 %vm6689_vm3, %v29032_v44  ;;  %v29052_v44 = vld [vmem:[#allocation3 + $0x272] sm:$0xff] }
 0x688   :  { %23690 = vmatprep.mubr.msk.f32.mxu1 %vm6689_vm3, %v29036_v53  ;;  %31398 = vst [vmem:[#allocation14_spill] sm:$0xff] %v29052_v44  ;;  %v29056_v53 = vld [vmem:[#allocation3 + $0x27a] sm:$0xff] }
 0x689   :  { %31399 = vst [vmem:[#allocation79_spill] sm:$0xff] %v29056_v53 }
 0x68b   :  { %23691 = vmatmul.mubr.msk.f32.gmra.mrb[22].mxu1 %vm6689_vm3, %v29040_v33  ;;  %v29060_v33 = vld [vmem:[#allocation3 + $0x28a] sm:$0xff] }
 0x68c   :  { %23693 = vmatprep.mubr.msk.f32.mxu1 %vm6689_vm3, %v29044_v46  ;;  %31400 = vst [vmem:[#allocation80_spill] sm:$0xff] %v29060_v33  ;;  %v29064_v46 = vld [vmem:[#allocation3 + $0x292] sm:$0xff] }
 0x68d   :  { %31401 = vst [vmem:[#allocation81_spill] sm:$0xff] %v29064_v46 }
 0x68f   :  { %23694 = vmatmul.mubr.msk.f32.gmra.mrb[24].mxu1 %vm6689_vm3, %v29048_v43  ;;  %v29068_v43 = vld [vmem:[#allocation3 + $0x2a2] sm:$0xff] }
 0x690   :  { %23696 = vmatprep.mubr.msk.f32.mxu1 %vm6689_vm3, %v29052_v44  ;;  %31402 = vst [vmem:[#allocation82_spill] sm:$0xff] %v29068_v43  ;;  %v29072_v44 = vld [vmem:[#allocation3 + $0x2aa] sm:$0xff] }
 0x691   :  { %31403 = vst [vmem:[#allocation83_spill] sm:$0xff] %v29072_v44 }
 0x693   :  { %23697 = vmatmul.mubr.msk.f32.gmra.mrb[26].mxu1 %vm6689_vm3, %v29056_v53  ;;  %v29076_v53 = vld [vmem:[#allocation3 + $0x2ba] sm:$0xff] }
 0x694   :  { %23699 = vmatprep.mubr.msk.f32.mxu1 %vm6689_vm3, %v29060_v33  ;;  %31404 = vst [vmem:[#allocation84_spill] sm:$0xff] %v29076_v53  ;;  %v29080_v33 = vld [vmem:[#allocation3 + $0x2c2] sm:$0xff] }
 0x695   :  { %31405 = vst [vmem:[#allocation85_spill] sm:$0xff] %v29080_v33 }
 0x697   :  { %23700 = vmatmul.mubr.msk.f32.gmra.mrb[28].mxu1 %vm6689_vm3, %v29064_v46  ;;  %v29084_v46 = vld [vmem:[#allocation3 + $0x2d2] sm:$0xff] }
 0x698   :  { %23702 = vmatprep.mubr.msk.f32.mxu1 %vm6689_vm3, %v29068_v43  ;;  %31406 = vst [vmem:[#allocation86_spill] sm:$0xff] %v29084_v46  ;;  %v29088_v43 = vld [vmem:[#allocation3 + $0x2da] sm:$0xff] }
 0x699   :  { %31407 = vst [vmem:[#allocation87_spill] sm:$0xff] %v29088_v43 }
 0x69b   :  { %23703 = vmatmul.mubr.msk.f32.gmra.mrb[30].mxu1 %vm6689_vm3, %v29072_v44  ;;  %v29092_v44 = vld [vmem:[#allocation3 + $0x2ea] sm:$0xff] }
 0x69c   :  { %23705 = vmatprep.mubr.msk.f32.mxu1 %vm6689_vm3, %v29076_v53  ;;  %31408 = vst [vmem:[#allocation88_spill] sm:$0xff] %v29092_v44  ;;  %v29096_v53 = vld [vmem:[#allocation3 + $0x2f2] sm:$0xff] }
 0x69f   :  { %23706 = vmatmul.mubr.msk.f32.gmra.mrb[32].mxu1 %vm6689_vm3, %v29080_v33  ;;  %v29100_v33 = vld [vmem:[#allocation3 + $0x302] sm:$0xff] }
 0x6a0   :  { %23708 = vmatprep.mubr.msk.f32.mxu1 %vm6689_vm3, %v29084_v46  ;;  %31409 = vst [vmem:[#allocation89_spill] sm:$0xff] %v29100_v33  ;;  %v29104_v46 = vld [vmem:[#allocation3 + $0x30a] sm:$0xff] }
 0x6a3   :  { %23709 = vmatmul.mubr.msk.f32.gmra.mrb[34].mxu1 %vm6689_vm3, %v29088_v43  ;;  %v29108_v43 = vld [vmem:[#allocation3 + $0x31a] sm:$0xff] }
 0x6a4   :  { %23711 = vmatprep.mubr.msk.f32.mxu1 %vm6689_vm3, %v29092_v44  ;;  %v29112_v44 = vld [vmem:[#allocation3 + $0x322] sm:$0xff] }
 0x6a7   :  { %23712 = vmatmul.mubr.msk.f32.gmra.mrb[36].mxu1 %vm6689_vm3, %v29096_v53 }
 0x6a8   :  { %23714 = vmatprep.mubr.msk.f32.mxu1 %vm6689_vm3, %v29100_v33  ;;  %v29121_v33 = vld [vmem:[%s31020_s5 + $0x28] sm:$0xff] }
 0x6ab   :  { %23715 = vmatmul.mubr.msk.f32.gmra.mrb[38].mxu1 %vm6689_vm3, %v29104_v46 }
 0x6ac   :  { %23717 = vmatprep.mubr.msk.f32.mxu1 %vm6689_vm3, %v29108_v43 }
 0x6af   :  { %23718 = vmatmul.mubr.msk.f32.gmra.mrb[40].mxu1 %vm6689_vm3, %v29112_v44 }
 0x6b0   :  { %23722 = vmatprep.mubr.msk.f32.mxu1 %vm6689_vm3, %v28581_v54  ;;  %v29183_v54 = vld [vmem:[#allocation3 + $0x180] sm:$0xff] }
 0x6b3   :  { %23723 = vmatmul.mubr.msk.f32.vlgmr.msra.gmra.mrb[42].mxu1 %vm6689_vm3, %v28587_v55  ;;  %v29187_v55 = vld [vmem:[#allocation3 + $0x188] sm:$0xff] }
 0x6b4   :  { %23819 = vmatpush3.msra.mxu1 %v28869_v39  ;;  %23725 = vmatprep.mubr.msk.f32.mxu1 %vm6689_vm3, %v28591_v56  ;;  %v31410_v56 = vld [vmem:[#allocation32_spill] sm:$0xff]  ;;  %v29410_v39 = vld [vmem:[#allocation3 + $0x219] sm:$0xff] }
 0x6b5   :  { %23916 = vmatprep.subr.mxu1 %v29121_v33 }
 0x6b7   :  { %23726 = vmatmul.mubr.msk.f32.gmra.mrb[44].mxu1 %vm6689_vm3, %v28595_v57  ;;  %v31411_v57 = vld [vmem:[#allocation34_spill] sm:$0xff] }
 0x6b8   :  { %23728 = vmatprep.mubr.msk.f32.mxu1 %vm6689_vm3, %v28599_v18  ;;  %v29251_v18 = vld [vmem:[#allocation3 + $0x330] sm:$0xff] }
 0x6bb   :  { %23729 = vmatmul.mubr.msk.f32.gmra.mrb[46].mxu1 %vm6689_vm3, %v28603_v58  ;;  %v29255_v58 = vld [vmem:[#allocation3 + $0x338] sm:$0xff] }
 0x6bc   :  { %23731 = vmatprep.mubr.msk.f32.mxu1 %vm6689_vm3, %v28607_v59  ;;  %v9563_v59 = vld [vmem:[#allocation3 + $0x19] sm:$0xff] }
 0x6bf   :  { %23732 = vmatmul.mubr.msk.f32.gmra.mrb[48].mxu1 %vm6689_vm3, %v28611_v60  ;;  %v9564_v60 = vld [vmem:[#allocation3 + $0x21] sm:$0xff] }
 0x6c0   :  { %23734 = vmatprep.mubr.msk.f32.mxu1 %vm6689_vm3, %v28615_v61  ;;  %v29263_v61 = vld [vmem:[%s31020_s5 + $0x30] sm:$0xff] }
 0x6c3   :  { %23735 = vmatmul.mubr.msk.f32.gmra.mrb[50].mxu1 %vm6689_vm3, %v28619_v62  ;;  %v29266_v62 = vld [vmem:[#allocation3 + $0x31] sm:$0xff] }
 0x6c4   :  { %23737 = vmatprep.mubr.msk.f32.mxu1 %vm6689_vm3, %v28623_v63  ;;  %v29272_v63 = vld [vmem:[#allocation3 + $0x39] sm:$0xff] }
 0x6c7   :  { %23738 = vmatmul.mubr.msk.f32.gmra.mrb[52].mxu1 %vm6689_vm3, %v28627_v36  ;;  %v29276_v36 = vld [vmem:[#allocation3 + $0x49] sm:$0xff] }
 0x6c8   :  { %23740 = vmatprep.mubr.msk.f32.mxu1 %vm6689_vm3, %v28631_v3  ;;  %v29280_v3 = vld [vmem:[#allocation3 + $0x51] sm:$0xff] }
 0x6cb   :  { %23741 = vmatmul.mubr.msk.f32.gmra.mrb[54].mxu1 %vm6689_vm3, %v28635_v4  ;;  %v29284_v4 = vld [vmem:[#allocation3 + $0x61] sm:$0xff] }
 0x6cc   :  { %23743 = vmatprep.mubr.msk.f32.mxu1 %vm6689_vm3, %v28639_v6  ;;  %v29288_v6 = vld [vmem:[#allocation3 + $0x69] sm:$0xff] }
 0x6cf   :  { %23744 = vmatmul.mubr.msk.f32.gmra.mrb[56].mxu1 %vm6689_vm3, %v28643_v2  ;;  %v29292_v2 = vld [vmem:[#allocation3 + $0x79] sm:$0xff] }
 0x6d0   :  { %23746 = vmatprep.mubr.msk.f32.mxu1 %vm6689_vm3, %v28647_v35  ;;  %v29296_v35 = vld [vmem:[#allocation3 + $0x81] sm:$0xff] }
 0x6d3   :  { %23747 = vmatmul.mubr.msk.f32.gmra.mrb[58].mxu1 %vm6689_vm3, %v28651_v0  ;;  %v29300_v0 = vld [vmem:[#allocation3 + $0x91] sm:$0xff] }
 0x6d4   :  { %23749 = vmatprep.mubr.msk.f32.mxu1 %vm6689_vm3, %v28655_v48  ;;  %v29304_v48 = vld [vmem:[#allocation3 + $0x99] sm:$0xff] }
 0x6d7   :  { %23750 = vmatmul.mubr.msk.f32.gmra.mrb[60].mxu1 %vm6689_vm3, %v28659_v11  ;;  %v29308_v11 = vld [vmem:[#allocation3 + $0xa9] sm:$0xff] }
 0x6d8   :  { %23752 = vmatprep.mubr.msk.f32.mxu1 %vm6689_vm3, %v28663_v7  ;;  %v29312_v7 = vld [vmem:[#allocation3 + $0xb1] sm:$0xff] }
 0x6db   :  { %23753 = vmatmul.mubr.msk.f32.gmra.mrb[62].mxu1 %vm6689_vm3, %v28667_v9  ;;  %v29316_v9 = vld [vmem:[#allocation3 + $0xc1] sm:$0xff] }
 0x6dc   :  { %23755 = vmatprep.mubr.msk.f32.mxu1 %vm6689_vm3, %v28671_v49  ;;  %v29320_v49 = vld [vmem:[#allocation3 + $0xc9] sm:$0xff] }
 0x6df   :  { %23756 = vmatmul.mubr.msk.f32.gmra.mrb[0].mxu1 %vm6689_vm3, %v28675_v8  ;;  %v29324_v8 = vld [vmem:[#allocation3 + $0xd9] sm:$0xff] }
 0x6e0   :  { %23758 = vmatprep.mubr.msk.f32.mxu1 %vm6689_vm3, %v28679_v13  ;;  %v29328_v13 = vld [vmem:[#allocation3 + $0xe1] sm:$0xff] }
 0x6e3   :  { %23759 = vmatmul.mubr.msk.f32.gmra.mrb[2].mxu1 %vm6689_vm3, %v28683_v14  ;;  %v29332_v14 = vld [vmem:[#allocation3 + $0xf1] sm:$0xff] }
 0x6e4   :  { %23761 = vmatprep.mubr.msk.f32.mxu1 %vm6689_vm3, %v28687_v5  ;;  %v29336_v5 = vld [vmem:[#allocation3 + $0xf9] sm:$0xff] }
 0x6e7   :  { %23762 = vmatmul.mubr.msk.f32.gmra.mrb[4].mxu1 %vm6689_vm3, %v28691_v10  ;;  %v29340_v10 = vld [vmem:[#allocation3 + $0x109] sm:$0xff] }
 0x6e8   :  { %23764 = vmatprep.mubr.msk.f32.mxu1 %vm6689_vm3, %v28695_v12  ;;  %v29344_v12 = vld [vmem:[#allocation3 + $0x111] sm:$0xff] }
 0x6eb   :  { %23765 = vmatmul.mubr.msk.f32.gmra.mrb[6].mxu1 %vm6689_vm3, %v28699_v19  ;;  %v29348_v19 = vld [vmem:[#allocation3 + $0x121] sm:$0xff] }
 0x6ec   :  { %23767 = vmatprep.mubr.msk.f32.mxu1 %vm6689_vm3, %v29183_v54 }
 0x6ef   :  { %23768 = vmatmul.mubr.msk.f32.gmra.mrb[8].mxu1 %vm6689_vm3, %v29187_v55 }
 0x6f0   :  { %23770 = vmatprep.mubr.msk.f32.mxu1 %vm6689_vm3, %v28705_v21  ;;  %v29352_v21 = vld [vmem:[#allocation3 + $0x129] sm:$0xff] }
 0x6f3   :  { %23771 = vmatmul.mubr.msk.f32.gmra.mrb[10].mxu1 %vm6689_vm3, %v28709_v22  ;;  %v29356_v22 = vld [vmem:[#allocation3 + $0x139] sm:$0xff] }
 0x6f4   :  { %23773 = vmatprep.mubr.msk.f32.mxu1 %vm6689_vm3, %v28713_v23  ;;  %v29360_v23 = vld [vmem:[#allocation3 + $0x141] sm:$0xff] }
 0x6f7   :  { %23774 = vmatmul.mubr.msk.f32.gmra.mrb[12].mxu1 %vm6689_vm3, %v28717_v24  ;;  %v29364_v24 = vld [vmem:[#allocation3 + $0x151] sm:$0xff] }
 0x6f8   :  { %23776 = vmatprep.mubr.msk.f32.mxu1 %vm6689_vm3, %v28721_v25  ;;  %v29368_v25 = vld [vmem:[#allocation3 + $0x159] sm:$0xff] }
 0x6fb   :  { %23777 = vmatmul.mubr.msk.f32.gmra.mrb[14].mxu1 %vm6689_vm3, %v28725_v26  ;;  %v29372_v26 = vld [vmem:[#allocation3 + $0x169] sm:$0xff] }
 0x6fc   :  { %23779 = vmatprep.mubr.msk.f32.mxu1 %vm6689_vm3, %v28729_v27  ;;  %v29376_v27 = vld [vmem:[#allocation3 + $0x171] sm:$0xff] }
 0x6ff   :  { %23780 = vmatmul.mubr.msk.f32.gmra.mrb[16].mxu1 %vm6689_vm3, %v28733_v38  ;;  %v29380_v38 = vld [vmem:[#allocation3 + $0x181] sm:$0xff] }
 0x700   :  { %23782 = vmatprep.mubr.msk.f32.mxu1 %vm6689_vm3, %v28737_v28  ;;  %v29384_v28 = vld [vmem:[#allocation3 + $0x189] sm:$0xff] }
 0x703   :  { %23783 = vmatmul.mubr.msk.f32.gmra.mrb[18].mxu1 %vm6689_vm3, %v28741_v29  ;;  %v9595_v29 = vld [vmem:[#allocation3 + $0x1c9] sm:$0xff] }
 0x704   :  { %23785 = vmatprep.mubr.msk.f32.mxu1 %vm6689_vm3, %v28745_v30  ;;  %v9596_v30 = vld [vmem:[#allocation3 + $0x1d1] sm:$0xff] }
 0x707   :  { %23786 = vmatmul.mubr.msk.f32.gmra.mrb[20].mxu1 %vm6689_vm3, %v28751_v32  ;;  %v29394_v32 = vld [vmem:[#allocation3 + $0x1e9] sm:$0xff] }
 0x708   :  { %23788 = vmatprep.mubr.msk.f32.mxu1 %vm6689_vm3, %v28757_v34  ;;  %v29398_v34 = vld [vmem:[#allocation3 + $0x1f9] sm:$0xff] }
 0x70b   :  { %23789 = vmatmul.mubr.msk.f32.gmra.mrb[22].mxu1 %vm6689_vm3, %v28763_v1  ;;  %v29406_v1 = vld [vmem:[#allocation3 + $0x211] sm:$0xff] }
 0x70c   :  { %23791 = vmatprep.mubr.msk.f32.mxu1 %vm6689_vm3, %v28769_v40  ;;  %v29414_v40 = vld [vmem:[#allocation3 + $0x229] sm:$0xff] }
 0x70f   :  { %23792 = vmatmul.mubr.msk.f32.gmra.mrb[24].mxu1 %vm6689_vm3, %v28775_v42  ;;  %v29422_v42 = vld [vmem:[#allocation3 + $0x241] sm:$0xff] }
 0x710   :  { %23794 = vmatprep.mubr.msk.f32.mxu1 %vm6689_vm3, %v28781_v45  ;;  %v29426_v45 = vld [vmem:[#allocation3 + $0x249] sm:$0xff] }
 0x713   :  { %23795 = vmatmul.mubr.msk.f32.gmra.mrb[26].mxu1 %vm6689_vm3, %v28787_v16  ;;  %v29434_v16 = vld [vmem:[#allocation3 + $0x261] sm:$0xff] }
 0x714   :  { %23797 = vmatprep.mubr.msk.f32.mxu1 %vm6689_vm3, %v28793_v51  ;;  %v29442_v51 = vld [vmem:[#allocation3 + $0x279] sm:$0xff] }
 0x717   :  { %23798 = vmatmul.mubr.msk.f32.gmra.mrb[28].mxu1 %vm6689_vm3, %v28799_v17  ;;  %v29450_v17 = vld [vmem:[#allocation3 + $0x291] sm:$0xff] }
 0x718   :  { %23800 = vmatprep.mubr.msk.f32.mxu1 %vm6689_vm3, %v28805_v15  ;;  %v31412_v15 = vld [vmem:[#allocation37_spill] sm:$0xff] }
 0x71b   :  { %23801 = vmatmul.mubr.msk.f32.gmra.mrb[30].mxu1 %vm6689_vm3, %v28811_v47  ;;  %v29430_v47 = vld [vmem:[#allocation3 + $0x259] sm:$0xff] }
 0x71c   :  { %23803 = vmatprep.mubr.msk.f32.mxu1 %vm6689_vm3, %v28817_v52  ;;  %v29446_v52 = vld [vmem:[#allocation3 + $0x289] sm:$0xff] }
 0x71f   :  { %23804 = vmatmul.mubr.msk.f32.gmra.mrb[32].mxu1 %vm6689_vm3, %v28823_v41  ;;  %v29418_v41 = vld [vmem:[#allocation3 + $0x231] sm:$0xff] }
 0x720   :  { %23806 = vmatprep.mubr.msk.f32.mxu1 %vm6689_vm3, %v28829_v50  ;;  %v29438_v50 = vld [vmem:[#allocation3 + $0x271] sm:$0xff] }
 0x723   :  { %23807 = vmatmul.mubr.msk.f32.gmra.mrb[34].mxu1 %vm6689_vm3, %v31410_v56  ;;  %v29458_v56 = vld [vmem:[#allocation3 + $0x2a9] sm:$0xff] }
 0x724   :  { %23809 = vmatprep.mubr.msk.f32.mxu1 %vm6689_vm3, %v31411_v57  ;;  %31414 = vst [vmem:[#allocation34_spill] sm:$0xff] %v29458_v56  ;;  %v29462_v57 = vld [vmem:[#allocation3 + $0x2b9] sm:$0xff] }
 0x725   :  { %31415 = vst [vmem:[#allocation37_spill] sm:$0xff] %v29462_v57 }
 0x727   :  { %23810 = vmatmul.mubr.msk.f32.gmra.mrb[36].mxu1 %vm6689_vm3, %v28847_v31  ;;  %v29390_v31 = vld [vmem:[#allocation3 + $0x1e1] sm:$0xff] }
 0x728   :  { %23812 = vmatprep.mubr.msk.f32.mxu1 %vm6689_vm3, %v31412_v15  ;;  %v29466_v15 = vld [vmem:[#allocation3 + $0x2c1] sm:$0xff] }
 0x729   :  { %31416 = vst [vmem:[#allocation90_spill] sm:$0xff] %v29466_v15 }
 0x72b   :  { %23813 = vmatmul.mubr.msk.f32.gmra.mrb[38].mxu1 %vm6689_vm3, %v28859_v37  ;;  %v29402_v37 = vld [vmem:[#allocation3 + $0x201] sm:$0xff] }
 0x72c   :  { %23815 = vmatprep.mubr.msk.f32.mxu1 %vm6689_vm3, %v29251_v18 }
 0x72f   :  { %23816 = vmatmul.mubr.msk.f32.gmra.mrb[40].mxu1 %vm6689_vm3, %v29255_v58 }
 0x730   :  { %23820 = vmatprep.mubr.msk.f32.mxu1 %vm6689_vm3, %v9563_v59  ;;  %v29470_v59 = vld [vmem:[#allocation3 + $0x2d1] sm:$0xff] }
 0x731   :  { %31417 = vst [vmem:[#allocation91_spill] sm:$0xff] %v29470_v59 }
 0x733   :  { %23821 = vmatmul.mubr.msk.f32.vlgmr.msra.gmra.mrb[42].mxu1 %vm6689_vm3, %v9564_v60  ;;  %v29474_v60 = vld [vmem:[#allocation3 + $0x2d9] sm:$0xff] }
 0x734   :  { %23917 = vmatpush3.msra.mxu1 %v29121_v33  ;;  %23823 = vmatprep.mubr.msk.f32.mxu1 %vm6689_vm3, %v29266_v62  ;;  %v29454_v33 = vld [vmem:[#allocation3 + $0x2a1] sm:$0xff]  ;;  %31418 = vst [vmem:[#allocation92_spill] sm:$0xff] %v29474_v60 }
 0x735   :  { %24014 = vmatprep.subr.mxu1 %v29263_v61  ;;  %31413 = vst [vmem:[#allocation32_spill] sm:$0xff] %v29454_v33 }
 0x737   :  { %23824 = vmatmul.mubr.msk.f32.gmra.mrb[44].mxu1 %vm6689_vm3, %v29272_v63 }
 0x738   :  { %23826 = vmatprep.mubr.msk.f32.mxu1 %vm6689_vm3, %v29276_v36 }
 0x73b   :  { %23827 = vmatmul.mubr.msk.f32.gmra.mrb[46].mxu1 %vm6689_vm3, %v29280_v3 }
 0x73c   :  { %23829 = vmatprep.mubr.msk.f32.mxu1 %vm6689_vm3, %v29284_v4 }
 0x73f   :  { %23830 = vmatmul.mubr.msk.f32.gmra.mrb[48].mxu1 %vm6689_vm3, %v29288_v6 }
 0x740   :  { %23832 = vmatprep.mubr.msk.f32.mxu1 %vm6689_vm3, %v29292_v2 }
 0x743   :  { %23833 = vmatmul.mubr.msk.f32.gmra.mrb[50].mxu1 %vm6689_vm3, %v29296_v35 }
 0x744   :  { %23835 = vmatprep.mubr.msk.f32.mxu1 %vm6689_vm3, %v29300_v0 }
 0x747   :  { %23836 = vmatmul.mubr.msk.f32.gmra.mrb[52].mxu1 %vm6689_vm3, %v29304_v48 }
 0x748   :  { %23838 = vmatprep.mubr.msk.f32.mxu1 %vm6689_vm3, %v29308_v11 }
 0x74b   :  { %23839 = vmatmul.mubr.msk.f32.gmra.mrb[54].mxu1 %vm6689_vm3, %v29312_v7 }
 0x74c   :  { %23841 = vmatprep.mubr.msk.f32.mxu1 %vm6689_vm3, %v29316_v9 }
 0x74f   :  { %23842 = vmatmul.mubr.msk.f32.gmra.mrb[56].mxu1 %vm6689_vm3, %v29320_v49 }
 0x750   :  { %23844 = vmatprep.mubr.msk.f32.mxu1 %vm6689_vm3, %v29324_v8 }
 0x753   :  { %23845 = vmatmul.mubr.msk.f32.gmra.mrb[58].mxu1 %vm6689_vm3, %v29328_v13 }
 0x754   :  { %23847 = vmatprep.mubr.msk.f32.mxu1 %vm6689_vm3, %v29332_v14 }
 0x757   :  { %23848 = vmatmul.mubr.msk.f32.gmra.mrb[60].mxu1 %vm6689_vm3, %v29336_v5 }
 0x758   :  { %23850 = vmatprep.mubr.msk.f32.mxu1 %vm6689_vm3, %v29340_v10 }
 0x75b   :  { %23851 = vmatmul.mubr.msk.f32.gmra.mrb[62].mxu1 %vm6689_vm3, %v29344_v12 }
 0x75c   :  { %23853 = vmatprep.mubr.msk.f32.mxu1 %vm6689_vm3, %v29348_v19 }
 0x75f   :  { %23854 = vmatmul.mubr.msk.f32.gmra.mrb[0].mxu1 %vm6689_vm3, %v29352_v21 }
 0x760   :  { %23856 = vmatprep.mubr.msk.f32.mxu1 %vm6689_vm3, %v29356_v22 }
 0x763   :  { %23857 = vmatmul.mubr.msk.f32.gmra.mrb[2].mxu1 %vm6689_vm3, %v29360_v23 }
 0x764   :  { %23859 = vmatprep.mubr.msk.f32.mxu1 %vm6689_vm3, %v29364_v24 }
 0x767   :  { %23860 = vmatmul.mubr.msk.f32.gmra.mrb[4].mxu1 %vm6689_vm3, %v29368_v25 }
 0x768   :  { %23862 = vmatprep.mubr.msk.f32.mxu1 %vm6689_vm3, %v29372_v26 }
 0x76b   :  { %23863 = vmatmul.mubr.msk.f32.gmra.mrb[6].mxu1 %vm6689_vm3, %v29376_v27 }
 0x76c   :  { %23865 = vmatprep.mubr.msk.f32.mxu1 %vm6689_vm3, %v29380_v38 }
 0x76f   :  { %23866 = vmatmul.mubr.msk.f32.gmra.mrb[8].mxu1 %vm6689_vm3, %v29384_v28 }
 0x770   :  { %23868 = vmatprep.mubr.msk.f32.mxu1 %vm6689_vm3, %v9595_v29  ;;  %v29478_v29 = vld [vmem:[#allocation3 + $0x2e9] sm:$0xff] }
 0x771   :  { %31419 = vst [vmem:[#allocation93_spill] sm:$0xff] %v29478_v29 }
 0x773   :  { %23869 = vmatmul.mubr.msk.f32.gmra.mrb[10].mxu1 %vm6689_vm3, %v9596_v30  ;;  %v29482_v30 = vld [vmem:[#allocation3 + $0x2f1] sm:$0xff] }
 0x774   :  { %23871 = vmatprep.mubr.msk.f32.mxu1 %vm6689_vm3, %v29390_v31  ;;  %31420 = vst [vmem:[#allocation94_spill] sm:$0xff] %v29482_v30 }
 0x777   :  { %23872 = vmatmul.mubr.msk.f32.gmra.mrb[12].mxu1 %vm6689_vm3, %v29394_v32 }
 0x778   :  { %23874 = vmatprep.mubr.msk.f32.mxu1 %vm6689_vm3, %v29398_v34 }
 0x77b   :  { %23875 = vmatmul.mubr.msk.f32.gmra.mrb[14].mxu1 %vm6689_vm3, %v29402_v37 }
 0x77c   :  { %23877 = vmatprep.mubr.msk.f32.mxu1 %vm6689_vm3, %v29406_v1 }
 0x77f   :  { %23878 = vmatmul.mubr.msk.f32.gmra.mrb[16].mxu1 %vm6689_vm3, %v29410_v39 }
 0x780   :  { %23880 = vmatprep.mubr.msk.f32.mxu1 %vm6689_vm3, %v29414_v40 }
 0x783   :  { %23881 = vmatmul.mubr.msk.f32.gmra.mrb[18].mxu1 %vm6689_vm3, %v29418_v41 }
 0x784   :  { %23883 = vmatprep.mubr.msk.f32.mxu1 %vm6689_vm3, %v29422_v42 }
 0x787   :  { %23884 = vmatmul.mubr.msk.f32.gmra.mrb[20].mxu1 %vm6689_vm3, %v29426_v45 }
 0x788   :  { %23886 = vmatprep.mubr.msk.f32.mxu1 %vm6689_vm3, %v29430_v47 }
 0x78b   :  { %23887 = vmatmul.mubr.msk.f32.gmra.mrb[22].mxu1 %vm6689_vm3, %v29434_v16 }
 0x78c   :  { %23889 = vmatprep.mubr.msk.f32.mxu1 %vm6689_vm3, %v29438_v50 }
 0x78f   :  { %23890 = vmatmul.mubr.msk.f32.gmra.mrb[24].mxu1 %vm6689_vm3, %v29442_v51 }
 0x790   :  { %23892 = vmatprep.mubr.msk.f32.mxu1 %vm6689_vm3, %v29446_v52 }
 0x793   :  { %23893 = vmatmul.mubr.msk.f32.gmra.mrb[26].mxu1 %vm6689_vm3, %v29450_v17 }
 0x794   :  { %23895 = vmatprep.mubr.msk.f32.mxu1 %vm6689_vm3, %v29454_v33  ;;  %v31437_v33 = vld [vmem:[#allocation50_spill] sm:$0xff] }
 0x797   :  { %23896 = vmatmul.mubr.msk.f32.gmra.mrb[28].mxu1 %vm6689_vm3, %v29458_v56  ;;  %v31433_v56 = vld [vmem:[#allocation46_spill] sm:$0xff] }
 0x798   :  { %23898 = vmatprep.mubr.msk.f32.mxu1 %vm6689_vm3, %v29462_v57  ;;  %v31428_v57 = vld [vmem:[#allocation41_spill] sm:$0xff] }
 0x79b   :  { %23899 = vmatmul.mubr.msk.f32.gmra.mrb[30].mxu1 %vm6689_vm3, %v29466_v15  ;;  %v29486_v15 = vld [vmem:[#allocation3 + $0x301] sm:$0xff] }
 0x79c   :  { %23901 = vmatprep.mubr.msk.f32.mxu1 %vm6689_vm3, %v29470_v59  ;;  %31421 = vst [vmem:[#allocation95_spill] sm:$0xff] %v29486_v15  ;;  %v29490_v59 = vld [vmem:[#allocation3 + $0x309] sm:$0xff] }
 0x79d   :  { %31422 = vst [vmem:[#allocation96_spill] sm:$0xff] %v29490_v59 }
 0x79f   :  { %23902 = vmatmul.mubr.msk.f32.gmra.mrb[32].mxu1 %vm6689_vm3, %v29474_v60  ;;  %v29494_v60 = vld [vmem:[#allocation3 + $0x319] sm:$0xff] }
 0x7a0   :  { %23904 = vmatprep.mubr.msk.f32.mxu1 %vm6689_vm3, %v29478_v29  ;;  %31423 = vst [vmem:[#allocation97_spill] sm:$0xff] %v29494_v60  ;;  %v29498_v29 = vld [vmem:[#allocation3 + $0x321] sm:$0xff] }
 0x7a1   :  { %31424 = vst [vmem:[#allocation98_spill] sm:$0xff] %v29498_v29 }
 0x7a3   :  { %23905 = vmatmul.mubr.msk.f32.gmra.mrb[34].mxu1 %vm6689_vm3, %v29482_v30  ;;  %v29502_v30 = vld [vmem:[#allocation3 + $0x331] sm:$0xff] }
 0x7a4   :  { %23907 = vmatprep.mubr.msk.f32.mxu1 %vm6689_vm3, %v29486_v15  ;;  %31425 = vst [vmem:[#allocation99_spill] sm:$0xff] %v29502_v30  ;;  %v29506_v15 = vld [vmem:[#allocation3 + $0x339] sm:$0xff] }
 0x7a5   :  { %31426 = vst [vmem:[#allocation100_spill] sm:$0xff] %v29506_v15 }
 0x7a7   :  { %23908 = vmatmul.mubr.msk.f32.gmra.mrb[36].mxu1 %vm6689_vm3, %v29490_v59  ;;  %v31427_v59 = vld [vmem:[#allocation40_spill] sm:$0xff] }
 0x7a8   :  { %23910 = vmatprep.mubr.msk.f32.mxu1 %vm6689_vm3, %v29494_v60  ;;  %v29515_v60 = vld [vmem:[%s31020_s5 + $0x38] sm:$0xff] }
 0x7ab   :  { %23911 = vmatmul.mubr.msk.f32.gmra.mrb[38].mxu1 %vm6689_vm3, %v29498_v29  ;;  %v31429_v29 = vld [vmem:[#allocation42_spill] sm:$0xff] }
 0x7ac   :  { %23913 = vmatprep.mubr.msk.f32.mxu1 %vm6689_vm3, %v29502_v30  ;;  %v31430_v30 = vld [vmem:[#allocation43_spill] sm:$0xff] }
 0x7af   :  { %23914 = vmatmul.mubr.msk.f32.gmra.mrb[40].mxu1 %vm6689_vm3, %v29506_v15  ;;  %v31431_v15 = vld [vmem:[#allocation44_spill] sm:$0xff] }
 0x7b0   :  { %23918 = vmatprep.mubr.msk.f32.mxu1 %vm6689_vm3, %v31427_v59  ;;  %v31432_v59 = vld [vmem:[#allocation45_spill] sm:$0xff] }
 0x7b3   :  { %23919 = vmatmul.mubr.msk.f32.vlgmr.msra.gmra.mrb[42].mxu1 %vm6689_vm3, %v31428_v57  ;;  %v31434_v57 = vld [vmem:[#allocation47_spill] sm:$0xff] }
 0x7b4   :  { %24015 = vmatpush3.msra.mxu1 %v29263_v61  ;;  %23921 = vmatprep.mubr.msk.f32.mxu1 %vm6689_vm3, %v31429_v29  ;;  %v31435_v61 = vld [vmem:[#allocation48_spill] sm:$0xff]  ;;  %v31436_v29 = vld [vmem:[#allocation49_spill] sm:$0xff] }
 0x7b5   :  { %24112 = vmatprep.subr.mxu1 %v29515_v60 }
 0x7b7   :  { %23922 = vmatmul.mubr.msk.f32.gmra.mrb[44].mxu1 %vm6689_vm3, %v31430_v30  ;;  %v31438_v30 = vld [vmem:[#allocation51_spill] sm:$0xff] }
 0x7b8   :  { %23924 = vmatprep.mubr.msk.f32.mxu1 %vm6689_vm3, %v31431_v15  ;;  %v31439_v15 = vld [vmem:[#allocation52_spill] sm:$0xff] }
 0x7bb   :  { %23925 = vmatmul.mubr.msk.f32.gmra.mrb[46].mxu1 %vm6689_vm3, %v31432_v59  ;;  %v31440_v59 = vld [vmem:[#allocation53_spill] sm:$0xff] }
 0x7bc   :  { %23927 = vmatprep.mubr.msk.f32.mxu1 %vm6689_vm3, %v31433_v56  ;;  %v31441_v56 = vld [vmem:[#allocation54_spill] sm:$0xff] }
 0x7bf   :  { %23928 = vmatmul.mubr.msk.f32.gmra.mrb[48].mxu1 %vm6689_vm3, %v31434_v57  ;;  %v31442_v57 = vld [vmem:[#allocation55_spill] sm:$0xff] }
 0x7c0   :  { %23930 = vmatprep.mubr.msk.f32.mxu1 %vm6689_vm3, %v31435_v61  ;;  %v31443_v61 = vld [vmem:[#allocation56_spill] sm:$0xff] }
 0x7c3   :  { %23931 = vmatmul.mubr.msk.f32.gmra.mrb[50].mxu1 %vm6689_vm3, %v31436_v29  ;;  %v31444_v29 = vld [vmem:[#allocation57_spill] sm:$0xff] }
 0x7c4   :  { %23933 = vmatprep.mubr.msk.f32.mxu1 %vm6689_vm3, %v31437_v33  ;;  %v31445_v33 = vld [vmem:[#allocation58_spill] sm:$0xff] }
 0x7c7   :  { %23934 = vmatmul.mubr.msk.f32.gmra.mrb[52].mxu1 %vm6689_vm3, %v31438_v30  ;;  %v31446_v30 = vld [vmem:[#allocation59_spill] sm:$0xff] }
 0x7c8   :  { %23936 = vmatprep.mubr.msk.f32.mxu1 %vm6689_vm3, %v31439_v15  ;;  %v31447_v15 = vld [vmem:[#allocation60_spill] sm:$0xff] }
 0x7cb   :  { %23937 = vmatmul.mubr.msk.f32.gmra.mrb[54].mxu1 %vm6689_vm3, %v31440_v59  ;;  %v31448_v59 = vld [vmem:[#allocation61_spill] sm:$0xff] }
 0x7cc   :  { %23939 = vmatprep.mubr.msk.f32.mxu1 %vm6689_vm3, %v31441_v56  ;;  %v31449_v56 = vld [vmem:[#allocation62_spill] sm:$0xff] }
 0x7cf   :  { %23940 = vmatmul.mubr.msk.f32.gmra.mrb[56].mxu1 %vm6689_vm3, %v31442_v57  ;;  %v31450_v57 = vld [vmem:[#allocation63_spill] sm:$0xff] }
 0x7d0   :  { %23942 = vmatprep.mubr.msk.f32.mxu1 %vm6689_vm3, %v31443_v61  ;;  %v31451_v61 = vld [vmem:[#allocation64_spill] sm:$0xff] }
 0x7d3   :  { %23943 = vmatmul.mubr.msk.f32.gmra.mrb[58].mxu1 %vm6689_vm3, %v31444_v29  ;;  %v31452_v29 = vld [vmem:[#allocation65_spill] sm:$0xff] }
 0x7d4   :  { %23945 = vmatprep.mubr.msk.f32.mxu1 %vm6689_vm3, %v31445_v33  ;;  %v31453_v33 = vld [vmem:[#allocation66_spill] sm:$0xff] }
 0x7d7   :  { %23946 = vmatmul.mubr.msk.f32.gmra.mrb[60].mxu1 %vm6689_vm3, %v31446_v30  ;;  %v31454_v30 = vld [vmem:[#allocation67_spill] sm:$0xff] }
 0x7d8   :  { %23948 = vmatprep.mubr.msk.f32.mxu1 %vm6689_vm3, %v31447_v15  ;;  %v31455_v15 = vld [vmem:[#allocation10_spill] sm:$0xff] }
 0x7db   :  { %23949 = vmatmul.mubr.msk.f32.gmra.mrb[62].mxu1 %vm6689_vm3, %v31448_v59  ;;  %v31456_v59 = vld [vmem:[#allocation11_spill] sm:$0xff] }
 0x7dc   :  { %23951 = vmatprep.mubr.msk.f32.mxu1 %vm6689_vm3, %v31449_v56  ;;  %v29577_v56 = vld [vmem:[#allocation3 + $0x182] sm:$0xff] }
 0x7df   :  { %23952 = vmatmul.mubr.msk.f32.gmra.mrb[0].mxu1 %vm6689_vm3, %v31450_v57  ;;  %v29581_v57 = vld [vmem:[#allocation3 + $0x18a] sm:$0xff] }
 0x7e0   :  { %23954 = vmatprep.mubr.msk.f32.mxu1 %vm6689_vm3, %v31451_v61  ;;  %31457 = vst [vmem:[#allocation40_spill] sm:$0xff] %v29581_v57  ;;  %v31458_v61 = vld [vmem:[#allocation12_spill] sm:$0xff] }
 0x7e3   :  { %23955 = vmatmul.mubr.msk.f32.gmra.mrb[2].mxu1 %vm6689_vm3, %v31452_v29  ;;  %v31459_v29 = vld [vmem:[#allocation13_spill] sm:$0xff] }
 0x7e4   :  { %23957 = vmatprep.mubr.msk.f32.mxu1 %vm6689_vm3, %v31453_v33  ;;  %v31460_v33 = vld [vmem:[#allocation68_spill] sm:$0xff] }
 0x7e7   :  { %23958 = vmatmul.mubr.msk.f32.gmra.mrb[4].mxu1 %vm6689_vm3, %v31454_v30  ;;  %v31461_v30 = vld [vmem:[#allocation69_spill] sm:$0xff] }
 0x7e8   :  { %23960 = vmatprep.mubr.msk.f32.mxu1 %vm6689_vm3, %v31455_v15  ;;  %v31462_v15 = vld [vmem:[#allocation70_spill] sm:$0xff] }
 0x7eb   :  { %23961 = vmatmul.mubr.msk.f32.gmra.mrb[6].mxu1 %vm6689_vm3, %v31456_v59  ;;  %v31463_v59 = vld [vmem:[#allocation71_spill] sm:$0xff] }
 0x7ec   :  { %23963 = vmatprep.mubr.msk.f32.mxu1 %vm6689_vm3, %v29577_v56 }
 0x7ef   :  { %23964 = vmatmul.mubr.msk.f32.gmra.mrb[8].mxu1 %vm6689_vm3, %v29581_v57  ;;  %v31464_v57 = vld [vmem:[#allocation72_spill] sm:$0xff] }
 0x7f0   :  { %23966 = vmatprep.mubr.msk.f32.mxu1 %vm6689_vm3, %v28996_v20  ;;  %v31465_v20 = vld [vmem:[#allocation73_spill] sm:$0xff] }
 0x7f3   :  { %23967 = vmatmul.mubr.msk.f32.gmra.mrb[10].mxu1 %vm6689_vm3, %v31458_v61  ;;  %v31466_v61 = vld [vmem:[#allocation74_spill] sm:$0xff] }
 0x7f4   :  { %23969 = vmatprep.mubr.msk.f32.mxu1 %vm6689_vm3, %v31459_v29  ;;  %v31467_v29 = vld [vmem:[#allocation75_spill] sm:$0xff] }
 0x7f7   :  { %23970 = vmatmul.mubr.msk.f32.gmra.mrb[12].mxu1 %vm6689_vm3, %v31460_v33  ;;  %v31468_v33 = vld [vmem:[#allocation76_spill] sm:$0xff] }
 0x7f8   :  { %23972 = vmatprep.mubr.msk.f32.mxu1 %vm6689_vm3, %v31461_v30  ;;  %v31469_v30 = vld [vmem:[#allocation77_spill] sm:$0xff] }
 0x7fb   :  { %23973 = vmatmul.mubr.msk.f32.gmra.mrb[14].mxu1 %vm6689_vm3, %v31462_v15  ;;  %v31470_v15 = vld [vmem:[#allocation78_spill] sm:$0xff] }
 0x7fc   :  { %23975 = vmatprep.mubr.msk.f32.mxu1 %vm6689_vm3, %v31463_v59  ;;  %v31471_v59 = vld [vmem:[#allocation14_spill] sm:$0xff] }
 0x7ff   :  { %23976 = vmatmul.mubr.msk.f32.gmra.mrb[16].mxu1 %vm6689_vm3, %v31464_v57  ;;  %v31472_v57 = vld [vmem:[#allocation79_spill] sm:$0xff] }
 0x800   :  { %23978 = vmatprep.mubr.msk.f32.mxu1 %vm6689_vm3, %v31465_v20  ;;  %v31473_v20 = vld [vmem:[#allocation80_spill] sm:$0xff] }
 0x803   :  { %23979 = vmatmul.mubr.msk.f32.gmra.mrb[18].mxu1 %vm6689_vm3, %v31466_v61  ;;  %v31474_v61 = vld [vmem:[#allocation81_spill] sm:$0xff] }
 0x804   :  { %23981 = vmatprep.mubr.msk.f32.mxu1 %vm6689_vm3, %v31467_v29  ;;  %v31475_v29 = vld [vmem:[#allocation82_spill] sm:$0xff] }
 0x807   :  { %23982 = vmatmul.mubr.msk.f32.gmra.mrb[20].mxu1 %vm6689_vm3, %v31468_v33  ;;  %v31476_v33 = vld [vmem:[#allocation83_spill] sm:$0xff] }
 0x808   :  { %23984 = vmatprep.mubr.msk.f32.mxu1 %vm6689_vm3, %v31469_v30  ;;  %v31477_v30 = vld [vmem:[#allocation84_spill] sm:$0xff] }
 0x80b   :  { %23985 = vmatmul.mubr.msk.f32.gmra.mrb[22].mxu1 %vm6689_vm3, %v31470_v15  ;;  %v31478_v15 = vld [vmem:[#allocation85_spill] sm:$0xff] }
 0x80c   :  { %23987 = vmatprep.mubr.msk.f32.mxu1 %vm6689_vm3, %v31471_v59  ;;  %v31479_v59 = vld [vmem:[#allocation86_spill] sm:$0xff] }
 0x80f   :  { %23988 = vmatmul.mubr.msk.f32.gmra.mrb[24].mxu1 %vm6689_vm3, %v31472_v57  ;;  %v31480_v57 = vld [vmem:[#allocation87_spill] sm:$0xff] }
 0x810   :  { %23990 = vmatprep.mubr.msk.f32.mxu1 %vm6689_vm3, %v31473_v20  ;;  %v31481_v20 = vld [vmem:[#allocation88_spill] sm:$0xff] }
 0x813   :  { %23991 = vmatmul.mubr.msk.f32.gmra.mrb[26].mxu1 %vm6689_vm3, %v31474_v61  ;;  %v31482_v61 = vld [vmem:[#allocation89_spill] sm:$0xff] }
 0x814   :  { %23993 = vmatprep.mubr.msk.f32.mxu1 %vm6689_vm3, %v31475_v29  ;;  %v29645_v29 = vld [vmem:[#allocation3 + $0x332] sm:$0xff] }
 0x817   :  { %23994 = vmatmul.mubr.msk.f32.gmra.mrb[28].mxu1 %vm6689_vm3, %v31476_v33  ;;  %v29649_v33 = vld [vmem:[#allocation3 + $0x33a] sm:$0xff] }
 0x818   :  { %23996 = vmatprep.mubr.msk.f32.mxu1 %vm6689_vm3, %v31477_v30  ;;  %v10981_v30 = vld [vmem:[#allocation3 + $0x50] sm:$0xff] }
 0x81b   :  { %23997 = vmatmul.mubr.msk.f32.gmra.mrb[30].mxu1 %vm6689_vm3, %v31478_v15  ;;  %v10982_v15 = vld [vmem:[#allocation3 + $0x60] sm:$0xff] }
 0x81c   :  { %23999 = vmatprep.mubr.msk.f32.mxu1 %vm6689_vm3, %v31479_v59  ;;  %v10983_v59 = vld [vmem:[#allocation3 + $0x68] sm:$0xff] }
 0x81f   :  { %24000 = vmatmul.mubr.msk.f32.gmra.mrb[32].mxu1 %vm6689_vm3, %v31480_v57  ;;  %v10984_v57 = vld [vmem:[#allocation3 + $0x78] sm:$0xff] }
 0x820   :  { %24002 = vmatprep.mubr.msk.f32.mxu1 %vm6689_vm3, %v31481_v20  ;;  %v10985_v20 = vld [vmem:[#allocation3 + $0x80] sm:$0xff] }
 0x823   :  { %24003 = vmatmul.mubr.msk.f32.gmra.mrb[34].mxu1 %vm6689_vm3, %v29096_v53  ;;  %v10978_v53 = vld [vmem:[#allocation3 + $0x30] sm:$0xff] }
 0x824   :  { %24005 = vmatprep.mubr.msk.f32.mxu1 %vm6689_vm3, %v31482_v61  ;;  %v10987_v61 = vld [vmem:[#allocation3 + $0x98] sm:$0xff] }
 0x827   :  { %24006 = vmatmul.mubr.msk.f32.gmra.mrb[36].mxu1 %vm6689_vm3, %v29104_v46  ;;  %v10979_v46 = vld [vmem:[#allocation3 + $0x38] sm:$0xff] }
 0x828   :  { %24008 = vmatprep.mubr.msk.f32.mxu1 %vm6689_vm3, %v29108_v43  ;;  %v29657_v43 = vld [vmem:[%s31020_s5 + $0x40] sm:$0xff]  ;;  %s20815_s5 = sshll.u32 %s20814_s27, 2 }
 0x829   :  { %s13986_s22 = sadd.s32 %s21082_s3, %s20815_s5 }
 0x82a   :  { %s30530_s4 = scalar_lea.vmem %s31028_s13, %s13986_s22 }
 0x82b   :  { %24009 = vmatmul.mubr.msk.f32.gmra.mrb[38].mxu1 %vm6689_vm3, %v29112_v44  ;;  %v10980_v44 = vld [vmem:[#allocation3 + $0x48] sm:$0xff] }
 0x82c   :  { %24011 = vmatprep.mubr.msk.f32.mxu1 %vm6689_vm3, %v29645_v29 }
 0x82f   :  { %24012 = vmatmul.mubr.msk.f32.gmra.mrb[40].mxu1 %vm6689_vm3, %v29649_v33 }
 0x830   :  { %24016 = vmatprep.mubr.msk.f32.mxu1 %vm6689_vm3, %v10978_v53  ;;  %v10988_v53 = vld [vmem:[#allocation3 + $0xa8] sm:$0xff] }
 0x833   :  { %24017 = vmatmul.mubr.msk.f32.vlgmr.msra.gmra.mrb[42].mxu1 %vm6689_vm3, %v10979_v46  ;;  %v10989_v46 = vld [vmem:[#allocation3 + $0xb0] sm:$0xff] }
 0x834   :  { %24113 = vmatpush3.msra.mxu1 %v29515_v60  ;;  %24019 = vmatprep.mubr.msk.f32.mxu1 %vm6689_vm3, %v10980_v44  ;;  %v10986_v60 = vld [vmem:[#allocation3 + $0x90] sm:$0xff]  ;;  %v10990_v44 = vld [vmem:[#allocation3 + $0xc0] sm:$0xff] }
 0x835   :  { %24210 = vmatprep.subr.mxu1 %v29657_v43 }
 0x837   :  { %24020 = vmatmul.mubr.msk.f32.gmra.mrb[44].mxu1 %vm6689_vm3, %v10981_v30  ;;  %v10991_v30 = vld [vmem:[#allocation3 + $0xc8] sm:$0xff] }
 0x838   :  { %24022 = vmatprep.mubr.msk.f32.mxu1 %vm6689_vm3, %v10982_v15  ;;  %v10992_v15 = vld [vmem:[#allocation3 + $0xd8] sm:$0xff] }
 0x83b   :  { %24023 = vmatmul.mubr.msk.f32.gmra.mrb[46].mxu1 %vm6689_vm3, %v10983_v59  ;;  %v10993_v59 = vld [vmem:[#allocation3 + $0xe0] sm:$0xff] }
 0x83c   :  { %24025 = vmatprep.mubr.msk.f32.mxu1 %vm6689_vm3, %v10984_v57  ;;  %v10994_v57 = vld [vmem:[#allocation3 + $0xf0] sm:$0xff] }
 0x83f   :  { %24026 = vmatmul.mubr.msk.f32.gmra.mrb[48].mxu1 %vm6689_vm3, %v10985_v20  ;;  %v10995_v20 = vld [vmem:[#allocation3 + $0xf8] sm:$0xff] }
 0x840   :  { %24028 = vmatprep.mubr.msk.f32.mxu1 %vm6689_vm3, %v10986_v60  ;;  %v10996_v60 = vld [vmem:[#allocation3 + $0x108] sm:$0xff] }
 0x843   :  { %24029 = vmatmul.mubr.msk.f32.gmra.mrb[50].mxu1 %vm6689_vm3, %v10987_v61  ;;  %v10997_v61 = vld [vmem:[#allocation3 + $0x110] sm:$0xff] }
 0x844   :  { %24031 = vmatprep.mubr.msk.f32.mxu1 %vm6689_vm3, %v10988_v53  ;;  %v10998_v53 = vld [vmem:[#allocation3 + $0x120] sm:$0xff] }
 0x847   :  { %24032 = vmatmul.mubr.msk.f32.gmra.mrb[52].mxu1 %vm6689_vm3, %v10989_v46  ;;  %v10999_v46 = vld [vmem:[#allocation3 + $0x128] sm:$0xff] }
 0x848   :  { %24034 = vmatprep.mubr.msk.f32.mxu1 %vm6689_vm3, %v10990_v44  ;;  %v11000_v44 = vld [vmem:[#allocation3 + $0x138] sm:$0xff] }
 0x84b   :  { %24035 = vmatmul.mubr.msk.f32.gmra.mrb[54].mxu1 %vm6689_vm3, %v10991_v30  ;;  %v11001_v30 = vld [vmem:[#allocation3 + $0x140] sm:$0xff] }
 0x84c   :  { %24037 = vmatprep.mubr.msk.f32.mxu1 %vm6689_vm3, %v10992_v15  ;;  %v11002_v15 = vld [vmem:[#allocation3 + $0x150] sm:$0xff] }
 0x84f   :  { %24038 = vmatmul.mubr.msk.f32.gmra.mrb[56].mxu1 %vm6689_vm3, %v10993_v59  ;;  %v11003_v59 = vld [vmem:[#allocation3 + $0x158] sm:$0xff] }
 0x850   :  { %24040 = vmatprep.mubr.msk.f32.mxu1 %vm6689_vm3, %v10994_v57  ;;  %v11004_v57 = vld [vmem:[#allocation3 + $0x168] sm:$0xff] }
 0x853   :  { %24041 = vmatmul.mubr.msk.f32.gmra.mrb[58].mxu1 %vm6689_vm3, %v10995_v20  ;;  %v11005_v20 = vld [vmem:[#allocation3 + $0x170] sm:$0xff] }
 0x854   :  { %24043 = vmatprep.mubr.msk.f32.mxu1 %vm6689_vm3, %v10996_v60  ;;  %v11008_v60 = vld [vmem:[#allocation3 + $0x198] sm:$0xff] }
 0x857   :  { %24044 = vmatmul.mubr.msk.f32.gmra.mrb[60].mxu1 %vm6689_vm3, %v10997_v61  ;;  %v11009_v61 = vld [vmem:[#allocation3 + $0x1a0] sm:$0xff] }
 0x858   :  { %24046 = vmatprep.mubr.msk.f32.mxu1 %vm6689_vm3, %v10998_v53  ;;  %v11010_v53 = vld [vmem:[#allocation3 + $0x1e0] sm:$0xff] }
 0x85b   :  { %24047 = vmatmul.mubr.msk.f32.gmra.mrb[62].mxu1 %vm6689_vm3, %v10999_v46  ;;  %v11011_v46 = vld [vmem:[#allocation3 + $0x1e8] sm:$0xff] }
 0x85c   :  { %24049 = vmatprep.mubr.msk.f32.mxu1 %vm6689_vm3, %v11000_v44  ;;  %v11012_v44 = vld [vmem:[#allocation3 + $0x1f8] sm:$0xff] }
 0x85f   :  { %24050 = vmatmul.mubr.msk.f32.gmra.mrb[0].mxu1 %vm6689_vm3, %v11001_v30  ;;  %v11013_v30 = vld [vmem:[#allocation3 + $0x200] sm:$0xff] }
 0x860   :  { %24052 = vmatprep.mubr.msk.f32.mxu1 %vm6689_vm3, %v11002_v15  ;;  %v11016_v15 = vld [vmem:[#allocation3 + $0x228] sm:$0xff] }
 0x863   :  { %24053 = vmatmul.mubr.msk.f32.gmra.mrb[2].mxu1 %vm6689_vm3, %v11003_v59  ;;  %v11017_v59 = vld [vmem:[#allocation3 + $0x230] sm:$0xff] }
 0x864   :  { %24055 = vmatprep.mubr.msk.f32.mxu1 %vm6689_vm3, %v11004_v57  ;;  %v11018_v57 = vld [vmem:[#allocation3 + $0x240] sm:$0xff] }
 0x867   :  { %24056 = vmatmul.mubr.msk.f32.gmra.mrb[4].mxu1 %vm6689_vm3, %v11005_v20  ;;  %v11019_v20 = vld [vmem:[#allocation3 + $0x248] sm:$0xff] }
 0x868   :  { %24058 = vmatprep.mubr.msk.f32.mxu1 %vm6689_vm3, %v29183_v54  ;;  %v11014_v54 = vld [vmem:[#allocation3 + $0x210] sm:$0xff] }
 0x86b   :  { %24059 = vmatmul.mubr.msk.f32.gmra.mrb[6].mxu1 %vm6689_vm3, %v29187_v55  ;;  %v11015_v55 = vld [vmem:[#allocation3 + $0x218] sm:$0xff] }
 0x86c   :  { %24061 = vmatprep.mubr.msk.f32.mxu1 %vm6689_vm3, %v11008_v60  ;;  %v11020_v60 = vld [vmem:[#allocation3 + $0x258] sm:$0xff] }
 0x86f   :  { %24062 = vmatmul.mubr.msk.f32.gmra.mrb[8].mxu1 %vm6689_vm3, %v11009_v61  ;;  %v11021_v61 = vld [vmem:[#allocation3 + $0x260] sm:$0xff] }
 0x870   :  { %24064 = vmatprep.mubr.msk.f32.mxu1 %vm6689_vm3, %v11010_v53  ;;  %v11022_v53 = vld [vmem:[#allocation3 + $0x270] sm:$0xff] }
 0x873   :  { %24065 = vmatmul.mubr.msk.f32.gmra.mrb[10].mxu1 %vm6689_vm3, %v11011_v46  ;;  %v11023_v46 = vld [vmem:[#allocation3 + $0x278] sm:$0xff] }
 0x874   :  { %24067 = vmatprep.mubr.msk.f32.mxu1 %vm6689_vm3, %v11012_v44  ;;  %v11024_v44 = vld [vmem:[#allocation3 + $0x288] sm:$0xff] }
 0x877   :  { %24068 = vmatmul.mubr.msk.f32.gmra.mrb[12].mxu1 %vm6689_vm3, %v11013_v30  ;;  %v11025_v30 = vld [vmem:[#allocation3 + $0x290] sm:$0xff] }
 0x878   :  { %24070 = vmatprep.mubr.msk.f32.mxu1 %vm6689_vm3, %v11014_v54  ;;  %v11026_v54 = vld [vmem:[#allocation3 + $0x2a0] sm:$0xff] }
 0x87b   :  { %24071 = vmatmul.mubr.msk.f32.gmra.mrb[14].mxu1 %vm6689_vm3, %v11015_v55  ;;  %v11027_v55 = vld [vmem:[#allocation3 + $0x2a8] sm:$0xff] }
 0x87c   :  { %24073 = vmatprep.mubr.msk.f32.mxu1 %vm6689_vm3, %v11016_v15  ;;  %v11028_v15 = vld [vmem:[#allocation3 + $0x2b8] sm:$0xff] }
 0x87f   :  { %24074 = vmatmul.mubr.msk.f32.gmra.mrb[16].mxu1 %vm6689_vm3, %v11017_v59  ;;  %v11029_v59 = vld [vmem:[#allocation3 + $0x2c0] sm:$0xff] }
 0x880   :  { %24076 = vmatprep.mubr.msk.f32.mxu1 %vm6689_vm3, %v11018_v57  ;;  %v11030_v57 = vld [vmem:[#allocation3 + $0x2d0] sm:$0xff] }
 0x883   :  { %24077 = vmatmul.mubr.msk.f32.gmra.mrb[18].mxu1 %vm6689_vm3, %v11019_v20  ;;  %v11031_v20 = vld [vmem:[#allocation3 + $0x2d8] sm:$0xff] }
 0x884   :  { %24079 = vmatprep.mubr.msk.f32.mxu1 %vm6689_vm3, %v11020_v60  ;;  %v11032_v60 = vld [vmem:[#allocation3 + $0x2e8] sm:$0xff] }
 0x887   :  { %24080 = vmatmul.mubr.msk.f32.gmra.mrb[20].mxu1 %vm6689_vm3, %v11021_v61  ;;  %v11033_v61 = vld [vmem:[#allocation3 + $0x2f0] sm:$0xff] }
 0x888   :  { %24082 = vmatprep.mubr.msk.f32.mxu1 %vm6689_vm3, %v11022_v53  ;;  %v11034_v53 = vld [vmem:[#allocation3 + $0x300] sm:$0xff] }
 0x88b   :  { %24083 = vmatmul.mubr.msk.f32.gmra.mrb[22].mxu1 %vm6689_vm3, %v11023_v46  ;;  %v11035_v46 = vld [vmem:[#allocation3 + $0x308] sm:$0xff] }
 0x88c   :  { %24085 = vmatprep.mubr.msk.f32.mxu1 %vm6689_vm3, %v11024_v44  ;;  %v11036_v44 = vld [vmem:[#allocation3 + $0x318] sm:$0xff] }
 0x88f   :  { %24086 = vmatmul.mubr.msk.f32.gmra.mrb[24].mxu1 %vm6689_vm3, %v11025_v30  ;;  %v11037_v30 = vld [vmem:[#allocation3 + $0x320] sm:$0xff] }
 0x890   :  { %24088 = vmatprep.mubr.msk.f32.mxu1 %vm6689_vm3, %v11026_v54  ;;  %v11040_v54 = vld [vmem:[#allocation3 + $0x348] sm:$0xff] }
 0x893   :  { %24089 = vmatmul.mubr.msk.f32.gmra.mrb[26].mxu1 %vm6689_vm3, %v11027_v55  ;;  %v11041_v55 = vld [vmem:[#allocation3 + $0x350] sm:$0xff] }
 0x894   :  { %24091 = vmatprep.mubr.msk.f32.mxu1 %vm6689_vm3, %v11028_v15  ;;  %v12423_v15 = vld [vmem:[#allocation3 + $0x1a2] sm:$0xff] }
 0x897   :  { %24092 = vmatmul.mubr.msk.f32.gmra.mrb[28].mxu1 %vm6689_vm3, %v11029_v59  ;;  %v12424_v59 = vld [vmem:[#allocation3 + $0x1e2] sm:$0xff] }
 0x898   :  { %24094 = vmatprep.mubr.msk.f32.mxu1 %vm6689_vm3, %v11030_v57  ;;  %v12425_v57 = vld [vmem:[#allocation3 + $0x1ea] sm:$0xff] }
 0x89b   :  { %24095 = vmatmul.mubr.msk.f32.gmra.mrb[30].mxu1 %vm6689_vm3, %v11031_v20  ;;  %v12426_v20 = vld [vmem:[#allocation3 + $0x1fa] sm:$0xff] }
 0x89c   :  { %24097 = vmatprep.mubr.msk.f32.mxu1 %vm6689_vm3, %v11032_v60  ;;  %v12427_v60 = vld [vmem:[#allocation3 + $0x202] sm:$0xff] }
 0x89f   :  { %24098 = vmatmul.mubr.msk.f32.gmra.mrb[32].mxu1 %vm6689_vm3, %v11033_v61  ;;  %v12429_v61 = vld [vmem:[#allocation3 + $0x21a] sm:$0xff] }
 0x8a0   :  { %24100 = vmatprep.mubr.msk.f32.mxu1 %vm6689_vm3, %v11034_v53  ;;  %v12430_v53 = vld [vmem:[#allocation3 + $0x22a] sm:$0xff] }
 0x8a3   :  { %24101 = vmatmul.mubr.msk.f32.gmra.mrb[34].mxu1 %vm6689_vm3, %v11035_v46  ;;  %v12431_v46 = vld [vmem:[#allocation3 + $0x232] sm:$0xff] }
 0x8a4   :  { %24103 = vmatprep.mubr.msk.f32.mxu1 %vm6689_vm3, %v11036_v44  ;;  %v12432_v44 = vld [vmem:[#allocation3 + $0x242] sm:$0xff] }
 0x8a7   :  { %24104 = vmatmul.mubr.msk.f32.gmra.mrb[36].mxu1 %vm6689_vm3, %v11037_v30  ;;  %v12433_v30 = vld [vmem:[#allocation3 + $0x24a] sm:$0xff] }
 0x8a8   :  { %24106 = vmatprep.mubr.msk.f32.mxu1 %vm6689_vm3, %v29251_v18  ;;  %v11715_v18 = vld [vmem:[#allocation3 + $0x199] sm:$0xff] }
 0x8ab   :  { %24107 = vmatmul.mubr.msk.f32.gmra.mrb[38].mxu1 %vm6689_vm3, %v29255_v58  ;;  %v11716_v58 = vld [vmem:[#allocation3 + $0x1a1] sm:$0xff] }
 0x8ac   :  { %24109 = vmatprep.mubr.msk.f32.mxu1 %vm6689_vm3, %v11040_v54  ;;  %v12434_v54 = vld [vmem:[#allocation3 + $0x25a] sm:$0xff] }
 0x8af   :  { %24110 = vmatmul.mubr.msk.f32.gmra.mrb[40].mxu1 %vm6689_vm3, %v11041_v55  ;;  %v12435_v55 = vld [vmem:[#allocation3 + $0x262] sm:$0xff] }
 0x8b0   :  { %24114 = vmatprep.mubr.msk.f32.mxu1 %vm6689_vm3, %v29266_v62  ;;  %v31483_v62 = vld [vmem:[#allocation32_spill] sm:$0xff] }
 0x8b3   :  { %24115 = vmatmul.mubr.msk.f32.vlgmr.msra.gmra.mrb[42].mxu1 %vm6689_vm3, %v29272_v63  ;;  %v31484_v63 = vld [vmem:[#allocation34_spill] sm:$0xff] }
 0x8b4   :  { %24211 = vmatpush3.msra.mxu1 %v29657_v43  ;;  %24117 = vmatprep.mubr.msk.f32.mxu1 %vm6689_vm3, %v29276_v36  ;;  %v31485_v36 = vld [vmem:[#allocation37_spill] sm:$0xff]  ;;  %v31497_v43 = vld [vmem:[#allocation40_spill] sm:$0xff] }
 0x8b7   :  { %24118 = vmatmul.mubr.msk.f32.gmra.mrb[44].mxu1 %vm6689_vm3, %v29280_v3  ;;  %v31486_v3 = vld [vmem:[#allocation90_spill] sm:$0xff] }
 0x8b8   :  { %24120 = vmatprep.mubr.msk.f32.mxu1 %vm6689_vm3, %v29284_v4  ;;  %v31487_v4 = vld [vmem:[#allocation91_spill] sm:$0xff] }
 0x8bb   :  { %24121 = vmatmul.mubr.msk.f32.gmra.mrb[46].mxu1 %vm6689_vm3, %v29288_v6  ;;  %v31488_v6 = vld [vmem:[#allocation92_spill] sm:$0xff] }
 0x8bc   :  { %24123 = vmatprep.mubr.msk.f32.mxu1 %vm6689_vm3, %v29292_v2  ;;  %v31489_v2 = vld [vmem:[#allocation93_spill] sm:$0xff] }
 0x8bf   :  { %24124 = vmatmul.mubr.msk.f32.gmra.mrb[48].mxu1 %vm6689_vm3, %v29296_v35  ;;  %v31490_v35 = vld [vmem:[#allocation94_spill] sm:$0xff] }
 0x8c0   :  { %24126 = vmatprep.mubr.msk.f32.mxu1 %vm6689_vm3, %v29300_v0  ;;  %v31491_v0 = vld [vmem:[#allocation95_spill] sm:$0xff] }
 0x8c3   :  { %24127 = vmatmul.mubr.msk.f32.gmra.mrb[50].mxu1 %vm6689_vm3, %v29304_v48  ;;  %v31492_v48 = vld [vmem:[#allocation96_spill] sm:$0xff] }
 0x8c4   :  { %24129 = vmatprep.mubr.msk.f32.mxu1 %vm6689_vm3, %v29308_v11  ;;  %v31493_v11 = vld [vmem:[#allocation97_spill] sm:$0xff] }
 0x8c7   :  { %24130 = vmatmul.mubr.msk.f32.gmra.mrb[52].mxu1 %vm6689_vm3, %v29312_v7  ;;  %v31494_v7 = vld [vmem:[#allocation98_spill] sm:$0xff] }
 0x8c8   :  { %24132 = vmatprep.mubr.msk.f32.mxu1 %vm6689_vm3, %v29316_v9  ;;  %v31495_v9 = vld [vmem:[#allocation99_spill] sm:$0xff] }
 0x8cb   :  { %24133 = vmatmul.mubr.msk.f32.gmra.mrb[54].mxu1 %vm6689_vm3, %v29320_v49  ;;  %v11747_v49 = vld [vmem:[#allocation3 + $0x349] sm:$0xff] }
 0x8cc   :  { %24135 = vmatprep.mubr.msk.f32.mxu1 %vm6689_vm3, %v29324_v8  ;;  %v31496_v8 = vld [vmem:[#allocation100_spill] sm:$0xff] }
 0x8cf   :  { %24136 = vmatmul.mubr.msk.f32.gmra.mrb[56].mxu1 %vm6689_vm3, %v29328_v13  ;;  %v11748_v13 = vld [vmem:[#allocation3 + $0x351] sm:$0xff] }
 0x8d0   :  { %24138 = vmatprep.mubr.msk.f32.mxu1 %vm6689_vm3, %v29332_v14  ;;  %v12392_v14 = vld [vmem:[#allocation3 + $0x32] sm:$0xff] }
 0x8d3   :  { %24139 = vmatmul.mubr.msk.f32.gmra.mrb[58].mxu1 %vm6689_vm3, %v29336_v5  ;;  %v13234_v5 = vld [vmem:[%s31022_s7] sm:$0xff]  ;;  %s13934_s7 = sld [smem:[#allocation8]] }
 0x8d4   :  { %24141 = vmatprep.mubr.msk.f32.mxu1 %vm6689_vm3, %v29340_v10  ;;  %24308 = vmatprep.subr.mxu0 %v13234_v5  ;;  %v12393_v10 = vld [vmem:[#allocation3 + $0x3a] sm:$0xff] }
 0x8d5   :  { %24309 = vmatpush3.msra.mxu0 %v13234_v5  ;;  %v29927_v5 = vld [vmem:[%s31021_s6] ss:$0 sm:$0xff] }
 0x8d7   :  { %24142 = vmatmul.mubr.msk.f32.gmra.mrb[60].mxu1 %vm6689_vm3, %v29344_v12  ;;  %v12394_v12 = vld [vmem:[#allocation3 + $0x4a] sm:$0xff] }
 0x8d8   :  { %24144 = vmatprep.mubr.msk.f32.mxu1 %vm6689_vm3, %v29348_v19  ;;  %v12395_v19 = vld [vmem:[#allocation3 + $0x52] sm:$0xff] }
 0x8d9   :  { %s20805_s30 = sshll.u32 %s13934_s7, 2 }
 0x8da   :  { %s13937_s21 = sadd.s32 %s21080_s15, %s20805_s30 }
 0x8db   :  { %24145 = vmatmul.mubr.msk.f32.gmra.mrb[62].mxu1 %vm6689_vm3, %v29352_v21  ;;  %v12396_v21 = vld [vmem:[#allocation3 + $0x62] sm:$0xff]  ;;  %s13938_s1 = scalar_lea.vmem %s31028_s13, %s13937_s21 }
 0x8dc   :  { %24147 = vmatprep.mubr.msk.f32.mxu1 %vm6689_vm3, %v29356_v22  ;;  %v12397_v22 = vld [vmem:[#allocation3 + $0x6a] sm:$0xff] }
 0x8df   :  { %24148 = vmatmul.mubr.msk.f32.gmra.mrb[0].mxu1 %vm6689_vm3, %v29360_v23  ;;  %v12398_v23 = vld [vmem:[#allocation3 + $0x7a] sm:$0xff] }
 0x8e0   :  { %24150 = vmatprep.mubr.msk.f32.mxu1 %vm6689_vm3, %v29364_v24  ;;  %v12399_v24 = vld [vmem:[#allocation3 + $0x82] sm:$0xff] }
 0x8e3   :  { %24151 = vmatmul.mubr.msk.f32.gmra.mrb[2].mxu1 %vm6689_vm3, %v29368_v25  ;;  %v12400_v25 = vld [vmem:[#allocation3 + $0x92] sm:$0xff] }
 0x8e4   :  { %24153 = vmatprep.mubr.msk.f32.mxu1 %vm6689_vm3, %v29372_v26  ;;  %v12401_v26 = vld [vmem:[#allocation3 + $0x9a] sm:$0xff] }
 0x8e7   :  { %24154 = vmatmul.mubr.msk.f32.gmra.mrb[4].mxu1 %vm6689_vm3, %v29376_v27  ;;  %v12402_v27 = vld [vmem:[#allocation3 + $0xaa] sm:$0xff] }
 0x8e8   :  { %24156 = vmatprep.mubr.msk.f32.mxu1 %vm6689_vm3, %v29380_v38  ;;  %v12403_v38 = vld [vmem:[#allocation3 + $0xb2] sm:$0xff] }
 0x8eb   :  { %24157 = vmatmul.mubr.msk.f32.gmra.mrb[6].mxu1 %vm6689_vm3, %v29384_v28  ;;  %v12404_v28 = vld [vmem:[#allocation3 + $0xc2] sm:$0xff] }
 0x8ec   :  { %24159 = vmatprep.mubr.msk.f32.mxu1 %vm6689_vm3, %v11715_v18  ;;  %v12436_v18 = vld [vmem:[#allocation3 + $0x272] sm:$0xff] }
 0x8ef   :  { %24160 = vmatmul.mubr.msk.f32.gmra.mrb[8].mxu1 %vm6689_vm3, %v11716_v58  ;;  %v12437_v58 = vld [vmem:[#allocation3 + $0x27a] sm:$0xff] }
 0x8f0   :  { %24162 = vmatprep.mubr.msk.f32.mxu1 %vm6689_vm3, %v29390_v31  ;;  %v12405_v31 = vld [vmem:[#allocation3 + $0xca] sm:$0xff] }
 0x8f3   :  { %24163 = vmatmul.mubr.msk.f32.gmra.mrb[10].mxu1 %vm6689_vm3, %v29394_v32  ;;  %v12406_v32 = vld [vmem:[#allocation3 + $0xda] sm:$0xff] }
 0x8f4   :  { %24165 = vmatprep.mubr.msk.f32.mxu1 %vm6689_vm3, %v29398_v34  ;;  %v12407_v34 = vld [vmem:[#allocation3 + $0xe2] sm:$0xff] }
 0x8f7   :  { %24166 = vmatmul.mubr.msk.f32.gmra.mrb[12].mxu1 %vm6689_vm3, %v29402_v37  ;;  %v12408_v37 = vld [vmem:[#allocation3 + $0xf2] sm:$0xff] }
 0x8f8   :  { %24168 = vmatprep.mubr.msk.f32.mxu1 %vm6689_vm3, %v29406_v1  ;;  %v12409_v1 = vld [vmem:[#allocation3 + $0xfa] sm:$0xff] }
 0x8fb   :  { %24169 = vmatmul.mubr.msk.f32.gmra.mrb[14].mxu1 %vm6689_vm3, %v29410_v39  ;;  %v12410_v39 = vld [vmem:[#allocation3 + $0x10a] sm:$0xff] }
 0x8fc   :  { %24171 = vmatprep.mubr.msk.f32.mxu1 %vm6689_vm3, %v29414_v40  ;;  %v12411_v40 = vld [vmem:[#allocation3 + $0x112] sm:$0xff] }
 0x8ff   :  { %24172 = vmatmul.mubr.msk.f32.gmra.mrb[16].mxu1 %vm6689_vm3, %v29418_v41  ;;  %v12412_v41 = vld [vmem:[#allocation3 + $0x122] sm:$0xff] }
 0x900   :  { %24174 = vmatprep.mubr.msk.f32.mxu1 %vm6689_vm3, %v29422_v42  ;;  %v12413_v42 = vld [vmem:[#allocation3 + $0x12a] sm:$0xff] }
 0x903   :  { %24175 = vmatmul.mubr.msk.f32.gmra.mrb[18].mxu1 %vm6689_vm3, %v29426_v45  ;;  %v12414_v45 = vld [vmem:[#allocation3 + $0x13a] sm:$0xff] }
 0x904   :  { %24177 = vmatprep.mubr.msk.f32.mxu1 %vm6689_vm3, %v29430_v47  ;;  %v12415_v47 = vld [vmem:[#allocation3 + $0x142] sm:$0xff] }
 0x907   :  { %24178 = vmatmul.mubr.msk.f32.gmra.mrb[20].mxu1 %vm6689_vm3, %v29434_v16  ;;  %v12416_v16 = vld [vmem:[#allocation3 + $0x152] sm:$0xff] }
 0x908   :  { %24180 = vmatprep.mubr.msk.f32.mxu1 %vm6689_vm3, %v29438_v50  ;;  %v12417_v50 = vld [vmem:[#allocation3 + $0x15a] sm:$0xff] }
 0x90b   :  { %24181 = vmatmul.mubr.msk.f32.gmra.mrb[22].mxu1 %vm6689_vm3, %v29442_v51  ;;  %v12418_v51 = vld [vmem:[#allocation3 + $0x16a] sm:$0xff] }
 0x90c   :  { %24183 = vmatprep.mubr.msk.f32.mxu1 %vm6689_vm3, %v29446_v52  ;;  %v12419_v52 = vld [vmem:[#allocation3 + $0x172] sm:$0xff] }
 0x90f   :  { %24184 = vmatmul.mubr.msk.f32.gmra.mrb[24].mxu1 %vm6689_vm3, %v29450_v17  ;;  %v12422_v17 = vld [vmem:[#allocation3 + $0x19a] sm:$0xff] }
 0x910   :  { %24186 = vmatprep.mubr.msk.f32.mxu1 %vm6689_vm3, %v31483_v62  ;;  %v12438_v62 = vld [vmem:[#allocation3 + $0x28a] sm:$0xff] }
 0x913   :  { %24187 = vmatmul.mubr.msk.f32.gmra.mrb[26].mxu1 %vm6689_vm3, %v31484_v63  ;;  %v12439_v63 = vld [vmem:[#allocation3 + $0x292] sm:$0xff] }
 0x914   :  { %24189 = vmatprep.mubr.msk.f32.mxu1 %vm6689_vm3, %v31485_v36  ;;  %v12440_v36 = vld [vmem:[#allocation3 + $0x2a2] sm:$0xff] }
 0x917   :  { %24190 = vmatmul.mubr.msk.f32.gmra.mrb[28].mxu1 %vm6689_vm3, %v31486_v3  ;;  %v12441_v3 = vld [vmem:[#allocation3 + $0x2aa] sm:$0xff] }
 0x918   :  { %24192 = vmatprep.mubr.msk.f32.mxu1 %vm6689_vm3, %v31487_v4  ;;  %v12442_v4 = vld [vmem:[#allocation3 + $0x2ba] sm:$0xff] }
 0x91b   :  { %24193 = vmatmul.mubr.msk.f32.gmra.mrb[30].mxu1 %vm6689_vm3, %v31488_v6  ;;  %v12443_v6 = vld [vmem:[#allocation3 + $0x2c2] sm:$0xff] }
 0x91c   :  { %24195 = vmatprep.mubr.msk.f32.mxu1 %vm6689_vm3, %v31489_v2  ;;  %v12444_v2 = vld [vmem:[#allocation3 + $0x2d2] sm:$0xff] }
 0x91f   :  { %24196 = vmatmul.mubr.msk.f32.gmra.mrb[32].mxu1 %vm6689_vm3, %v31490_v35  ;;  %v12445_v35 = vld [vmem:[#allocation3 + $0x2da] sm:$0xff] }
 0x920   :  { %24198 = vmatprep.mubr.msk.f32.mxu1 %vm6689_vm3, %v31491_v0  ;;  %v12446_v0 = vld [vmem:[#allocation3 + $0x2ea] sm:$0xff] }
 0x923   :  { %24199 = vmatmul.mubr.msk.f32.gmra.mrb[34].mxu1 %vm6689_vm3, %v31492_v48  ;;  %v12447_v48 = vld [vmem:[#allocation3 + $0x2f2] sm:$0xff] }
 0x924   :  { %24201 = vmatprep.mubr.msk.f32.mxu1 %vm6689_vm3, %v31493_v11  ;;  %v12448_v11 = vld [vmem:[#allocation3 + $0x302] sm:$0xff] }
 0x927   :  { %24202 = vmatmul.mubr.msk.f32.gmra.mrb[36].mxu1 %vm6689_vm3, %v31494_v7  ;;  %v12449_v7 = vld [vmem:[#allocation3 + $0x30a] sm:$0xff] }
 0x928   :  { %24204 = vmatprep.mubr.msk.f32.mxu1 %vm6689_vm3, %v31495_v9  ;;  %v12450_v9 = vld [vmem:[#allocation3 + $0x31a] sm:$0xff] }
 0x92b   :  { %24205 = vmatmul.mubr.msk.f32.gmra.mrb[38].mxu1 %vm6689_vm3, %v31496_v8  ;;  %v12454_v8 = vld [vmem:[#allocation3 + $0x34a] sm:$0xff] }
 0x92c   :  { %24207 = vmatprep.mubr.msk.f32.mxu1 %vm6689_vm3, %v11747_v49  ;;  %v12451_v49 = vld [vmem:[#allocation3 + $0x322] sm:$0xff] }
 0x92f   :  { %24208 = vmatmul.mubr.msk.f32.gmra.mrb[40].mxu1 %vm6689_vm3, %v11748_v13  ;;  %v12455_v13 = vld [vmem:[#allocation3 + $0x352] sm:$0xff] }
 0x930   :  { %24212 = vmatprep.mubr.msk.f32.mxu1 %vm6689_vm3, %v12392_v14 }
 0x933   :  { %24213 = vmatmul.mubr.msk.f32.vlgmr.msra.gmra.mrb[42].mxu1 %vm6689_vm3, %v12393_v10  ;;  %v31498_v10 = vld [vmem:[#allocation15_spill] sm:$0xff] }
 0x934   :  { %24215 = vmatprep.mubr.msk.f32.mxu1 %vm6689_vm3, %v12394_v12 }
 0x937   :  { %24216 = vmatmul.mubr.msk.f32.gmra.mrb[44].mxu1 %vm6689_vm3, %v12395_v19 }
 0x938   :  { %24218 = vmatprep.mubr.msk.f32.mxu1 %vm6689_vm3, %v12396_v21  ;;  %v31499_v21 = vld [vmem:[#allocation16_spill] sm:$0xff] }
 0x93b   :  { %24219 = vmatmul.mubr.msk.f32.gmra.mrb[46].mxu1 %vm6689_vm3, %v12397_v22 }
 0x93c   :  { %24221 = vmatprep.mubr.msk.f32.mxu1 %vm6689_vm3, %v12398_v23 }
 0x93f   :  { %24222 = vmatmul.mubr.msk.f32.gmra.mrb[48].mxu1 %vm6689_vm3, %v12399_v24  ;;  %v31500_v24 = vld [vmem:[#allocation17_spill] sm:$0xff] }
 0x940   :  { %24224 = vmatprep.mubr.msk.f32.mxu1 %vm6689_vm3, %v12400_v25 }
 0x943   :  { %24225 = vmatmul.mubr.msk.f32.gmra.mrb[50].mxu1 %vm6689_vm3, %v12401_v26 }
 0x944   :  { %24227 = vmatprep.mubr.msk.f32.mxu1 %vm6689_vm3, %v12402_v27 }
 0x947   :  { %24228 = vmatmul.mubr.msk.f32.gmra.mrb[52].mxu1 %vm6689_vm3, %v12403_v38  ;;  %v31501_v38 = vld [vmem:[#allocation18_spill] sm:$0xff] }
 0x948   :  { %24230 = vmatprep.mubr.msk.f32.mxu1 %vm6689_vm3, %v12404_v28 }
 0x94b   :  { %24231 = vmatmul.mubr.msk.f32.gmra.mrb[54].mxu1 %vm6689_vm3, %v12405_v31 }
 0x94c   :  { %24233 = vmatprep.mubr.msk.f32.mxu1 %vm6689_vm3, %v12406_v32 }
 0x94f   :  { %24234 = vmatmul.mubr.msk.f32.gmra.mrb[56].mxu1 %vm6689_vm3, %v12407_v34 }
 0x950   :  { %24236 = vmatprep.mubr.msk.f32.mxu1 %vm6689_vm3, %v12408_v37 }
 0x953   :  { %24237 = vmatmul.mubr.msk.f32.gmra.mrb[58].mxu1 %vm6689_vm3, %v12409_v1  ;;  %v31502_v1 = vld [vmem:[#allocation19_spill] sm:$0xff] }
 0x954   :  { %24239 = vmatprep.mubr.msk.f32.mxu1 %vm6689_vm3, %v12410_v39 }
 0x957   :  { %24240 = vmatmul.mubr.msk.f32.gmra.mrb[60].mxu1 %vm6689_vm3, %v12411_v40 }
 0x958   :  { %24242 = vmatprep.mubr.msk.f32.mxu1 %vm6689_vm3, %v12412_v41 }
 0x95b   :  { %24243 = vmatmul.mubr.msk.f32.gmra.mrb[62].mxu1 %vm6689_vm3, %v12413_v42  ;;  %v31503_v42 = vld [vmem:[#allocation20_spill] sm:$0xff] }
 0x95c   :  { %24245 = vmatprep.mubr.msk.f32.mxu1 %vm6689_vm3, %v12414_v45 }
 0x95f   :  { %24246 = vmatmul.mubr.msk.f32.gmra.mrb[0].mxu1 %vm6689_vm3, %v12415_v47 }
 0x960   :  { %24248 = vmatprep.mubr.msk.f32.mxu1 %vm6689_vm3, %v12416_v16 }
 0x963   :  { %24249 = vmatmul.mubr.msk.f32.gmra.mrb[2].mxu1 %vm6689_vm3, %v12417_v50 }
 0x964   :  { %24251 = vmatprep.mubr.msk.f32.mxu1 %vm6689_vm3, %v12418_v51 }
 0x967   :  { %24252 = vmatmul.mubr.msk.f32.gmra.mrb[4].mxu1 %vm6689_vm3, %v12419_v52  ;;  %v31504_v52 = vld [vmem:[#allocation21_spill] sm:$0xff] }
 0x968   :  { %24254 = vmatprep.mubr.msk.f32.mxu1 %vm6689_vm3, %v29577_v56  ;;  %v12428_v56 = vld [vmem:[#allocation3 + $0x212] sm:$0xff] }
 0x96b   :  { %24255 = vmatmul.mubr.msk.f32.gmra.mrb[6].mxu1 %vm6689_vm3, %v31497_v43 }
 0x96c   :  { %24257 = vmatprep.mubr.msk.f32.mxu1 %vm6689_vm3, %v12422_v17 }
 0x96f   :  { %24258 = vmatmul.mubr.msk.f32.gmra.mrb[8].mxu1 %vm6689_vm3, %v12423_v15 }
 0x970   :  { %24260 = vmatprep.mubr.msk.f32.mxu1 %vm6689_vm3, %v12424_v59  ;;  %v31505_v59 = vld [vmem:[#allocation22_spill] sm:$0xff] }
 0x973   :  { %24261 = vmatmul.mubr.msk.f32.gmra.mrb[10].mxu1 %vm6689_vm3, %v12425_v57 }
 0x974   :  { %24263 = vmatprep.mubr.msk.f32.mxu1 %vm6689_vm3, %v12426_v20 }
 0x977   :  { %24264 = vmatmul.mubr.msk.f32.gmra.mrb[12].mxu1 %vm6689_vm3, %v12427_v60 }
 0x978   :  { %24266 = vmatprep.mubr.msk.f32.mxu1 %vm6689_vm3, %v12428_v56 }
 0x97b   :  { %24267 = vmatmul.mubr.msk.f32.gmra.mrb[14].mxu1 %vm6689_vm3, %v12429_v61 }
 0x97c   :  { %24269 = vmatprep.mubr.msk.f32.mxu1 %vm6689_vm3, %v12430_v53  ;;  %v31506_v53 = vld [vmem:[#allocation23_spill] sm:$0xff] }
 0x97f   :  { %24270 = vmatmul.mubr.msk.f32.gmra.mrb[16].mxu1 %vm6689_vm3, %v12431_v46 }
 0x980   :  { %24272 = vmatprep.mubr.msk.f32.mxu1 %vm6689_vm3, %v12432_v44 }
 0x983   :  { %24273 = vmatmul.mubr.msk.f32.gmra.mrb[18].mxu1 %vm6689_vm3, %v12433_v30 }
 0x984   :  { %24275 = vmatprep.mubr.msk.f32.mxu1 %vm6689_vm3, %v12434_v54  ;;  %v31507_v54 = vld [vmem:[#allocation24_spill] sm:$0xff] }
 0x987   :  { %24276 = vmatmul.mubr.msk.f32.gmra.mrb[20].mxu1 %vm6689_vm3, %v12435_v55 }
 0x988   :  { %24278 = vmatprep.mubr.msk.f32.mxu1 %vm6689_vm3, %v12436_v18 }
 0x98b   :  { %24279 = vmatmul.mubr.msk.f32.gmra.mrb[22].mxu1 %vm6689_vm3, %v12437_v58 }
 0x98c   :  { %24281 = vmatprep.mubr.msk.f32.mxu1 %vm6689_vm3, %v12438_v62 }
 0x98f   :  { %24282 = vmatmul.mubr.msk.f32.gmra.mrb[24].mxu1 %vm6689_vm3, %v12439_v63 }
 0x990   :  { %24284 = vmatprep.mubr.msk.f32.mxu1 %vm6689_vm3, %v12440_v36  ;;  %v31508_v36 = vld [vmem:[#allocation25_spill] sm:$0xff] }
 0x993   :  { %24285 = vmatmul.mubr.msk.f32.gmra.mrb[26].mxu1 %vm6689_vm3, %v12441_v3 }
 0x994   :  { %24287 = vmatprep.mubr.msk.f32.mxu1 %vm6689_vm3, %v12442_v4 }
 0x997   :  { %24288 = vmatmul.mubr.msk.f32.gmra.mrb[28].mxu1 %vm6689_vm3, %v12443_v6 }
 0x998   :  { %24290 = vmatprep.mubr.msk.f32.mxu1 %vm6689_vm3, %v12444_v2  ;;  %v31509_v2 = vld [vmem:[#allocation26_spill] sm:$0xff] }
 0x99b   :  { %24291 = vmatmul.mubr.msk.f32.gmra.mrb[30].mxu1 %vm6689_vm3, %v12445_v35 }
 0x99c   :  { %24293 = vmatprep.mubr.msk.f32.mxu1 %vm6689_vm3, %v12446_v0 }
 0x99f   :  { %24294 = vmatmul.mubr.msk.f32.gmra.mrb[32].mxu1 %vm6689_vm3, %v12447_v48 }
 0x9a0   :  { %24296 = vmatprep.mubr.msk.f32.mxu1 %vm6689_vm3, %v12448_v11 }
 0x9a3   :  { %24297 = vmatmul.mubr.msk.f32.gmra.mrb[34].mxu1 %vm6689_vm3, %v12449_v7 }
 0x9a4   :  { %24299 = vmatprep.mubr.msk.f32.mxu1 %vm6689_vm3, %v12450_v9  ;;  %v31510_v9 = vld [vmem:[#allocation27_spill] sm:$0xff] }
 0x9a7   :  { %24300 = vmatmul.mubr.msk.f32.gmra.mrb[36].mxu1 %vm6689_vm3, %v12451_v49 }
 0x9a8   :  { %24302 = vmatprep.mubr.msk.f32.mxu1 %vm6689_vm3, %v29645_v29 }
 0x9ab   :  { %24303 = vmatmul.mubr.msk.f32.gmra.mrb[38].mxu1 %vm6689_vm3, %v29649_v33 }
 0x9ac   :  { %24305 = vmatprep.mubr.msk.f32.mxu1 %vm6689_vm3, %v12454_v8 }
 0x9af   :  { %24306 = vmatmul.mubr.msk.f32.gmra.mrb[40].mxu1 %vm6689_vm3, %v12455_v13 }
 0xa06   :  { %v24214_v14 = vpop.f32.mrb[42].mxu1 }
 0xa07   :  { %v24768_v12 = vadd.f32 %v24214_v14, %v31498_v10  ;;  %v12716_v19 = vpop.f32.mrb[43].mxu1  ;;  %v31511_v14 = vld [vmem:[#allocation28_spill] sm:$0xff] }
 0xa08   :  { %v24769_v29 = vadd.f32 %v12716_v19, %v31499_v21 }
 0xa09   :  { %v13107_v22 = vadd.f32 %v24768_v12, %v29927_v5 }
 0xa0a   :  { %v13106_v33 = vadd.f32 %v24769_v29, %v29927_v5  ;;  %v24217_v23 = vpop.f32.mrb[44].mxu1 }
 0xa0b   :  { %v24770_v25 = vadd.f32 %v24217_v23, %v31500_v24  ;;  %v12726_v26 = vpop.f32.mrb[45].mxu1  ;;  %v13171_v31 = vmax.f32 %v13107_v22, 0.0  ;;  %v31512_v22 = vld [vmem:[#allocation29_spill] sm:$0xff] }
 0xa0c   :  { %v13170_v27 = vmax.f32 %v13106_v33, 0.0  ;;  %v24771_v28 = vadd.f32 %v12726_v26, %v31501_v38 }
 0xa0d   :  { %v13109_v32 = vadd.f32 %v24770_v25, %v29927_v5  ;;  %v31513_v25 = vld [vmem:[#allocation30_spill] sm:$0xff] }
 0xa0e   :  { %v13108_v34 = vadd.f32 %v24771_v28, %v29927_v5  ;;  %v24220_v37 = vpop.f32.mrb[46].mxu1  ;;  %24310 = vmatprep.mubr.msk.f32.mxu0 %vm6689_vm3, %v13170_v27 }
 0xa0f   :  { %v24772_v39 = vadd.f32 %v24220_v37, %v31502_v1  ;;  %v12736_v40 = vpop.f32.mrb[47].mxu1  ;;  %24311 = vmatmul.mubr.msk.f32.vlgmr.msra.gmra.mrb[86].mxu0 %vm6689_vm3, %v13171_v31  ;;  %v13173_v47 = vmax.f32 %v13109_v32, 0.0  ;;  %v31514_v32 = vld [vmem:[#allocation31_spill] sm:$0xff] }
 0xa10   :  { %v13172_v41 = vmax.f32 %v13108_v34, 0.0  ;;  %v24773_v45 = vadd.f32 %v12736_v40, %v31503_v42 }
 0xa11   :  { %v13111_v16 = vadd.f32 %v24772_v39, %v29927_v5  ;;  %v31515_v39 = vld [vmem:[#allocation33_spill] sm:$0xff] }
 0xa12   :  { %v13110_v50 = vadd.f32 %v24773_v45, %v29927_v5  ;;  %v24223_v51 = vpop.f32.mrb[48].mxu1  ;;  %24313 = vmatprep.mubr.msk.f32.mxu0 %vm6689_vm3, %v13172_v41 }
 0xa13   :  { %v24774_v17 = vadd.f32 %v24223_v51, %v31504_v52  ;;  %v12746_v43 = vpop.f32.mrb[49].mxu1  ;;  %24314 = vmatmul.mubr.msk.f32.gmra.mrb[88].mxu0 %vm6689_vm3, %v13173_v47  ;;  %v13175_v20 = vmax.f32 %v13111_v16, 0.0  ;;  %v31516_v16 = vld [vmem:[#allocation35_spill] sm:$0xff] }
 0xa14   :  { %v13174_v15 = vmax.f32 %v13110_v50, 0.0  ;;  %v24775_v57 = vadd.f32 %v12746_v43, %v31505_v59 }
 0xa15   :  { %v13113_v60 = vadd.f32 %v24774_v17, %v29927_v5  ;;  %v31517_v17 = vld [vmem:[#allocation36_spill] sm:$0xff] }
 0xa16   :  { %v13112_v56 = vadd.f32 %v24775_v57, %v29927_v5  ;;  %v24226_v61 = vpop.f32.mrb[50].mxu1  ;;  %24316 = vmatprep.mubr.msk.f32.mxu0 %vm6689_vm3, %v13174_v15 }
 0xa17   :  { %v24776_v46 = vadd.f32 %v24226_v61, %v31506_v53  ;;  %v12756_v44 = vpop.f32.mrb[51].mxu1  ;;  %24317 = vmatmul.mubr.msk.f32.gmra.mrb[90].mxu0 %vm6689_vm3, %v13175_v20  ;;  %v13177_v18 = vmax.f32 %v13113_v60, 0.0  ;;  %v31518_v60 = vld [vmem:[#allocation38_spill] sm:$0xff] }
 0xa18   :  { %v13176_v30 = vmax.f32 %v13112_v56, 0.0  ;;  %v24777_v55 = vadd.f32 %v12756_v44, %v31507_v54 }
 0xa19   :  { %v13115_v58 = vadd.f32 %v24776_v46, %v29927_v5  ;;  %v31519_v46 = vld [vmem:[#allocation39_spill] sm:$0xff] }
 0xa1a   :  { %v13114_v62 = vadd.f32 %v24777_v55, %v29927_v5  ;;  %v24229_v63 = vpop.f32.mrb[52].mxu1  ;;  %24319 = vmatprep.mubr.msk.f32.mxu0 %vm6689_vm3, %v13176_v30 }
 0xa1b   :  { %v24778_v3 = vadd.f32 %v24229_v63, %v31508_v36  ;;  %v12766_v4 = vpop.f32.mrb[53].mxu1  ;;  %24320 = vmatmul.mubr.msk.f32.gmra.mrb[92].mxu0 %vm6689_vm3, %v13177_v18  ;;  %v13179_v0 = vmax.f32 %v13115_v58, 0.0 }
 0xa1c   :  { %v13178_v6 = vmax.f32 %v13114_v62, 0.0  ;;  %v24779_v35 = vadd.f32 %v12766_v4, %v31509_v2 }
 0xa1d   :  { %v13117_v48 = vadd.f32 %v24778_v3, %v29927_v5 }
 0xa1e   :  { %v13116_v11 = vadd.f32 %v24779_v35, %v29927_v5  ;;  %v24232_v7 = vpop.f32.mrb[54].mxu1  ;;  %24322 = vmatprep.mubr.msk.f32.mxu0 %vm6689_vm3, %v13178_v6 }
 0xa1f   :  { %v24780_v49 = vadd.f32 %v24232_v7, %v31510_v9  ;;  %v12776_v8 = vpop.f32.mrb[55].mxu1  ;;  %24323 = vmatmul.mubr.msk.f32.gmra.mrb[94].mxu0 %vm6689_vm3, %v13179_v0  ;;  %v13181_v12 = vmax.f32 %v13117_v48, 0.0 }
 0xa20   :  { %v13180_v13 = vmax.f32 %v13116_v11, 0.0  ;;  %v24781_v10 = vadd.f32 %v12776_v8, %v31511_v14 }
 0xa21   :  { %v13119_v19 = vadd.f32 %v24780_v49, %v29927_v5 }
 0xa22   :  { %v13118_v21 = vadd.f32 %v24781_v10, %v29927_v5  ;;  %v24235_v29 = vpop.f32.mrb[56].mxu1  ;;  %24325 = vmatprep.mubr.msk.f32.mxu0 %vm6689_vm3, %v13180_v13 }
 0xa23   :  { %v24782_v33 = vadd.f32 %v24235_v29, %v31512_v22  ;;  %v12786_v23 = vpop.f32.mrb[57].mxu1  ;;  %24326 = vmatmul.mubr.msk.f32.gmra.mrb[96].mxu0 %vm6689_vm3, %v13181_v12  ;;  %v13183_v27 = vmax.f32 %v13119_v19, 0.0 }
 0xa24   :  { %v13182_v24 = vmax.f32 %v13118_v21, 0.0  ;;  %v24783_v26 = vadd.f32 %v12786_v23, %v31513_v25 }
 0xa25   :  { %v13121_v38 = vadd.f32 %v24782_v33, %v29927_v5 }
 0xa26   :  { %v13120_v28 = vadd.f32 %v24783_v26, %v29927_v5  ;;  %v24238_v31 = vpop.f32.mrb[58].mxu1  ;;  %24328 = vmatprep.mubr.msk.f32.mxu0 %vm6689_vm3, %v13182_v24 }
 0xa27   :  { %v24784_v34 = vadd.f32 %v24238_v31, %v31514_v32  ;;  %v12796_v37 = vpop.f32.mrb[59].mxu1  ;;  %24329 = vmatmul.mubr.msk.f32.gmra.mrb[98].mxu0 %vm6689_vm3, %v13183_v27  ;;  %v13185_v41 = vmax.f32 %v13121_v38, 0.0 }
 0xa28   :  { %v13184_v1 = vmax.f32 %v13120_v28, 0.0  ;;  %v24785_v40 = vadd.f32 %v12796_v37, %v31515_v39 }
 0xa29   :  { %v13123_v42 = vadd.f32 %v24784_v34, %v29927_v5 }
 0xa2a   :  { %v13122_v45 = vadd.f32 %v24785_v40, %v29927_v5  ;;  %v24241_v47 = vpop.f32.mrb[60].mxu1  ;;  %24331 = vmatprep.mubr.msk.f32.mxu0 %vm6689_vm3, %v13184_v1 }
 0xa2b   :  { %v24786_v50 = vadd.f32 %v24241_v47, %v31516_v16  ;;  %v12806_v51 = vpop.f32.mrb[61].mxu1  ;;  %24332 = vmatmul.mubr.msk.f32.gmra.mrb[100].mxu0 %vm6689_vm3, %v13185_v41  ;;  %v13187_v15 = vmax.f32 %v13123_v42, 0.0 }
 0xa2c   :  { %v13186_v52 = vmax.f32 %v13122_v45, 0.0  ;;  %v24787_v43 = vadd.f32 %v12806_v51, %v31517_v17 }
 0xa2d   :  { %v13125_v59 = vadd.f32 %v24786_v50, %v29927_v5 }
 0xa2e   :  { %v13124_v57 = vadd.f32 %v24787_v43, %v29927_v5  ;;  %v24244_v20 = vpop.f32.mrb[62].mxu1  ;;  %24334 = vmatprep.mubr.msk.f32.mxu0 %vm6689_vm3, %v13186_v52 }
 0xa2f   :  { %v24788_v56 = vadd.f32 %v24244_v20, %v31518_v60  ;;  %v12816_v61 = vpop.f32.mrb[63].mxu1  ;;  %24335 = vmatmul.mubr.msk.f32.gmra.mrb[102].mxu0 %vm6689_vm3, %v13187_v15  ;;  %v13189_v30 = vmax.f32 %v13125_v59, 0.0 }
 0xa30   :  { %v13188_v53 = vmax.f32 %v13124_v57, 0.0  ;;  %v24789_v44 = vadd.f32 %v12816_v61, %v31519_v46 }
 0xa31   :  { %v13127_v54 = vadd.f32 %v24788_v56, %v29927_v5 }
 0xa32   :  { %v13126_v55 = vadd.f32 %v24789_v44, %v29927_v5  ;;  %v24247_v18 = vpop.f32.mrb[0].mxu1  ;;  %24337 = vmatprep.mubr.msk.f32.mxu0 %vm6689_vm3, %v13188_v53 }
 0xa33   :  { %v12826_v58 = vpop.f32.mrb[1].mxu1  ;;  %24338 = vmatmul.mubr.msk.f32.gmra.mrb[104].mxu0 %vm6689_vm3, %v13189_v30  ;;  %v13191_v36 = vmax.f32 %v13127_v54, 0.0  ;;  %v13129_v3 = vadd.f32 %v24247_v18, %v29927_v5 }
 0xa34   :  { %v13190_v62 = vmax.f32 %v13126_v55, 0.0  ;;  %v13128_v63 = vadd.f32 %v29927_v5, %v12826_v58 }
 0xa35   :  { %v13193_v0 = vmax.f32 %v13129_v3, 0.0 }
 0xa36   :  { %v13192_v4 = vmax.f32 %v13128_v63, 0.0  ;;  %v24250_v6 = vpop.f32.mrb[2].mxu1  ;;  %24340 = vmatprep.mubr.msk.f32.mxu0 %vm6689_vm3, %v13190_v62 }
 0xa37   :  { %v12836_v2 = vpop.f32.mrb[3].mxu1  ;;  %24341 = vmatmul.mubr.msk.f32.gmra.mrb[106].mxu0 %vm6689_vm3, %v13191_v36  ;;  %v13131_v48 = vadd.f32 %v24250_v6, %v29927_v5 }
 0xa38   :  { %v13130_v35 = vadd.f32 %v29927_v5, %v12836_v2  ;;  %24343 = vmatprep.mubr.msk.f32.mxu0 %vm6689_vm3, %v13192_v4 }
 0xa39   :  { %v13195_v8 = vmax.f32 %v13131_v48, 0.0 }
 0xa3a   :  { %v13194_v11 = vmax.f32 %v13130_v35, 0.0  ;;  %v24253_v7 = vpop.f32.mrb[4].mxu1 }
 0xa3b   :  { %v12846_v9 = vpop.f32.mrb[5].mxu1  ;;  %24344 = vmatmul.mubr.msk.f32.gmra.mrb[108].mxu0 %vm6689_vm3, %v13193_v0  ;;  %v13133_v13 = vadd.f32 %v24253_v7, %v29927_v5 }
 0xa3c   :  { %v13132_v49 = vadd.f32 %v29927_v5, %v12846_v9  ;;  %24346 = vmatprep.mubr.msk.f32.mxu0 %vm6689_vm3, %v13194_v11 }
 0xa3d   :  { %v13197_v21 = vmax.f32 %v13133_v13, 0.0 }
 0xa3e   :  { %v13196_v14 = vmax.f32 %v13132_v49, 0.0  ;;  %v24256_v10 = vpop.f32.mrb[6].mxu1 }
 0xa3f   :  { %v12856_v12 = vpop.f32.mrb[7].mxu1  ;;  %24347 = vmatmul.mubr.msk.f32.gmra.mrb[110].mxu0 %vm6689_vm3, %v13195_v8  ;;  %v13135_v29 = vadd.f32 %v24256_v10, %v29927_v5 }
 0xa40   :  { %v13134_v19 = vadd.f32 %v29927_v5, %v12856_v12  ;;  %24349 = vmatprep.mubr.msk.f32.mxu0 %vm6689_vm3, %v13196_v14 }
 0xa41   :  { %v13199_v25 = vmax.f32 %v13135_v29, 0.0 }
 0xa42   :  { %v13198_v22 = vmax.f32 %v13134_v19, 0.0  ;;  %v24259_v33 = vpop.f32.mrb[8].mxu1 }
 0xa43   :  { %v12866_v23 = vpop.f32.mrb[9].mxu1  ;;  %24350 = vmatmul.mubr.msk.f32.gmra.mrb[112].mxu0 %vm6689_vm3, %v13197_v21  ;;  %v13137_v26 = vadd.f32 %v24259_v33, %v29927_v5 }
 0xa44   :  { %v13136_v24 = vadd.f32 %v29927_v5, %v12866_v23  ;;  %24352 = vmatprep.mubr.msk.f32.mxu0 %vm6689_vm3, %v13198_v22 }
 0xa45   :  { %v13201_v32 = vmax.f32 %v13137_v26, 0.0 }
 0xa46   :  { %v13200_v27 = vmax.f32 %v13136_v24, 0.0  ;;  %v24262_v38 = vpop.f32.mrb[10].mxu1 }
 0xa47   :  { %v12876_v28 = vpop.f32.mrb[11].mxu1  ;;  %24353 = vmatmul.mubr.msk.f32.gmra.mrb[114].mxu0 %vm6689_vm3, %v13199_v25  ;;  %v13139_v34 = vadd.f32 %v24262_v38, %v29927_v5 }
 0xa48   :  { %v13138_v31 = vadd.f32 %v29927_v5, %v12876_v28  ;;  %24355 = vmatprep.mubr.msk.f32.mxu0 %vm6689_vm3, %v13200_v27 }
 0xa49   :  { %v13203_v41 = vmax.f32 %v13139_v34, 0.0 }
 0xa4a   :  { %v13202_v37 = vmax.f32 %v13138_v31, 0.0  ;;  %v24265_v1 = vpop.f32.mrb[12].mxu1 }
 0xa4b   :  { %v12886_v39 = vpop.f32.mrb[13].mxu1  ;;  %24356 = vmatmul.mubr.msk.f32.gmra.mrb[116].mxu0 %vm6689_vm3, %v13201_v32  ;;  %v13141_v42 = vadd.f32 %v24265_v1, %v29927_v5 }
 0xa4c   :  { %v13140_v40 = vadd.f32 %v29927_v5, %v12886_v39  ;;  %24358 = vmatprep.mubr.msk.f32.mxu0 %vm6689_vm3, %v13202_v37 }
 0xa4d   :  { %v13205_v51 = vmax.f32 %v13141_v42, 0.0  ;;  %v20822_v42 = vld [vmem:[%s31024_s9 + $0x10] sm:$0x7] }
 0xa4e   :  { %v13204_v45 = vmax.f32 %v13140_v40, 0.0  ;;  %v24268_v47 = vpop.f32.mrb[14].mxu1  ;;  %24406 = vmatprep.subr.msk.mxu1 %vm614_vm0, %v20822_v42 }
 0xa4f   :  { %v12896_v16 = vpop.f32.mrb[15].mxu1  ;;  %24359 = vmatmul.mubr.msk.f32.gmra.mrb[118].mxu0 %vm6689_vm3, %v13203_v41  ;;  %v13143_v52 = vadd.f32 %v24268_v47, %v29927_v5  ;;  %24407 = vmatpush3.msk.msra.mxu1 %vm614_vm0, %v20822_v42 }
 0xa50   :  { %v13142_v50 = vadd.f32 %v29927_v5, %v12896_v16  ;;  %24361 = vmatprep.mubr.msk.f32.mxu0 %vm6689_vm3, %v13204_v45 }
 0xa51   :  { %v13207_v57 = vmax.f32 %v13143_v52, 0.0 }
 0xa52   :  { %v13206_v17 = vmax.f32 %v13142_v50, 0.0  ;;  %v24271_v43 = vpop.f32.mrb[16].mxu1 }
 0xa53   :  { %v12906_v15 = vpop.f32.mrb[17].mxu1  ;;  %24362 = vmatmul.mubr.msk.f32.gmra.mrb[120].mxu0 %vm6689_vm3, %v13205_v51  ;;  %v13145_v20 = vadd.f32 %v24271_v43, %v29927_v5 }
 0xa54   :  { %v13144_v59 = vadd.f32 %v29927_v5, %v12906_v15  ;;  %24364 = vmatprep.mubr.msk.f32.mxu0 %vm6689_vm3, %v13206_v17 }
 0xa55   :  { %v13209_v46 = vmax.f32 %v13145_v20, 0.0 }
 0xa56   :  { %v13208_v60 = vmax.f32 %v13144_v59, 0.0  ;;  %v24274_v56 = vpop.f32.mrb[18].mxu1 }
 0xa57   :  { %v12916_v61 = vpop.f32.mrb[19].mxu1  ;;  %24365 = vmatmul.mubr.msk.f32.gmra.mrb[122].mxu0 %vm6689_vm3, %v13207_v57  ;;  %v13147_v44 = vadd.f32 %v24274_v56, %v29927_v5 }
 0xa58   :  { %v13146_v53 = vadd.f32 %v29927_v5, %v12916_v61  ;;  %24367 = vmatprep.mubr.msk.f32.mxu0 %vm6689_vm3, %v13208_v60 }
 0xa59   :  { %v13211_v58 = vmax.f32 %v13147_v44, 0.0 }
 0xa5a   :  { %v13210_v30 = vmax.f32 %v13146_v53, 0.0  ;;  %v24277_v54 = vpop.f32.mrb[20].mxu1 }
 0xa5b   :  { %v12926_v55 = vpop.f32.mrb[21].mxu1  ;;  %24368 = vmatmul.mubr.msk.f32.gmra.mrb[124].mxu0 %vm6689_vm3, %v13209_v46  ;;  %v13149_v62 = vadd.f32 %v24277_v54, %v29927_v5 }
 0xa5c   :  { %v13148_v18 = vadd.f32 %v29927_v5, %v12926_v55  ;;  %24370 = vmatprep.mubr.msk.f32.mxu0 %vm6689_vm3, %v13210_v30 }
 0xa5d   :  { %v13213_v6 = vmax.f32 %v13149_v62, 0.0 }
 0xa5e   :  { %v13212_v63 = vmax.f32 %v13148_v18, 0.0  ;;  %v24280_v36 = vpop.f32.mrb[22].mxu1 }
 0xa5f   :  { %v12936_v3 = vpop.f32.mrb[23].mxu1  ;;  %24371 = vmatmul.mubr.msk.f32.gmra.mrb[126].mxu0 %vm6689_vm3, %v13211_v58  ;;  %v13151_v2 = vadd.f32 %v24280_v36, %v29927_v5 }
 0xa60   :  { %v13150_v4 = vadd.f32 %v29927_v5, %v12936_v3  ;;  %24373 = vmatprep.mubr.msk.f32.mxu0 %vm6689_vm3, %v13212_v63  ;;  %v30087_v63 = vld [vmem:[%s31023_s8] ss:$0 sm:$0xff] }
 0xa61   :  { %v13215_v7 = vmax.f32 %v13151_v2, 0.0 }
 0xa62   :  { %v13214_v35 = vmax.f32 %v13150_v4, 0.0  ;;  %v24283_v0 = vpop.f32.mrb[24].mxu1 }
 0xa63   :  { %v12946_v48 = vpop.f32.mrb[25].mxu1  ;;  %24374 = vmatmul.mubr.msk.f32.gmra.mrb[128].mxu0 %vm6689_vm3, %v13213_v6  ;;  %v13153_v9 = vadd.f32 %v24283_v0, %v29927_v5  ;;  %v31520_v6 = vmov 0.0  }
 0xa64   :  { %v13152_v11 = vadd.f32 %v29927_v5, %v12946_v48  ;;  %24376 = vmatprep.mubr.msk.f32.mxu0 %vm6689_vm3, %v13214_v35  ;;  %13884 = vst.msk [vmem:[#allocation4] sm:$0x3f] %vm13883_vm5, %v31520_v6  ;;  %13885 = vst.msk [vmem:[#allocation4 + $0x8] sm:$0x3f] %vm13883_vm5, %v31520_v6 }
 0xa65   :  { %v13217_v10 = vmax.f32 %v13153_v9, 0.0  ;;  %13886 = vst.msk [vmem:[#allocation4 + $0x10] sm:$0x3f] %vm13883_vm5, %v31520_v6  ;;  %13887 = vst.msk [vmem:[#allocation4 + $0x18] sm:$0x3f] %vm13883_vm5, %v31520_v6 }
 0xa66   :  { %v13216_v49 = vmax.f32 %v13152_v11, 0.0  ;;  %v24286_v8 = vpop.f32.mrb[26].mxu1  ;;  %13888 = vst.msk [vmem:[#allocation4 + $0x20] sm:$0x3f] %vm13883_vm5, %v31520_v6  ;;  %13889 = vst.msk [vmem:[#allocation4 + $0x28] sm:$0x3f] %vm13883_vm5, %v31520_v6 }
 0xa67   :  { %v12956_v13 = vpop.f32.mrb[27].mxu1  ;;  %24377 = vmatmul.mubr.msk.f32.gmra.mrb[130].mxu0 %vm6689_vm3, %v13215_v7  ;;  %v13155_v12 = vadd.f32 %v24286_v8, %v29927_v5  ;;  %13890 = vst.msk [vmem:[#allocation4 + $0x30] sm:$0x3f] %vm13883_vm5, %v31520_v6  ;;  %13891 = vst.msk [vmem:[#allocation4 + $0x38] sm:$0x3f] %vm13883_vm5, %v31520_v6 }
 0xa68   :  { %v13154_v14 = vadd.f32 %v29927_v5, %v12956_v13  ;;  %24379 = vmatprep.mubr.msk.f32.mxu0 %vm6689_vm3, %v13216_v49  ;;  %13892 = vst.msk [vmem:[#allocation4 + $0x40] sm:$0x3f] %vm13883_vm5, %v31520_v6  ;;  %13893 = vst.msk [vmem:[#allocation4 + $0x48] sm:$0x3f] %vm13883_vm5, %v31520_v6 }
 0xa69   :  { %v13219_v33 = vmax.f32 %v13155_v12, 0.0  ;;  %13894 = vst.msk [vmem:[#allocation4 + $0x50] sm:$0x3f] %vm13883_vm5, %v31520_v6  ;;  %13895 = vst.msk [vmem:[#allocation4 + $0x58] sm:$0x3f] %vm13883_vm5, %v31520_v6 }
 0xa6a   :  { %v13218_v19 = vmax.f32 %v13154_v14, 0.0  ;;  %v24289_v21 = vpop.f32.mrb[28].mxu1  ;;  %13896 = vst.msk [vmem:[#allocation4 + $0x60] sm:$0x3f] %vm13883_vm5, %v31520_v6  ;;  %13897 = vst.msk [vmem:[#allocation4 + $0x68] sm:$0x3f] %vm13883_vm5, %v31520_v6 }
 0xa6b   :  { %v12966_v29 = vpop.f32.mrb[29].mxu1  ;;  %24380 = vmatmul.mubr.msk.f32.gmra.mrb[132].mxu0 %vm6689_vm3, %v13217_v10  ;;  %v13157_v23 = vadd.f32 %v24289_v21, %v29927_v5  ;;  %13898 = vst.msk [vmem:[#allocation4 + $0x70] sm:$0x3f] %vm13883_vm5, %v31520_v6  ;;  %13899 = vst.msk [vmem:[#allocation4 + $0x78] sm:$0x3f] %vm13883_vm5, %v31520_v6 }
 0xa6c   :  { %v13156_v22 = vadd.f32 %v29927_v5, %v12966_v29  ;;  %24382 = vmatprep.mubr.msk.f32.mxu0 %vm6689_vm3, %v13218_v19  ;;  %13900 = vst.msk [vmem:[#allocation4 + $0x80] sm:$0x3f] %vm13883_vm5, %v31520_v6  ;;  %13901 = vst.msk [vmem:[#allocation4 + $0x88] sm:$0x3f] %vm13883_vm5, %v31520_v6  ;;  %v30229_v29 = vld [vmem:[%s31024_s9] sm:$0x7] }
 0xa6d   :  { %v13221_v38 = vmax.f32 %v13157_v23, 0.0  ;;  %13902 = vst.msk [vmem:[#allocation4 + $0x90] sm:$0x3f] %vm13883_vm5, %v31520_v6  ;;  %13903 = vst.msk [vmem:[#allocation4 + $0x98] sm:$0x3f] %vm13883_vm5, %v31520_v6  ;;  %24414 = vmatprep.subr.msk.mxu1 %vm614_vm0, %v30229_v29 }
 0xa6e   :  { %v13220_v24 = vmax.f32 %v13156_v22, 0.0  ;;  %v24292_v25 = vpop.f32.mrb[30].mxu1  ;;  %13904 = vst.msk [vmem:[#allocation4 + $0xa0] sm:$0x3f] %vm13883_vm5, %v31520_v6  ;;  %13905 = vst.msk [vmem:[#allocation4 + $0xa8] sm:$0x3f] %vm13883_vm5, %v31520_v6 }
 0xa6f   :  { %v12976_v26 = vpop.f32.mrb[31].mxu1  ;;  %24383 = vmatmul.mubr.msk.f32.gmra.mrb[134].mxu0 %vm6689_vm3, %v13219_v33  ;;  %v13159_v28 = vadd.f32 %v24292_v25, %v29927_v5  ;;  %13906 = vst.msk [vmem:[#allocation4 + $0xb0] sm:$0x3f] %vm13883_vm5, %v31520_v6  ;;  %13907 = vst.msk [vmem:[#allocation4 + $0xb8] sm:$0x3f] %vm13883_vm5, %v31520_v6 }
 0xa70   :  { %v13158_v27 = vadd.f32 %v29927_v5, %v12976_v26  ;;  %24385 = vmatprep.mubr.msk.f32.mxu0 %vm6689_vm3, %v13220_v24  ;;  %13908 = vst.msk [vmem:[#allocation4 + $0xc0] sm:$0x3f] %vm13883_vm5, %v31520_v6  ;;  %13909 = vst.msk [vmem:[#allocation4 + $0xc8] sm:$0x3f] %vm13883_vm5, %v31520_v6 }
 0xa71   :  { %v13223_v1 = vmax.f32 %v13159_v28, 0.0  ;;  %13910 = vst.msk [vmem:[#allocation4 + $0xd0] sm:$0x3f] %vm13883_vm5, %v31520_v6  ;;  %13911 = vst.msk [vmem:[#allocation4 + $0xd8] sm:$0x3f] %vm13883_vm5, %v31520_v6 }
 0xa72   :  { %v13222_v31 = vmax.f32 %v13158_v27, 0.0  ;;  %v24295_v32 = vpop.f32.mrb[32].mxu1  ;;  %13912 = vst.msk [vmem:[#allocation4 + $0xe0] sm:$0x3f] %vm13883_vm5, %v31520_v6  ;;  %13913 = vst.msk [vmem:[#allocation4 + $0xe8] sm:$0x3f] %vm13883_vm5, %v31520_v6 }
 0xa73   :  { %v12986_v34 = vpop.f32.mrb[33].mxu1  ;;  %24386 = vmatmul.mubr.msk.f32.gmra.mrb[136].mxu0 %vm6689_vm3, %v13221_v38  ;;  %v13161_v39 = vadd.f32 %v24295_v32, %v29927_v5  ;;  %13914 = vst.msk [vmem:[#allocation4 + $0xf0] sm:$0x3f] %vm13883_vm5, %v31520_v6  ;;  %13915 = vst.msk [vmem:[#allocation4 + $0xf8] sm:$0x3f] %vm13883_vm5, %v31520_v6 }
 0xa74   :  { %v13160_v37 = vadd.f32 %v29927_v5, %v12986_v34  ;;  %24388 = vmatprep.mubr.msk.f32.mxu0 %vm6689_vm3, %v13222_v31  ;;  %13916 = vst.msk [vmem:[#allocation4 + $0x100] sm:$0x3f] %vm13883_vm5, %v31520_v6  ;;  %13917 = vst.msk [vmem:[#allocation4 + $0x108] sm:$0x3f] %vm13883_vm5, %v31520_v6 }
 0xa75   :  { %v13225_v16 = vmax.f32 %v13161_v39, 0.0  ;;  %13918 = vst.msk [vmem:[#allocation4 + $0x110] sm:$0x3f] %vm13883_vm5, %v31520_v6  ;;  %13919 = vst.msk [vmem:[#allocation4 + $0x118] sm:$0x3f] %vm13883_vm5, %v31520_v6 }
 0xa76   :  { %v13224_v40 = vmax.f32 %v13160_v37, 0.0  ;;  %v24298_v41 = vpop.f32.mrb[34].mxu1  ;;  %13920 = vst.msk [vmem:[#allocation4 + $0x120] sm:$0x3f] %vm13883_vm5, %v31520_v6  ;;  %13921 = vst.msk [vmem:[#allocation4 + $0x128] sm:$0x3f] %vm13883_vm5, %v31520_v6 }
 0xa77   :  { %v12996_v45 = vpop.f32.mrb[35].mxu1  ;;  %24389 = vmatmul.mubr.msk.f32.gmra.mrb[138].mxu0 %vm6689_vm3, %v13223_v1  ;;  %v13163_v50 = vadd.f32 %v24298_v41, %v29927_v5  ;;  %13922 = vst.msk [vmem:[#allocation4 + $0x130] sm:$0x3f] %vm13883_vm5, %v31520_v6  ;;  %13923 = vst.msk [vmem:[#allocation4 + $0x138] sm:$0x3f] %vm13883_vm5, %v31520_v6 }
 0xa78   :  { %v13162_v47 = vadd.f32 %v29927_v5, %v12996_v45  ;;  %24391 = vmatprep.mubr.msk.f32.mxu0 %vm6689_vm3, %v13224_v40  ;;  %13924 = vst.msk [vmem:[#allocation4 + $0x140] sm:$0x3f] %vm13883_vm5, %v31520_v6  ;;  %13925 = vst.msk [vmem:[#allocation4 + $0x148] sm:$0x3f] %vm13883_vm5, %v31520_v6 }
 0xa79   :  { %v13227_v15 = vmax.f32 %v13163_v50, 0.0  ;;  %13926 = vst.msk [vmem:[#allocation4 + $0x150] sm:$0x3f] %vm13883_vm5, %v31520_v6  ;;  %13927 = vst.msk [vmem:[#allocation4 + $0x158] sm:$0x3f] %vm13883_vm5, %v31520_v6 }
 0xa7a   :  { %v13226_v51 = vmax.f32 %v13162_v47, 0.0  ;;  %v24301_v52 = vpop.f32.mrb[36].mxu1  ;;  %13928 = vst.msk [vmem:[#allocation4 + $0x160] sm:$0x3f] %vm13883_vm5, %v31520_v6  ;;  %13929 = vst.msk [vmem:[#allocation4 + $0x168] sm:$0x3f] %vm13883_vm5, %v31520_v6 }
 0xa7b   :  { %v13006_v17 = vpop.f32.mrb[37].mxu1  ;;  %24392 = vmatmul.mubr.msk.f32.gmra.mrb[140].mxu0 %vm6689_vm3, %v13225_v16  ;;  %v13165_v59 = vadd.f32 %v24301_v52, %v29927_v5  ;;  %13930 = vst.msk [vmem:[#allocation4 + $0x170] sm:$0x3f] %vm13883_vm5, %v31520_v6  ;;  %13931 = vst.msk [vmem:[#allocation4 + $0x178] sm:$0x3f] %vm13883_vm5, %v31520_v6 }
 0xa7c   :  { %v13164_v43 = vadd.f32 %v29927_v5, %v13006_v17  ;;  %24394 = vmatprep.mubr.msk.f32.mxu0 %vm6689_vm3, %v13226_v51  ;;  %18423 = vst.msk [vmem:[#allocation5 + $0x18] sm:$0x3f] %vm18419_vm7, %v31520_v6  ;;  %18424 = vst.msk [vmem:[#allocation5 + $0x20] sm:$0x3f] %vm18419_vm7, %v31520_v6 }
 0xa7d   :  { %v13229_v61 = vmax.f32 %v13165_v59, 0.0  ;;  %18420 = vst.msk [vmem:[#allocation5] sm:$0x3f] %vm18419_vm7, %v31520_v6  ;;  %18421 = vst.msk [vmem:[#allocation5 + $0x8] sm:$0x3f] %vm18419_vm7, %v31520_v6 }
 0xa7e   :  { %v13228_v57 = vmax.f32 %v13164_v43, 0.0  ;;  %v24304_v20 = vpop.f32.mrb[38].mxu1  ;;  %18422 = vst.msk [vmem:[#allocation5 + $0x10] sm:$0x3f] %vm18419_vm7, %v31520_v6  ;;  %18425 = vst.msk [vmem:[#allocation5 + $0x28] sm:$0x3f] %vm18419_vm7, %v31520_v6 }
 0xa7f   :  { %v13016_v60 = vpop.f32.mrb[39].mxu1  ;;  %24395 = vmatmul.mubr.msk.f32.gmra.mrb[142].mxu0 %vm6689_vm3, %v13227_v15  ;;  %v13167_v53 = vadd.f32 %v24304_v20, %v29927_v5  ;;  %18426 = vst.msk [vmem:[#allocation5 + $0x30] sm:$0x3f] %vm18419_vm7, %v31520_v6  ;;  %18427 = vst.msk [vmem:[#allocation5 + $0x38] sm:$0x3f] %vm18419_vm7, %v31520_v6 }
 0xa80   :  { %v13166_v56 = vadd.f32 %v29927_v5, %v13016_v60  ;;  %24397 = vmatprep.mubr.msk.f32.mxu0 %vm6689_vm3, %v13228_v57  ;;  %18428 = vst.msk [vmem:[#allocation5 + $0x40] sm:$0x3f] %vm18419_vm7, %v31520_v6  ;;  %18429 = vst.msk [vmem:[#allocation5 + $0x48] sm:$0x3f] %vm18419_vm7, %v31520_v6 }
 0xa81   :  { %v13231_v55 = vmax.f32 %v13167_v53, 0.0  ;;  %18430 = vst.msk [vmem:[#allocation5 + $0x50] sm:$0x3f] %vm18419_vm7, %v31520_v6  ;;  %18431 = vst.msk [vmem:[#allocation5 + $0x58] sm:$0x3f] %vm18419_vm7, %v31520_v6 }
 0xa82   :  { %v13230_v46 = vmax.f32 %v13166_v56, 0.0  ;;  %v24307_v44 = vpop.f32.mrb[40].mxu1 }
 0xa83   :  { %v13026_v30 = vpop.f32.mrb[41].mxu1  ;;  %24398 = vmatmul.mubr.msk.f32.gmra.mrb[144].mxu0 %vm6689_vm3, %v13229_v61  ;;  %v13169_v18 = vadd.f32 %v24307_v44, %v29927_v5 }
 0xa84   :  { %v13168_v54 = vadd.f32 %v29927_v5, %v13026_v30  ;;  %24400 = vmatprep.mubr.msk.f32.mxu0 %vm6689_vm3, %v13230_v46 }
 0xa85   :  { %v13233_v62 = vmax.f32 %v13169_v18, 0.0 }
 0xa86   :  { %v13232_v58 = vmax.f32 %v13168_v54, 0.0 }
 0xa87   :  { %24401 = vmatmul.mubr.msk.f32.gmra.mrb[146].mxu0 %vm6689_vm3, %v13231_v55 }
 0xa88   :  { %24403 = vmatprep.mubr.msk.f32.mxu0 %vm6689_vm3, %v13232_v58 }
 0xa8b   :  { %24404 = vmatmul.mubr.msk.f32.gmra.mrb[148].mxu0 %vm6689_vm3, %v13233_v62 }
 0xae2   :  { %v24312_v36 = vpop.f32.mrb[86].mxu0 }
 0xae3   :  { %v13506_v3 = vadd.f32 %v24312_v36, %v30087_v63  ;;  %v13500_v4 = vpop.f32.mrb[87].mxu0 }
 0xae4   :  { %v13501_v5 = vadd.f32 %v30087_v63, %v13500_v4 }
 0xae5   :  { %13820 = vst.msk [vmem:[%s31028_s13 + $0x8] sm:$0xff] %vm116_vm1, %v13506_v3 }
 0xae6   :  { %13819 = vst.msk [vmem:[%s31028_s13] sm:$0xff] %vm116_vm1, %v13501_v5  ;;  %v24315_v2 = vpop.f32.mrb[88].mxu0 }
 0xae7   :  { %v13516_v35 = vadd.f32 %v24315_v2, %v30087_v63  ;;  %v13510_v0 = vpop.f32.mrb[89].mxu0 }
 0xae8   :  { %v13511_v48 = vadd.f32 %v30087_v63, %v13510_v0 }
 0xae9   :  { %13822 = vst.msk [vmem:[%s31028_s13 + $0x18] sm:$0xff] %vm116_vm1, %v13516_v35 }
 0xaea   :  { %13821 = vst.msk [vmem:[%s31028_s13 + $0x10] sm:$0xff] %vm116_vm1, %v13511_v48  ;;  %v24318_v11 = vpop.f32.mrb[90].mxu0 }
 0xaeb   :  { %v13526_v7 = vadd.f32 %v24318_v11, %v30087_v63  ;;  %v13520_v9 = vpop.f32.mrb[91].mxu0 }
 0xaec   :  { %v13521_v49 = vadd.f32 %v30087_v63, %v13520_v9 }
 0xaed   :  { %13824 = vst.msk [vmem:[%s31028_s13 + $0x28] sm:$0xff] %vm116_vm1, %v13526_v7 }
 0xaee   :  { %13823 = vst.msk [vmem:[%s31028_s13 + $0x20] sm:$0xff] %vm116_vm1, %v13521_v49  ;;  %v24321_v8 = vpop.f32.mrb[92].mxu0 }
 0xaef   :  { %v13536_v13 = vadd.f32 %v24321_v8, %v30087_v63  ;;  %v13530_v14 = vpop.f32.mrb[93].mxu0 }
 0xaf0   :  { %v13531_v10 = vadd.f32 %v30087_v63, %v13530_v14 }
 0xaf1   :  { %13826 = vst.msk [vmem:[%s31028_s13 + $0x38] sm:$0xff] %vm116_vm1, %v13536_v13 }
 0xaf2   :  { %13825 = vst.msk [vmem:[%s31028_s13 + $0x30] sm:$0xff] %vm116_vm1, %v13531_v10  ;;  %v24324_v12 = vpop.f32.mrb[94].mxu0 }
 0xaf3   :  { %v13546_v19 = vadd.f32 %v24324_v12, %v30087_v63  ;;  %v13540_v21 = vpop.f32.mrb[95].mxu0 }
 0xaf4   :  { %v13541_v22 = vadd.f32 %v30087_v63, %v13540_v21 }
 0xaf5   :  { %13828 = vst.msk [vmem:[%s31028_s13 + $0x48] sm:$0xff] %vm116_vm1, %v13546_v19 }
 0xaf6   :  { %13827 = vst.msk [vmem:[%s31028_s13 + $0x40] sm:$0xff] %vm116_vm1, %v13541_v22  ;;  %v24327_v33 = vpop.f32.mrb[96].mxu0 }
 0xaf7   :  { %v13556_v23 = vadd.f32 %v24327_v33, %v30087_v63  ;;  %v13550_v24 = vpop.f32.mrb[97].mxu0 }
 0xaf8   :  { %v13551_v25 = vadd.f32 %v30087_v63, %v13550_v24 }
 0xaf9   :  { %13830 = vst.msk [vmem:[%s31028_s13 + $0x58] sm:$0xff] %vm116_vm1, %v13556_v23 }
 0xafa   :  { %13829 = vst.msk [vmem:[%s31028_s13 + $0x50] sm:$0xff] %vm116_vm1, %v13551_v25  ;;  %v24330_v26 = vpop.f32.mrb[98].mxu0 }
 0xafb   :  { %v13566_v27 = vadd.f32 %v24330_v26, %v30087_v63  ;;  %v13560_v38 = vpop.f32.mrb[99].mxu0 }
 0xafc   :  { %v13561_v28 = vadd.f32 %v30087_v63, %v13560_v38 }
 0xafd   :  { %13832 = vst.msk [vmem:[%s31028_s13 + $0x68] sm:$0xff] %vm116_vm1, %v13566_v27 }
 0xafe   :  { %13831 = vst.msk [vmem:[%s31028_s13 + $0x60] sm:$0xff] %vm116_vm1, %v13561_v28  ;;  %v24333_v31 = vpop.f32.mrb[100].mxu0 }
 0xaff   :  { %v13576_v32 = vadd.f32 %v24333_v31, %v30087_v63  ;;  %v13570_v34 = vpop.f32.mrb[101].mxu0 }
 0xb00   :  { %v13571_v37 = vadd.f32 %v30087_v63, %v13570_v34 }
 0xb01   :  { %13834 = vst.msk [vmem:[%s31028_s13 + $0x78] sm:$0xff] %vm116_vm1, %v13576_v32 }
 0xb02   :  { %13833 = vst.msk [vmem:[%s31028_s13 + $0x70] sm:$0xff] %vm116_vm1, %v13571_v37  ;;  %v24336_v1 = vpop.f32.mrb[102].mxu0 }
 0xb03   :  { %v13586_v39 = vadd.f32 %v24336_v1, %v30087_v63  ;;  %v13580_v40 = vpop.f32.mrb[103].mxu0 }
 0xb04   :  { %v13581_v41 = vadd.f32 %v30087_v63, %v13580_v40 }
 0xb05   :  { %13836 = vst.msk [vmem:[%s31028_s13 + $0x88] sm:$0xff] %vm116_vm1, %v13586_v39 }
 0xb06   :  { %13835 = vst.msk [vmem:[%s31028_s13 + $0x80] sm:$0xff] %vm116_vm1, %v13581_v41  ;;  %v24339_v42 = vpop.f32.mrb[104].mxu0 }
 0xb07   :  { %v13596_v45 = vadd.f32 %v24339_v42, %v30087_v63  ;;  %v13590_v47 = vpop.f32.mrb[105].mxu0 }
 0xb08   :  { %v13591_v16 = vadd.f32 %v30087_v63, %v13590_v47 }
 0xb09   :  { %13838 = vst.msk [vmem:[%s31028_s13 + $0x98] sm:$0xff] %vm116_vm1, %v13596_v45 }
 0xb0a   :  { %13837 = vst.msk [vmem:[%s31028_s13 + $0x90] sm:$0xff] %vm116_vm1, %v13591_v16  ;;  %v24342_v50 = vpop.f32.mrb[106].mxu0 }
 0xb0b   :  { %v13606_v51 = vadd.f32 %v24342_v50, %v30087_v63  ;;  %v13600_v52 = vpop.f32.mrb[107].mxu0 }
 0xb0c   :  { %v13601_v17 = vadd.f32 %v30087_v63, %v13600_v52 }
 0xb0d   :  { %13840 = vst.msk [vmem:[%s31028_s13 + $0xa8] sm:$0xff] %vm116_vm1, %v13606_v51 }
 0xb0e   :  { %13839 = vst.msk [vmem:[%s31028_s13 + $0xa0] sm:$0xff] %vm116_vm1, %v13601_v17  ;;  %v24345_v43 = vpop.f32.mrb[108].mxu0 }
 0xb0f   :  { %v13616_v15 = vadd.f32 %v24345_v43, %v30087_v63  ;;  %v13610_v59 = vpop.f32.mrb[109].mxu0 }
 0xb10   :  { %v13611_v57 = vadd.f32 %v30087_v63, %v13610_v59 }
 0xb11   :  { %13842 = vst.msk [vmem:[%s31028_s13 + $0xb8] sm:$0xff] %vm116_vm1, %v13616_v15 }
 0xb12   :  { %13841 = vst.msk [vmem:[%s31028_s13 + $0xb0] sm:$0xff] %vm116_vm1, %v13611_v57  ;;  %v24348_v20 = vpop.f32.mrb[110].mxu0 }
 0xb13   :  { %v13626_v60 = vadd.f32 %v24348_v20, %v30087_v63  ;;  %v13620_v56 = vpop.f32.mrb[111].mxu0 }
 0xb14   :  { %v13621_v61 = vadd.f32 %v30087_v63, %v13620_v56 }
 0xb15   :  { %13844 = vst.msk [vmem:[%s31028_s13 + $0xc8] sm:$0xff] %vm116_vm1, %v13626_v60 }
 0xb16   :  { %13843 = vst.msk [vmem:[%s31028_s13 + $0xc0] sm:$0xff] %vm116_vm1, %v13621_v61  ;;  %v24351_v53 = vpop.f32.mrb[112].mxu0 }
 0xb17   :  { %v13636_v46 = vadd.f32 %v24351_v53, %v30087_v63  ;;  %v13630_v44 = vpop.f32.mrb[113].mxu0 }
 0xb18   :  { %v13631_v30 = vadd.f32 %v30087_v63, %v13630_v44 }
 0xb19   :  { %13846 = vst.msk [vmem:[%s31028_s13 + $0xd8] sm:$0xff] %vm116_vm1, %v13636_v46 }
 0xb1a   :  { %13845 = vst.msk [vmem:[%s31028_s13 + $0xd0] sm:$0xff] %vm116_vm1, %v13631_v30  ;;  %v24354_v54 = vpop.f32.mrb[114].mxu0 }
 0xb1b   :  { %v13646_v55 = vadd.f32 %v24354_v54, %v30087_v63  ;;  %v13640_v18 = vpop.f32.mrb[115].mxu0 }
 0xb1c   :  { %v13641_v58 = vadd.f32 %v30087_v63, %v13640_v18 }
 0xb1d   :  { %13848 = vst.msk [vmem:[%s31028_s13 + $0xe8] sm:$0xff] %vm116_vm1, %v13646_v55 }
 0xb1e   :  { %13847 = vst.msk [vmem:[%s31028_s13 + $0xe0] sm:$0xff] %vm116_vm1, %v13641_v58  ;;  %v24357_v62 = vpop.f32.mrb[116].mxu0 }
 0xb1f   :  { %v13656_v36 = vadd.f32 %v24357_v62, %v30087_v63  ;;  %v13650_v3 = vpop.f32.mrb[117].mxu0 }
 0xb20   :  { %v13651_v4 = vadd.f32 %v30087_v63, %v13650_v3 }
 0xb21   :  { %13850 = vst.msk [vmem:[%s31028_s13 + $0xf8] sm:$0xff] %vm116_vm1, %v13656_v36 }
 0xb22   :  { %13849 = vst.msk [vmem:[%s31028_s13 + $0xf0] sm:$0xff] %vm116_vm1, %v13651_v4  ;;  %v24360_v5 = vpop.f32.mrb[118].mxu0 }
 0xb23   :  { %v13666_v2 = vadd.f32 %v24360_v5, %v30087_v63  ;;  %v13660_v35 = vpop.f32.mrb[119].mxu0 }
 0xb24   :  { %v13661_v0 = vadd.f32 %v30087_v63, %v13660_v35 }
 0xb25   :  { %13852 = vst.msk [vmem:[%s31028_s13 + $0x108] sm:$0xff] %vm116_vm1, %v13666_v2 }
 0xb26   :  { %13851 = vst.msk [vmem:[%s31028_s13 + $0x100] sm:$0xff] %vm116_vm1, %v13661_v0  ;;  %v24363_v48 = vpop.f32.mrb[120].mxu0 }
 0xb27   :  { %v13676_v11 = vadd.f32 %v24363_v48, %v30087_v63  ;;  %v13670_v7 = vpop.f32.mrb[121].mxu0 }
 0xb28   :  { %v13671_v9 = vadd.f32 %v30087_v63, %v13670_v7 }
 0xb29   :  { %13854 = vst.msk [vmem:[%s31028_s13 + $0x118] sm:$0xff] %vm116_vm1, %v13676_v11 }
 0xb2a   :  { %13853 = vst.msk [vmem:[%s31028_s13 + $0x110] sm:$0xff] %vm116_vm1, %v13671_v9  ;;  %v24366_v49 = vpop.f32.mrb[122].mxu0 }
 0xb2b   :  { %v13686_v8 = vadd.f32 %v24366_v49, %v30087_v63  ;;  %v13680_v13 = vpop.f32.mrb[123].mxu0 }
 0xb2c   :  { %v13681_v14 = vadd.f32 %v30087_v63, %v13680_v13 }
 0xb2d   :  { %13856 = vst.msk [vmem:[%s31028_s13 + $0x128] sm:$0xff] %vm116_vm1, %v13686_v8 }
 0xb2e   :  { %13855 = vst.msk [vmem:[%s31028_s13 + $0x120] sm:$0xff] %vm116_vm1, %v13681_v14  ;;  %v24369_v10 = vpop.f32.mrb[124].mxu0 }
 0xb2f   :  { %v13696_v12 = vadd.f32 %v24369_v10, %v30087_v63  ;;  %v13690_v19 = vpop.f32.mrb[125].mxu0 }
 0xb30   :  { %v13691_v21 = vadd.f32 %v30087_v63, %v13690_v19 }
 0xb31   :  { %13858 = vst.msk [vmem:[%s31028_s13 + $0x138] sm:$0xff] %vm116_vm1, %v13696_v12 }
 0xb32   :  { %13857 = vst.msk [vmem:[%s31028_s13 + $0x130] sm:$0xff] %vm116_vm1, %v13691_v21  ;;  %v24372_v22 = vpop.f32.mrb[126].mxu0 }
 0xb33   :  { %v13706_v33 = vadd.f32 %v24372_v22, %v30087_v63  ;;  %v13700_v23 = vpop.f32.mrb[127].mxu0 }
 0xb34   :  { %v13701_v24 = vadd.f32 %v30087_v63, %v13700_v23 }
 0xb35   :  { %13860 = vst.msk [vmem:[%s31028_s13 + $0x148] sm:$0xff] %vm116_vm1, %v13706_v33 }
 0xb36   :  { %13859 = vst.msk [vmem:[%s31028_s13 + $0x140] sm:$0xff] %vm116_vm1, %v13701_v24  ;;  %v24375_v25 = vpop.f32.mrb[128].mxu0 }
 0xb37   :  { %v13716_v26 = vadd.f32 %v24375_v25, %v30087_v63  ;;  %v13710_v27 = vpop.f32.mrb[129].mxu0 }
 0xb38   :  { %v13711_v38 = vadd.f32 %v30087_v63, %v13710_v27 }
 0xb39   :  { %13862 = vst.msk [vmem:[%s31028_s13 + $0x158] sm:$0xff] %vm116_vm1, %v13716_v26 }
 0xb3a   :  { %13861 = vst.msk [vmem:[%s31028_s13 + $0x150] sm:$0xff] %vm116_vm1, %v13711_v38  ;;  %v24378_v28 = vpop.f32.mrb[130].mxu0 }
 0xb3b   :  { %v13726_v31 = vadd.f32 %v24378_v28, %v30087_v63  ;;  %v13720_v32 = vpop.f32.mrb[131].mxu0 }
 0xb3c   :  { %v13721_v34 = vadd.f32 %v30087_v63, %v13720_v32  ;;  %v20833_v32 = vld [vmem:[%s31024_s9 + $0x20] sm:$0x7] }
 0xb3d   :  { %13864 = vst.msk [vmem:[%s31028_s13 + $0x168] sm:$0xff] %vm116_vm1, %v13726_v31 }
 0xb3e   :  { %13863 = vst.msk [vmem:[%s31028_s13 + $0x160] sm:$0xff] %vm116_vm1, %v13721_v34  ;;  %v24381_v37 = vpop.f32.mrb[132].mxu0 }
 0xb3f   :  { %v13736_v1 = vadd.f32 %v24381_v37, %v30087_v63  ;;  %v13730_v39 = vpop.f32.mrb[133].mxu0 }
 0xb40   :  { %v13731_v40 = vadd.f32 %v30087_v63, %v13730_v39 }
 0xb41   :  { %13866 = vst.msk [vmem:[%s31028_s13 + $0x178] sm:$0xff] %vm116_vm1, %v13736_v1 }
 0xb42   :  { %13865 = vst.msk [vmem:[%s31028_s13 + $0x170] sm:$0xff] %vm116_vm1, %v13731_v40  ;;  %v24384_v41 = vpop.f32.mrb[134].mxu0  ;;  %v20839_v40 = vld [vmem:[%s31024_s9 + $0x30] sm:$0x7] }
 0xb43   :  { %v13746_v42 = vadd.f32 %v24384_v41, %v30087_v63  ;;  %v13740_v45 = vpop.f32.mrb[135].mxu0 }
 0xb44   :  { %v13741_v47 = vadd.f32 %v30087_v63, %v13740_v45 }
 0xb45   :  { %13868 = vst.msk [vmem:[%s31028_s13 + $0x188] sm:$0xff] %vm116_vm1, %v13746_v42 }
 0xb46   :  { %13867 = vst.msk [vmem:[%s31028_s13 + $0x180] sm:$0xff] %vm116_vm1, %v13741_v47  ;;  %v24387_v16 = vpop.f32.mrb[136].mxu0  ;;  %v20845_v47 = vld [vmem:[%s31024_s9 + $0x40] sm:$0x7] }
 0xb47   :  { %v13756_v50 = vadd.f32 %v24387_v16, %v30087_v63  ;;  %v13750_v51 = vpop.f32.mrb[137].mxu0 }
 0xb48   :  { %v13751_v52 = vadd.f32 %v30087_v63, %v13750_v51 }
 0xb49   :  { %13870 = vst.msk [vmem:[%s31028_s13 + $0x198] sm:$0xff] %vm116_vm1, %v13756_v50 }
 0xb4a   :  { %13869 = vst.msk [vmem:[%s31028_s13 + $0x190] sm:$0xff] %vm116_vm1, %v13751_v52  ;;  %v24390_v17 = vpop.f32.mrb[138].mxu0 }
 0xb4b   :  { %v13766_v43 = vadd.f32 %v24390_v17, %v30087_v63  ;;  %v13760_v15 = vpop.f32.mrb[139].mxu0 }
 0xb4c   :  { %v13761_v59 = vadd.f32 %v30087_v63, %v13760_v15  ;;  %v20851_v15 = vld [vmem:[%s31024_s9 + $0x50] sm:$0x7] }
 0xb4d   :  { %13872 = vst.msk [vmem:[%s31028_s13 + $0x1a8] sm:$0xff] %vm116_vm1, %v13766_v43 }
 0xb4e   :  { %13871 = vst.msk [vmem:[%s31028_s13 + $0x1a0] sm:$0xff] %vm116_vm1, %v13761_v59  ;;  %v24393_v57 = vpop.f32.mrb[140].mxu0 }
 0xb4f   :  { %v13776_v20 = vadd.f32 %v24393_v57, %v30087_v63  ;;  %v13770_v60 = vpop.f32.mrb[141].mxu0 }
 0xb50   :  { %v13771_v56 = vadd.f32 %v30087_v63, %v13770_v60 }
 0xb51   :  { %13874 = vst.msk [vmem:[%s31028_s13 + $0x1b8] sm:$0xff] %vm116_vm1, %v13776_v20  ;;  %v20857_v20 = vld [vmem:[%s31024_s9 + $0x60] sm:$0x7] }
 0xb52   :  { %13873 = vst.msk [vmem:[%s31028_s13 + $0x1b0] sm:$0xff] %vm116_vm1, %v13771_v56  ;;  %v24396_v61 = vpop.f32.mrb[142].mxu0 }
 0xb53   :  { %v13786_v53 = vadd.f32 %v24396_v61, %v30087_v63  ;;  %v13780_v46 = vpop.f32.mrb[143].mxu0 }
 0xb54   :  { %v13781_v44 = vadd.f32 %v30087_v63, %v13780_v46  ;;  %v20863_v46 = vld [vmem:[%s31024_s9 + $0x70] sm:$0x7] }
 0xb55   :  { %13876 = vst.msk [vmem:[%s31028_s13 + $0x1c8] sm:$0xff] %vm116_vm1, %v13786_v53 }
 0xb56   :  { %13875 = vst.msk [vmem:[%s31028_s13 + $0x1c0] sm:$0xff] %vm116_vm1, %v13781_v44  ;;  %v24399_v30 = vpop.f32.mrb[144].mxu0 }
 0xb57   :  { %v13796_v54 = vadd.f32 %v24399_v30, %v30087_v63  ;;  %v13790_v55 = vpop.f32.mrb[145].mxu0 }
 0xb58   :  { %v13791_v18 = vadd.f32 %v30087_v63, %v13790_v55 }
 0xb59   :  { %13878 = vst.msk [vmem:[%s31028_s13 + $0x1d8] sm:$0xff] %vm116_vm1, %v13796_v54 }
 0xb5a   :  { %13877 = vst.msk [vmem:[%s31028_s13 + $0x1d0] sm:$0xff] %vm116_vm1, %v13791_v18  ;;  %v24402_v58 = vpop.f32.mrb[146].mxu0  ;;  %v20869_v18 = vld [vmem:[%s31024_s9 + $0x80] sm:$0x7] }
 0xb5b   :  { %v13806_v62 = vadd.f32 %v24402_v58, %v30087_v63  ;;  %v13800_v36 = vpop.f32.mrb[147].mxu0 }
 0xb5c   :  { %v13801_v3 = vadd.f32 %v30087_v63, %v13800_v36 }
 0xb5d   :  { %13880 = vst.msk [vmem:[%s31028_s13 + $0x1e8] sm:$0xff] %vm116_vm1, %v13806_v62 }
 0xb5e   :  { %13879 = vst.msk [vmem:[%s31028_s13 + $0x1e0] sm:$0xff] %vm116_vm1, %v13801_v3  ;;  %v24405_v4 = vpop.f32.mrb[148].mxu0 }
 0xb5f   :  { %v13816_v5 = vadd.f32 %v24405_v4, %v30087_v63  ;;  %v13810_v2 = vpop.f32.mrb[149].mxu0 }
 0xb60   :  { %v13811_v35 = vadd.f32 %v30087_v63, %v13810_v2  ;;  %v15128_v2 = vld [vmem:[%s31024_s9 + $0x3] sm:$0x7] }
 0xb61   :  { %13882 = vst.msk [vmem:[%s31028_s13 + $0x1f8] sm:$0xff] %vm116_vm1, %v13816_v5 }
 0xb62   :  { %13881 = vst.msk [vmem:[%s31028_s13 + $0x1f0] sm:$0xff] %vm116_vm1, %v13811_v35 }
 0xb69   :  { %v13939_v63 = vld [vmem:[%s13938_s1] sm:$0xf]  ;;  %v13940_v0 = vld [vmem:[%s13938_s1 + $0x10] sm:$0xf] }
 0xb6a   :  { %v13941_v48 = vld [vmem:[%s13938_s1 + $0x20] sm:$0xf]  ;;  %13949 = vst.msk [vmem:[#allocation4 + $0x9] sm:$0xf] %vm13948_vm6, %v13939_v63  ;;  %13950 = vst.msk [vmem:[#allocation4 + $0x11] sm:$0xf] %vm13948_vm6, %v13940_v0 }
 0xb6b   :  { %13951 = vst.msk [vmem:[#allocation4 + $0x19] sm:$0xf] %vm13948_vm6, %v13941_v48  ;;  %v13943_v11 = vld [vmem:[%s13938_s1 + $0x100] sm:$0xf]  ;;  %v13944_v7 = vld [vmem:[%s13938_s1 + $0x110] sm:$0xf] }
 0xb6c   :  { %v13945_v9 = vld [vmem:[%s13938_s1 + $0x120] sm:$0xf]  ;;  %13953 = vst.msk [vmem:[#allocation4 + $0x39] sm:$0xf] %vm13948_vm6, %v13943_v11  ;;  %13954 = vst.msk [vmem:[#allocation4 + $0x41] sm:$0xf] %vm13948_vm6, %v13944_v7 }
 0xb6d   :  { %13955 = vst.msk [vmem:[#allocation4 + $0x49] sm:$0xf] %vm13948_vm6, %v13945_v9  ;;  %v13942_v49 = vld [vmem:[%s13938_s1 + $0x30] sm:$0xf]  ;;  %v13964_v13 = vld [vmem:[%s30518_s25] sm:$0xf] }
 0xb6e   :  { %v13946_v8 = vld [vmem:[%s13938_s1 + $0x130] sm:$0xf]  ;;  %13952 = vst.msk [vmem:[#allocation4 + $0x21] sm:$0xf] %vm13948_vm6, %v13942_v49  ;;  %13973 = vst.msk [vmem:[#allocation4 + $0x69] sm:$0xf] %vm13948_vm6, %v13964_v13 }
 0xb6f   :  { %13956 = vst.msk [vmem:[#allocation4 + $0x51] sm:$0xf] %vm13948_vm6, %v13946_v8  ;;  %v13965_v14 = vld [vmem:[%s30518_s25 + $0x10] sm:$0xf]  ;;  %v13966_v10 = vld [vmem:[%s30518_s25 + $0x20] sm:$0xf] }
 0xb70   :  { %v13968_v12 = vld [vmem:[%s30518_s25 + $0x100] sm:$0xf]  ;;  %13974 = vst.msk [vmem:[#allocation4 + $0x71] sm:$0xf] %vm13948_vm6, %v13965_v14  ;;  %13975 = vst.msk [vmem:[#allocation4 + $0x79] sm:$0xf] %vm13948_vm6, %v13966_v10 }
 0xb71   :  { %13977 = vst.msk [vmem:[#allocation4 + $0x99] sm:$0xf] %vm13948_vm6, %v13968_v12  ;;  %v13969_v19 = vld [vmem:[%s30518_s25 + $0x110] sm:$0xf]  ;;  %v13970_v21 = vld [vmem:[%s30518_s25 + $0x120] sm:$0xf] }
 0xb72   :  { %v13967_v22 = vld [vmem:[%s30518_s25 + $0x30] sm:$0xf]  ;;  %13978 = vst.msk [vmem:[#allocation4 + $0xa1] sm:$0xf] %vm13948_vm6, %v13969_v19  ;;  %13979 = vst.msk [vmem:[#allocation4 + $0xa9] sm:$0xf] %vm13948_vm6, %v13970_v21 }
 0xb73   :  { %13976 = vst.msk [vmem:[#allocation4 + $0x81] sm:$0xf] %vm13948_vm6, %v13967_v22  ;;  %v13971_v33 = vld [vmem:[%s30518_s25 + $0x130] sm:$0xf]  ;;  %v13988_v23 = vld [vmem:[%s30530_s4] sm:$0xf] }
 0xb74   :  { %13980 = vst.msk [vmem:[#allocation4 + $0xb1] sm:$0xf] %vm13948_vm6, %v13971_v33  ;;  %13997 = vst.msk [vmem:[#allocation4 + $0xc9] sm:$0xf] %vm13948_vm6, %v13988_v23  ;;  %v13989_v24 = vld [vmem:[%s30530_s4 + $0x10] sm:$0xf] }
 0xb75   :  { %v13990_v25 = vld [vmem:[%s30530_s4 + $0x20] sm:$0xf]  ;;  %13998 = vst.msk [vmem:[#allocation4 + $0xd1] sm:$0xf] %vm13948_vm6, %v13989_v24  ;;  %v13993_v27 = vld [vmem:[%s30530_s4 + $0x110] sm:$0xf] }
 0xb76   :  { %v13992_v26 = vld [vmem:[%s30530_s4 + $0x100] sm:$0xf]  ;;  %13999 = vst.msk [vmem:[#allocation4 + $0xd9] sm:$0xf] %vm13948_vm6, %v13990_v25  ;;  %v13991_v28 = vld [vmem:[%s30530_s4 + $0x30] sm:$0xf] }
 0xb77   :  { %14001 = vst.msk [vmem:[#allocation4 + $0xf9] sm:$0xf] %vm13948_vm6, %v13992_v26  ;;  %v13994_v38 = vld [vmem:[%s30530_s4 + $0x120] sm:$0xf]  ;;  %14002 = vst.msk [vmem:[#allocation4 + $0x101] sm:$0xf] %vm13948_vm6, %v13993_v27 }
 0xb78   :  { %v25967_v31 = vld [vmem:[#allocation4 + $0x1] ss:$8 sps:$4 sm:$0xff]   ;;  %14003 = vst.msk [vmem:[#allocation4 + $0x109] sm:$0xf] %vm13948_vm6, %v13994_v38  ;;  %14000 = vst.msk [vmem:[#allocation4 + $0xe1] sm:$0xf] %vm13948_vm6, %v13991_v28 }
 0xb79   :  { %v25968_v34 = vld [vmem:[#allocation4 + $0x11] ss:$8 sps:$4 sm:$0xff]   ;;  %24408 = vmatprep.mubr.msk.f32.mxu1 %vm116_vm1, %v25967_v31  ;;  %v25970_v1 = vld [vmem:[#allocation4 + $0x41] ss:$8 sps:$4 sm:$0xff]   ;;  %s30652_s25 = sld [smem:[#allocation7 + $0x3]] }
 0xb7a   :  { %v25969_v37 = vld [vmem:[#allocation4 + $0x31] ss:$8 sps:$4 sm:$0xff]   ;;  %24409 = vmatmul.mubr.msk.f32.vlgmr.msra.gmra.mrb[64].mxu1 %vm116_vm1, %v25968_v34  ;;  %v25971_v39 = vld [vmem:[#allocation4] ss:$8 sps:$4 sm:$0xff]  }
 0xb7b   :  { %24415 = vmatpush3.msk.msra.mxu1 %vm614_vm0, %v30229_v29  ;;  %24411 = vmatprep.mubr.msk.f32.mxu1 %vm116_vm1, %v25969_v37  ;;  %v25972_v41 = vld [vmem:[#allocation4 + $0x10] ss:$8 sps:$4 sm:$0xff]   ;;  %v25974_v29 = vld [vmem:[#allocation4 + $0x40] ss:$8 sps:$4 sm:$0xff]  }
 0xb7c   :  { %24422 = vmatprep.subr.msk.mxu1 %vm614_vm0, %v20833_v32  ;;  %v25973_v42 = vld [vmem:[#allocation4 + $0x30] ss:$8 sps:$4 sm:$0xff]   ;;  %v25975_v45 = vld [vmem:[#allocation4 + $0x2] ss:$8 sps:$4 sm:$0xff]  }
 0xb7d   :  { %v25976_v16 = vld [vmem:[#allocation4 + $0x12] ss:$8 sps:$4 sm:$0xff]   ;;  %v25978_v51 = vld [vmem:[#allocation4 + $0x42] ss:$8 sps:$4 sm:$0xff]  }
 0xb7e   :  { %24412 = vmatmul.mubr.msk.f32.gmra.mrb[66].mxu1 %vm116_vm1, %v25970_v1  ;;  %v25977_v50 = vld [vmem:[#allocation4 + $0x32] ss:$8 sps:$4 sm:$0xff]   ;;  %v25992_v58 = vld [vmem:[#allocation4 + $0x20] ss:$8 sps:$4 sm:$0xff]  }
 0xb7f   :  { %24416 = vmatprep.mubr.msk.f32.mxu1 %vm116_vm1, %v25971_v39  ;;  %v25979_v52 = vld [vmem:[#allocation4 + $0x8] ss:$8 sps:$4 sm:$0xff]   ;;  %v25980_v17 = vld [vmem:[#allocation4 + $0x18] ss:$8 sps:$4 sm:$0xff]   ;;  %s21083_s29 = sshll.u32 %s30652_s25, 6 }
 0xb80   :  { %v25981_v43 = vld [vmem:[#allocation4 + $0x38] ss:$8 sps:$4 sm:$0xff]   ;;  %v25982_v59 = vld [vmem:[#allocation4 + $0x48] ss:$8 sps:$4 sm:$0xff]   ;;  %s14010_s30 = sadd.s32 %s21083_s29, %s20820_s28 }
 0xb81   :  { %v25983_v57 = vld [vmem:[#allocation4 + $0x9] ss:$8 sps:$4 sm:$0xff]   ;;  %v25984_v60 = vld [vmem:[#allocation4 + $0x19] ss:$8 sps:$4 sm:$0xff]   ;;  %s14011_s18 = scalar_lea.vmem %s31028_s13, %s14010_s30 }
 0xb82   :  { %24417 = vmatmul.mubr.msk.f32.vlgmr.msra.gmra.mrb[64].mxu1 %vm116_vm1, %v25972_v41  ;;  %v25985_v56 = vld [vmem:[#allocation4 + $0x39] ss:$8 sps:$4 sm:$0xff]   ;;  %v25986_v61 = vld [vmem:[#allocation4 + $0x49] ss:$8 sps:$4 sm:$0xff]  }
 0xb83   :  { %24423 = vmatpush3.msk.msra.mxu1 %vm614_vm0, %v20833_v32  ;;  %24419 = vmatprep.mubr.msk.f32.mxu1 %vm116_vm1, %v25973_v42  ;;  %v25987_v53 = vld [vmem:[#allocation4 + $0xa] ss:$8 sps:$4 sm:$0xff]   ;;  %v25988_v44 = vld [vmem:[#allocation4 + $0x1a] ss:$8 sps:$4 sm:$0xff]  }
 0xb84   :  { %24430 = vmatprep.subr.msk.mxu1 %vm614_vm0, %v20839_v40  ;;  %v25989_v30 = vld [vmem:[#allocation4 + $0x3a] ss:$8 sps:$4 sm:$0xff]   ;;  %v25990_v54 = vld [vmem:[#allocation4 + $0x4a] ss:$8 sps:$4 sm:$0xff]  }
 0xb85   :  { %v25991_v55 = vld [vmem:[#allocation4 + $0x10] ss:$8 sps:$4 sm:$0xff]   ;;  %v25993_v62 = vld [vmem:[#allocation4 + $0x40] ss:$8 sps:$4 sm:$0xff]  }
 0xb86   :  { %24420 = vmatmul.mubr.msk.f32.gmra.mrb[66].mxu1 %vm116_vm1, %v25974_v29  ;;  %v25994_v36 = vld [vmem:[#allocation4 + $0x50] ss:$8 sps:$4 sm:$0xff]   ;;  %v25996_v4 = vld [vmem:[#allocation4 + $0x21] ss:$8 sps:$4 sm:$0xff]  }
 0xb87   :  { %24424 = vmatprep.mubr.msk.f32.mxu1 %vm116_vm1, %v25975_v45  ;;  %v25995_v3 = vld [vmem:[#allocation4 + $0x11] ss:$8 sps:$4 sm:$0xff]   ;;  %v25997_v5 = vld [vmem:[#allocation4 + $0x41] ss:$8 sps:$4 sm:$0xff]  }
 0xb88   :  { %v25998_v35 = vld [vmem:[#allocation4 + $0x51] ss:$8 sps:$4 sm:$0xff]   ;;  %v26000_v0 = vld [vmem:[#allocation4 + $0x22] ss:$8 sps:$4 sm:$0xff]  }
 0xb89   :  { %v25999_v63 = vld [vmem:[#allocation4 + $0x12] ss:$8 sps:$4 sm:$0xff]   ;;  %v26001_v11 = vld [vmem:[#allocation4 + $0x42] ss:$8 sps:$4 sm:$0xff]  }
 0xb8a   :  { %24425 = vmatmul.mubr.msk.f32.vlgmr.msra.gmra.mrb[64].mxu1 %vm116_vm1, %v25976_v16  ;;  %v20880_v48 = vld [vmem:[%s31024_s9 + $0x13] sm:$0x7]  ;;  %v26003_v9 = vld [vmem:[#allocation4 + $0x60] ss:$8 sps:$4 sm:$0xff]  }
 0xb8b   :  { %24431 = vmatpush3.msk.msra.mxu1 %vm614_vm0, %v20839_v40  ;;  %24427 = vmatprep.mubr.msk.f32.mxu1 %vm116_vm1, %v25977_v50  ;;  %v26002_v7 = vld [vmem:[#allocation4 + $0x52] ss:$8 sps:$4 sm:$0xff]   ;;  %v20886_v49 = vld [vmem:[%s31024_s9 + $0x23] sm:$0x7] }
 0xb8c   :  { %24438 = vmatprep.subr.msk.mxu1 %vm614_vm0, %v20845_v47  ;;  %v26004_v8 = vld [vmem:[#allocation4 + $0x70] ss:$8 sps:$4 sm:$0xff]   ;;  %v26006_v14 = vld [vmem:[#allocation4 + $0xa0] ss:$8 sps:$4 sm:$0xff]  }
 0xb8d   :  { %v26005_v13 = vld [vmem:[#allocation4 + $0x90] ss:$8 sps:$4 sm:$0xff]   ;;  %v26007_v10 = vld [vmem:[#allocation4 + $0x61] ss:$8 sps:$4 sm:$0xff]  }
 0xb8e   :  { %24428 = vmatmul.mubr.msk.f32.gmra.mrb[66].mxu1 %vm116_vm1, %v25978_v51  ;;  %v13995_v12 = vld [vmem:[%s30530_s4 + $0x130] sm:$0xf]  ;;  %v26010_v33 = vld [vmem:[#allocation4 + $0xa1] ss:$8 sps:$4 sm:$0xff]  }
 0xb8f   :  { %24432 = vmatprep.mubr.msk.f32.mxu1 %vm116_vm1, %v25979_v52  ;;  %v20892_v19 = vld [vmem:[%s31024_s9 + $0x33] sm:$0x7]  ;;  %14004 = vst.msk [vmem:[#allocation4 + $0x111] sm:$0xf] %vm13948_vm6, %v13995_v12  ;;  %v26011_v23 = vld [vmem:[#allocation4 + $0x62] ss:$8 sps:$4 sm:$0xff]  }
 0xb90   :  { %v26008_v21 = vld [vmem:[#allocation4 + $0x71] ss:$8 sps:$4 sm:$0xff]   ;;  %v20898_v26 = vld [vmem:[%s31024_s9 + $0x43] sm:$0x7] }
 0xb91   :  { %v26009_v22 = vld [vmem:[#allocation4 + $0x91] ss:$8 sps:$4 sm:$0xff]   ;;  %v26014_v27 = vld [vmem:[#allocation4 + $0xa2] ss:$8 sps:$4 sm:$0xff]  }
 0xb92   :  { %24433 = vmatmul.mubr.msk.f32.vlgmr.msra.gmra.mrb[64].mxu1 %vm116_vm1, %v25980_v17  ;;  %v26012_v24 = vld [vmem:[#allocation4 + $0x72] ss:$8 sps:$4 sm:$0xff]   ;;  %v14012_v37 = vld [vmem:[%s14011_s18] sm:$0xf] }
 0xb93   :  { %24439 = vmatpush3.msk.msra.mxu1 %vm614_vm0, %v20845_v47  ;;  %24435 = vmatprep.mubr.msk.f32.mxu1 %vm116_vm1, %v25981_v43  ;;  %v26013_v25 = vld [vmem:[#allocation4 + $0x92] ss:$8 sps:$4 sm:$0xff]   ;;  %14021 = vst.msk [vmem:[#allocation4 + $0x129] sm:$0xf] %vm13948_vm6, %v14012_v37  ;;  %v14014_v39 = vld [vmem:[%s14011_s18 + $0x20] sm:$0xf] }
 0xb94   :  { %24446 = vmatprep.subr.msk.mxu1 %vm614_vm0, %v20851_v15  ;;  %v26015_v38 = vld [vmem:[#allocation4 + $0x68] ss:$8 sps:$4 sm:$0xff]   ;;  %v26016_v28 = vld [vmem:[#allocation4 + $0x78] ss:$8 sps:$4 sm:$0xff]   ;;  %14023 = vst.msk [vmem:[#allocation4 + $0x139] sm:$0xf] %vm13948_vm6, %v14014_v39 }
 0xb95   :  { %v20904_v31 = vld [vmem:[%s31024_s9 + $0x53] sm:$0x7]  ;;  %v26017_v32 = vld [vmem:[#allocation4 + $0x98] ss:$8 sps:$4 sm:$0xff]  }
 0xb96   :  { %24436 = vmatmul.mubr.msk.f32.gmra.mrb[66].mxu1 %vm116_vm1, %v25982_v59  ;;  %v26018_v34 = vld [vmem:[#allocation4 + $0xa8] ss:$8 sps:$4 sm:$0xff]   ;;  %v14016_v40 = vld [vmem:[%s14011_s18 + $0x100] sm:$0xf] }
 0xb97   :  { %24440 = vmatprep.mubr.msk.f32.mxu1 %vm116_vm1, %v25983_v57  ;;  %v14013_v1 = vld [vmem:[%s14011_s18 + $0x10] sm:$0xf]  ;;  %14025 = vst.msk [vmem:[#allocation4 + $0x159] sm:$0xf] %vm13948_vm6, %v14016_v40  ;;  %v14018_v29 = vld [vmem:[%s14011_s18 + $0x120] sm:$0xf] }
 0xb98   :  { %14022 = vst.msk [vmem:[#allocation4 + $0x131] sm:$0xf] %vm13948_vm6, %v14013_v1  ;;  %v14017_v41 = vld [vmem:[%s14011_s18 + $0x110] sm:$0xf]  ;;  %14027 = vst.msk [vmem:[#allocation4 + $0x169] sm:$0xf] %vm13948_vm6, %v14018_v29 }
 0xb99   :  { %v26019_v42 = vld [vmem:[#allocation4 + $0x69] ss:$8 sps:$4 sm:$0xff]   ;;  %14026 = vst.msk [vmem:[#allocation4 + $0x161] sm:$0xf] %vm13948_vm6, %v14017_v41  ;;  %v26020_v16 = vld [vmem:[#allocation4 + $0x79] ss:$8 sps:$4 sm:$0xff]  }
 0xb9a   :  { %24441 = vmatmul.mubr.msk.f32.vlgmr.msra.gmra.mrb[64].mxu1 %vm116_vm1, %v25984_v60  ;;  %v14015_v45 = vld [vmem:[%s14011_s18 + $0x30] sm:$0xf]  ;;  %v26021_v50 = vld [vmem:[#allocation4 + $0x99] ss:$8 sps:$4 sm:$0xff]   ;;  %v20975_v41 = vld [vmem:[%s31024_s9 + $0x86] sm:$0x7] }
 0xb9b   :  { %24447 = vmatpush3.msk.msra.mxu1 %vm614_vm0, %v20851_v15  ;;  %24443 = vmatprep.mubr.msk.f32.mxu1 %vm116_vm1, %v25985_v56  ;;  %14024 = vst.msk [vmem:[#allocation4 + $0x141] sm:$0xf] %vm13948_vm6, %v14015_v45  ;;  %v14019_v47 = vld [vmem:[%s14011_s18 + $0x130] sm:$0xf]  ;;  %v20910_v51 = vld [vmem:[%s31024_s9 + $0x63] sm:$0x7] }
 0xb9c   :  { %24454 = vmatprep.subr.msk.mxu1 %vm614_vm0, %v20857_v20  ;;  %14028 = vst.msk [vmem:[#allocation4 + $0x171] sm:$0xf] %vm13948_vm6, %v14019_v47  ;;  %v26022_v52 = vld [vmem:[#allocation4 + $0xa9] ss:$8 sps:$4 sm:$0xff]   ;;  %v26024_v15 = vld [vmem:[#allocation4 + $0x7a] ss:$8 sps:$4 sm:$0xff]  }
 0xb9d   :  { %v26023_v17 = vld [vmem:[#allocation4 + $0x6a] ss:$8 sps:$4 sm:$0xff]   ;;  %v26025_v59 = vld [vmem:[#allocation4 + $0x9a] ss:$8 sps:$4 sm:$0xff]  }
 0xb9e   :  { %24444 = vmatmul.mubr.msk.f32.gmra.mrb[66].mxu1 %vm116_vm1, %v25986_v61  ;;  %v20916_v43 = vld [vmem:[%s31024_s9 + $0x73] sm:$0x7]  ;;  %v26028_v60 = vld [vmem:[#allocation4 + $0x80] ss:$8 sps:$4 sm:$0xff]  }
 0xb9f   :  { %24448 = vmatprep.mubr.msk.f32.mxu1 %vm116_vm1, %v25987_v53  ;;  %v26026_v57 = vld [vmem:[#allocation4 + $0xaa] ss:$8 sps:$4 sm:$0xff]   ;;  %v20922_v61 = vld [vmem:[%s31024_s9 + $0x83] sm:$0x7] }
 0xba0   :  { %v26029_v56 = vld [vmem:[#allocation4 + $0xa0] ss:$8 sps:$4 sm:$0xff]   ;;  %v26030_v53 = vld [vmem:[#allocation4 + $0xb0] ss:$8 sps:$4 sm:$0xff]  }
 0xba1   :  { %v26050_v12 = vld [vmem:[#allocation4 + $0x102] ss:$8 sps:$4 sm:$0xff]   ;;  %v26063_v1 = vld [vmem:[#allocation4 + $0xd0] ss:$8 sps:$4 sm:$0xff]  }
 0xba2   :  { %24449 = vmatmul.mubr.msk.f32.vlgmr.msra.gmra.mrb[64].mxu1 %vm116_vm1, %v25988_v44  ;;  %v26032_v44 = vld [vmem:[#allocation4 + $0x81] ss:$8 sps:$4 sm:$0xff]   ;;  %v26067_v29 = vld [vmem:[#allocation4 + $0xd1] ss:$8 sps:$4 sm:$0xff]  }
 0xba3   :  { %24455 = vmatpush3.msk.msra.mxu1 %vm614_vm0, %v20857_v20  ;;  %24451 = vmatprep.mubr.msk.f32.mxu1 %vm116_vm1, %v25989_v30  ;;  %v26027_v20 = vld [vmem:[#allocation4 + $0x70] ss:$8 sps:$4 sm:$0xff]   ;;  %v26033_v30 = vld [vmem:[#allocation4 + $0xa1] ss:$8 sps:$4 sm:$0xff]  }
 0xba4   :  { %24462 = vmatprep.subr.msk.mxu1 %vm614_vm0, %v20863_v46  ;;  %v26062_v37 = vld [vmem:[#allocation4 + $0x10a] ss:$8 sps:$4 sm:$0xff]  }
 0xba5   :  { %v26064_v39 = vld [vmem:[#allocation4 + $0xe0] ss:$8 sps:$4 sm:$0xff]  }
 0xba6   :  { %24452 = vmatmul.mubr.msk.f32.gmra.mrb[66].mxu1 %vm116_vm1, %v25990_v54  ;;  %v16219_v54 = vld [vmem:[%s31024_s9 + $0x6] sm:$0x7]  ;;  %v26068_v45 = vld [vmem:[#allocation4 + $0xe1] ss:$8 sps:$4 sm:$0xff]  }
 0xba7   :  { %24456 = vmatprep.mubr.msk.f32.mxu1 %vm116_vm1, %v25991_v55  ;;  %v26034_v55 = vld [vmem:[#allocation4 + $0xb1] ss:$8 sps:$4 sm:$0xff]   ;;  %v26065_v40 = vld [vmem:[#allocation4 + $0x100] ss:$8 sps:$4 sm:$0xff]  }
 0xba8   :  { %v26069_v47 = vld [vmem:[#allocation4 + $0x101] ss:$8 sps:$4 sm:$0xff]  }
 0xbaa   :  { %24457 = vmatmul.mubr.msk.f32.vlgmr.msra.gmra.mrb[64].mxu1 %vm116_vm1, %v25992_v58  ;;  %v26036_v58 = vld [vmem:[#allocation4 + $0x82] ss:$8 sps:$4 sm:$0xff]  }
 0xbab   :  { %24463 = vmatpush3.msk.msra.mxu1 %vm614_vm0, %v20863_v46  ;;  %24459 = vmatprep.mubr.msk.f32.mxu1 %vm116_vm1, %v25993_v62  ;;  %v26031_v46 = vld [vmem:[#allocation4 + $0x71] ss:$8 sps:$4 sm:$0xff]   ;;  %v26037_v62 = vld [vmem:[#allocation4 + $0xa2] ss:$8 sps:$4 sm:$0xff]  }
 0xbac   :  { %24470 = vmatprep.subr.msk.mxu1 %vm614_vm0, %v20869_v18 }
 0xbae   :  { %24460 = vmatmul.mubr.msk.f32.gmra.mrb[66].mxu1 %vm116_vm1, %v25994_v36  ;;  %v20933_v36 = vld [vmem:[%s31024_s9 + $0x16] sm:$0x7] }
 0xbaf   :  { %24464 = vmatprep.mubr.msk.f32.mxu1 %vm116_vm1, %v25995_v3  ;;  %v26038_v3 = vld [vmem:[#allocation4 + $0xb2] ss:$8 sps:$4 sm:$0xff]  }
 0xbb2   :  { %24465 = vmatmul.mubr.msk.f32.vlgmr.msra.gmra.mrb[64].mxu1 %vm116_vm1, %v25996_v4  ;;  %v26039_v4 = vld [vmem:[#allocation4 + $0xc0] ss:$8 sps:$4 sm:$0xff]  }
 0xbb3   :  { %24471 = vmatpush3.msk.msra.mxu1 %vm614_vm0, %v20869_v18  ;;  %24467 = vmatprep.mubr.msk.f32.mxu1 %vm116_vm1, %v25997_v5  ;;  %v26035_v18 = vld [vmem:[#allocation4 + $0x72] ss:$8 sps:$4 sm:$0xff]  }
 0xbb4   :  { %24478 = vmatprep.subr.msk.mxu1 %vm614_vm0, %v15128_v2  ;;  %v26040_v5 = vld [vmem:[#allocation4 + $0xd0] ss:$8 sps:$4 sm:$0xff]  }
 0xbb6   :  { %24468 = vmatmul.mubr.msk.f32.gmra.mrb[66].mxu1 %vm116_vm1, %v25998_v35  ;;  %v20939_v35 = vld [vmem:[%s31024_s9 + $0x26] sm:$0x7] }
 0xbb7   :  { %24472 = vmatprep.mubr.msk.f32.mxu1 %vm116_vm1, %v25999_v63  ;;  %v26042_v63 = vld [vmem:[#allocation4 + $0x100] ss:$8 sps:$4 sm:$0xff]  }
 0xbba   :  { %24473 = vmatmul.mubr.msk.f32.vlgmr.msra.gmra.mrb[64].mxu1 %vm116_vm1, %v26000_v0  ;;  %v26043_v0 = vld [vmem:[#allocation4 + $0xc1] ss:$8 sps:$4 sm:$0xff]  }
 0xbbb   :  { %24479 = vmatpush3.msk.msra.mxu1 %vm614_vm0, %v15128_v2  ;;  %24475 = vmatprep.mubr.msk.f32.mxu1 %vm116_vm1, %v26001_v11  ;;  %v26041_v2 = vld [vmem:[#allocation4 + $0xf0] ss:$8 sps:$4 sm:$0xff]  }
 0xbbc   :  { %24486 = vmatprep.subr.msk.mxu1 %vm614_vm0, %v20880_v48  ;;  %v26045_v11 = vld [vmem:[#allocation4 + $0xf1] ss:$8 sps:$4 sm:$0xff]  }
 0xbbe   :  { %24476 = vmatmul.mubr.msk.f32.gmra.mrb[66].mxu1 %vm116_vm1, %v26002_v7  ;;  %v20945_v7 = vld [vmem:[%s31024_s9 + $0x36] sm:$0x7] }
 0xbbf   :  { %24480 = vmatprep.mubr.msk.f32.mxu1 %vm116_vm1, %v26003_v9  ;;  %v26046_v9 = vld [vmem:[#allocation4 + $0x101] ss:$8 sps:$4 sm:$0xff]  }
 0xbc2   :  { %24481 = vmatmul.mubr.msk.f32.vlgmr.msra.gmra.mrb[64].mxu1 %vm116_vm1, %v26004_v8  ;;  %v21035_v8 = vld [vmem:[%s31026_s11 + $0x8] sm:$0xff] }
 0xbc3   :  { %24487 = vmatpush3.msk.msra.mxu1 %vm614_vm0, %v20880_v48  ;;  %24483 = vmatprep.mubr.msk.f32.mxu1 %vm116_vm1, %v26005_v13  ;;  %v26044_v48 = vld [vmem:[#allocation4 + $0xd1] ss:$8 sps:$4 sm:$0xff]  }
 0xbc4   :  { %24494 = vmatprep.subr.msk.mxu1 %vm614_vm0, %v20886_v49  ;;  %24694 = vmatprep.subr.mxu0 %v21035_v8  ;;  %v26048_v13 = vld [vmem:[#allocation4 + $0xd2] ss:$8 sps:$4 sm:$0xff]  }
 0xbc5   :  { %24695 = vmatpush3.msra.mxu0 %v21035_v8  ;;  %v21022_v8 = vld [vmem:[%s31024_s9 + $0x79] sm:$0x7] }
 0xbc6   :  { %24484 = vmatmul.mubr.msk.f32.gmra.mrb[66].mxu1 %vm116_vm1, %v26006_v14  ;;  %v26049_v14 = vld [vmem:[#allocation4 + $0xf2] ss:$8 sps:$4 sm:$0xff]  }
 0xbc7   :  { %24488 = vmatprep.mubr.msk.f32.mxu1 %vm116_vm1, %v26007_v10  ;;  %v20951_v10 = vld [vmem:[%s31024_s9 + $0x46] sm:$0x7] }
 0xbca   :  { %24489 = vmatmul.mubr.msk.f32.vlgmr.msra.gmra.mrb[64].mxu1 %vm116_vm1, %v26008_v21  ;;  %v26052_v21 = vld [vmem:[#allocation4 + $0xd8] ss:$8 sps:$4 sm:$0xff]  }
 0xbcb   :  { %24495 = vmatpush3.msk.msra.mxu1 %vm614_vm0, %v20886_v49  ;;  %24491 = vmatprep.mubr.msk.f32.mxu1 %vm116_vm1, %v26009_v22  ;;  %v26047_v49 = vld [vmem:[#allocation4 + $0xc2] ss:$8 sps:$4 sm:$0xff]  }
 0xbcc   :  { %24502 = vmatprep.subr.msk.mxu1 %vm614_vm0, %v20892_v19  ;;  %v26053_v22 = vld [vmem:[#allocation4 + $0xf8] ss:$8 sps:$4 sm:$0xff]  }
 0xbce   :  { %24492 = vmatmul.mubr.msk.f32.gmra.mrb[66].mxu1 %vm116_vm1, %v26010_v33  ;;  %v20957_v33 = vld [vmem:[%s31024_s9 + $0x56] sm:$0x7] }
 0xbcf   :  { %24496 = vmatprep.mubr.msk.f32.mxu1 %vm116_vm1, %v26011_v23  ;;  %v26054_v23 = vld [vmem:[#allocation4 + $0x108] ss:$8 sps:$4 sm:$0xff]  }
 0xbd2   :  { %24497 = vmatmul.mubr.msk.f32.vlgmr.msra.gmra.mrb[64].mxu1 %vm116_vm1, %v26012_v24  ;;  %v26055_v24 = vld [vmem:[#allocation4 + $0xc9] ss:$8 sps:$4 sm:$0xff]  }
 0xbd3   :  { %24503 = vmatpush3.msk.msra.mxu1 %vm614_vm0, %v20892_v19  ;;  %24499 = vmatprep.mubr.msk.f32.mxu1 %vm116_vm1, %v26013_v25  ;;  %v26051_v19 = vld [vmem:[#allocation4 + $0xc8] ss:$8 sps:$4 sm:$0xff]   ;;  %v26056_v25 = vld [vmem:[#allocation4 + $0xd9] ss:$8 sps:$4 sm:$0xff]  }
 0xbd4   :  { %24510 = vmatprep.subr.msk.mxu1 %vm614_vm0, %v20898_v26 }
 0xbd6   :  { %24500 = vmatmul.mubr.msk.f32.gmra.mrb[66].mxu1 %vm116_vm1, %v26014_v27  ;;  %v20963_v27 = vld [vmem:[%s31024_s9 + $0x66] sm:$0x7] }
 0xbd7   :  { %24504 = vmatprep.mubr.msk.f32.mxu1 %vm116_vm1, %v26015_v38  ;;  %v26058_v38 = vld [vmem:[#allocation4 + $0x109] ss:$8 sps:$4 sm:$0xff]  }
 0xbda   :  { %24505 = vmatmul.mubr.msk.f32.vlgmr.msra.gmra.mrb[64].mxu1 %vm116_vm1, %v26016_v28  ;;  %v26059_v28 = vld [vmem:[#allocation4 + $0xca] ss:$8 sps:$4 sm:$0xff]  }
 0xbdb   :  { %24511 = vmatpush3.msk.msra.mxu1 %vm614_vm0, %v20898_v26  ;;  %24507 = vmatprep.mubr.msk.f32.mxu1 %vm116_vm1, %v26017_v32  ;;  %v26057_v26 = vld [vmem:[#allocation4 + $0xf9] ss:$8 sps:$4 sm:$0xff]  }
 0xbdc   :  { %24518 = vmatprep.subr.msk.mxu1 %vm614_vm0, %v20904_v31  ;;  %v26061_v32 = vld [vmem:[#allocation4 + $0xfa] ss:$8 sps:$4 sm:$0xff]  }
 0xbde   :  { %24508 = vmatmul.mubr.msk.f32.gmra.mrb[66].mxu1 %vm116_vm1, %v26018_v34  ;;  %v20969_v34 = vld [vmem:[%s31024_s9 + $0x76] sm:$0x7] }
 0xbdf   :  { %24512 = vmatprep.mubr.msk.f32.mxu1 %vm116_vm1, %v26019_v42  ;;  %v26066_v42 = vld [vmem:[#allocation4 + $0x110] ss:$8 sps:$4 sm:$0xff]  }
 0xbe2   :  { %24513 = vmatmul.mubr.msk.f32.vlgmr.msra.gmra.mrb[64].mxu1 %vm116_vm1, %v26020_v16  ;;  %v17310_v16 = vld [vmem:[%s31024_s9 + $0x9] sm:$0x7] }
 0xbe3   :  { %24519 = vmatpush3.msk.msra.mxu1 %vm614_vm0, %v20904_v31  ;;  %24515 = vmatprep.mubr.msk.f32.mxu1 %vm116_vm1, %v26021_v50  ;;  %v26060_v31 = vld [vmem:[#allocation4 + $0xda] ss:$8 sps:$4 sm:$0xff]  }
 0xbe4   :  { %24526 = vmatprep.subr.msk.mxu1 %vm614_vm0, %v20910_v51  ;;  %v26070_v50 = vld [vmem:[#allocation4 + $0x111] ss:$8 sps:$4 sm:$0xff]  }
 0xbe6   :  { %24516 = vmatmul.mubr.msk.f32.gmra.mrb[66].mxu1 %vm116_vm1, %v26022_v52  ;;  %v26072_v52 = vld [vmem:[#allocation4 + $0xe2] ss:$8 sps:$4 sm:$0xff]  }
 0xbe7   :  { %24520 = vmatprep.mubr.msk.f32.mxu1 %vm116_vm1, %v26023_v17  ;;  %v26073_v17 = vld [vmem:[#allocation4 + $0x102] ss:$8 sps:$4 sm:$0xff]  }
 0xbea   :  { %24521 = vmatmul.mubr.msk.f32.vlgmr.msra.gmra.mrb[64].mxu1 %vm116_vm1, %v26024_v15  ;;  %v26074_v15 = vld [vmem:[#allocation4 + $0x112] ss:$8 sps:$4 sm:$0xff]  }
 0xbeb   :  { %24527 = vmatpush3.msk.msra.mxu1 %vm614_vm0, %v20910_v51  ;;  %24523 = vmatprep.mubr.msk.f32.mxu1 %vm116_vm1, %v26025_v59  ;;  %v26071_v51 = vld [vmem:[#allocation4 + $0xd2] ss:$8 sps:$4 sm:$0xff]   ;;  %v26075_v59 = vld [vmem:[#allocation4 + $0x120] ss:$8 sps:$4 sm:$0xff]  }
 0xbec   :  { %24534 = vmatprep.subr.msk.mxu1 %vm614_vm0, %v20916_v43 }
 0xbee   :  { %24524 = vmatmul.mubr.msk.f32.gmra.mrb[66].mxu1 %vm116_vm1, %v26026_v57  ;;  %v26076_v57 = vld [vmem:[#allocation4 + $0x130] ss:$8 sps:$4 sm:$0xff]  }
 0xbef   :  { %24528 = vmatprep.mubr.msk.f32.mxu1 %vm116_vm1, %v26027_v20  ;;  %v26077_v20 = vld [vmem:[#allocation4 + $0x150] ss:$8 sps:$4 sm:$0xff]  }
 0xbf2   :  { %24529 = vmatmul.mubr.msk.f32.vlgmr.msra.gmra.mrb[64].mxu1 %vm116_vm1, %v26028_v60  ;;  %v20992_v60 = vld [vmem:[%s31024_s9 + $0x29] sm:$0x7] }
 0xbf3   :  { %24535 = vmatpush3.msk.msra.mxu1 %vm614_vm0, %v20916_v43  ;;  %24531 = vmatprep.mubr.msk.f32.mxu1 %vm116_vm1, %v26029_v56  ;;  %v20986_v43 = vld [vmem:[%s31024_s9 + $0x19] sm:$0x7]  ;;  %v26078_v56 = vld [vmem:[#allocation4 + $0x160] ss:$8 sps:$4 sm:$0xff]  }
 0xbf4   :  { %24542 = vmatprep.subr.msk.mxu1 %vm614_vm0, %v20922_v61 }
 0xbf6   :  { %24532 = vmatmul.mubr.msk.f32.gmra.mrb[66].mxu1 %vm116_vm1, %v26030_v53  ;;  %v26080_v53 = vld [vmem:[#allocation4 + $0x131] ss:$8 sps:$4 sm:$0xff]  }
 0xbf7   :  { %24536 = vmatprep.mubr.msk.f32.mxu1 %vm116_vm1, %v26031_v46  ;;  %v26081_v46 = vld [vmem:[#allocation4 + $0x151] ss:$8 sps:$4 sm:$0xff]  }
 0xbfa   :  { %24537 = vmatmul.mubr.msk.f32.vlgmr.msra.gmra.mrb[64].mxu1 %vm116_vm1, %v26032_v44  ;;  %v20998_v44 = vld [vmem:[%s31024_s9 + $0x39] sm:$0x7] }
 0xbfb   :  { %24543 = vmatpush3.msk.msra.mxu1 %vm614_vm0, %v20922_v61  ;;  %24539 = vmatprep.mubr.msk.f32.mxu1 %vm116_vm1, %v26033_v30  ;;  %v26079_v61 = vld [vmem:[#allocation4 + $0x121] ss:$8 sps:$4 sm:$0xff]  }
 0xbfc   :  { %24550 = vmatprep.subr.msk.mxu1 %vm614_vm0, %v16219_v54  ;;  %v26082_v30 = vld [vmem:[#allocation4 + $0x161] ss:$8 sps:$4 sm:$0xff]  }
 0xbfe   :  { %24540 = vmatmul.mubr.msk.f32.gmra.mrb[66].mxu1 %vm116_vm1, %v26034_v55  ;;  %v26084_v55 = vld [vmem:[#allocation4 + $0x132] ss:$8 sps:$4 sm:$0xff]  }
 0xbff   :  { %24544 = vmatprep.mubr.msk.f32.mxu1 %vm116_vm1, %v26035_v18  ;;  %v26085_v18 = vld [vmem:[#allocation4 + $0x152] ss:$8 sps:$4 sm:$0xff]  }
 0xc02   :  { %24545 = vmatmul.mubr.msk.f32.vlgmr.msra.gmra.mrb[64].mxu1 %vm116_vm1, %v26036_v58  ;;  %v21004_v58 = vld [vmem:[%s31024_s9 + $0x49] sm:$0x7] }
 0xc03   :  { %24551 = vmatpush3.msk.msra.mxu1 %vm614_vm0, %v16219_v54  ;;  %24547 = vmatprep.mubr.msk.f32.mxu1 %vm116_vm1, %v26037_v62  ;;  %v26083_v54 = vld [vmem:[#allocation4 + $0x122] ss:$8 sps:$4 sm:$0xff]  }
 0xc04   :  { %24558 = vmatprep.subr.msk.mxu1 %vm614_vm0, %v20933_v36  ;;  %v26086_v62 = vld [vmem:[#allocation4 + $0x162] ss:$8 sps:$4 sm:$0xff]  }
 0xc06   :  { %24548 = vmatmul.mubr.msk.f32.gmra.mrb[66].mxu1 %vm116_vm1, %v26038_v3  ;;  %v26088_v3 = vld [vmem:[#allocation4 + $0x138] ss:$8 sps:$4 sm:$0xff]  }
 0xc07   :  { %24552 = vmatprep.mubr.msk.f32.mxu1 %vm116_vm1, %v26039_v4  ;;  %v26089_v4 = vld [vmem:[#allocation4 + $0x158] ss:$8 sps:$4 sm:$0xff]  }
 0xc0a   :  { %24553 = vmatmul.mubr.msk.f32.vlgmr.msra.gmra.mrb[64].mxu1 %vm116_vm1, %v26040_v5  ;;  %v21010_v5 = vld [vmem:[%s31024_s9 + $0x59] sm:$0x7] }
 0xc0b   :  { %24559 = vmatpush3.msk.msra.mxu1 %vm614_vm0, %v20933_v36  ;;  %24555 = vmatprep.mubr.msk.f32.mxu1 %vm116_vm1, %v26041_v2  ;;  %v26087_v36 = vld [vmem:[#allocation4 + $0x128] ss:$8 sps:$4 sm:$0xff]  }
 0xc0c   :  { %24566 = vmatprep.subr.msk.mxu1 %vm614_vm0, %v20939_v35  ;;  %v26090_v2 = vld [vmem:[#allocation4 + $0x168] ss:$8 sps:$4 sm:$0xff]  }
 0xc0e   :  { %24556 = vmatmul.mubr.msk.f32.gmra.mrb[66].mxu1 %vm116_vm1, %v26042_v63  ;;  %v26092_v63 = vld [vmem:[#allocation4 + $0x139] ss:$8 sps:$4 sm:$0xff]  }
 0xc0f   :  { %24560 = vmatprep.mubr.msk.f32.mxu1 %vm116_vm1, %v26043_v0  ;;  %v26093_v0 = vld [vmem:[#allocation4 + $0x159] ss:$8 sps:$4 sm:$0xff]  }
 0xc12   :  { %24561 = vmatmul.mubr.msk.f32.vlgmr.msra.gmra.mrb[64].mxu1 %vm116_vm1, %v26044_v48  ;;  %v21016_v48 = vld [vmem:[%s31024_s9 + $0x69] sm:$0x7] }
 0xc13   :  { %24567 = vmatpush3.msk.msra.mxu1 %vm614_vm0, %v20939_v35  ;;  %24563 = vmatprep.mubr.msk.f32.mxu1 %vm116_vm1, %v26045_v11  ;;  %v26091_v35 = vld [vmem:[#allocation4 + $0x129] ss:$8 sps:$4 sm:$0xff]  }
 0xc14   :  { %24574 = vmatprep.subr.msk.mxu1 %vm614_vm0, %v20945_v7  ;;  %v26094_v11 = vld [vmem:[#allocation4 + $0x169] ss:$8 sps:$4 sm:$0xff]  }
 0xc16   :  { %24564 = vmatmul.mubr.msk.f32.gmra.mrb[66].mxu1 %vm116_vm1, %v26046_v9  ;;  %v26096_v9 = vld [vmem:[#allocation4 + $0x13a] ss:$8 sps:$4 sm:$0xff]  }
 0xc17   :  { %24568 = vmatprep.mubr.msk.f32.mxu1 %vm116_vm1, %v26047_v49  ;;  %v26097_v49 = vld [vmem:[#allocation4 + $0x15a] ss:$8 sps:$4 sm:$0xff]  }
 0xc1a   :  { %24569 = vmatmul.mubr.msk.f32.vlgmr.msra.gmra.mrb[64].mxu1 %vm116_vm1, %v26048_v13  ;;  %v26098_v13 = vld [vmem:[#allocation4 + $0x16a] ss:$8 sps:$4 sm:$0xff]  }
 0xc1b   :  { %24575 = vmatpush3.msk.msra.mxu1 %vm614_vm0, %v20945_v7  ;;  %24571 = vmatprep.mubr.msk.f32.mxu1 %vm116_vm1, %v26049_v14  ;;  %v26095_v7 = vld [vmem:[#allocation4 + $0x12a] ss:$8 sps:$4 sm:$0xff]  }
 0xc1c   :  { %24582 = vmatprep.subr.msk.mxu1 %vm614_vm0, %v20951_v10  ;;  %v26099_v14 = vld [vmem:[#allocation4 + $0x130] ss:$8 sps:$4 sm:$0xff]  }
 0xc1e   :  { %24572 = vmatmul.mubr.msk.f32.gmra.mrb[66].mxu1 %vm116_vm1, %v26050_v12  ;;  %v26101_v12 = vld [vmem:[#allocation4 + $0x160] ss:$8 sps:$4 sm:$0xff]  }
 0xc1f   :  { %24576 = vmatprep.mubr.msk.f32.mxu1 %vm116_vm1, %v26051_v19  ;;  %v21028_v19 = vld [vmem:[%s31024_s9 + $0x89] sm:$0x7] }
 0xc22   :  { %24577 = vmatmul.mubr.msk.f32.vlgmr.msra.gmra.mrb[64].mxu1 %vm116_vm1, %v26052_v21  ;;  %v26102_v21 = vld [vmem:[#allocation4 + $0x170] ss:$8 sps:$4 sm:$0xff]  }
 0xc23   :  { %24583 = vmatpush3.msk.msra.mxu1 %vm614_vm0, %v20951_v10  ;;  %24579 = vmatprep.mubr.msk.f32.mxu1 %vm116_vm1, %v26053_v22  ;;  %v26100_v10 = vld [vmem:[#allocation4 + $0x140] ss:$8 sps:$4 sm:$0xff]   ;;  %v26103_v22 = vld [vmem:[#allocation4 + $0x131] ss:$8 sps:$4 sm:$0xff]  }
 0xc24   :  { %24590 = vmatprep.subr.msk.mxu1 %vm614_vm0, %v20957_v33 }
 0xc26   :  { %24580 = vmatmul.mubr.msk.f32.gmra.mrb[66].mxu1 %vm116_vm1, %v26054_v23  ;;  %v26105_v23 = vld [vmem:[#allocation4 + $0x161] ss:$8 sps:$4 sm:$0xff]  }
 0xc27   :  { %24584 = vmatprep.mubr.msk.f32.mxu1 %vm116_vm1, %v26055_v24  ;;  %v26106_v24 = vld [vmem:[#allocation4 + $0x171] ss:$8 sps:$4 sm:$0xff]  }
 0xc2a   :  { %24585 = vmatmul.mubr.msk.f32.vlgmr.msra.gmra.mrb[64].mxu1 %vm116_vm1, %v26056_v25  ;;  %v26107_v25 = vld [vmem:[#allocation4 + $0x132] ss:$8 sps:$4 sm:$0xff]  }
 0xc2b   :  { %24591 = vmatpush3.msk.msra.mxu1 %vm614_vm0, %v20957_v33  ;;  %24587 = vmatprep.mubr.msk.f32.mxu1 %vm116_vm1, %v26057_v26  ;;  %v26104_v33 = vld [vmem:[#allocation4 + $0x141] ss:$8 sps:$4 sm:$0xff]  }
 0xc2c   :  { %24598 = vmatprep.subr.msk.mxu1 %vm614_vm0, %v20963_v27  ;;  %v26108_v26 = vld [vmem:[#allocation4 + $0x142] ss:$8 sps:$4 sm:$0xff]  }
 0xc2e   :  { %24588 = vmatmul.mubr.msk.f32.gmra.mrb[66].mxu1 %vm116_vm1, %v26058_v38  ;;  %v26110_v38 = vld [vmem:[#allocation4 + $0x172] ss:$8 sps:$4 sm:$0xff]  }
 0xc2f   :  { %24592 = vmatprep.mubr.msk.f32.mxu1 %vm116_vm1, %v26059_v28  ;;  %v18450_v28 = vld [vmem:[%s31026_s11] sm:$0xff] }
 0xc30   :  { %24702 = vmatprep.subr.mxu0 %v18450_v28 }
 0xc32   :  { %24593 = vmatmul.mubr.msk.f32.vlgmr.msra.gmra.mrb[64].mxu1 %vm116_vm1, %v26060_v31  ;;  %v21034_v31 = vld [vmem:[%s31025_s10] ss:$0 sm:$0xff] }
 0xc33   :  { %24599 = vmatpush3.msk.msra.mxu1 %vm614_vm0, %v20963_v27  ;;  %24595 = vmatprep.mubr.msk.f32.mxu1 %vm116_vm1, %v26061_v32  ;;  %v26109_v27 = vld [vmem:[#allocation4 + $0x162] ss:$8 sps:$4 sm:$0xff]  }
 0xc34   :  { %24606 = vmatprep.subr.msk.mxu1 %vm614_vm0, %v20969_v34 }
 0xc36   :  { %24596 = vmatmul.mubr.msk.f32.gmra.mrb[66].mxu1 %vm116_vm1, %v26062_v37 }
 0xc37   :  { %24600 = vmatprep.mubr.msk.f32.mxu1 %vm116_vm1, %v26063_v1 }
 0xc3a   :  { %24601 = vmatmul.mubr.msk.f32.vlgmr.msra.gmra.mrb[64].mxu1 %vm116_vm1, %v26064_v39 }
 0xc3b   :  { %24607 = vmatpush3.msk.msra.mxu1 %vm614_vm0, %v20969_v34  ;;  %24603 = vmatprep.mubr.msk.f32.mxu1 %vm116_vm1, %v26065_v40 }
 0xc3c   :  { %24614 = vmatprep.subr.msk.mxu1 %vm614_vm0, %v20975_v41 }
 0xc3e   :  { %24604 = vmatmul.mubr.msk.f32.gmra.mrb[66].mxu1 %vm116_vm1, %v26066_v42 }
 0xc3f   :  { %24608 = vmatprep.mubr.msk.f32.mxu1 %vm116_vm1, %v26067_v29 }
 0xc42   :  { %24609 = vmatmul.mubr.msk.f32.vlgmr.msra.gmra.mrb[64].mxu1 %vm116_vm1, %v26068_v45 }
 0xc43   :  { %24615 = vmatpush3.msk.msra.mxu1 %vm614_vm0, %v20975_v41  ;;  %24611 = vmatprep.mubr.msk.f32.mxu1 %vm116_vm1, %v26069_v47 }
 0xc44   :  { %24622 = vmatprep.subr.msk.mxu1 %vm614_vm0, %v17310_v16 }
 0xc46   :  { %24612 = vmatmul.mubr.msk.f32.gmra.mrb[66].mxu1 %vm116_vm1, %v26070_v50 }
 0xc47   :  { %24616 = vmatprep.mubr.msk.f32.mxu1 %vm116_vm1, %v26071_v51 }
 0xc4a   :  { %24617 = vmatmul.mubr.msk.f32.vlgmr.msra.gmra.mrb[64].mxu1 %vm116_vm1, %v26072_v52 }
 0xc4b   :  { %24623 = vmatpush3.msk.msra.mxu1 %vm614_vm0, %v17310_v16  ;;  %24619 = vmatprep.mubr.msk.f32.mxu1 %vm116_vm1, %v26073_v17 }
 0xc4c   :  { %24630 = vmatprep.subr.msk.mxu1 %vm614_vm0, %v20986_v43 }
 0xc4e   :  { %24620 = vmatmul.mubr.msk.f32.gmra.mrb[66].mxu1 %vm116_vm1, %v26074_v15  ;;  %v21044_v15 = vld [vmem:[%s31026_s11 + $0x10] sm:$0xff] }
 0xc4f   :  { %24624 = vmatprep.mubr.msk.f32.mxu1 %vm116_vm1, %v26075_v59 }
 0xc52   :  { %24625 = vmatmul.mubr.msk.f32.vlgmr.msra.gmra.mrb[64].mxu1 %vm116_vm1, %v26076_v57 }
 0xc53   :  { %24631 = vmatpush3.msk.msra.mxu1 %vm614_vm0, %v20986_v43  ;;  %24627 = vmatprep.mubr.msk.f32.mxu1 %vm116_vm1, %v26077_v20 }
 0xc54   :  { %24638 = vmatprep.subr.msk.mxu1 %vm614_vm0, %v20992_v60 }
 0xc56   :  { %24628 = vmatmul.mubr.msk.f32.gmra.mrb[66].mxu1 %vm116_vm1, %v26078_v56 }
 0xc57   :  { %24632 = vmatprep.mubr.msk.f32.mxu1 %vm116_vm1, %v26079_v61 }
 0xc5a   :  { %24633 = vmatmul.mubr.msk.f32.vlgmr.msra.gmra.mrb[64].mxu1 %vm116_vm1, %v26080_v53 }
 0xc5b   :  { %24639 = vmatpush3.msk.msra.mxu1 %vm614_vm0, %v20992_v60  ;;  %24635 = vmatprep.mubr.msk.f32.mxu1 %vm116_vm1, %v26081_v46  ;;  %v21049_v60 = vld [vmem:[%s31026_s11 + $0x18] sm:$0xff] }
 0xc5c   :  { %24646 = vmatprep.subr.msk.mxu1 %vm614_vm0, %v20998_v44 }
 0xc5e   :  { %24636 = vmatmul.mubr.msk.f32.gmra.mrb[66].mxu1 %vm116_vm1, %v26082_v30 }
 0xc5f   :  { %24640 = vmatprep.mubr.msk.f32.mxu1 %vm116_vm1, %v26083_v54 }
 0xc62   :  { %24641 = vmatmul.mubr.msk.f32.vlgmr.msra.gmra.mrb[64].mxu1 %vm116_vm1, %v26084_v55 }
 0xc63   :  { %24647 = vmatpush3.msk.msra.mxu1 %vm614_vm0, %v20998_v44  ;;  %24643 = vmatprep.mubr.msk.f32.mxu1 %vm116_vm1, %v26085_v18  ;;  %v21054_v44 = vld [vmem:[%s31026_s11 + $0x20] sm:$0xff] }
 0xc64   :  { %24654 = vmatprep.subr.msk.mxu1 %vm614_vm0, %v21004_v58 }
 0xc66   :  { %24644 = vmatmul.mubr.msk.f32.gmra.mrb[66].mxu1 %vm116_vm1, %v26086_v62 }
 0xc67   :  { %24648 = vmatprep.mubr.msk.f32.mxu1 %vm116_vm1, %v26087_v36 }
 0xc6a   :  { %24649 = vmatmul.mubr.msk.f32.vlgmr.msra.gmra.mrb[64].mxu1 %vm116_vm1, %v26088_v3 }
 0xc6b   :  { %24655 = vmatpush3.msk.msra.mxu1 %vm614_vm0, %v21004_v58  ;;  %24651 = vmatprep.mubr.msk.f32.mxu1 %vm116_vm1, %v26089_v4  ;;  %v21059_v58 = vld [vmem:[%s31026_s11 + $0x28] sm:$0xff] }
 0xc6c   :  { %24662 = vmatprep.subr.msk.mxu1 %vm614_vm0, %v21010_v5 }
 0xc6e   :  { %24652 = vmatmul.mubr.msk.f32.gmra.mrb[66].mxu1 %vm116_vm1, %v26090_v2 }
 0xc6f   :  { %24656 = vmatprep.mubr.msk.f32.mxu1 %vm116_vm1, %v26091_v35  ;;  %v21064_v35 = vld [vmem:[%s31026_s11 + $0x30] sm:$0xff] }
 0xc72   :  { %24657 = vmatmul.mubr.msk.f32.vlgmr.msra.gmra.mrb[64].mxu1 %vm116_vm1, %v26092_v63 }
 0xc73   :  { %24663 = vmatpush3.msk.msra.mxu1 %vm614_vm0, %v21010_v5  ;;  %24659 = vmatprep.mubr.msk.f32.mxu1 %vm116_vm1, %v26093_v0 }
 0xc74   :  { %24670 = vmatprep.subr.msk.mxu1 %vm614_vm0, %v21016_v48 }
 0xc76   :  { %24660 = vmatmul.mubr.msk.f32.gmra.mrb[66].mxu1 %vm116_vm1, %v26094_v11 }
 0xc77   :  { %24664 = vmatprep.mubr.msk.f32.mxu1 %vm116_vm1, %v26095_v7  ;;  %v21069_v7 = vld [vmem:[%s31026_s11 + $0x38] sm:$0xff] }
 0xc7a   :  { %24665 = vmatmul.mubr.msk.f32.vlgmr.msra.gmra.mrb[64].mxu1 %vm116_vm1, %v26096_v9 }
 0xc7b   :  { %24671 = vmatpush3.msk.msra.mxu1 %vm614_vm0, %v21016_v48  ;;  %24667 = vmatprep.mubr.msk.f32.mxu1 %vm116_vm1, %v26097_v49 }
 0xc7c   :  { %24678 = vmatprep.subr.msk.mxu1 %vm614_vm0, %v21022_v8 }
 0xc7e   :  { %24668 = vmatmul.mubr.msk.f32.gmra.mrb[66].mxu1 %vm116_vm1, %v26098_v13 }
 0xc7f   :  { %24672 = vmatprep.mubr.msk.f32.mxu1 %vm116_vm1, %v26099_v14  ;;  %v21074_v14 = vld [vmem:[%s31026_s11 + $0x40] sm:$0xff] }
 0xc82   :  { %24673 = vmatmul.mubr.msk.f32.vlgmr.msra.gmra.mrb[64].mxu1 %vm116_vm1, %v26100_v10 }
 0xc83   :  { %24679 = vmatpush3.msk.msra.mxu1 %vm614_vm0, %v21022_v8  ;;  %24675 = vmatprep.mubr.msk.f32.mxu1 %vm116_vm1, %v26101_v12 }
 0xc84   :  { %24686 = vmatprep.subr.msk.mxu1 %vm614_vm0, %v21028_v19 }
 0xc86   :  { %24676 = vmatmul.mubr.msk.f32.gmra.mrb[66].mxu1 %vm116_vm1, %v26102_v21 }
 0xc87   :  { %24680 = vmatprep.mubr.msk.f32.mxu1 %vm116_vm1, %v26103_v22 }
 0xc8a   :  { %24681 = vmatmul.mubr.msk.f32.vlgmr.msra.gmra.mrb[64].mxu1 %vm116_vm1, %v26104_v33 }
 0xc8b   :  { %24687 = vmatpush3.msk.msra.mxu1 %vm614_vm0, %v21028_v19  ;;  %24683 = vmatprep.mubr.msk.f32.mxu1 %vm116_vm1, %v26105_v23 }
 0xc8e   :  { %24684 = vmatmul.mubr.msk.f32.gmra.mrb[66].mxu1 %vm116_vm1, %v26106_v24 }
 0xc8f   :  { %24688 = vmatprep.mubr.msk.f32.mxu1 %vm116_vm1, %v26107_v25 }
 0xc92   :  { %24689 = vmatmul.mubr.msk.f32.vlgmr.msra.gmra.mrb[64].mxu1 %vm116_vm1, %v26108_v26  ;;  %v21079_v26 = vld [vmem:[%s31027_s12] ss:$0 sm:$0xff] }
 0xc93   :  { %24691 = vmatprep.mubr.msk.f32.mxu1 %vm116_vm1, %v26109_v27 }
 0xc96   :  { %24692 = vmatmul.mubr.msk.f32.gmra.mrb[66].mxu1 %vm116_vm1, %v26110_v38 }
 0xd65   :  { %v24690_v32 = vpop.f32.mrb[64].mxu1 }
 0xd66   :  { %v18400_v34 = vadd.f32 %v24690_v32, %v21034_v31  ;;  %v18369_v37 = vpop.f32.mrb[65].mxu1 }
 0xd67   :  { %v18399_v1 = vadd.f32 %v21034_v31, %v18369_v37 }
 0xd68   :  { %v18404_v39 = vmax.f32 %v18400_v34, 0.0 }
 0xd69   :  { %v18403_v40 = vmax.f32 %v18399_v1, 0.0  ;;  %v24693_v41 = vpop.f32.mrb[66].mxu1 }
 0xd6a   :  { %v18412_v42 = vcombine.high %v18404_v39, %v18404_v39  ;;  %18436 = vst.msk [vmem:[#allocation5 + $0x19] sm:$0xf] %vm18433_vm8, %v18404_v39  ;;  %v18402_v6 = vadd.f32 %v24693_v41, %v21034_v31  ;;  %v18379_v29 = vpop.f32.mrb[67].mxu1 }
 0xd6b   :  { %v18411_v45 = vcombine.high %v18403_v40, %v18403_v40  ;;  %18434 = vst.msk [vmem:[#allocation5 + $0x9] sm:$0xf] %vm18433_vm8, %v18403_v40  ;;  %v18401_v47 = vadd.f32 %v21034_v31, %v18379_v29 }
 0xd6c   :  { %18437 = vst.msk [vmem:[#allocation5 + $0x21] sm:$0xf] %vm18433_vm8, %v18412_v42  ;;  %v18406_v16 = vmax.f32 %v18402_v6, 0.0 }
 0xd6d   :  { %18435 = vst.msk [vmem:[#allocation5 + $0x11] sm:$0xf] %vm18433_vm8, %v18411_v45  ;;  %v18405_v50 = vmax.f32 %v18401_v47, 0.0 }
 0xd6e   :  { %v18414_v51 = vcombine.high %v18406_v16, %v18406_v16  ;;  %18440 = vst.msk [vmem:[#allocation5 + $0x49] sm:$0xf] %vm18433_vm8, %v18406_v16 }
 0xd6f   :  { %v18413_v52 = vcombine.high %v18405_v50, %v18405_v50  ;;  %18438 = vst.msk [vmem:[#allocation5 + $0x39] sm:$0xf] %vm18433_vm8, %v18405_v50 }
 0xd70   :  { %18441 = vst.msk [vmem:[#allocation5 + $0x51] sm:$0xf] %vm18433_vm8, %v18414_v51 }
 0xd71   :  { %18439 = vst.msk [vmem:[#allocation5 + $0x41] sm:$0xf] %vm18433_vm8, %v18413_v52 }
 0xd72   :  { %v26111_v17 = vld [vmem:[#allocation5 + $0x1] ss:$8 sps:$4 sm:$0xff]  }
 0xd73   :  { %24696 = vmatprep.mubr.msk.f32.mxu0 %vm6689_vm3, %v26111_v17  ;;  %v26115_v20 = vld [vmem:[#allocation5] ss:$8 sps:$4 sm:$0xff]  }
 0xd74   :  { %v26112_v43 = vld [vmem:[#allocation5 + $0x11] ss:$8 sps:$4 sm:$0xff]   ;;  %v26119_v46 = vld [vmem:[#allocation5 + $0x2] ss:$8 sps:$4 sm:$0xff]  }
 0xd75   :  { %24697 = vmatmul.mubr.msk.f32.vlgmr.msra.gmra.mrb[150].mxu0 %vm6689_vm3, %v26112_v43  ;;  %v26116_v56 = vld [vmem:[#allocation5 + $0x10] ss:$8 sps:$4 sm:$0xff]   ;;  %v26136_v8 = vld [vmem:[#allocation5 + $0x20] ss:$8 sps:$4 sm:$0xff]  }
 0xd76   :  { %v26113_v59 = vld [vmem:[#allocation5 + $0x31] ss:$8 sps:$4 sm:$0xff]   ;;  %24703 = vmatpush3.msra.mxu0 %v18450_v28  ;;  %v26140_v19 = vld [vmem:[#allocation5 + $0x21] ss:$8 sps:$4 sm:$0xff]  }
 0xd77   :  { %24699 = vmatprep.mubr.msk.f32.mxu0 %vm6689_vm3, %v26113_v59  ;;  %24710 = vmatprep.subr.mxu0 %v21044_v15  ;;  %v26117_v61 = vld [vmem:[#allocation5 + $0x30] ss:$8 sps:$4 sm:$0xff]   ;;  %v26144_v23 = vld [vmem:[#allocation5 + $0x22] ss:$8 sps:$4 sm:$0xff]  }
 0xd78   :  { %v26114_v57 = vld [vmem:[#allocation5 + $0x41] ss:$8 sps:$4 sm:$0xff]   ;;  %v26120_v30 = vld [vmem:[#allocation5 + $0x12] ss:$8 sps:$4 sm:$0xff]  }
 0xd79   :  { %24700 = vmatmul.mubr.msk.f32.gmra.mrb[152].mxu0 %vm6689_vm3, %v26114_v57  ;;  %v26118_v53 = vld [vmem:[#allocation5 + $0x40] ss:$8 sps:$4 sm:$0xff]   ;;  %v26121_v54 = vld [vmem:[#allocation5 + $0x32] ss:$8 sps:$4 sm:$0xff]  }
 0xd7a   :  { %24704 = vmatprep.mubr.msk.f32.mxu0 %vm6689_vm3, %v26115_v20  ;;  %v26122_v55 = vld [vmem:[#allocation5 + $0x42] ss:$8 sps:$4 sm:$0xff]   ;;  %v26135_v49 = vld [vmem:[#allocation5 + $0x10] ss:$8 sps:$4 sm:$0xff]  }
 0xd7b   :  { %v26123_v18 = vld [vmem:[#allocation5 + $0x8] ss:$8 sps:$4 sm:$0xff]   ;;  %v26124_v62 = vld [vmem:[#allocation5 + $0x18] ss:$8 sps:$4 sm:$0xff]  }
 0xd7c   :  { %v26125_v36 = vld [vmem:[#allocation5 + $0x38] ss:$8 sps:$4 sm:$0xff]   ;;  %v26126_v3 = vld [vmem:[#allocation5 + $0x48] ss:$8 sps:$4 sm:$0xff]  }
 0xd7d   :  { %24705 = vmatmul.mubr.msk.f32.vlgmr.msra.gmra.mrb[150].mxu0 %vm6689_vm3, %v26116_v56  ;;  %v26127_v4 = vld [vmem:[#allocation5 + $0x9] ss:$8 sps:$4 sm:$0xff]   ;;  %v26128_v5 = vld [vmem:[#allocation5 + $0x19] ss:$8 sps:$4 sm:$0xff]  }
 0xd7e   :  { %24711 = vmatpush3.msra.mxu0 %v21044_v15  ;;  %24707 = vmatprep.mubr.msk.f32.mxu0 %vm6689_vm3, %v26117_v61  ;;  %v26129_v2 = vld [vmem:[#allocation5 + $0x39] ss:$8 sps:$4 sm:$0xff]   ;;  %v26130_v63 = vld [vmem:[#allocation5 + $0x49] ss:$8 sps:$4 sm:$0xff]  }
 0xd7f   :  { %24718 = vmatprep.subr.mxu0 %v21049_v60  ;;  %v26131_v0 = vld [vmem:[#allocation5 + $0xa] ss:$8 sps:$4 sm:$0xff]   ;;  %v26132_v48 = vld [vmem:[#allocation5 + $0x1a] ss:$8 sps:$4 sm:$0xff]  }
 0xd80   :  { %v26133_v11 = vld [vmem:[#allocation5 + $0x3a] ss:$8 sps:$4 sm:$0xff]   ;;  %v26134_v9 = vld [vmem:[#allocation5 + $0x4a] ss:$8 sps:$4 sm:$0xff]  }
 0xd81   :  { %24708 = vmatmul.mubr.msk.f32.gmra.mrb[152].mxu0 %vm6689_vm3, %v26118_v53  ;;  %v26137_v13 = vld [vmem:[#allocation5 + $0x40] ss:$8 sps:$4 sm:$0xff]   ;;  %v26138_v10 = vld [vmem:[#allocation5 + $0x50] ss:$8 sps:$4 sm:$0xff]  }
 0xd82   :  { %24712 = vmatprep.mubr.msk.f32.mxu0 %vm6689_vm3, %v26119_v46  ;;  %v26139_v12 = vld [vmem:[#allocation5 + $0x11] ss:$8 sps:$4 sm:$0xff]   ;;  %v26141_v21 = vld [vmem:[#allocation5 + $0x41] ss:$8 sps:$4 sm:$0xff]  }
 0xd83   :  { %v26142_v22 = vld [vmem:[#allocation5 + $0x51] ss:$8 sps:$4 sm:$0xff]   ;;  %v26145_v24 = vld [vmem:[#allocation5 + $0x42] ss:$8 sps:$4 sm:$0xff]  }
 0xd84   :  { %v26143_v33 = vld [vmem:[#allocation5 + $0x12] ss:$8 sps:$4 sm:$0xff]  }
 0xd85   :  { %24713 = vmatmul.mubr.msk.f32.vlgmr.msra.gmra.mrb[150].mxu0 %vm6689_vm3, %v26120_v30  ;;  %v26146_v25 = vld [vmem:[#allocation5 + $0x52] ss:$8 sps:$4 sm:$0xff]  }
 0xd86   :  { %24719 = vmatpush3.msra.mxu0 %v21049_v60  ;;  %24715 = vmatprep.mubr.msk.f32.mxu0 %vm6689_vm3, %v26121_v54 }
 0xd87   :  { %24726 = vmatprep.subr.mxu0 %v21054_v44 }
 0xd89   :  { %24716 = vmatmul.mubr.msk.f32.gmra.mrb[152].mxu0 %vm6689_vm3, %v26122_v55 }
 0xd8a   :  { %24720 = vmatprep.mubr.msk.f32.mxu0 %vm6689_vm3, %v26123_v18 }
 0xd8d   :  { %24721 = vmatmul.mubr.msk.f32.vlgmr.msra.gmra.mrb[150].mxu0 %vm6689_vm3, %v26124_v62 }
 0xd8e   :  { %24727 = vmatpush3.msra.mxu0 %v21054_v44  ;;  %24723 = vmatprep.mubr.msk.f32.mxu0 %vm6689_vm3, %v26125_v36 }
 0xd8f   :  { %24734 = vmatprep.subr.mxu0 %v21059_v58 }
 0xd91   :  { %24724 = vmatmul.mubr.msk.f32.gmra.mrb[152].mxu0 %vm6689_vm3, %v26126_v3 }
 0xd92   :  { %24728 = vmatprep.mubr.msk.f32.mxu0 %vm6689_vm3, %v26127_v4 }
 0xd95   :  { %24729 = vmatmul.mubr.msk.f32.vlgmr.msra.gmra.mrb[150].mxu0 %vm6689_vm3, %v26128_v5 }
 0xd96   :  { %24735 = vmatpush3.msra.mxu0 %v21059_v58  ;;  %24731 = vmatprep.mubr.msk.f32.mxu0 %vm6689_vm3, %v26129_v2 }
 0xd97   :  { %24742 = vmatprep.subr.mxu0 %v21064_v35 }
 0xd99   :  { %24732 = vmatmul.mubr.msk.f32.gmra.mrb[152].mxu0 %vm6689_vm3, %v26130_v63 }
 0xd9a   :  { %24736 = vmatprep.mubr.msk.f32.mxu0 %vm6689_vm3, %v26131_v0 }
 0xd9d   :  { %24737 = vmatmul.mubr.msk.f32.vlgmr.msra.gmra.mrb[150].mxu0 %vm6689_vm3, %v26132_v48 }
 0xd9e   :  { %24743 = vmatpush3.msra.mxu0 %v21064_v35  ;;  %24739 = vmatprep.mubr.msk.f32.mxu0 %vm6689_vm3, %v26133_v11 }
 0xd9f   :  { %24750 = vmatprep.subr.mxu0 %v21069_v7 }
 0xda1   :  { %24740 = vmatmul.mubr.msk.f32.gmra.mrb[152].mxu0 %vm6689_vm3, %v26134_v9 }
 0xda2   :  { %24744 = vmatprep.mubr.msk.f32.mxu0 %vm6689_vm3, %v26135_v49 }
 0xda5   :  { %24745 = vmatmul.mubr.msk.f32.vlgmr.msra.gmra.mrb[150].mxu0 %vm6689_vm3, %v26136_v8 }
 0xda6   :  { %24751 = vmatpush3.msra.mxu0 %v21069_v7  ;;  %24747 = vmatprep.mubr.msk.f32.mxu0 %vm6689_vm3, %v26137_v13 }
 0xda7   :  { %24758 = vmatprep.subr.mxu0 %v21074_v14 }
 0xda9   :  { %24748 = vmatmul.mubr.msk.f32.gmra.mrb[152].mxu0 %vm6689_vm3, %v26138_v10 }
 0xdaa   :  { %24752 = vmatprep.mubr.msk.f32.mxu0 %vm6689_vm3, %v26139_v12 }
 0xdad   :  { %24753 = vmatmul.mubr.msk.f32.vlgmr.msra.gmra.mrb[150].mxu0 %vm6689_vm3, %v26140_v19 }
 0xdae   :  { %24759 = vmatpush3.msra.mxu0 %v21074_v14  ;;  %24755 = vmatprep.mubr.msk.f32.mxu0 %vm6689_vm3, %v26141_v21 }
 0xdb1   :  { %24756 = vmatmul.mubr.msk.f32.gmra.mrb[152].mxu0 %vm6689_vm3, %v26142_v22 }
 0xdb2   :  { %24760 = vmatprep.mubr.msk.f32.mxu0 %vm6689_vm3, %v26143_v33 }
 0xdb5   :  { %24761 = vmatmul.mubr.msk.f32.vlgmr.msra.gmra.mrb[150].mxu0 %vm6689_vm3, %v26144_v23 }
 0xdb6   :  { %24763 = vmatprep.mubr.msk.f32.mxu0 %vm6689_vm3, %v26145_v24 }
 0xdb9   :  { %24764 = vmatmul.mubr.msk.f32.gmra.mrb[152].mxu0 %vm6689_vm3, %v26146_v25 }
 0xe88   :  { %v24762_v27 = vpop.f32.mrb[150].mxu0 }
 0xe89   :  { %v19513_v38 = vadd.f32 %v24762_v27, %v21079_v26  ;;  %v19482_v28 = vpop.f32.mrb[151].mxu0 }
 0xe8a   :  { %v19512_v31 = vadd.f32 %v21079_v26, %v19482_v28 }
 0xe8b   :  { %v19521_v32 = vcombine.high %v19513_v38, %v19513_v38  ;;  %19530 = vst.msk [vmem:[%s31029_s14 + $0x8] sm:$0xf] %vm13948_vm6, %v19513_v38 }
 0xe8c   :  { %v19520_v34 = vcombine.high %v19512_v31, %v19512_v31  ;;  %19528 = vst.msk [vmem:[%s31029_s14] sm:$0xf] %vm13948_vm6, %v19512_v31  ;;  %v24765_v37 = vpop.f32.mrb[152].mxu0 }
 0xe8d   :  { %19531 = vst.msk [vmem:[%s31029_s14 + $0xc] sm:$0xf] %vm13948_vm6, %v19521_v32  ;;  %v19515_v1 = vadd.f32 %v24765_v37, %v21079_v26  ;;  %v19492_v39 = vpop.f32.mrb[153].mxu0 }
 0xe8e   :  { %19529 = vst.msk [vmem:[%s31029_s14 + $0x4] sm:$0xf] %vm13948_vm6, %v19520_v34  ;;  %v19514_v40 = vadd.f32 %v21079_v26, %v19492_v39 }
 0xe8f   :  { %v19523_v41 = vcombine.high %v19515_v1, %v19515_v1  ;;  %19534 = vst.msk [vmem:[%s31029_s14 + $0x18] sm:$0xf] %vm13948_vm6, %v19515_v1 }
 0xe90   :  { %v19522_v42 = vcombine.high %v19514_v40, %v19514_v40  ;;  %19532 = vst.msk [vmem:[%s31029_s14 + $0x10] sm:$0xf] %vm13948_vm6, %v19514_v40 }
 0xe91   :  { %19535 = vst.msk [vmem:[%s31029_s14 + $0x1c] sm:$0xf] %vm13948_vm6, %v19523_v41 }
 0xe92   :  { %19533 = vst.msk [vmem:[%s31029_s14 + $0x14] sm:$0xf] %vm13948_vm6, %v19522_v42 }

</bundles_post_ra>
